<compile_context>
chip_gen: v5e
topology: v5e:2x2
jax: 0.10.0
libtpu: 0.0.40
codegen_flags: <defaults>
</compile_context>

<pallas_src>
import numpy as np
import jax
import jax.numpy as jnp
from jax.experimental import pallas as pl
from jax.experimental.pallas import tpu as pltpu

LANE = 128
VMEM_LIMIT = 48 * 1024 * 1024   # explicit scoped-VMEM cap (well under v7x's 64 MiB)


def _round_up(n, m):
    return ((n + m - 1) // m) * m


def _pick_tile(n, unit, max_tile, min_steps=2):
    """Row-tile size: multiple of `unit`, <= max_tile, and (when possible) at least
    `min_steps` grid steps so v7x's 2 TensorCores both get work under 'parallel'."""
    target = _round_up(max(1, -(-n // min_steps)), unit)
    return int(max(unit, min(max_tile, target)))


# ----------------------------------------------------------------------------
# Pallas kernels
# ----------------------------------------------------------------------------

def pointnet_kernel(x_ref, w1_ref, b1_ref, w2_ref, b2_ref,
                    w3_ref, b3_ref, w4_ref, b4_ref, o_ref):
    """PPmodel MLP with BatchNorm folded into the linears.

    x: (TILE_N, 8) bf16 -> o: (TILE_N, 128) bf16.  bf16 MXU inputs, f32 accumulation,
    bf16 writeback (the stage is writeback-bound; this halves the dominant HBM traffic).
    """
    h = x_ref[...]
    h = jnp.maximum(
        jnp.dot(h, w1_ref[...], preferred_element_type=jnp.float32) + b1_ref[...], 0.0)
    h = jnp.maximum(
        jnp.dot(h.astype(jnp.bfloat16), w2_ref[...],
                preferred_element_type=jnp.float32) + b2_ref[...], 0.0)
    h = jnp.maximum(
        jnp.dot(h.astype(jnp.bfloat16), w3_ref[...],
                preferred_element_type=jnp.float32) + b3_ref[...], 0.0)
    o = (jnp.dot(h.astype(jnp.bfloat16), w4_ref[...],
                 preferred_element_type=jnp.float32) + b4_ref[...])
    o_ref[...] = o.astype(o_ref.dtype)


def linear_relu_kernel(x_ref, w_ref, b_ref, o_ref):
    """relu(x @ W + b) on a row tile; lane-dense (128-col) bf16 output."""
    acc = jnp.dot(x_ref[...], w_ref[...], preferred_element_type=jnp.float32) + b_ref[...]
    o_ref[...] = jnp.maximum(acc, 0.0).astype(o_ref.dtype)


def maxpool3x3_kernel(x_ref, o_ref):
    """Separable 3x3 stride-1 max pool (padding=1) on one (C, X, Z) batch block.

    Z is on lanes, X on sublanes, C is the leading (untouched) axis.  Shifts use
    pltpu.roll (XLU) with -inf edge masks, matching MaxPool2d's implicit -inf pad.
    """
    x = x_ref[...]                                     # (C, X, Z)
    C, X, Z = x.shape
    neg = jnp.asarray(-jnp.inf, x.dtype)
    xi = jax.lax.broadcasted_iota(jnp.int32, (C, X, Z), 1)
    zi = jax.lax.broadcasted_iota(jnp.int32, (C, X, Z), 2)

    # vertical (X / sublane) 3-tap max
    up = jnp.where(xi < X - 1, pltpu.roll(x, shift=X - 1, axis=1), neg)
    down = jnp.where(xi > 0, pltpu.roll(x, shift=1, axis=1), neg)
    rmax = jnp.maximum(x, jnp.maximum(up, down))

    # horizontal (Z / lane) 3-tap max
    left = jnp.where(zi < Z - 1, pltpu.roll(rmax, shift=Z - 1, axis=2), neg)
    right = jnp.where(zi > 0, pltpu.roll(rmax, shift=1, axis=2), neg)
    o_ref[...] = jnp.maximum(rmax, jnp.maximum(left, right))


# ----------------------------------------------------------------------------
# Wrappers
# ----------------------------------------------------------------------------

def pointnet_forward(x_np, pp_params, max_tile=4096):
    """x: (N, fea_dim) f32 host array -> (N, 128) bf16.  Tiled over points."""
    w1, b1, w2, b2, w3, b3, w4, b4 = pp_params
    n_pts, fin = x_np.shape
    fin_pad = w1.shape[0]                              # 8 (fea_dim padded)
    fout = w4.shape[1]                                 # 128
    tile_n = _pick_tile(n_pts, 512, max_tile)
    n_pad = _round_up(max(n_pts, tile_n), tile_n)

    x_p = jnp.zeros((n_pad, fin_pad), jnp.bfloat16).at[:n_pts, :fin].set(
        jnp.asarray(x_np, dtype=jnp.bfloat16))
    weights = [w1, b1, w2, b2, w3, b3, w4, b4]

    out = pl.pallas_call(
        pointnet_kernel,
        out_shape=jax.ShapeDtypeStruct((n_pad, fout), jnp.bfloat16),
        grid=(n_pad // tile_n,),
        in_specs=[pl.BlockSpec((tile_n, fin_pad), lambda i: (i, 0))]
                 + [pl.BlockSpec(a.shape, lambda i: (0, 0)) for a in weights],
        out_specs=pl.BlockSpec((tile_n, fout), lambda i: (i, 0)),
        compiler_params=pltpu.CompilerParams(
            dimension_semantics=("parallel",),
            vmem_limit_bytes=VMEM_LIMIT),
    )(x_p, *weights)
    return out[:n_pts]


def compress(x_bf16, w_pad, b_pad, max_tile=2048):
    """relu(x @ W + b), row-tiled, lane-dense (128-col) bf16 output.

    Returns the padded (n_pad, 128) array; callers slice rows/columns where consumed
    (fea_compression in cols [0:fc], vox_fea_compression in cols [fc:2fc]).
    """
    n, k = x_bf16.shape
    c_pad = w_pad.shape[1]
    tile_m = _pick_tile(n, 256, max_tile)
    n_pad = _round_up(max(n, tile_m), tile_m)

    x_p = jnp.zeros((n_pad, k), jnp.bfloat16).at[:n, :].set(x_bf16.astype(jnp.bfloat16))

    return pl.pallas_call(
        linear_relu_kernel,
        out_shape=jax.ShapeDtypeStruct((n_pad, c_pad), jnp.bfloat16),
        grid=(n_pad // tile_m,),
        in_specs=[pl.BlockSpec((tile_m, k), lambda i: (i, 0)),
                  pl.BlockSpec((k, c_pad), lambda i: (0, 0)),
                  pl.BlockSpec((1, c_pad), lambda i: (0, 0))],
        out_specs=pl.BlockSpec((tile_m, c_pad), lambda i: (i, 0)),
        compiler_params=pltpu.CompilerParams(
            dimension_semantics=("parallel",),
            vmem_limit_bytes=VMEM_LIMIT),
    )(x_p, w_pad, b_pad)


def maxpool3x3_nchw(x_nchw):
    """MaxPool2d(kernel=3, stride=1, padding=1) on (B, C, X, Z); one grid step per
    batch, all channels blocked together (few big DMAs instead of B*C tiny ones)."""
    B, C, X, Z = x_nchw.shape
    return pl.pallas_call(
        maxpool3x3_kernel,
        out_shape=jax.ShapeDtypeStruct((B, C, X, Z), x_nchw.dtype),
        grid=(B,),
        in_specs=[pl.BlockSpec((None, C, X, Z), lambda b: (b, 0, 0, 0))],
        out_specs=pl.BlockSpec((None, C, X, Z), lambda b: (b, 0, 0, 0)),
        compiler_params=pltpu.CompilerParams(
            dimension_semantics=("parallel",)),
    )(x_nchw)


# ----------------------------------------------------------------------------
# Parameter construction (deterministic, synthetic)
# ----------------------------------------------------------------------------

def bn_affine(gamma, beta, mean, var, eps=1e-5):
    s = gamma / jnp.sqrt(var + eps)
    t = beta - mean * s
    return s, t


def fold_linear(s_in, t_in, W, b, s_out, t_out):
    """Fold pre- and post- BN affines into a Linear: bn_out(bn_in(x) @ W + b)."""
    Wf = (s_in[:, None] * W) * s_out[None, :]
    bf = (t_in @ W + b) * s_out + t_out
    return Wf, bf.reshape(1, -1)


def make_params(key, fea_dim=3, out_pt_fea_dim=128, fea_compre=32):
    dims = [fea_dim, 64, 128, 256, out_pt_fea_dim]
    keys = jax.random.split(key, 32)
    ki = iter(range(32))

    def nrm(shape, scale=0.1):
        return scale * jax.random.normal(keys[next(ki)], shape, dtype=jnp.float32)

    # BN0 on the raw input features + BN after each of the first three linears.
    bn = []
    for c in [fea_dim, 64, 128, 256]:
        gamma = 1.0 + nrm((c,))
        beta = nrm((c,))
        mean = nrm((c,))
        var = 1.0 + jnp.abs(nrm((c,)))
        bn.append(bn_affine(gamma, beta, mean, var))

    lins = []
    for i in range(4):
        W = nrm((dims[i], dims[i + 1]), scale=1.0 / np.sqrt(dims[i]))
        b = nrm((dims[i + 1],))
        lins.append((W, b))

    # Fold:  BN0 -> L1 -> BN1 -> relu -> L2 -> BN2 -> relu -> L3 -> BN3 -> relu -> L4
    ident = lambda c: (jnp.ones((c,), jnp.float32), jnp.zeros((c,), jnp.float32))
    folded = [
        fold_linear(*bn[0], *lins[0], *bn[1]),
        fold_linear(*ident(64), *lins[1], *bn[2]),
        fold_linear(*ident(128), *lins[2], *bn[3]),
        fold_linear(*ident(256), *lins[3], *ident(out_pt_fea_dim)),
    ]
    (W1, b1), (W2, b2), (W3, b3), (W4, b4) = folded

    # Device-ready padded weights for the pointnet kernel:
    #  * input features padded 3 -> 8
    #  * hidden width 64 -> 128 (zero cols of W1 / zero rows of W2): free on the MXU,
    #    keeps every intermediate a full 128-lane multiple (no half-filled vregs).
    fin_pad, h1_pad = 8, 128
    w1p = jnp.zeros((fin_pad, h1_pad), jnp.bfloat16).at[:fea_dim, :64].set(
        W1.astype(jnp.bfloat16))
    b1p = jnp.zeros((1, h1_pad), jnp.float32).at[:, :64].set(b1)
    w2p = jnp.zeros((h1_pad, 128), jnp.bfloat16).at[:64, :].set(W2.astype(jnp.bfloat16))
    pp_params = (w1p, b1p,
                 w2p, b2.astype(jnp.float32),
                 W3.astype(jnp.bfloat16), b3.astype(jnp.float32),
                 W4.astype(jnp.bfloat16), b4.astype(jnp.float32))

    # fea_compression and vox_fea_compression merged into ONE lane-dense linear:
    # columns [0:fc] = fea_compression, [fc:2fc] = vox_fea_compression, rest zero.
    assert 2 * fea_compre <= LANE
    comp_w = nrm((out_pt_fea_dim, fea_compre), scale=1.0 / np.sqrt(out_pt_fea_dim))
    comp_b = nrm((fea_compre,)).reshape(1, -1)
    vox_w = nrm((out_pt_fea_dim, fea_compre), scale=1.0 / np.sqrt(out_pt_fea_dim))
    vox_b = nrm((fea_compre,)).reshape(1, -1)
    cw = (jnp.zeros((out_pt_fea_dim, LANE), jnp.bfloat16)
          .at[:, :fea_compre].set(comp_w.astype(jnp.bfloat16))
          .at[:, fea_compre:2 * fea_compre].set(vox_w.astype(jnp.bfloat16)))
    cb = (jnp.zeros((1, LANE), jnp.float32)
          .at[:, :fea_compre].set(comp_b)
          .at[:, fea_compre:2 * fea_compre].set(vox_b))
    return pp_params, (cw, cb)


# ----------------------------------------------------------------------------
# SSA_SC forward (point / BEV feature branch)
# ----------------------------------------------------------------------------

def ssa_sc_forward(batch, params, input_dimensions, fea_compre=32):
    pp_params, (cw, cb) = params
    X, Y, Z = input_dimensions          # Y == n_height
    xy_ind = batch["grid_ind"]          # list of (N_i, 2) host numpy int arrays
    xyz_ind = batch["voxel_ind"]        # list of (N_i, 3) host numpy int arrays
    pt_fea = batch["feature"]           # list of (N_i, 3) host numpy float arrays
    B = len(pt_fea)

    # --- host glue: concat + prepend batch index (F.pad(..., (1,0), value=i)) -----
    cat_pt_ind = np.concatenate(
        [np.pad(np.asarray(xy_ind[i]), ((0, 0), (1, 0)), constant_values=i)
         for i in range(B)], axis=0).astype(np.int64)
    cat_pt_xyz_ind = np.concatenate(
        [np.pad(np.asarray(xyz_ind[i]), ((0, 0), (1, 0)), constant_values=i)
         for i in range(B)], axis=0).astype(np.int64)
    cat_pt_fea = np.concatenate(
        [np.asarray(f, dtype=np.float32) for f in pt_fea], axis=0)

    # --- unique voxel ids (host numpy, no device sync); sort points by xyz id so
    #     the xyz segment_max sees sorted segments; separate permutation for xy. ---
    unq_xyz, unq_inv_xyz = np.unique(cat_pt_xyz_ind, axis=0, return_inverse=True)
    unq_inv_xyz = np.asarray(unq_inv_xyz).reshape(-1)
    order_xyz = np.argsort(unq_inv_xyz, kind="stable")
    cat_pt_fea = cat_pt_fea[order_xyz]
    cat_pt_ind = cat_pt_ind[order_xyz]
    inv_xyz_sorted = unq_inv_xyz[order_xyz].astype(np.int32)

    unq, unq_inv = np.unique(cat_pt_ind, axis=0, return_inverse=True)
    unq_inv = np.asarray(unq_inv).reshape(-1)
    perm_xy = np.argsort(unq_inv, kind="stable").astype(np.int32)
    inv_xy_sorted = unq_inv[perm_xy].astype(np.int32)

    n_unq, n_unq_xyz = unq.shape[0], unq_xyz.shape[0]
    # flat BEV row index (b*X*Z + x*Z + z): contiguous 128-byte row scatter instead
    # of the strided NCHW scatter.  Sorted & unique by construction of np.unique.
    flat_idx = (unq[:, 0] * X * Z + unq[:, 1] * Z + unq[:, 2]).astype(np.int32)

    # --- PPmodel pointnet (Pallas, bf16 out, big parallel row tiles) --------------
    processed = pointnet_forward(cat_pt_fea, pp_params)          # (N, 128) bf16

    # --- scatter_max pooling (sorted segment_max; segments non-empty) ------------
    voxel_features = jax.ops.segment_max(
        processed, jnp.asarray(inv_xyz_sorted),
        num_segments=n_unq_xyz, indices_are_sorted=True)
    processed_xy = jnp.take(processed, jnp.asarray(perm_xy), axis=0)
    pooled_data = jax.ops.segment_max(
        processed_xy, jnp.asarray(inv_xy_sorted),
        num_segments=n_unq, indices_are_sorted=True)

    # --- feature compression: both linears in ONE lane-dense pallas_call ---------
    comb = jnp.concatenate([pooled_data, voxel_features], axis=0)
    comp_out = compress(comb, cw, cb)                             # (n_pad, 128) bf16
    processed_pooled_data = comp_out[:n_unq, :fea_compre]
    processed_voxel_features = comp_out[n_unq:n_unq + n_unq_xyz,
                                        fea_compre:2 * fea_compre]

    # --- dense scatter: contiguous rows into flat (B*X*Z, C), then to NCHW -------
    flat = jnp.zeros((B * X * Z, fea_compre), jnp.float32)
    flat = flat.at[jnp.asarray(flat_idx)].set(
        processed_pooled_data.astype(jnp.float32),
        indices_are_sorted=True, unique_indices=True)
    out_data = flat.reshape(B, X, Z, fea_compre).transpose(0, 3, 1, 2)  # (B,C,X,Z)

    # --- local 3x3 max pool (Pallas, one step per batch, all channels blocked) ----
    out_data = maxpool3x3_nchw(out_data)                          # (B, C, X, Z)

    # --- occupancy channel stack ---------------------------------------------------
    occ = batch["3D_OCCUPANCY"]                                   # (B, 1, X, Y, Z)
    occu = jnp.transpose(jnp.squeeze(occ, axis=1), (0, 2, 1, 3))  # (B, Y, X, Z)
    bev_feature = jnp.concatenate([occu, out_data], axis=1)       # (B, Y+C, X, Z)

    # TODO(synk): bev_feature would feed SSCNet (BEV_UNet) and
    #             (processed_voxel_features, unq_xyz) would feed SegNet
    #             (Asymm_3d_spconv); those submodules are not defined here.
    return {
        "bev_feature": bev_feature,
        "voxel_features": processed_voxel_features.astype(jnp.float32),
        "voxel_coords": jnp.asarray(unq_xyz.astype(np.int32)),
    }


# ----------------------------------------------------------------------------
# Demo
# ----------------------------------------------------------------------------

if __name__ == "__main__":
    key = jax.random.PRNGKey(0)
    k_param, _ = jax.random.split(key)

    input_dimensions = (16, 8, 128)   # (X, Y=n_height, Z); Z lane-dense for the pool
    fea_dim = 3
    fea_compre = 32
    X, Y, Z = input_dimensions
    B = 2
    n_pts_per_batch = [1500, 1700]

    params = make_params(k_param, fea_dim=fea_dim,
                         out_pt_fea_dim=128, fea_compre=fea_compre)

    rng = np.random.RandomState(0)
    grid_ind, voxel_ind, features = [], [], []
    for n in n_pts_per_batch:
        gx = rng.randint(0, X, size=(n, 1))
        gz = rng.randint(0, Z, size=(n, 1))
        gy = rng.randint(0, Y, size=(n, 1))
        grid_ind.append(np.concatenate([gx, gz], axis=1).astype(np.int32))
        voxel_ind.append(np.concatenate([gx, gy, gz], axis=1).astype(np.int32))
        features.append(rng.randn(n, fea_dim).astype(np.float32))

    occ = (jax.random.uniform(jax.random.PRNGKey(1), (B, 1, X, Y, Z)) > 0.5
           ).astype(jnp.float32)

    batch = {
        "grid_ind": grid_ind,
        "voxel_ind": voxel_ind,
        "feature": features,
        "3D_OCCUPANCY": occ,
    }

    out = ssa_sc_forward(batch, params, input_dimensions, fea_compre=fea_compre)
    jax.block_until_ready(out["bev_feature"])
    jax.block_until_ready(out["voxel_features"])

    assert out["bev_feature"].shape == (B, Y + fea_compre, X, Z)
    assert out["voxel_features"].shape[1] == fea_compre
    assert bool(jnp.isfinite(out["bev_feature"]).all())
    assert bool(jnp.isfinite(out["voxel_features"]).all())
    print("KERNEL_OK")
</pallas_src>

<mosaic_0001>
module attributes {stable_mosaic.version = 11 : i64} {
  func.func @pointnet_kernel(%arg0: i32, %arg1: memref<2048x8xbf16, #tpu.memory_space<vmem>>, %arg2: memref<8x128xbf16, #tpu.memory_space<vmem>>, %arg3: memref<1x128xf32, #tpu.memory_space<vmem>>, %arg4: memref<128x128xbf16, #tpu.memory_space<vmem>>, %arg5: memref<1x128xf32, #tpu.memory_space<vmem>>, %arg6: memref<128x256xbf16, #tpu.memory_space<vmem>>, %arg7: memref<1x256xf32, #tpu.memory_space<vmem>>, %arg8: memref<256x128xbf16, #tpu.memory_space<vmem>>, %arg9: memref<1x128xf32, #tpu.memory_space<vmem>>, %arg10: memref<2048x128xbf16, #tpu.memory_space<vmem>>) attributes {dimension_semantics = [#tpu.dimension_semantics<parallel>], iteration_bounds = array<i64: 2>, scalar_prefetch = 0 : i64, scratch_operands = 0 : i64, tpu.core_type = #tpu.core_type<tc>, window_params = [{transform_indices = @transform_0, window_bounds = array<i64: 2048, 8>}, {pipeline_mode = #tpu.pipeline_mode<synchronous>, transform_indices = @transform_1, window_bounds = array<i64: 8, 128>}, {pipeline_mode = #tpu.pipeline_mode<synchronous>, transform_indices = @transform_2, window_bounds = array<i64: 1, 128>}, {pipeline_mode = #tpu.pipeline_mode<synchronous>, transform_indices = @transform_3, window_bounds = array<i64: 128, 128>}, {pipeline_mode = #tpu.pipeline_mode<synchronous>, transform_indices = @transform_4, window_bounds = array<i64: 1, 128>}, {pipeline_mode = #tpu.pipeline_mode<synchronous>, transform_indices = @transform_5, window_bounds = array<i64: 128, 256>}, {pipeline_mode = #tpu.pipeline_mode<synchronous>, transform_indices = @transform_6, window_bounds = array<i64: 1, 256>}, {pipeline_mode = #tpu.pipeline_mode<synchronous>, transform_indices = @transform_7, window_bounds = array<i64: 256, 128>}, {pipeline_mode = #tpu.pipeline_mode<synchronous>, transform_indices = @transform_8, window_bounds = array<i64: 1, 128>}, {transform_indices = @transform_9, window_bounds = array<i64: 2048, 128>}]} {
    %c0 = arith.constant 0 : index
    %c0_0 = arith.constant 0 : index
    %0 = vector.load %arg1[%c0, %c0_0] : memref<2048x8xbf16, #tpu.memory_space<vmem>>, vector<2048x8xbf16>
    %c0_1 = arith.constant 0 : index
    %c0_2 = arith.constant 0 : index
    %1 = vector.load %arg2[%c0_1, %c0_2] : memref<8x128xbf16, #tpu.memory_space<vmem>>, vector<8x128xbf16>
    %cst = arith.constant dense<0.000000e+00> : vector<2048x128xf32>
    %2 = tpu.matmul %0, %1, %cst {dimension_numbers = #tpu.dot_dimension_numbers<[1], [0], [0], [1], [0, 0, 1, 1], [], []>} : vector<2048x8xbf16>, vector<8x128xbf16>, vector<2048x128xf32> -> vector<2048x128xf32>
    %c0_3 = arith.constant 0 : index
    %c0_4 = arith.constant 0 : index
    %3 = vector.load %arg3[%c0_3, %c0_4] : memref<1x128xf32, #tpu.memory_space<vmem>>, vector<1x128xf32>
    %4 = vector.broadcast %3 : vector<1x128xf32> to vector<2048x128xf32>
    %5 = arith.addf %2, %4 : vector<2048x128xf32>
    %cst_5 = arith.constant 0.000000e+00 : f32
    %6 = vector.broadcast %cst_5 : f32 to vector<2048x128xf32>
    %7 = arith.maximumf %5, %6 : vector<2048x128xf32>
    %8 = arith.truncf %7 : vector<2048x128xf32> to vector<2048x128xbf16>
    %c0_6 = arith.constant 0 : index
    %c0_7 = arith.constant 0 : index
    %9 = vector.load %arg4[%c0_6, %c0_7] : memref<128x128xbf16, #tpu.memory_space<vmem>>, vector<128x128xbf16>
    %cst_8 = arith.constant dense<0.000000e+00> : vector<2048x128xf32>
    %10 = tpu.matmul %8, %9, %cst_8 {dimension_numbers = #tpu.dot_dimension_numbers<[1], [0], [0], [1], [0, 0, 1, 1], [], []>} : vector<2048x128xbf16>, vector<128x128xbf16>, vector<2048x128xf32> -> vector<2048x128xf32>
    %c0_9 = arith.constant 0 : index
    %c0_10 = arith.constant 0 : index
    %11 = vector.load %arg5[%c0_9, %c0_10] : memref<1x128xf32, #tpu.memory_space<vmem>>, vector<1x128xf32>
    %12 = vector.broadcast %11 : vector<1x128xf32> to vector<2048x128xf32>
    %13 = arith.addf %10, %12 : vector<2048x128xf32>
    %cst_11 = arith.constant 0.000000e+00 : f32
    %14 = vector.broadcast %cst_11 : f32 to vector<2048x128xf32>
    %15 = arith.maximumf %13, %14 : vector<2048x128xf32>
    %16 = arith.truncf %15 : vector<2048x128xf32> to vector<2048x128xbf16>
    %c0_12 = arith.constant 0 : index
    %c0_13 = arith.constant 0 : index
    %17 = vector.load %arg6[%c0_12, %c0_13] : memref<128x256xbf16, #tpu.memory_space<vmem>>, vector<128x256xbf16>
    %cst_14 = arith.constant dense<0.000000e+00> : vector<2048x256xf32>
    %18 = tpu.matmul %16, %17, %cst_14 {dimension_numbers = #tpu.dot_dimension_numbers<[1], [0], [0], [1], [0, 0, 1, 1], [], []>} : vector<2048x128xbf16>, vector<128x256xbf16>, vector<2048x256xf32> -> vector<2048x256xf32>
    %c0_15 = arith.constant 0 : index
    %c0_16 = arith.constant 0 : index
    %19 = vector.load %arg7[%c0_15, %c0_16] : memref<1x256xf32, #tpu.memory_space<vmem>>, vector<1x256xf32>
    %20 = vector.broadcast %19 : vector<1x256xf32> to vector<2048x256xf32>
    %21 = arith.addf %18, %20 : vector<2048x256xf32>
    %cst_17 = arith.constant 0.000000e+00 : f32
    %22 = vector.broadcast %cst_17 : f32 to vector<2048x256xf32>
    %23 = arith.maximumf %21, %22 : vector<2048x256xf32>
    %24 = arith.truncf %23 : vector<2048x256xf32> to vector<2048x256xbf16>
    %c0_18 = arith.constant 0 : index
    %c0_19 = arith.constant 0 : index
    %25 = vector.load %arg8[%c0_18, %c0_19] : memref<256x128xbf16, #tpu.memory_space<vmem>>, vector<256x128xbf16>
    %cst_20 = arith.constant dense<0.000000e+00> : vector<2048x128xf32>
    %26 = tpu.matmul %24, %25, %cst_20 {dimension_numbers = #tpu.dot_dimension_numbers<[1], [0], [0], [1], [0, 0, 1, 1], [], []>} : vector<2048x256xbf16>, vector<256x128xbf16>, vector<2048x128xf32> -> vector<2048x128xf32>
    %c0_21 = arith.constant 0 : index
    %c0_22 = arith.constant 0 : index
    %27 = vector.load %arg9[%c0_21, %c0_22] : memref<1x128xf32, #tpu.memory_space<vmem>>, vector<1x128xf32>
    %28 = vector.broadcast %27 : vector<1x128xf32> to vector<2048x128xf32>
    %29 = arith.addf %26, %28 : vector<2048x128xf32>
    %30 = arith.truncf %29 : vector<2048x128xf32> to vector<2048x128xbf16>
    %c0_23 = arith.constant 0 : index
    %c0_24 = arith.constant 0 : index
    %31 = vector.load %arg10[%c0_23, %c0_24] : memref<2048x128xbf16, #tpu.memory_space<vmem>>, vector<2048x128xbf16>
    tpu.vector_store %arg10[%c0_23, %c0_24], %30 {strides = array<i32>} : memref<2048x128xbf16, #tpu.memory_space<vmem>>, vector<2048x128xbf16>,
    return
  }
  func.func @transform_0(%arg0: i32) -> (i32, i32) {
    %c0_i32 = arith.constant 0 : i32
    %c0_i32_0 = arith.constant 0 : i32
    return %arg0, %c0_i32 : i32, i32
  }
  func.func @transform_1(%arg0: i32) -> (i32, i32) {
    %c0_i32 = arith.constant 0 : i32
    %c0_i32_0 = arith.constant 0 : i32
    %c0_i32_1 = arith.constant 0 : i32
    return %c0_i32, %c0_i32_0 : i32, i32
  }
  func.func @transform_2(%arg0: i32) -> (i32, i32) {
    %c0_i32 = arith.constant 0 : i32
    %c0_i32_0 = arith.constant 0 : i32
    %c0_i32_1 = arith.constant 0 : i32
    return %c0_i32, %c0_i32_0 : i32, i32
  }
  func.func @transform_3(%arg0: i32) -> (i32, i32) {
    %c0_i32 = arith.constant 0 : i32
    %c0_i32_0 = arith.constant 0 : i32
    %c0_i32_1 = arith.constant 0 : i32
    return %c0_i32, %c0_i32_0 : i32, i32
  }
  func.func @transform_4(%arg0: i32) -> (i32, i32) {
    %c0_i32 = arith.constant 0 : i32
    %c0_i32_0 = arith.constant 0 : i32
    %c0_i32_1 = arith.constant 0 : i32
    return %c0_i32, %c0_i32_0 : i32, i32
  }
  func.func @transform_5(%arg0: i32) -> (i32, i32) {
    %c0_i32 = arith.constant 0 : i32
    %c0_i32_0 = arith.constant 0 : i32
    %c0_i32_1 = arith.constant 0 : i32
    return %c0_i32, %c0_i32_0 : i32, i32
  }
  func.func @transform_6(%arg0: i32) -> (i32, i32) {
    %c0_i32 = arith.constant 0 : i32
    %c0_i32_0 = arith.constant 0 : i32
    %c0_i32_1 = arith.constant 0 : i32
    return %c0_i32, %c0_i32_0 : i32, i32
  }
  func.func @transform_7(%arg0: i32) -> (i32, i32) {
    %c0_i32 = arith.constant 0 : i32
    %c0_i32_0 = arith.constant 0 : i32
    %c0_i32_1 = arith.constant 0 : i32
    return %c0_i32, %c0_i32_0 : i32, i32
  }
  func.func @transform_8(%arg0: i32) -> (i32, i32) {
    %c0_i32 = arith.constant 0 : i32
    %c0_i32_0 = arith.constant 0 : i32
    %c0_i32_1 = arith.constant 0 : i32
    return %c0_i32, %c0_i32_0 : i32, i32
  }
  func.func @transform_9(%arg0: i32) -> (i32, i32) {
    %c0_i32 = arith.constant 0 : i32
    %c0_i32_0 = arith.constant 0 : i32
    return %arg0, %c0_i32 : i32, i32
  }
}

</mosaic_0001>

<bundles_post_ra>
// kernel: tpu_custom_call.1
= control target key start
LH: loop header
LB: loop body
LE: loop exit
PB: predicated region body
PF: predicated region fallthrough
CT: control target
= control target key end

     0   :  { %14 = vsyncpa [#allocation3], 0  ;;  %s13577_s0 = inlined_call_operand.vmem [shape: bf16[4096,8], index: 0, kind: input, shape index: {}]   ;;  %s13578_s1 = inlined_call_operand.vmem [shape: bf16[8,128], index: 1, kind: input, shape index: {}]   ;;  %s13579_s2 = inlined_call_operand.vmem [shape: f32[1,128], index: 2, kind: input, shape index: {}]   ;;  %s13580_s3 = inlined_call_operand.vmem [shape: bf16[128,128], index: 3, kind: input, shape index: {}]   ;;  %s13581_s4 = inlined_call_operand.vmem [shape: f32[1,128], index: 4, kind: input, shape index: {}]   ;;  %s13582_s5 = inlined_call_operand.vmem [shape: bf16[128,256], index: 5, kind: input, shape index: {}]   ;;  %s13583_s6 = inlined_call_operand.vmem [shape: f32[1,256], index: 6, kind: input, shape index: {}]   ;;  %s13584_s7 = inlined_call_operand.vmem [shape: bf16[256,128], index: 7, kind: input, shape index: {}]   ;;  %s13585_s8 = inlined_call_operand.vmem [shape: f32[1,128], index: 8, kind: input, shape index: {}]   ;;  %s13586_s9 = inlined_call_operand.hbm [shape: bf16[4096,128], index: 9, kind: output, shape index: {}]  }
   0x1   :  { %16 = vsyncpa [#allocation3 + $0x1], 0  ;;  %s9880_s30 = smov 0   ;;  %s9882_s10 = smov 0  }
   0x2   :  { %s9884_s11 = smov 0   ;;  %s9886_s12 = smov 0  }
   0x3 LB: > { %s9901_s13 = sadd.s32 4294967295, %s9826_s12   ;;  %s7947_s14 = sadd.s32 4294967294, %s9826_s12   ;;  %s9826_s12 = sphi %s9886_s12, %s14592_s12   ;;  %s9822_s11 = sphi %s9884_s11, %s14591_s11   ;;  %s9818_s10 = sphi %s9882_s10, %s14590_s10   ;;  %s9814_s30 = sphi %s9880_s30, %s14589_s30  }
   0x4   : > { %s9905_s15 = sadd.s32 1, %s9826_s12   ;;  %s223_s16 = sadd.s32 1, %s9822_s11 }
   0x5   : > { %s220_s17 = ssub.s32 %s9826_s12, %s9905_s15  ;;  %p233_p0 = scmp.ne.s32.totalorder %s9822_s11, %s9818_s10 }
   0x6   : > { %p221_p1 = scmp.eq.s32.totalorder %s220_s17, 0  ;;  %p234_p2 = scmp.eq.s32.totalorder %s9901_s13, 1 }
   0x7   : > { %p239_p3 = scmp.ne.s32.totalorder %s9818_s10, %s9814_s30  ;;  %p240_p4 = scmp.eq.s32.totalorder %s7947_s14, 1 }
   0x8   : > { %s9916_s18 = scalar_select %p221_p1, %s9822_s11, %s223_s16  }
   0x9   : > { %p9918_p5 = por %p234_p2, %p233_p0  ;;  %p9922_p6 = por %p240_p4, %p239_p3 }
   0xa   : > { %p7950_p7 = scmp.ge.s32.totalorder %s9826_s12, 1  ;;  %p291_p8 = scmp.lt.s32.totalorder %s9826_s12, 3 }
   0xc   : > { %p292_p9 = pnand %p7950_p7, %p291_p8 }
   0xe   : > { %295 = sbr.rel (%p292_p9) target bundleno = 4536 (0x11b8), region = 56 }
  0x13   : > { %v591_v0 = vld [vmem:[%s13578_s1] sm:$0xf]  ;;  %vm1621_vm0 = vcmask 1043456   ;;  %s7952_s23 = sshll.u32 %s9901_s13, 8  ;;  %vm1236_vm1 = vcmask 64512   ;;  %v8894_v12 = vld [vmem:[%s13580_s3 + $0x38] sm:$0xff] }
  0x14   : > { %v1623_v1 = vsel %vm1621_vm0, %v591_v0, 0  ;;  %p328_p10 = scmp.lt.s32.totalorder %s7952_s23, 511  ;;  %2726 = vmatpush.bf16.msra.mxu1 %v8894_v12  ;;  %9696 = vmatpush.bf16.msra.mxu2 %v8894_v12  ;;  %v8893_v15 = vld [vmem:[%s13580_s3 + $0x30] sm:$0xff]  ;;  %v8892_v16 = vld [vmem:[%s13580_s3 + $0x28] sm:$0xff]  ;;  %v8891_v17 = vld [vmem:[%s13580_s3 + $0x20] sm:$0xff]  ;;  %s324_s16 = sand.u32 1, %s9818_s10  }
  0x15   : > { %1632 = vmatpush.bf16.msra.mxu0 %v1623_v1  ;;  %9695 = vmatpush.bf16.msra.mxu3 %v1623_v1  ;;  %v8890_v18 = vld [vmem:[%s13580_s3 + $0x18] sm:$0xff]  ;;  %v8889_v21 = vld [vmem:[%s13580_s3 + $0x10] sm:$0xff]  ;;  %v8888_v22 = vld [vmem:[%s13580_s3 + $0x8] sm:$0xff]  ;;  %s7951_s17 = sshll.u32 %s324_s16, 10  ;;  %s8927_s14 = sshll.u32 %s9901_s13, 10 }
  0x16   : > { %s14594_s23 = smov (!%p328_p10, %s7952_s23), 511  ;;  %v8887_v23 = vld [vmem:[%s13580_s3] sm:$0xff]  ;;  %s7881_s22 = scalar_lea.hbm %s13586_s9, %s8927_s14 }
  0x17   : > { %s7953_s24 = sshll.u32 %s14594_s23, 2  ;;  %v9998_v29 = vld [vmem:[%s13579_s2] ss:$0 sm:$0xff]  ;;  %s7884_s26 = sshll.u32 %s7881_s22, 4  ;;  %s7885_s26 = int_to_ptr.hbm [resolvable:$true] %s7884_s26 }
  0x18   : > { %s9935_s27 = scalar_lea.vmem %s13577_s0, %s7953_s24  ;;  %2727 = vmatpush.bf16.msra.mxu1 %v8893_v15  ;;  %9697 = vmatpush.bf16.msra.mxu2 %v8893_v15  ;;  %s7870_s13 = scalar_lea.sflag [#allocation3], %s324_s16 }
  0x19   : > { %v8759_v2 = vld [vmem:[%s9935_s27] sm:$0xff]  ;;  %v8824_v3 = vld [vmem:[%s9935_s27 + $0x208] sm:$0xff]  ;;  %v8825_v5 = vld [vmem:[%s9935_s27 + $0x210] sm:$0xff]  ;;  %s9778_s28 = sshra.s32 %s7885_s26, 4  ;;  %s9784_s21 = scalar_lea.hbm %s13586_s9, 2048  ;;  %s9779_s28 = int_to_ptr.hbm [resolvable:$true] %s9778_s28 }
  0x1a   : > { %8466 = vmatmul.msk.bf16.vlgmr.msra.gmra.mxu0 %vm1236_vm1, %v8759_v2  ;;  %8531 = vmatmul.msk.bf16.vlgmr.msra.gmra.mxu3 %vm1236_vm1, %v8824_v3  ;;  %v8760_v4 = vld [vmem:[%s9935_s27 + $0x8] sm:$0xff]  ;;  %v8761_v6 = vld [vmem:[%s9935_s27 + $0x10] sm:$0xff]  ;;  %v8826_v7 = vld [vmem:[%s9935_s27 + $0x218] sm:$0xff]  ;;  %s9780_s29 = scalar_lea.hbm %s9779_s28, 1024  ;;  %p9785_p0 = scmp.lt.s32.totalorder %s9779_s28, %s13586_s9 }
  0x1b   : > { %v8762_v8 = vld [vmem:[%s9935_s27 + $0x18] sm:$0xff]  ;;  %v8827_v9 = vld [vmem:[%s9935_s27 + $0x220] sm:$0xff]  ;;  %v8828_v11 = vld [vmem:[%s9935_s27 + $0x228] sm:$0xff]  ;;  %p9781_p11 = scmp.ne.s32.totalorder %s9779_s28, %s9780_s29  ;;  %p9786_p1 = scmp.lt.s32.totalorder %s9784_s21, %s9780_s29 }
  0x1c   : > { %v8763_v10 = vld [vmem:[%s9935_s27 + $0x20] sm:$0xff]  ;;  %v8764_v13 = vld [vmem:[%s9935_s27 + $0x28] sm:$0xff]  ;;  %v8829_v14 = vld [vmem:[%s9935_s27 + $0x230] sm:$0xff]  ;;  %2728 = vmatpush.bf16.msra.mxu1 %v8892_v16  ;;  %9698 = vmatpush.bf16.msra.mxu2 %v8892_v16 }
  0x1d   : > { %v8765_v19 = vld [vmem:[%s9935_s27 + $0x30] sm:$0xff]  ;;  %v8830_v20 = vld [vmem:[%s9935_s27 + $0x238] sm:$0xff]  ;;  %v8831_v25 = vld [vmem:[%s9935_s27 + $0x240] sm:$0xff]  ;;  %p9782_p12 = pnand %p9781_p11, %p9918_p5  ;;  %p9787_p2 = por %p9786_p1, %p9785_p0 }
  0x1e   : > { %v8766_v24 = vld [vmem:[%s9935_s27 + $0x38] sm:$0xff]  ;;  %v8767_v26 = vld [vmem:[%s9935_s27 + $0x40] sm:$0xff]  ;;  %v8832_v27 = vld [vmem:[%s9935_s27 + $0x248] sm:$0xff] }
  0x1f   : > { %v8768_v38 = vld [vmem:[%s9935_s27 + $0x48] sm:$0xff]  ;;  %v8833_v39 = vld [vmem:[%s9935_s27 + $0x250] sm:$0xff]  ;;  %v8834_v50 = vld [vmem:[%s9935_s27 + $0x258] sm:$0xff]  ;;  %p9783_p13 = pneg %p9782_p12 }
  0x20   : > { %2729 = vmatpush.bf16.msra.mxu1 %v8891_v17  ;;  %9699 = vmatpush.bf16.msra.mxu2 %v8891_v17  ;;  %v8769_v49 = vld [vmem:[%s9935_s27 + $0x50] sm:$0xff]  ;;  %v8770_v60 = vld [vmem:[%s9935_s27 + $0x58] sm:$0xff]  ;;  %v8835_v61 = vld [vmem:[%s9935_s27 + $0x260] sm:$0xff] }
  0x21   : > { %p9788_p3 = pnand %p9787_p2, %p9783_p13 }
  0x24   : > { %2730 = vmatpush.bf16.msra.mxu1 %v8890_v18  ;;  %9700 = vmatpush.bf16.msra.mxu2 %v8890_v18  ;;  %v8772_v18 = vld [vmem:[%s9935_s27 + $0x68] sm:$0xff] }
  0x28   : > { %2731 = vmatpush.bf16.msra.mxu1 %v8889_v21  ;;  %9701 = vmatpush.bf16.msra.mxu2 %v8889_v21 }
  0x2a   : > { %8467 = vmatmul.msk.bf16.gmra.mxu0 %vm1236_vm1, %v8760_v4  ;;  %8532 = vmatmul.msk.bf16.gmra.mxu3 %vm1236_vm1, %v8825_v5 }
  0x2c   : > { %2732 = vmatpush.bf16.msra.mxu1 %v8888_v22  ;;  %9702 = vmatpush.bf16.msra.mxu2 %v8888_v22 }
  0x30   : > { %2733 = vmatpush.bf16.msra.mxu1 %v8887_v23  ;;  %9703 = vmatpush.bf16.msra.mxu2 %v8887_v23 }
  0x3a   : > { %8468 = vmatmul.msk.bf16.gmra.mxu0 %vm1236_vm1, %v8761_v6  ;;  %8533 = vmatmul.msk.bf16.gmra.mxu3 %vm1236_vm1, %v8826_v7  ;;  %v8771_v7 = vld [vmem:[%s9935_s27 + $0x60] sm:$0xff] }
  0x4a   : > { %8469 = vmatmul.msk.bf16.gmra.mxu0 %vm1236_vm1, %v8762_v8  ;;  %8534 = vmatmul.msk.bf16.gmra.mxu3 %vm1236_vm1, %v8827_v9  ;;  %v8836_v8 = vld [vmem:[%s9935_s27 + $0x268] sm:$0xff] }
  0x5a   : > { %8470 = vmatmul.msk.bf16.gmra.mxu0 %vm1236_vm1, %v8763_v10  ;;  %8535 = vmatmul.msk.bf16.gmra.mxu3 %vm1236_vm1, %v8828_v11 }
  0x6a   : > { %8471 = vmatmul.msk.bf16.gmra.mxu0 %vm1236_vm1, %v8764_v13  ;;  %8536 = vmatmul.msk.bf16.gmra.mxu3 %vm1236_vm1, %v8829_v14 }
  0x7a   : > { %8472 = vmatmul.msk.bf16.gmra.mxu0 %vm1236_vm1, %v8765_v19  ;;  %8537 = vmatmul.msk.bf16.gmra.mxu3 %vm1236_vm1, %v8830_v20  ;;  %v8837_v19 = vld [vmem:[%s9935_s27 + $0x270] sm:$0xff] }
  0x8a   : > { %8473 = vmatmul.msk.bf16.gmra.mxu0 %vm1236_vm1, %v8766_v24  ;;  %8538 = vmatmul.msk.bf16.gmra.mxu3 %vm1236_vm1, %v8831_v25 }
  0x97   : > { %v1634_v28 = vpop.f32.mrf.mxu0 }
  0x98   : > { %v1635_v31 = vadd.f32 %v9998_v29, %v1634_v28 }
  0x9a   : > { %8474 = vmatmul.msk.bf16.gmra.mxu0 %vm1236_vm1, %v8767_v26  ;;  %8539 = vmatmul.msk.bf16.gmra.mxu3 %vm1236_vm1, %v8832_v27  ;;  %v2274_v34 = vmax.f32 %v1635_v31, 0.0  ;;  %v8773_v31 = vld [vmem:[%s9935_s27 + $0x70] sm:$0xff] }
  0x9d   : > { %v10002_v30 = vpop.f32.mrf.mxu3 }
  0x9f   : > { %v1636_v32 = vpop.f32.mrf.mxu0 }
  0xa0   : > { %v1637_v33 = vadd.f32 %v9998_v29, %v1636_v32  ;;  %v8838_v32 = vld [vmem:[%s9935_s27 + $0x278] sm:$0xff] }
  0xa2   : > { %v2275_v35 = vmax.f32 %v1637_v33, 0.0 }
  0xa4   : > { %v2530_v36 = vpack.c.bf16 %v2275_v35, %v2274_v34 }
  0xa5   : > { %v10006_v37 = vpop.f32.mrf.mxu3 }
  0xa6   : > { %2734 = vmatmul.bf16.vlgmr.msra.gmra.mxu1 %v2530_v36 }
  0xa7   : > { %v1639_v40 = vpop.f32.mrf.mxu0 }
  0xa8   : > { %v1640_v42 = vadd.f32 %v9998_v29, %v1639_v40 }
  0xaa   : > { %8475 = vmatmul.msk.bf16.gmra.mxu0 %vm1236_vm1, %v8768_v38  ;;  %8540 = vmatmul.msk.bf16.gmra.mxu3 %vm1236_vm1, %v8833_v39  ;;  %v2276_v45 = vmax.f32 %v1640_v42, 0.0 }
  0xad   : > { %v10012_v41 = vpop.f32.mrf.mxu3 }
  0xaf   : > { %v1641_v43 = vpop.f32.mrf.mxu0 }
  0xb0   : > { %v1642_v44 = vadd.f32 %v9998_v29, %v1641_v43 }
  0xb2   : > { %v2277_v46 = vmax.f32 %v1642_v44, 0.0  ;;  %v8774_v44 = vld [vmem:[%s9935_s27 + $0x78] sm:$0xff] }
  0xb4   : > { %v2531_v47 = vpack.c.bf16 %v2277_v46, %v2276_v45  ;;  %v8839_v45 = vld [vmem:[%s9935_s27 + $0x280] sm:$0xff] }
  0xb5   : > { %v10016_v48 = vpop.f32.mrf.mxu3 }
  0xb6   : > { %2739 = vmatmul.bf16.gmra.mxu1 %v2531_v47 }
  0xb7   : > { %v1644_v51 = vpop.f32.mrf.mxu0 }
  0xb8   : > { %v1645_v53 = vadd.f32 %v9998_v29, %v1644_v51 }
  0xba   : > { %8476 = vmatmul.msk.bf16.gmra.mxu0 %vm1236_vm1, %v8769_v49  ;;  %8541 = vmatmul.msk.bf16.gmra.mxu3 %vm1236_vm1, %v8834_v50  ;;  %v2278_v56 = vmax.f32 %v1645_v53, 0.0 }
  0xbd   : > { %v10022_v52 = vpop.f32.mrf.mxu3 }
  0xbf   : > { %v1646_v54 = vpop.f32.mrf.mxu0 }
  0xc0   : > { %v1647_v55 = vadd.f32 %v9998_v29, %v1646_v54 }
  0xc2   : > { %v2279_v57 = vmax.f32 %v1647_v55, 0.0 }
  0xc4   : > { %v2532_v58 = vpack.c.bf16 %v2279_v57, %v2278_v56  ;;  %v8775_v57 = vld [vmem:[%s9935_s27 + $0x80] sm:$0xff] }
  0xc5   : > { %v10026_v59 = vpop.f32.mrf.mxu3 }
  0xc6   : > { %2744 = vmatmul.bf16.gmra.mxu1 %v2532_v58  ;;  %v8840_v58 = vld [vmem:[%s9935_s27 + $0x288] sm:$0xff] }
  0xc7   : > { %v1649_v62 = vpop.f32.mrf.mxu0 }
  0xc8   : > { %v1650_v0 = vadd.f32 %v9998_v29, %v1649_v62 }
  0xca   : > { %8477 = vmatmul.msk.bf16.gmra.mxu0 %vm1236_vm1, %v8770_v60  ;;  %8542 = vmatmul.msk.bf16.gmra.mxu3 %vm1236_vm1, %v8835_v61  ;;  %v2280_v3 = vmax.f32 %v1650_v0, 0.0 }
  0xcd   : > { %v10032_v63 = vpop.f32.mrf.mxu3 }
  0xcf   : > { %v1651_v1 = vpop.f32.mrf.mxu0 }
  0xd0   : > { %v1652_v2 = vadd.f32 %v9998_v29, %v1651_v1 }
  0xd2   : > { %v2281_v4 = vmax.f32 %v1652_v2, 0.0 }
  0xd4   : > { %v2533_v5 = vpack.c.bf16 %v2281_v4, %v2280_v3 }
  0xd5   : > { %v10036_v6 = vpop.f32.mrf.mxu3 }
  0xd6   : > { %2749 = vmatmul.bf16.gmra.mxu1 %v2533_v5 }
  0xd7   : > { %v1654_v9 = vpop.f32.mrf.mxu0 }
  0xd8   : > { %v1655_v11 = vadd.f32 %v9998_v29, %v1654_v9  ;;  %v8776_v9 = vld [vmem:[%s9935_s27 + $0x88] sm:$0xff] }
  0xda   : > { %8478 = vmatmul.msk.bf16.gmra.mxu0 %vm1236_vm1, %v8771_v7  ;;  %8543 = vmatmul.msk.bf16.gmra.mxu3 %vm1236_vm1, %v8836_v8  ;;  %v2282_v14 = vmax.f32 %v1655_v11, 0.0  ;;  %v10091_v8 = vld [vmem:[%s13581_s4] ss:$0 sm:$0xff]  ;;  %v8841_v11 = vld [vmem:[%s9935_s27 + $0x290] sm:$0xff] }
  0xdd   : > { %v10042_v10 = vpop.f32.mrf.mxu3 }
  0xdf   : > { %v1656_v12 = vpop.f32.mrf.mxu0 }
  0xe0   : > { %v1657_v13 = vadd.f32 %v9998_v29, %v1656_v12 }
  0xe2   : > { %v2283_v15 = vmax.f32 %v1657_v13, 0.0 }
  0xe4   : > { %v2534_v16 = vpack.c.bf16 %v2283_v15, %v2282_v14 }
  0xe5   : > { %v10046_v17 = vpop.f32.mrf.mxu3 }
  0xe6   : > { %2754 = vmatmul.bf16.gmra.mxu1 %v2534_v16 }
  0xe7   : > { %v1659_v20 = vpop.f32.mrf.mxu0 }
  0xe8   : > { %v1660_v22 = vadd.f32 %v9998_v29, %v1659_v20 }
  0xea   : > { %8479 = vmatmul.msk.bf16.gmra.mxu0 %vm1236_vm1, %v8772_v18  ;;  %8544 = vmatmul.msk.bf16.gmra.mxu3 %vm1236_vm1, %v8837_v19  ;;  %v2284_v25 = vmax.f32 %v1660_v22, 0.0 }
  0xed   : > { %v10052_v21 = vpop.f32.mrf.mxu3 }
  0xef   : > { %v1661_v23 = vpop.f32.mrf.mxu0 }
  0xf0   : > { %v1662_v24 = vadd.f32 %v9998_v29, %v1661_v23 }
  0xf2   : > { %v2285_v26 = vmax.f32 %v1662_v24, 0.0 }
  0xf4   : > { %v2535_v27 = vpack.c.bf16 %v2285_v26, %v2284_v25 }
  0xf5   : > { %v10056_v28 = vpop.f32.mrf.mxu3 }
  0xf6   : > { %2759 = vmatmul.bf16.gmra.mxu1 %v2535_v27 }
  0xf7   : > { %v1664_v33 = vpop.f32.mrf.mxu0 }
  0xf8   : > { %v1665_v35 = vadd.f32 %v9998_v29, %v1664_v33  ;;  %v8777_v33 = vld [vmem:[%s9935_s27 + $0x90] sm:$0xff] }
  0xfa   : > { %8480 = vmatmul.msk.bf16.gmra.mxu0 %vm1236_vm1, %v8773_v31  ;;  %8545 = vmatmul.msk.bf16.gmra.mxu3 %vm1236_vm1, %v8838_v32  ;;  %v2286_v39 = vmax.f32 %v1665_v35, 0.0  ;;  %v8842_v35 = vld [vmem:[%s9935_s27 + $0x298] sm:$0xff] }
  0xfd   : > { %v10062_v34 = vpop.f32.mrf.mxu3 }
  0xff   : > { %v1666_v36 = vpop.f32.mrf.mxu0 }
 0x100   : > { %v1667_v38 = vadd.f32 %v9998_v29, %v1666_v36 }
 0x102   : > { %v2287_v40 = vmax.f32 %v1667_v38, 0.0 }
 0x104   : > { %v2536_v42 = vpack.c.bf16 %v2287_v40, %v2286_v39 }
 0x105   : > { %v10066_v43 = vpop.f32.mrf.mxu3 }
 0x106   : > { %2764 = vmatmul.bf16.gmra.mxu1 %v2536_v42 }
 0x107   : > { %v1669_v46 = vpop.f32.mrf.mxu0 }
 0x108   : > { %v1670_v49 = vadd.f32 %v9998_v29, %v1669_v46 }
 0x10a   : > { %8481 = vmatmul.msk.bf16.gmra.mxu0 %vm1236_vm1, %v8774_v44  ;;  %8546 = vmatmul.msk.bf16.gmra.mxu3 %vm1236_vm1, %v8839_v45  ;;  %v2288_v53 = vmax.f32 %v1670_v49, 0.0 }
 0x10d   : > { %v10072_v47 = vpop.f32.mrf.mxu3 }
 0x10f   : > { %v1671_v50 = vpop.f32.mrf.mxu0 }
 0x110   : > { %v1672_v51 = vadd.f32 %v9998_v29, %v1671_v50 }
 0x112   : > { %v2289_v54 = vmax.f32 %v1672_v51, 0.0 }
 0x114   : > { %v2537_v55 = vpack.c.bf16 %v2289_v54, %v2288_v53 }
 0x115   : > { %v10076_v56 = vpop.f32.mrf.mxu3 }
 0x116   : > { %2769 = vmatmul.bf16.gmra.mxu1 %v2537_v55 }
 0x117   : > { %v1674_v60 = vpop.f32.mrf.mxu0 }
 0x118   : > { %v1675_v62 = vadd.f32 %v9998_v29, %v1674_v60  ;;  %v8778_v60 = vld [vmem:[%s9935_s27 + $0x98] sm:$0xff] }
 0x11a   : > { %8482 = vmatmul.msk.bf16.gmra.mxu0 %vm1236_vm1, %v8775_v57  ;;  %8547 = vmatmul.msk.bf16.gmra.mxu3 %vm1236_vm1, %v8840_v58  ;;  %v2290_v2 = vmax.f32 %v1675_v62, 0.0  ;;  %v8843_v62 = vld [vmem:[%s9935_s27 + $0x2a0] sm:$0xff] }
 0x11d   : > { %v10082_v61 = vpop.f32.mrf.mxu3 }
 0x11f   : > { %v1676_v0 = vpop.f32.mrf.mxu0 }
 0x120   : > { %v1677_v1 = vadd.f32 %v9998_v29, %v1676_v0 }
 0x122   : > { %v2291_v3 = vmax.f32 %v1677_v1, 0.0 }
 0x123   : > { %v2735_v4 = vpop.f32.mrf.mxu1 }
 0x124   : > { %v2538_v5 = vpack.c.bf16 %v2291_v3, %v2290_v2  ;;  %v2736_v13 = vadd.f32 %v10091_v8, %v2735_v4 }
 0x125   : > { %v10086_v7 = vpop.f32.mrf.mxu3 }
 0x126   : > { %2774 = vmatmul.bf16.gmra.mxu1 %v2538_v5  ;;  %v3375_v18 = vmax.f32 %v2736_v13, 0.0 }
 0x127   : > { %v1679_v12 = vpop.f32.mrf.mxu0 }
 0x128   : > { %v1680_v19 = vadd.f32 %v9998_v29, %v1679_v12 }
 0x12a   : > { %8483 = vmatmul.msk.bf16.gmra.mxu0 %vm1236_vm1, %v8776_v9  ;;  %8548 = vmatmul.msk.bf16.gmra.mxu3 %vm1236_vm1, %v8841_v11  ;;  %v2292_v25 = vmax.f32 %v1680_v19, 0.0 }
 0x12b   : > { %v2737_v14 = vpop.f32.mrf.mxu1 }
 0x12c   : > { %v2738_v15 = vadd.f32 %v10091_v8, %v2737_v14 }
 0x12d   : > { %v10099_v16 = vpop.f32.mrf.mxu3 }
 0x12e   : > { %v3376_v20 = vmax.f32 %v2738_v15, 0.0 }
 0x12f   : > { %v1681_v22 = vpop.f32.mrf.mxu0 }
 0x130   : > { %v10102_v23 = vpack.c.bf16 %v3376_v20, %v3375_v18  ;;  %v1682_v24 = vadd.f32 %v9998_v29, %v1681_v22 }
 0x132   : > { %13714 = vst [vmem:[#allocation5_spill] sm:$0xff] %v10102_v23  ;;  %v2293_v26 = vmax.f32 %v1682_v24, 0.0  ;;  %v8779_v24 = vld [vmem:[%s9935_s27 + $0xa0] sm:$0xff] }
 0x133   : > { %v2740_v27 = vpop.f32.mrf.mxu1 }
 0x134   : > { %v2539_v31 = vpack.c.bf16 %v2293_v26, %v2292_v25  ;;  %v2741_v38 = vadd.f32 %v10091_v8, %v2740_v27  ;;  %v8844_v25 = vld [vmem:[%s9935_s27 + $0x2a8] sm:$0xff] }
 0x135   : > { %v10105_v32 = vpop.f32.mrf.mxu3 }
 0x136   : > { %2779 = vmatmul.bf16.gmra.mxu1 %v2539_v31  ;;  %v3377_v44 = vmax.f32 %v2741_v38, 0.0 }
 0x137   : > { %v1684_v36 = vpop.f32.mrf.mxu0 }
 0x138   : > { %v1685_v45 = vadd.f32 %v9998_v29, %v1684_v36 }
 0x13a   : > { %8484 = vmatmul.msk.bf16.gmra.mxu0 %vm1236_vm1, %v8777_v33  ;;  %8549 = vmatmul.msk.bf16.gmra.mxu3 %vm1236_vm1, %v8842_v35  ;;  %v2294_v53 = vmax.f32 %v1685_v45, 0.0 }
 0x13b   : > { %v2742_v39 = vpop.f32.mrf.mxu1 }
 0x13c   : > { %v2743_v40 = vadd.f32 %v10091_v8, %v2742_v39 }
 0x13d   : > { %v10113_v42 = vpop.f32.mrf.mxu3 }
 0x13e   : > { %v3378_v46 = vmax.f32 %v2743_v40, 0.0 }
 0x13f   : > { %v1686_v49 = vpop.f32.mrf.mxu0 }
 0x140   : > { %v1687_v50 = vadd.f32 %v9998_v29, %v1686_v49  ;;  %v10117_v51 = vpack.c.bf16 %v3378_v46, %v3377_v44 }
 0x142   : > { %13715 = vst [vmem:[#allocation6_spill] sm:$0xff] %v10117_v51  ;;  %v2295_v54 = vmax.f32 %v1687_v50, 0.0 }
 0x143   : > { %v2745_v55 = vpop.f32.mrf.mxu1 }
 0x144   : > { %v2540_v57 = vpack.c.bf16 %v2295_v54, %v2294_v53  ;;  %v2746_v1 = vadd.f32 %v10091_v8, %v2745_v55  ;;  %v8780_v55 = vld [vmem:[%s9935_s27 + $0xa8] sm:$0xff] }
 0x145   : > { %v10119_v58 = vpop.f32.mrf.mxu3 }
 0x146   : > { %2784 = vmatmul.bf16.gmra.mxu1 %v2540_v57  ;;  %v3379_v5 = vmax.f32 %v2746_v1, 0.0  ;;  %v8845_v57 = vld [vmem:[%s9935_s27 + $0x2b0] sm:$0xff] }
 0x147   : > { %v1689_v0 = vpop.f32.mrf.mxu0 }
 0x148   : > { %v1690_v9 = vadd.f32 %v9998_v29, %v1689_v0 }
 0x14a   : > { %8485 = vmatmul.msk.bf16.gmra.mxu0 %vm1236_vm1, %v8778_v60  ;;  %8550 = vmatmul.msk.bf16.gmra.mxu3 %vm1236_vm1, %v8843_v62  ;;  %v2296_v15 = vmax.f32 %v1690_v9, 0.0 }
 0x14b   : > { %v2747_v2 = vpop.f32.mrf.mxu1 }
 0x14c   : > { %v2748_v3 = vadd.f32 %v10091_v8, %v2747_v2 }
 0x14d   : > { %v10127_v4 = vpop.f32.mrf.mxu3 }
 0x14e   : > { %v3380_v11 = vmax.f32 %v2748_v3, 0.0 }
 0x14f   : > { %v1691_v12 = vpop.f32.mrf.mxu0 }
 0x150   : > { %v1692_v13 = vadd.f32 %v9998_v29, %v1691_v12  ;;  %v10131_v14 = vpack.c.bf16 %v3380_v11, %v3379_v5 }
 0x152   : > { %13716 = vst [vmem:[#allocation7_spill] sm:$0xff] %v10131_v14  ;;  %v2297_v18 = vmax.f32 %v1692_v13, 0.0 }
 0x153   : > { %v2750_v19 = vpop.f32.mrf.mxu1 }
 0x154   : > { %v2541_v20 = vpack.c.bf16 %v2297_v18, %v2296_v15  ;;  %v2751_v27 = vadd.f32 %v10091_v8, %v2750_v19 }
 0x155   : > { %v10133_v22 = vpop.f32.mrf.mxu3 }
 0x156   : > { %2789 = vmatmul.bf16.gmra.mxu1 %v2541_v20  ;;  %v3381_v36 = vmax.f32 %v2751_v27, 0.0 }
 0x157   : > { %v1694_v26 = vpop.f32.mrf.mxu0 }
 0x158   : > { %v1695_v38 = vadd.f32 %v9998_v29, %v1694_v26  ;;  %v8846_v26 = vld [vmem:[%s9935_s27 + $0x2b8] sm:$0xff] }
 0x15a   : > { %8486 = vmatmul.msk.bf16.gmra.mxu0 %vm1236_vm1, %v8779_v24  ;;  %8551 = vmatmul.msk.bf16.gmra.mxu3 %vm1236_vm1, %v8844_v25  ;;  %v2298_v46 = vmax.f32 %v1695_v38, 0.0  ;;  %v8781_v25 = vld [vmem:[%s9935_s27 + $0xb0] sm:$0xff] }
 0x15b   : > { %v2752_v31 = vpop.f32.mrf.mxu1 }
 0x15c   : > { %v2753_v33 = vadd.f32 %v10091_v8, %v2752_v31 }
 0x15d   : > { %v10141_v35 = vpop.f32.mrf.mxu3 }
 0x15e   : > { %13717 = vst [vmem:[#allocation8_spill] sm:$0xff] %v10141_v35  ;;  %v3382_v39 = vmax.f32 %v2753_v33, 0.0 }
 0x15f   : > { %v1696_v40 = vpop.f32.mrf.mxu0 }
 0x160   : > { %v1697_v44 = vadd.f32 %v9998_v29, %v1696_v40  ;;  %v10145_v45 = vpack.c.bf16 %v3382_v39, %v3381_v36 }
 0x162   : > { %13718 = vst [vmem:[#allocation9_spill] sm:$0xff] %v10145_v45  ;;  %v2299_v49 = vmax.f32 %v1697_v44, 0.0 }
 0x163   : > { %v2755_v50 = vpop.f32.mrf.mxu1 }
 0x164   : > { %v2542_v53 = vpack.c.bf16 %v2299_v49, %v2298_v46  ;;  %v2756_v62 = vadd.f32 %v10091_v8, %v2755_v50 }
 0x165   : > { %v10147_v54 = vpop.f32.mrf.mxu3 }
 0x166   : > { %13719 = vst [vmem:[#allocation10_spill] sm:$0xff] %v10147_v54  ;;  %2794 = vmatmul.bf16.gmra.mxu1 %v2542_v53  ;;  %v3383_v3 = vmax.f32 %v2756_v62, 0.0 }
 0x167   : > { %v1699_v60 = vpop.f32.mrf.mxu0 }
 0x168   : > { %v1700_v5 = vadd.f32 %v9998_v29, %v1699_v60 }
 0x16a   : > { %8487 = vmatmul.msk.bf16.gmra.mxu0 %vm1236_vm1, %v8780_v55  ;;  %8552 = vmatmul.msk.bf16.gmra.mxu3 %vm1236_vm1, %v8845_v57  ;;  %v2300_v15 = vmax.f32 %v1700_v5, 0.0 }
 0x16b   : > { %v2757_v0 = vpop.f32.mrf.mxu1 }
 0x16c   : > { %v2758_v1 = vadd.f32 %v10091_v8, %v2757_v0  ;;  %v8782_v0 = vld [vmem:[%s9935_s27 + $0xb8] sm:$0xff] }
 0x16d   : > { %v10155_v2 = vpop.f32.mrf.mxu3 }
 0x16e   : > { %13720 = vst [vmem:[#allocation11_spill] sm:$0xff] %v10155_v2  ;;  %v3384_v9 = vmax.f32 %v2758_v1, 0.0  ;;  %v8847_v1 = vld [vmem:[%s9935_s27 + $0x2c0] sm:$0xff]  ;;  %v8796_v2 = vld [vmem:[%s9935_s27 + $0x128] sm:$0xff] }
 0x16f   : > { %v1701_v11 = vpop.f32.mrf.mxu0 }
 0x170   : > { %v1702_v12 = vadd.f32 %v9998_v29, %v1701_v11  ;;  %v10159_v13 = vpack.c.bf16 %v3384_v9, %v3383_v3 }
 0x172   : > { %13721 = vst [vmem:[#allocation12_spill] sm:$0xff] %v10159_v13  ;;  %v2301_v18 = vmax.f32 %v1702_v12, 0.0 }
 0x173   : > { %v2760_v19 = vpop.f32.mrf.mxu1 }
 0x174   : > { %v2543_v20 = vpack.c.bf16 %v2301_v18, %v2300_v15  ;;  %v2761_v31 = vadd.f32 %v10091_v8, %v2760_v19 }
 0x175   : > { %v10161_v24 = vpop.f32.mrf.mxu3 }
 0x176   : > { %13722 = vst [vmem:[#allocation13_spill] sm:$0xff] %v10161_v24  ;;  %2799 = vmatmul.bf16.gmra.mxu1 %v2543_v20  ;;  %v3385_v39 = vmax.f32 %v2761_v31, 0.0 }
 0x177   : > { %v1704_v27 = vpop.f32.mrf.mxu0 }
 0x178   : > { %v1705_v40 = vadd.f32 %v9998_v29, %v1704_v27 }
 0x17a   : > { %8488 = vmatmul.msk.bf16.gmra.mxu0 %vm1236_vm1, %v8781_v25  ;;  %8553 = vmatmul.msk.bf16.gmra.mxu3 %vm1236_vm1, %v8846_v26  ;;  %v2302_v53 = vmax.f32 %v1705_v40, 0.0  ;;  %v8783_v40 = vld [vmem:[%s9935_s27 + $0xc0] sm:$0xff] }
 0x17b   : > { %v2762_v33 = vpop.f32.mrf.mxu1 }
 0x17c   : > { %v2763_v36 = vadd.f32 %v10091_v8, %v2762_v33 }
 0x17d   : > { %v10169_v38 = vpop.f32.mrf.mxu3 }
 0x17e   : > { %13723 = vst [vmem:[#allocation14_spill] sm:$0xff] %v10169_v38  ;;  %v3386_v44 = vmax.f32 %v2763_v36, 0.0 }
 0x17f   : > { %v1706_v46 = vpop.f32.mrf.mxu0 }
 0x180   : > { %v1707_v49 = vadd.f32 %v9998_v29, %v1706_v46  ;;  %v10173_v50 = vpack.c.bf16 %v3386_v44, %v3385_v39  ;;  %v8848_v44 = vld [vmem:[%s9935_s27 + $0x2c8] sm:$0xff] }
 0x182   : > { %13724 = vst [vmem:[#allocation15_spill] sm:$0xff] %v10173_v50  ;;  %v2303_v55 = vmax.f32 %v1707_v49, 0.0 }
 0x183   : > { %v2765_v57 = vpop.f32.mrf.mxu1 }
 0x184   : > { %v2544_v60 = vpack.c.bf16 %v2303_v55, %v2302_v53  ;;  %v2766_v5 = vadd.f32 %v10091_v8, %v2765_v57 }
 0x185   : > { %v10175_v62 = vpop.f32.mrf.mxu3 }
 0x186   : > { %13725 = vst [vmem:[#allocation16_spill] sm:$0xff] %v10175_v62  ;;  %2804 = vmatmul.bf16.gmra.mxu1 %v2544_v60  ;;  %v3387_v15 = vmax.f32 %v2766_v5, 0.0 }
 0x187   : > { %v1709_v3 = vpop.f32.mrf.mxu0 }
 0x188   : > { %v1710_v18 = vadd.f32 %v9998_v29, %v1709_v3 }
 0x18a   : > { %8489 = vmatmul.msk.bf16.gmra.mxu0 %vm1236_vm1, %v8782_v0  ;;  %8554 = vmatmul.msk.bf16.gmra.mxu3 %vm1236_vm1, %v8847_v1  ;;  %v2304_v27 = vmax.f32 %v1710_v18, 0.0 }
 0x18b   : > { %v2767_v9 = vpop.f32.mrf.mxu1 }
 0x18c   : > { %v2768_v11 = vadd.f32 %v10091_v8, %v2767_v9 }
 0x18d   : > { %v10183_v12 = vpop.f32.mrf.mxu3 }
 0x18e   : > { %13726 = vst [vmem:[#allocation17_spill] sm:$0xff] %v10183_v12  ;;  %v3388_v19 = vmax.f32 %v2768_v11, 0.0 }
 0x18f   : > { %v1711_v20 = vpop.f32.mrf.mxu0 }
 0x190   : > { %v1712_v25 = vadd.f32 %v9998_v29, %v1711_v20  ;;  %v10187_v26 = vpack.c.bf16 %v3388_v19, %v3387_v15 }
 0x192   : > { %13727 = vst [vmem:[#allocation18_spill] sm:$0xff] %v10187_v26  ;;  %v2305_v31 = vmax.f32 %v1712_v25, 0.0  ;;  %v8784_v25 = vld [vmem:[%s9935_s27 + $0xc8] sm:$0xff] }
 0x193   : > { %v2770_v33 = vpop.f32.mrf.mxu1 }
 0x194   : > { %v2545_v36 = vpack.c.bf16 %v2305_v31, %v2304_v27  ;;  %v2771_v49 = vadd.f32 %v10091_v8, %v2770_v33  ;;  %v8849_v27 = vld [vmem:[%s9935_s27 + $0x2d0] sm:$0xff] }
 0x195   : > { %v10189_v39 = vpop.f32.mrf.mxu3 }
 0x196   : > { %13728 = vst [vmem:[#allocation19_spill] sm:$0xff] %v10189_v39  ;;  %2809 = vmatmul.bf16.gmra.mxu1 %v2545_v36  ;;  %v3389_v60 = vmax.f32 %v2771_v49, 0.0 }
 0x197   : > { %v1714_v46 = vpop.f32.mrf.mxu0 }
 0x198   : > { %v1715_v0 = vadd.f32 %v9998_v29, %v1714_v46 }
 0x19a   : > { %8490 = vmatmul.msk.bf16.gmra.mxu0 %vm1236_vm1, %v8783_v40  ;;  %8555 = vmatmul.msk.bf16.gmra.mxu3 %vm1236_vm1, %v8848_v44  ;;  %v2306_v11 = vmax.f32 %v1715_v0, 0.0 }
 0x19b   : > { %v2772_v53 = vpop.f32.mrf.mxu1 }
 0x19c   : > { %v2773_v55 = vadd.f32 %v10091_v8, %v2772_v53 }
 0x19d   : > { %v10197_v57 = vpop.f32.mrf.mxu3 }
 0x19e   : > { %13729 = vst [vmem:[#allocation20_spill] sm:$0xff] %v10197_v57  ;;  %v3390_v1 = vmax.f32 %v2773_v55, 0.0 }
 0x19f   : > { %v1716_v3 = vpop.f32.mrf.mxu0 }
 0x1a0   : > { %v1717_v5 = vadd.f32 %v9998_v29, %v1716_v3  ;;  %v10201_v9 = vpack.c.bf16 %v3390_v1, %v3389_v60 }
 0x1a2   : > { %13730 = vst [vmem:[#allocation21_spill] sm:$0xff] %v10201_v9  ;;  %v2307_v15 = vmax.f32 %v1717_v5, 0.0 }
 0x1a3   : > { %v2775_v18 = vpop.f32.mrf.mxu1 }
 0x1a4   : > { %v2546_v19 = vpack.c.bf16 %v2307_v15, %v2306_v11  ;;  %v2776_v33 = vadd.f32 %v10091_v8, %v2775_v18  ;;  %v8785_v18 = vld [vmem:[%s9935_s27 + $0xd0] sm:$0xff] }
 0x1a5   : > { %v10203_v20 = vpop.f32.mrf.mxu3 }
 0x1a6   : > { %13731 = vst [vmem:[#allocation22_spill] sm:$0xff] %v10203_v20  ;;  %2814 = vmatmul.bf16.gmra.mxu1 %v2546_v19  ;;  %v3391_v46 = vmax.f32 %v2776_v33, 0.0  ;;  %v8850_v19 = vld [vmem:[%s9935_s27 + $0x2d8] sm:$0xff] }
 0x1a7   : > { %v1719_v31 = vpop.f32.mrf.mxu0 }
 0x1a8   : > { %v1720_v49 = vadd.f32 %v9998_v29, %v1719_v31 }
 0x1aa   : > { %8491 = vmatmul.msk.bf16.gmra.mxu0 %vm1236_vm1, %v8784_v25  ;;  %8556 = vmatmul.msk.bf16.gmra.mxu3 %vm1236_vm1, %v8849_v27  ;;  %v2308_v1 = vmax.f32 %v1720_v49, 0.0 }
 0x1ab   : > { %v2777_v36 = vpop.f32.mrf.mxu1 }
 0x1ac   : > { %v2778_v40 = vadd.f32 %v10091_v8, %v2777_v36 }
 0x1ad   : > { %v10211_v44 = vpop.f32.mrf.mxu3 }
 0x1ae   : > { %13732 = vst [vmem:[#allocation23_spill] sm:$0xff] %v10211_v44  ;;  %v3392_v53 = vmax.f32 %v2778_v40, 0.0 }
 0x1af   : > { %v1721_v55 = vpop.f32.mrf.mxu0 }
 0x1b0   : > { %v1722_v60 = vadd.f32 %v9998_v29, %v1721_v55  ;;  %v10215_v0 = vpack.c.bf16 %v3392_v53, %v3391_v46 }
 0x1b2   : > { %13733 = vst [vmem:[#allocation24_spill] sm:$0xff] %v10215_v0  ;;  %v2309_v3 = vmax.f32 %v1722_v60, 0.0 }
 0x1b3   : > { %v2780_v5 = vpop.f32.mrf.mxu1 }
 0x1b4   : > { %v2547_v11 = vpack.c.bf16 %v2309_v3, %v2308_v1  ;;  %v2781_v27 = vadd.f32 %v10091_v8, %v2780_v5 }
 0x1b5   : > { %v10217_v15 = vpop.f32.mrf.mxu3 }
 0x1b6   : > { %13734 = vst [vmem:[#allocation25_spill] sm:$0xff] %v10217_v15  ;;  %2819 = vmatmul.bf16.gmra.mxu1 %v2547_v11  ;;  %v3393_v40 = vmax.f32 %v2781_v27, 0.0 }
 0x1b7   : > { %v1724_v25 = vpop.f32.mrf.mxu0 }
 0x1b8   : > { %v1725_v46 = vadd.f32 %v9998_v29, %v1724_v25 }
 0x1ba   : > { %8492 = vmatmul.msk.bf16.gmra.mxu0 %vm1236_vm1, %v8785_v18  ;;  %8557 = vmatmul.msk.bf16.gmra.mxu3 %vm1236_vm1, %v8850_v19  ;;  %v2310_v1 = vmax.f32 %v1725_v46, 0.0  ;;  %v8786_v19 = vld [vmem:[%s9935_s27 + $0xd8] sm:$0xff] }
 0x1bb   : > { %v2782_v31 = vpop.f32.mrf.mxu1 }
 0x1bc   : > { %v2783_v33 = vadd.f32 %v10091_v8, %v2782_v31  ;;  %v8851_v31 = vld [vmem:[%s9935_s27 + $0x2e0] sm:$0xff] }
 0x1bd   : > { %v10225_v36 = vpop.f32.mrf.mxu3 }
 0x1be   : > { %13735 = vst [vmem:[#allocation26_spill] sm:$0xff] %v10225_v36  ;;  %v3394_v49 = vmax.f32 %v2783_v33, 0.0  ;;  %v8787_v36 = vld [vmem:[%s9935_s27 + $0xe0] sm:$0xff] }
 0x1bf   : > { %v1726_v53 = vpop.f32.mrf.mxu0 }
 0x1c0   : > { %v1727_v55 = vadd.f32 %v9998_v29, %v1726_v53  ;;  %v10229_v60 = vpack.c.bf16 %v3394_v49, %v3393_v40 }
 0x1c2   : > { %13736 = vst [vmem:[#allocation27_spill] sm:$0xff] %v10229_v60  ;;  %v2311_v3 = vmax.f32 %v1727_v55, 0.0 }
 0x1c3   : > { %v2785_v5 = vpop.f32.mrf.mxu1 }
 0x1c4   : > { %v2548_v11 = vpack.c.bf16 %v2311_v3, %v2310_v1  ;;  %v2786_v27 = vadd.f32 %v10091_v8, %v2785_v5 }
 0x1c5   : > { %v10231_v18 = vpop.f32.mrf.mxu3 }
 0x1c6   : > { %13737 = vst [vmem:[#allocation28_spill] sm:$0xff] %v10231_v18  ;;  %2824 = vmatmul.bf16.gmra.mxu1 %v2548_v11  ;;  %v3395_v46 = vmax.f32 %v2786_v27, 0.0 }
 0x1c7   : > { %v1729_v15 = vpop.f32.mrf.mxu0 }
 0x1c8   : > { %v1730_v49 = vadd.f32 %v9998_v29, %v1729_v15 }
 0x1ca   : > { %8493 = vmatmul.msk.bf16.gmra.mxu0 %vm1236_vm1, %v8786_v19  ;;  %8558 = vmatmul.msk.bf16.gmra.mxu3 %vm1236_vm1, %v8851_v31  ;;  %v2312_v5 = vmax.f32 %v1730_v49, 0.0 }
 0x1cb   : > { %v2787_v25 = vpop.f32.mrf.mxu1 }
 0x1cc   : > { %v2788_v33 = vadd.f32 %v10091_v8, %v2787_v25  ;;  %v8852_v25 = vld [vmem:[%s9935_s27 + $0x2e8] sm:$0xff] }
 0x1cd   : > { %v10239_v40 = vpop.f32.mrf.mxu3 }
 0x1ce   : > { %13738 = vst [vmem:[#allocation29_spill] sm:$0xff] %v10239_v40  ;;  %v3396_v53 = vmax.f32 %v2788_v33, 0.0  ;;  %v8788_v40 = vld [vmem:[%s9935_s27 + $0xe8] sm:$0xff] }
 0x1cf   : > { %v1731_v55 = vpop.f32.mrf.mxu0 }
 0x1d0   : > { %v1732_v1 = vadd.f32 %v9998_v29, %v1731_v55  ;;  %v10243_v3 = vpack.c.bf16 %v3396_v53, %v3395_v46 }
 0x1d2   : > { %v2313_v11 = vmax.f32 %v1732_v1, 0.0 }
 0x1d3   : > { %v2790_v19 = vpop.f32.mrf.mxu1 }
 0x1d4   : > { %v2549_v31 = vpack.c.bf16 %v2313_v11, %v2312_v5  ;;  %v2791_v27 = vadd.f32 %v10091_v8, %v2790_v19 }
 0x1d5   : > { %v10245_v18 = vpop.f32.mrf.mxu3 }
 0x1d6   : > { %13739 = vst [vmem:[#allocation30_spill] sm:$0xff] %v10245_v18  ;;  %2829 = vmatmul.bf16.gmra.mxu1 %v2549_v31  ;;  %v3397_v49 = vmax.f32 %v2791_v27, 0.0 }
 0x1d7   : > { %v1734_v44 = vpop.f32.mrf.mxu0 }
 0x1d8   : > { %v1735_v53 = vadd.f32 %v9998_v29, %v1734_v44 }
 0x1da   : > { %8494 = vmatmul.msk.bf16.gmra.mxu0 %vm1236_vm1, %v8787_v36  ;;  %8559 = vmatmul.msk.bf16.gmra.mxu3 %vm1236_vm1, %v8852_v25  ;;  %v2314_v19 = vmax.f32 %v1735_v53, 0.0 }
 0x1db   : > { %v2792_v15 = vpop.f32.mrf.mxu1 }
 0x1dc   : > { %v2793_v33 = vadd.f32 %v10091_v8, %v2792_v15  ;;  %v8853_v15 = vld [vmem:[%s9935_s27 + $0x2f0] sm:$0xff] }
 0x1dd   : > { %v10253_v46 = vpop.f32.mrf.mxu3 }
 0x1de   : > { %13740 = vst [vmem:[#allocation31_spill] sm:$0xff] %v10253_v46  ;;  %v3398_v55 = vmax.f32 %v2793_v33, 0.0  ;;  %v8789_v46 = vld [vmem:[%s9935_s27 + $0xf0] sm:$0xff] }
 0x1df   : > { %v1736_v1 = vpop.f32.mrf.mxu0 }
 0x1e0   : > { %v1737_v5 = vadd.f32 %v9998_v29, %v1736_v1  ;;  %v10257_v11 = vpack.c.bf16 %v3398_v55, %v3397_v49 }
 0x1e2   : > { %13741 = vst [vmem:[#allocation32_spill] sm:$0xff] %v10257_v11  ;;  %v2315_v36 = vmax.f32 %v1737_v5, 0.0 }
 0x1e3   : > { %v2795_v31 = vpop.f32.mrf.mxu1 }
 0x1e4   : > { %v2550_v25 = vpack.c.bf16 %v2315_v36, %v2314_v19  ;;  %v2796_v27 = vadd.f32 %v10091_v8, %v2795_v31 }
 0x1e5   : > { %v10259_v18 = vpop.f32.mrf.mxu3 }
 0x1e6   : > { %13742 = vst [vmem:[#allocation33_spill] sm:$0xff] %v10259_v18  ;;  %2834 = vmatmul.bf16.gmra.mxu1 %v2550_v25  ;;  %v3399_v53 = vmax.f32 %v2796_v27, 0.0 }
 0x1e7   : > { %v1739_v20 = vpop.f32.mrf.mxu0 }
 0x1e8   : > { %v1740_v55 = vadd.f32 %v9998_v29, %v1739_v20 }
 0x1ea   : > { %8495 = vmatmul.msk.bf16.gmra.mxu0 %vm1236_vm1, %v8788_v40  ;;  %8560 = vmatmul.msk.bf16.gmra.mxu3 %vm1236_vm1, %v8853_v15  ;;  %v2316_v31 = vmax.f32 %v1740_v55, 0.0 }
 0x1eb   : > { %v2797_v44 = vpop.f32.mrf.mxu1 }
 0x1ec   : > { %v2798_v33 = vadd.f32 %v10091_v8, %v2797_v44  ;;  %v8854_v44 = vld [vmem:[%s9935_s27 + $0x2f8] sm:$0xff] }
 0x1ed   : > { %v10267_v49 = vpop.f32.mrf.mxu3 }
 0x1ee   : > { %13743 = vst [vmem:[#allocation34_spill] sm:$0xff] %v10267_v49  ;;  %v3400_v1 = vmax.f32 %v2798_v33, 0.0  ;;  %v8790_v49 = vld [vmem:[%s9935_s27 + $0xf8] sm:$0xff] }
 0x1ef   : > { %v1741_v5 = vpop.f32.mrf.mxu0 }
 0x1f0   : > { %v1742_v19 = vadd.f32 %v9998_v29, %v1741_v5  ;;  %v10271_v36 = vpack.c.bf16 %v3400_v1, %v3399_v53 }
 0x1f2   : > { %13744 = vst [vmem:[#allocation35_spill] sm:$0xff] %v10271_v36  ;;  %v2317_v40 = vmax.f32 %v1742_v19, 0.0 }
 0x1f3   : > { %v2800_v25 = vpop.f32.mrf.mxu1 }
 0x1f4   : > { %v2551_v15 = vpack.c.bf16 %v2317_v40, %v2316_v31  ;;  %v2801_v27 = vadd.f32 %v10091_v8, %v2800_v25 }
 0x1f5   : > { %v10273_v18 = vpop.f32.mrf.mxu3 }
 0x1f6   : > { %13745 = vst [vmem:[#allocation36_spill] sm:$0xff] %v10273_v18  ;;  %2839 = vmatmul.bf16.gmra.mxu1 %v2551_v15  ;;  %v3401_v55 = vmax.f32 %v2801_v27, 0.0 }
 0x1f7   : > { %v1744_v57 = vpop.f32.mrf.mxu0 }
 0x1f8   : > { %v1745_v1 = vadd.f32 %v9998_v29, %v1744_v57 }
 0x1fa   : > { %8496 = vmatmul.msk.bf16.gmra.mxu0 %vm1236_vm1, %v8789_v46  ;;  %8561 = vmatmul.msk.bf16.gmra.mxu3 %vm1236_vm1, %v8854_v44  ;;  %v2318_v25 = vmax.f32 %v1745_v1, 0.0 }
 0x1fb   : > { %v2802_v20 = vpop.f32.mrf.mxu1 }
 0x1fc   : > { %v2803_v33 = vadd.f32 %v10091_v8, %v2802_v20  ;;  %v8855_v20 = vld [vmem:[%s9935_s27 + $0x300] sm:$0xff] }
 0x1fd   : > { %v10281_v53 = vpop.f32.mrf.mxu3 }
 0x1fe   : > { %13746 = vst [vmem:[#allocation37_spill] sm:$0xff] %v10281_v53  ;;  %v3402_v5 = vmax.f32 %v2803_v33, 0.0  ;;  %v8791_v53 = vld [vmem:[%s9935_s27 + $0x100] sm:$0xff] }
 0x1ff   : > { %v1746_v19 = vpop.f32.mrf.mxu0 }
 0x200   : > { %v1747_v31 = vadd.f32 %v9998_v29, %v1746_v19  ;;  %v10285_v40 = vpack.c.bf16 %v3402_v5, %v3401_v55 }
 0x202   : > { %13747 = vst [vmem:[#allocation38_spill] sm:$0xff] %v10285_v40  ;;  %v2319_v46 = vmax.f32 %v1747_v31, 0.0 }
 0x203   : > { %v2805_v15 = vpop.f32.mrf.mxu1 }
 0x204   : > { %v2552_v44 = vpack.c.bf16 %v2319_v46, %v2318_v25  ;;  %v2806_v27 = vadd.f32 %v10091_v8, %v2805_v15 }
 0x205   : > { %v10287_v18 = vpop.f32.mrf.mxu3 }
 0x206   : > { %13748 = vst [vmem:[#allocation39_spill] sm:$0xff] %v10287_v18  ;;  %2844 = vmatmul.bf16.gmra.mxu1 %v2552_v44  ;;  %v3403_v1 = vmax.f32 %v2806_v27, 0.0 }
 0x207   : > { %v1749_v39 = vpop.f32.mrf.mxu0 }
 0x208   : > { %v1750_v5 = vadd.f32 %v9998_v29, %v1749_v39 }
 0x20a   : > { %8497 = vmatmul.msk.bf16.gmra.mxu0 %vm1236_vm1, %v8790_v49  ;;  %8562 = vmatmul.msk.bf16.gmra.mxu3 %vm1236_vm1, %v8855_v20  ;;  %v2320_v15 = vmax.f32 %v1750_v5, 0.0 }
 0x20b   : > { %v2807_v57 = vpop.f32.mrf.mxu1 }
 0x20c   : > { %v2808_v33 = vadd.f32 %v10091_v8, %v2807_v57  ;;  %v8856_v57 = vld [vmem:[%s9935_s27 + $0x308] sm:$0xff] }
 0x20d   : > { %v10295_v55 = vpop.f32.mrf.mxu3 }
 0x20e   : > { %13749 = vst [vmem:[#allocation40_spill] sm:$0xff] %v10295_v55  ;;  %v3404_v19 = vmax.f32 %v2808_v33, 0.0  ;;  %v8792_v55 = vld [vmem:[%s9935_s27 + $0x108] sm:$0xff] }
 0x20f   : > { %v1751_v31 = vpop.f32.mrf.mxu0 }
 0x210   : > { %v1752_v25 = vadd.f32 %v9998_v29, %v1751_v31  ;;  %v10299_v46 = vpack.c.bf16 %v3404_v19, %v3403_v1 }
 0x212   : > { %13750 = vst [vmem:[#allocation41_spill] sm:$0xff] %v10299_v46  ;;  %v2321_v49 = vmax.f32 %v1752_v25, 0.0 }
 0x213   : > { %v2810_v44 = vpop.f32.mrf.mxu1 }
 0x214   : > { %v2553_v20 = vpack.c.bf16 %v2321_v49, %v2320_v15  ;;  %v2811_v27 = vadd.f32 %v10091_v8, %v2810_v44 }
 0x215   : > { %v10301_v18 = vpop.f32.mrf.mxu3 }
 0x216   : > { %13751 = vst [vmem:[#allocation42_spill] sm:$0xff] %v10301_v18  ;;  %2849 = vmatmul.bf16.gmra.mxu1 %v2553_v20  ;;  %v3405_v5 = vmax.f32 %v2811_v27, 0.0 }
 0x217   : > { %v1754_v12 = vpop.f32.mrf.mxu0 }
 0x218   : > { %v1755_v19 = vadd.f32 %v9998_v29, %v1754_v12 }
 0x21a   : > { %8498 = vmatmul.msk.bf16.gmra.mxu0 %vm1236_vm1, %v8791_v53  ;;  %8563 = vmatmul.msk.bf16.gmra.mxu3 %vm1236_vm1, %v8856_v57  ;;  %v2322_v44 = vmax.f32 %v1755_v19, 0.0 }
 0x21b   : > { %v2812_v39 = vpop.f32.mrf.mxu1 }
 0x21c   : > { %v2813_v33 = vadd.f32 %v10091_v8, %v2812_v39  ;;  %v8857_v39 = vld [vmem:[%s9935_s27 + $0x310] sm:$0xff] }
 0x21d   : > { %v10309_v1 = vpop.f32.mrf.mxu3 }
 0x21e   : > { %13752 = vst [vmem:[#allocation43_spill] sm:$0xff] %v10309_v1  ;;  %v3406_v31 = vmax.f32 %v2813_v33, 0.0  ;;  %v8793_v1 = vld [vmem:[%s9935_s27 + $0x110] sm:$0xff] }
 0x21f   : > { %v1756_v25 = vpop.f32.mrf.mxu0 }
 0x220   : > { %v1757_v15 = vadd.f32 %v9998_v29, %v1756_v25  ;;  %v10313_v49 = vpack.c.bf16 %v3406_v31, %v3405_v5 }
 0x222   : > { %13753 = vst [vmem:[#allocation44_spill] sm:$0xff] %v10313_v49  ;;  %v2323_v53 = vmax.f32 %v1757_v15, 0.0 }
 0x223   : > { %v2815_v20 = vpop.f32.mrf.mxu1 }
 0x224   : > { %v2554_v57 = vpack.c.bf16 %v2323_v53, %v2322_v44  ;;  %v2816_v27 = vadd.f32 %v10091_v8, %v2815_v20 }
 0x225   : > { %v10315_v18 = vpop.f32.mrf.mxu3 }
 0x226   : > { %13754 = vst [vmem:[#allocation45_spill] sm:$0xff] %v10315_v18  ;;  %2854 = vmatmul.bf16.gmra.mxu1 %v2554_v57  ;;  %v3407_v19 = vmax.f32 %v2816_v27, 0.0 }
 0x227   : > { %v1759_v62 = vpop.f32.mrf.mxu0 }
 0x228   : > { %v1760_v31 = vadd.f32 %v9998_v29, %v1759_v62 }
 0x22a   : > { %8499 = vmatmul.msk.bf16.gmra.mxu0 %vm1236_vm1, %v8792_v55  ;;  %8564 = vmatmul.msk.bf16.gmra.mxu3 %vm1236_vm1, %v8857_v39  ;;  %v2324_v20 = vmax.f32 %v1760_v31, 0.0 }
 0x22b   : > { %v2817_v12 = vpop.f32.mrf.mxu1 }
 0x22c   : > { %v2818_v33 = vadd.f32 %v10091_v8, %v2817_v12  ;;  %v8858_v12 = vld [vmem:[%s9935_s27 + $0x318] sm:$0xff] }
 0x22d   : > { %v10323_v5 = vpop.f32.mrf.mxu3 }
 0x22e   : > { %13755 = vst [vmem:[#allocation46_spill] sm:$0xff] %v10323_v5  ;;  %v3408_v25 = vmax.f32 %v2818_v33, 0.0  ;;  %v8794_v5 = vld [vmem:[%s9935_s27 + $0x118] sm:$0xff] }
 0x22f   : > { %v1761_v15 = vpop.f32.mrf.mxu0 }
 0x230   : > { %v1762_v44 = vadd.f32 %v9998_v29, %v1761_v15  ;;  %v10327_v53 = vpack.c.bf16 %v3408_v25, %v3407_v19 }
 0x232   : > { %13756 = vst [vmem:[#allocation47_spill] sm:$0xff] %v10327_v53  ;;  %v2325_v55 = vmax.f32 %v1762_v44, 0.0 }
 0x233   : > { %v2820_v57 = vpop.f32.mrf.mxu1 }
 0x234   : > { %v2555_v39 = vpack.c.bf16 %v2325_v55, %v2324_v20  ;;  %v2821_v27 = vadd.f32 %v10091_v8, %v2820_v57 }
 0x235   : > { %v10329_v18 = vpop.f32.mrf.mxu3 }
 0x236   : > { %13757 = vst [vmem:[#allocation48_spill] sm:$0xff] %v10329_v18  ;;  %2859 = vmatmul.bf16.gmra.mxu1 %v2555_v39  ;;  %v3409_v31 = vmax.f32 %v2821_v27, 0.0 }
 0x237   : > { %v1764_v38 = vpop.f32.mrf.mxu0 }
 0x238   : > { %v1765_v25 = vadd.f32 %v9998_v29, %v1764_v38 }
 0x23a   : > { %8500 = vmatmul.msk.bf16.gmra.mxu0 %vm1236_vm1, %v8793_v1  ;;  %8565 = vmatmul.msk.bf16.gmra.mxu3 %vm1236_vm1, %v8858_v12  ;;  %v2326_v57 = vmax.f32 %v1765_v25, 0.0  ;;  %v10356_v25 = vld [vmem:[%s13579_s2] ss:$0 sm:$0xff] }
 0x23b   : > { %v2822_v62 = vpop.f32.mrf.mxu1 }
 0x23c   : > { %v2823_v33 = vadd.f32 %v10091_v8, %v2822_v62  ;;  %v8859_v62 = vld [vmem:[%s9935_s27 + $0x320] sm:$0xff] }
 0x23d   : > { %v10337_v19 = vpop.f32.mrf.mxu3 }
 0x23e   : > { %13758 = vst [vmem:[#allocation49_spill] sm:$0xff] %v10337_v19  ;;  %v3410_v15 = vmax.f32 %v2823_v33, 0.0 }
 0x23f   : > { %v1766_v44 = vpop.f32.mrf.mxu0 }
 0x240   : > { %v1767_v20 = vadd.f32 %v9998_v29, %v1766_v44  ;;  %v10341_v55 = vpack.c.bf16 %v3410_v15, %v3409_v31 }
 0x242   : > { %13759 = vst [vmem:[#allocation50_spill] sm:$0xff] %v10341_v55  ;;  %v2327_v1 = vmax.f32 %v1767_v20, 0.0 }
 0x243   : > { %v2825_v39 = vpop.f32.mrf.mxu1 }
 0x244   : > { %v2556_v12 = vpack.c.bf16 %v2327_v1, %v2326_v57  ;;  %v2826_v27 = vadd.f32 %v10091_v8, %v2825_v39 }
 0x245   : > { %v10343_v18 = vpop.f32.mrf.mxu3 }
 0x246   : > { %13760 = vst [vmem:[#allocation51_spill] sm:$0xff] %v10343_v18  ;;  %2864 = vmatmul.bf16.gmra.mxu1 %v2556_v12  ;;  %v3411_v31 = vmax.f32 %v2826_v27, 0.0  ;;  %v8795_v27 = vld [vmem:[%s9935_s27 + $0x120] sm:$0xff] }
 0x247   : > { %v1769_v24 = vpop.f32.mrf.mxu0 }
 0x248   : > { %v1770_v15 = vadd.f32 %v10356_v25, %v1769_v24 }
 0x24a   : > { %8501 = vmatmul.msk.bf16.gmra.mxu0 %vm1236_vm1, %v8794_v5  ;;  %8566 = vmatmul.msk.bf16.gmra.mxu3 %vm1236_vm1, %v8859_v62  ;;  %v2328_v1 = vmax.f32 %v1770_v15, 0.0 }
 0x24b   : > { %v2827_v38 = vpop.f32.mrf.mxu1 }
 0x24c   : > { %v2828_v29 = vadd.f32 %v10091_v8, %v2827_v38 }
 0x24d   : > { %v10351_v33 = vpop.f32.mrf.mxu3 }
 0x24e   : > { %13761 = vst [vmem:[#allocation52_spill] sm:$0xff] %v10351_v33  ;;  %v3412_v44 = vmax.f32 %v2828_v29, 0.0  ;;  %v8860_v33 = vld [vmem:[%s9935_s27 + $0x328] sm:$0xff] }
 0x24f   : > { %v1771_v20 = vpop.f32.mrf.mxu0 }
 0x250   : > { %v1772_v5 = vadd.f32 %v10356_v25, %v1771_v20  ;;  %v10360_v57 = vpack.c.bf16 %v3412_v44, %v3411_v31 }
 0x252   : > { %13762 = vst [vmem:[#allocation53_spill] sm:$0xff] %v10360_v57  ;;  %v2329_v39 = vmax.f32 %v1772_v5, 0.0 }
 0x253   : > { %v2830_v12 = vpop.f32.mrf.mxu1 }
 0x254   : > { %v2557_v62 = vpack.c.bf16 %v2329_v39, %v2328_v1  ;;  %v2831_v19 = vadd.f32 %v10091_v8, %v2830_v12 }
 0x255   : > { %v10362_v38 = vpop.f32.mrf.mxu3 }
 0x256   : > { %13763 = vst [vmem:[#allocation54_spill] sm:$0xff] %v10362_v38  ;;  %2869 = vmatmul.bf16.gmra.mxu1 %v2557_v62  ;;  %v3413_v15 = vmax.f32 %v2831_v19, 0.0 }
 0x257   : > { %v1774_v18 = vpop.f32.mrf.mxu0 }
 0x258   : > { %v1775_v44 = vadd.f32 %v10356_v25, %v1774_v18 }
 0x25a   : > { %8502 = vmatmul.msk.bf16.gmra.mxu0 %vm1236_vm1, %v8795_v27  ;;  %8567 = vmatmul.msk.bf16.gmra.mxu3 %vm1236_vm1, %v8860_v33  ;;  %v2330_v12 = vmax.f32 %v1775_v44, 0.0 }
 0x25b   : > { %v2832_v24 = vpop.f32.mrf.mxu1 }
 0x25c   : > { %v2833_v29 = vadd.f32 %v10091_v8, %v2832_v24  ;;  %v8861_v24 = vld [vmem:[%s9935_s27 + $0x330] sm:$0xff] }
 0x25d   : > { %v10370_v31 = vpop.f32.mrf.mxu3 }
 0x25e   : > { %13764 = vst [vmem:[#allocation55_spill] sm:$0xff] %v10370_v31  ;;  %v3414_v20 = vmax.f32 %v2833_v29, 0.0  ;;  %v8797_v31 = vld [vmem:[%s9935_s27 + $0x130] sm:$0xff] }
 0x25f   : > { %v1776_v5 = vpop.f32.mrf.mxu0 }
 0x260   : > { %v1777_v1 = vadd.f32 %v10356_v25, %v1776_v5  ;;  %v10374_v39 = vpack.c.bf16 %v3414_v20, %v3413_v15 }
 0x262   : > { %13765 = vst [vmem:[#allocation56_spill] sm:$0xff] %v10374_v39  ;;  %v2331_v62 = vmax.f32 %v1777_v1, 0.0 }
 0x263   : > { %v2835_v27 = vpop.f32.mrf.mxu1 }
 0x264   : > { %v2558_v33 = vpack.c.bf16 %v2331_v62, %v2330_v12  ;;  %v2836_v19 = vadd.f32 %v10091_v8, %v2835_v27 }
 0x265   : > { %v10376_v38 = vpop.f32.mrf.mxu3 }
 0x266   : > { %13766 = vst [vmem:[#allocation57_spill] sm:$0xff] %v10376_v38  ;;  %2874 = vmatmul.bf16.gmra.mxu1 %v2558_v33  ;;  %v3415_v44 = vmax.f32 %v2836_v19, 0.0 }
 0x267   : > { %v1779_v54 = vpop.f32.mrf.mxu0 }
 0x268   : > { %v1780_v20 = vadd.f32 %v10356_v25, %v1779_v54 }
 0x26a   : > { %8503 = vmatmul.msk.bf16.gmra.mxu0 %vm1236_vm1, %v8796_v2  ;;  %8568 = vmatmul.msk.bf16.gmra.mxu3 %vm1236_vm1, %v8861_v24  ;;  %v2332_v27 = vmax.f32 %v1780_v20, 0.0 }
 0x26b   : > { %v2837_v18 = vpop.f32.mrf.mxu1 }
 0x26c   : > { %v2838_v29 = vadd.f32 %v10091_v8, %v2837_v18  ;;  %v8862_v18 = vld [vmem:[%s9935_s27 + $0x338] sm:$0xff] }
 0x26d   : > { %v10384_v15 = vpop.f32.mrf.mxu3 }
 0x26e   : > { %13767 = vst [vmem:[#allocation58_spill] sm:$0xff] %v10384_v15  ;;  %v3416_v5 = vmax.f32 %v2838_v29, 0.0  ;;  %v8798_v15 = vld [vmem:[%s9935_s27 + $0x138] sm:$0xff] }
 0x26f   : > { %v1781_v1 = vpop.f32.mrf.mxu0 }
 0x270   : > { %v1782_v12 = vadd.f32 %v10356_v25, %v1781_v1  ;;  %v10388_v62 = vpack.c.bf16 %v3416_v5, %v3415_v44 }
 0x272   : > { %13768 = vst [vmem:[#allocation59_spill] sm:$0xff] %v10388_v62  ;;  %v2333_v2 = vmax.f32 %v1782_v12, 0.0 }
 0x273   : > { %v2840_v33 = vpop.f32.mrf.mxu1 }
 0x274   : > { %v2559_v24 = vpack.c.bf16 %v2333_v2, %v2332_v27  ;;  %v2841_v19 = vadd.f32 %v10091_v8, %v2840_v33 }
 0x275   : > { %v10390_v38 = vpop.f32.mrf.mxu3 }
 0x276   : > { %13769 = vst [vmem:[#allocation60_spill] sm:$0xff] %v10390_v38  ;;  %2879 = vmatmul.bf16.gmra.mxu1 %v2559_v24  ;;  %v3417_v20 = vmax.f32 %v2841_v19, 0.0 }
 0x277   : > { %v1784_v35 = vpop.f32.mrf.mxu0 }
 0x278   : > { %v1785_v5 = vadd.f32 %v10356_v25, %v1784_v35 }
 0x27a   : > { %8504 = vmatmul.msk.bf16.gmra.mxu0 %vm1236_vm1, %v8797_v31  ;;  %8569 = vmatmul.msk.bf16.gmra.mxu3 %vm1236_vm1, %v8862_v18  ;;  %v2334_v33 = vmax.f32 %v1785_v5, 0.0 }
 0x27b   : > { %v2842_v54 = vpop.f32.mrf.mxu1 }
 0x27c   : > { %v2843_v29 = vadd.f32 %v10091_v8, %v2842_v54  ;;  %v8863_v54 = vld [vmem:[%s9935_s27 + $0x340] sm:$0xff] }
 0x27d   : > { %v10398_v44 = vpop.f32.mrf.mxu3 }
 0x27e   : > { %13770 = vst [vmem:[#allocation61_spill] sm:$0xff] %v10398_v44  ;;  %v3418_v1 = vmax.f32 %v2843_v29, 0.0  ;;  %v8799_v44 = vld [vmem:[%s9935_s27 + $0x140] sm:$0xff] }
 0x27f   : > { %v1786_v12 = vpop.f32.mrf.mxu0 }
 0x280   : > { %v1787_v27 = vadd.f32 %v10356_v25, %v1786_v12  ;;  %v10402_v2 = vpack.c.bf16 %v3418_v1, %v3417_v20 }
 0x282   : > { %13771 = vst [vmem:[#allocation62_spill] sm:$0xff] %v10402_v2  ;;  %v2335_v31 = vmax.f32 %v1787_v27, 0.0 }
 0x283   : > { %v2845_v24 = vpop.f32.mrf.mxu1 }
 0x284   : > { %v2560_v18 = vpack.c.bf16 %v2335_v31, %v2334_v33  ;;  %v2846_v19 = vadd.f32 %v10091_v8, %v2845_v24 }
 0x285   : > { %v10404_v38 = vpop.f32.mrf.mxu3 }
 0x286   : > { %13772 = vst [vmem:[#allocation63_spill] sm:$0xff] %v10404_v38  ;;  %2884 = vmatmul.bf16.gmra.mxu1 %v2560_v18  ;;  %v3419_v5 = vmax.f32 %v2846_v19, 0.0 }
 0x287   : > { %v1789_v62 = vpop.f32.mrf.mxu0 }
 0x288   : > { %v1790_v1 = vadd.f32 %v10356_v25, %v1789_v62 }
 0x28a   : > { %8505 = vmatmul.msk.bf16.gmra.mxu0 %vm1236_vm1, %v8798_v15  ;;  %8570 = vmatmul.msk.bf16.gmra.mxu3 %vm1236_vm1, %v8863_v54  ;;  %v2336_v24 = vmax.f32 %v1790_v1, 0.0 }
 0x28b   : > { %v2847_v35 = vpop.f32.mrf.mxu1 }
 0x28c   : > { %v2848_v29 = vadd.f32 %v10091_v8, %v2847_v35  ;;  %v8864_v35 = vld [vmem:[%s9935_s27 + $0x348] sm:$0xff] }
 0x28d   : > { %v10412_v20 = vpop.f32.mrf.mxu3 }
 0x28e   : > { %13773 = vst [vmem:[#allocation64_spill] sm:$0xff] %v10412_v20  ;;  %v3420_v12 = vmax.f32 %v2848_v29, 0.0  ;;  %v8800_v20 = vld [vmem:[%s9935_s27 + $0x148] sm:$0xff] }
 0x28f   : > { %v1791_v27 = vpop.f32.mrf.mxu0 }
 0x290   : > { %v1792_v33 = vadd.f32 %v10356_v25, %v1791_v27  ;;  %v10416_v31 = vpack.c.bf16 %v3420_v12, %v3419_v5 }
 0x292   : > { %13774 = vst [vmem:[#allocation65_spill] sm:$0xff] %v10416_v31  ;;  %v2337_v15 = vmax.f32 %v1792_v33, 0.0 }
 0x293   : > { %v2850_v18 = vpop.f32.mrf.mxu1 }
 0x294   : > { %v2561_v54 = vpack.c.bf16 %v2337_v15, %v2336_v24  ;;  %v2851_v19 = vadd.f32 %v10091_v8, %v2850_v18 }
 0x295   : > { %v10418_v38 = vpop.f32.mrf.mxu3 }
 0x296   : > { %13775 = vst [vmem:[#allocation66_spill] sm:$0xff] %v10418_v38  ;;  %2889 = vmatmul.bf16.gmra.mxu1 %v2561_v54  ;;  %v3421_v1 = vmax.f32 %v2851_v19, 0.0 }
 0x297   : > { %v1794_v2 = vpop.f32.mrf.mxu0 }
 0x298   : > { %v1795_v12 = vadd.f32 %v10356_v25, %v1794_v2 }
 0x29a   : > { %8506 = vmatmul.msk.bf16.gmra.mxu0 %vm1236_vm1, %v8799_v44  ;;  %8571 = vmatmul.msk.bf16.gmra.mxu3 %vm1236_vm1, %v8864_v35  ;;  %v2338_v18 = vmax.f32 %v1795_v12, 0.0 }
 0x29b   : > { %v2852_v62 = vpop.f32.mrf.mxu1 }
 0x29c   : > { %v2853_v29 = vadd.f32 %v10091_v8, %v2852_v62  ;;  %v8865_v62 = vld [vmem:[%s9935_s27 + $0x350] sm:$0xff] }
 0x29d   : > { %v10426_v5 = vpop.f32.mrf.mxu3 }
 0x29e   : > { %13776 = vst [vmem:[#allocation67_spill] sm:$0xff] %v10426_v5  ;;  %v3422_v27 = vmax.f32 %v2853_v29, 0.0  ;;  %v10442_v29 = vld [vmem:[%s13581_s4] ss:$0 sm:$0xff]  ;;  %v8801_v5 = vld [vmem:[%s9935_s27 + $0x150] sm:$0xff] }
 0x29f   : > { %v1796_v33 = vpop.f32.mrf.mxu0 }
 0x2a0   : > { %v1797_v24 = vadd.f32 %v10356_v25, %v1796_v33  ;;  %v10430_v15 = vpack.c.bf16 %v3422_v27, %v3421_v1 }
 0x2a2   : > { %13777 = vst [vmem:[#allocation68_spill] sm:$0xff] %v10430_v15  ;;  %v2339_v44 = vmax.f32 %v1797_v24, 0.0 }
 0x2a3   : > { %v2855_v54 = vpop.f32.mrf.mxu1 }
 0x2a4   : > { %v2562_v35 = vpack.c.bf16 %v2339_v44, %v2338_v18  ;;  %v2856_v19 = vadd.f32 %v10091_v8, %v2855_v54 }
 0x2a5   : > { %v10432_v38 = vpop.f32.mrf.mxu3 }
 0x2a6   : > { %13778 = vst [vmem:[#allocation69_spill] sm:$0xff] %v10432_v38  ;;  %2894 = vmatmul.bf16.gmra.mxu1 %v2562_v35  ;;  %v3423_v27 = vmax.f32 %v2856_v19, 0.0 }
 0x2a7   : > { %v1799_v31 = vpop.f32.mrf.mxu0 }
 0x2a8   : > { %v1800_v33 = vadd.f32 %v10356_v25, %v1799_v31 }
 0x2aa   : > { %8507 = vmatmul.msk.bf16.gmra.mxu0 %vm1236_vm1, %v8800_v20  ;;  %8572 = vmatmul.msk.bf16.gmra.mxu3 %vm1236_vm1, %v8865_v62  ;;  %v2340_v44 = vmax.f32 %v1800_v33, 0.0 }
 0x2ab   : > { %v2857_v2 = vpop.f32.mrf.mxu1 }
 0x2ac   : > { %v2858_v1 = vadd.f32 %v10442_v29, %v2857_v2  ;;  %v8866_v2 = vld [vmem:[%s9935_s27 + $0x358] sm:$0xff] }
 0x2ad   : > { %v10445_v12 = vpop.f32.mrf.mxu3 }
 0x2ae   : > { %13779 = vst [vmem:[#allocation70_spill] sm:$0xff] %v10445_v12  ;;  %v3424_v8 = vmax.f32 %v2858_v1, 0.0  ;;  %v8802_v12 = vld [vmem:[%s9935_s27 + $0x158] sm:$0xff] }
 0x2af   : > { %v1801_v24 = vpop.f32.mrf.mxu0 }
 0x2b0   : > { %v1802_v20 = vadd.f32 %v10356_v25, %v1801_v24  ;;  %v10449_v18 = vpack.c.bf16 %v3424_v8, %v3423_v27 }
 0x2b2   : > { %13780 = vst [vmem:[#allocation71_spill] sm:$0xff] %v10449_v18  ;;  %v2341_v54 = vmax.f32 %v1802_v20, 0.0 }
 0x2b3   : > { %v2860_v35 = vpop.f32.mrf.mxu1 }
 0x2b4   : > { %v2563_v62 = vpack.c.bf16 %v2341_v54, %v2340_v44  ;;  %v2861_v19 = vadd.f32 %v10442_v29, %v2860_v35 }
 0x2b5   : > { %v10451_v38 = vpop.f32.mrf.mxu3 }
 0x2b6   : > { %13781 = vst [vmem:[#allocation72_spill] sm:$0xff] %v10451_v38  ;;  %2899 = vmatmul.bf16.gmra.mxu1 %v2563_v62  ;;  %v3425_v33 = vmax.f32 %v2861_v19, 0.0 }
 0x2b7   : > { %v1804_v15 = vpop.f32.mrf.mxu0 }
 0x2b8   : > { %v1805_v8 = vadd.f32 %v10356_v25, %v1804_v15 }
 0x2ba   : > { %8508 = vmatmul.msk.bf16.gmra.mxu0 %vm1236_vm1, %v8801_v5  ;;  %8573 = vmatmul.msk.bf16.gmra.mxu3 %vm1236_vm1, %v8866_v2  ;;  %v2342_v35 = vmax.f32 %v1805_v8, 0.0 }
 0x2bb   : > { %v2862_v31 = vpop.f32.mrf.mxu1 }
 0x2bc   : > { %v2863_v1 = vadd.f32 %v10442_v29, %v2862_v31  ;;  %v8867_v31 = vld [vmem:[%s9935_s27 + $0x360] sm:$0xff] }
 0x2bd   : > { %v10459_v27 = vpop.f32.mrf.mxu3 }
 0x2be   : > { %13782 = vst [vmem:[#allocation73_spill] sm:$0xff] %v10459_v27  ;;  %v3426_v24 = vmax.f32 %v2863_v1, 0.0  ;;  %v8803_v27 = vld [vmem:[%s9935_s27 + $0x160] sm:$0xff] }
 0x2bf   : > { %v1806_v20 = vpop.f32.mrf.mxu0 }
 0x2c0   : > { %v1807_v44 = vadd.f32 %v10356_v25, %v1806_v20  ;;  %v10463_v54 = vpack.c.bf16 %v3426_v24, %v3425_v33 }
 0x2c2   : > { %13783 = vst [vmem:[#allocation74_spill] sm:$0xff] %v10463_v54  ;;  %v2343_v5 = vmax.f32 %v1807_v44, 0.0 }
 0x2c3   : > { %v2865_v62 = vpop.f32.mrf.mxu1 }
 0x2c4   : > { %v2564_v2 = vpack.c.bf16 %v2343_v5, %v2342_v35  ;;  %v2866_v19 = vadd.f32 %v10442_v29, %v2865_v62 }
 0x2c5   : > { %v10465_v38 = vpop.f32.mrf.mxu3 }
 0x2c6   : > { %13784 = vst [vmem:[#allocation75_spill] sm:$0xff] %v10465_v38  ;;  %2904 = vmatmul.bf16.gmra.mxu1 %v2564_v2  ;;  %v3427_v8 = vmax.f32 %v2866_v19, 0.0 }
 0x2c7   : > { %v1809_v18 = vpop.f32.mrf.mxu0 }
 0x2c8   : > { %v1810_v24 = vadd.f32 %v10356_v25, %v1809_v18 }
 0x2ca   : > { %8509 = vmatmul.msk.bf16.gmra.mxu0 %vm1236_vm1, %v8802_v12  ;;  %8574 = vmatmul.msk.bf16.gmra.mxu3 %vm1236_vm1, %v8867_v31  ;;  %v2344_v62 = vmax.f32 %v1810_v24, 0.0 }
 0x2cb   : > { %v2867_v15 = vpop.f32.mrf.mxu1 }
 0x2cc   : > { %v2868_v1 = vadd.f32 %v10442_v29, %v2867_v15  ;;  %v8868_v15 = vld [vmem:[%s9935_s27 + $0x368] sm:$0xff] }
 0x2cd   : > { %v10473_v33 = vpop.f32.mrf.mxu3 }
 0x2ce   : > { %13785 = vst [vmem:[#allocation76_spill] sm:$0xff] %v10473_v33  ;;  %v3428_v20 = vmax.f32 %v2868_v1, 0.0  ;;  %v8804_v33 = vld [vmem:[%s9935_s27 + $0x168] sm:$0xff] }
 0x2cf   : > { %v1811_v44 = vpop.f32.mrf.mxu0 }
 0x2d0   : > { %v1812_v35 = vadd.f32 %v10356_v25, %v1811_v44  ;;  %v10477_v5 = vpack.c.bf16 %v3428_v20, %v3427_v8 }
 0x2d2   : > { %13786 = vst [vmem:[#allocation77_spill] sm:$0xff] %v10477_v5  ;;  %v2345_v12 = vmax.f32 %v1812_v35, 0.0 }
 0x2d3   : > { %v2870_v2 = vpop.f32.mrf.mxu1 }
 0x2d4   : > { %v2565_v31 = vpack.c.bf16 %v2345_v12, %v2344_v62  ;;  %v2871_v19 = vadd.f32 %v10442_v29, %v2870_v2 }
 0x2d5   : > { %v10479_v38 = vpop.f32.mrf.mxu3 }
 0x2d6   : > { %13787 = vst [vmem:[#allocation78_spill] sm:$0xff] %v10479_v38  ;;  %2909 = vmatmul.bf16.gmra.mxu1 %v2565_v31  ;;  %v3429_v24 = vmax.f32 %v2871_v19, 0.0 }
 0x2d7   : > { %v1814_v54 = vpop.f32.mrf.mxu0 }
 0x2d8   : > { %v1815_v20 = vadd.f32 %v10356_v25, %v1814_v54 }
 0x2da   : > { %8510 = vmatmul.msk.bf16.gmra.mxu0 %vm1236_vm1, %v8803_v27  ;;  %8575 = vmatmul.msk.bf16.gmra.mxu3 %vm1236_vm1, %v8868_v15  ;;  %v2346_v2 = vmax.f32 %v1815_v20, 0.0 }
 0x2db   : > { %v2872_v18 = vpop.f32.mrf.mxu1 }
 0x2dc   : > { %v2873_v1 = vadd.f32 %v10442_v29, %v2872_v18  ;;  %v8869_v18 = vld [vmem:[%s9935_s27 + $0x370] sm:$0xff] }
 0x2dd   : > { %v10487_v8 = vpop.f32.mrf.mxu3 }
 0x2de   : > { %13788 = vst [vmem:[#allocation79_spill] sm:$0xff] %v10487_v8  ;;  %v3430_v44 = vmax.f32 %v2873_v1, 0.0  ;;  %v8805_v8 = vld [vmem:[%s9935_s27 + $0x170] sm:$0xff] }
 0x2df   : > { %v1816_v35 = vpop.f32.mrf.mxu0 }
 0x2e0   : > { %v1817_v62 = vadd.f32 %v10356_v25, %v1816_v35  ;;  %v10491_v12 = vpack.c.bf16 %v3430_v44, %v3429_v24 }
 0x2e2   : > { %13789 = vst [vmem:[#allocation80_spill] sm:$0xff] %v10491_v12  ;;  %v2347_v27 = vmax.f32 %v1817_v62, 0.0 }
 0x2e3   : > { %v2875_v31 = vpop.f32.mrf.mxu1 }
 0x2e4   : > { %v2566_v15 = vpack.c.bf16 %v2347_v27, %v2346_v2  ;;  %v2876_v19 = vadd.f32 %v10442_v29, %v2875_v31 }
 0x2e5   : > { %v10493_v38 = vpop.f32.mrf.mxu3 }
 0x2e6   : > { %13790 = vst [vmem:[#allocation81_spill] sm:$0xff] %v10493_v38  ;;  %2914 = vmatmul.bf16.gmra.mxu1 %v2566_v15  ;;  %v3431_v20 = vmax.f32 %v2876_v19, 0.0 }
 0x2e7   : > { %v1819_v5 = vpop.f32.mrf.mxu0 }
 0x2e8   : > { %v1820_v44 = vadd.f32 %v10356_v25, %v1819_v5 }
 0x2ea   : > { %8511 = vmatmul.msk.bf16.gmra.mxu0 %vm1236_vm1, %v8804_v33  ;;  %8576 = vmatmul.msk.bf16.gmra.mxu3 %vm1236_vm1, %v8869_v18  ;;  %v2348_v31 = vmax.f32 %v1820_v44, 0.0 }
 0x2eb   : > { %v2877_v54 = vpop.f32.mrf.mxu1 }
 0x2ec   : > { %v2878_v1 = vadd.f32 %v10442_v29, %v2877_v54  ;;  %v8870_v54 = vld [vmem:[%s9935_s27 + $0x378] sm:$0xff] }
 0x2ed   : > { %v10501_v24 = vpop.f32.mrf.mxu3 }
 0x2ee   : > { %13791 = vst [vmem:[#allocation82_spill] sm:$0xff] %v10501_v24  ;;  %v3432_v35 = vmax.f32 %v2878_v1, 0.0  ;;  %v8806_v24 = vld [vmem:[%s9935_s27 + $0x178] sm:$0xff] }
 0x2ef   : > { %v1821_v62 = vpop.f32.mrf.mxu0 }
 0x2f0   : > { %v1822_v2 = vadd.f32 %v10356_v25, %v1821_v62  ;;  %v10505_v27 = vpack.c.bf16 %v3432_v35, %v3431_v20 }
 0x2f2   : > { %13792 = vst [vmem:[#allocation83_spill] sm:$0xff] %v10505_v27  ;;  %v2349_v33 = vmax.f32 %v1822_v2, 0.0 }
 0x2f3   : > { %v2880_v15 = vpop.f32.mrf.mxu1 }
 0x2f4   : > { %v2567_v18 = vpack.c.bf16 %v2349_v33, %v2348_v31  ;;  %v2881_v19 = vadd.f32 %v10442_v29, %v2880_v15 }
 0x2f5   : > { %v10507_v38 = vpop.f32.mrf.mxu3 }
 0x2f6   : > { %13793 = vst [vmem:[#allocation84_spill] sm:$0xff] %v10507_v38  ;;  %2919 = vmatmul.bf16.gmra.mxu1 %v2567_v18  ;;  %v3433_v44 = vmax.f32 %v2881_v19, 0.0 }
 0x2f7   : > { %v1824_v12 = vpop.f32.mrf.mxu0 }
 0x2f8   : > { %v1825_v35 = vadd.f32 %v10356_v25, %v1824_v12 }
 0x2fa   : > { %8512 = vmatmul.msk.bf16.gmra.mxu0 %vm1236_vm1, %v8805_v8  ;;  %8577 = vmatmul.msk.bf16.gmra.mxu3 %vm1236_vm1, %v8870_v54  ;;  %v2350_v15 = vmax.f32 %v1825_v35, 0.0 }
 0x2fb   : > { %v2882_v5 = vpop.f32.mrf.mxu1 }
 0x2fc   : > { %v2883_v1 = vadd.f32 %v10442_v29, %v2882_v5  ;;  %v8871_v5 = vld [vmem:[%s9935_s27 + $0x380] sm:$0xff] }
 0x2fd   : > { %v10515_v20 = vpop.f32.mrf.mxu3 }
 0x2fe   : > { %13794 = vst [vmem:[#allocation85_spill] sm:$0xff] %v10515_v20  ;;  %v3434_v62 = vmax.f32 %v2883_v1, 0.0  ;;  %v8807_v20 = vld [vmem:[%s9935_s27 + $0x180] sm:$0xff] }
 0x2ff   : > { %v1826_v2 = vpop.f32.mrf.mxu0 }
 0x300   : > { %v1827_v31 = vadd.f32 %v10356_v25, %v1826_v2  ;;  %v10519_v33 = vpack.c.bf16 %v3434_v62, %v3433_v44 }
 0x302   : > { %13795 = vst [vmem:[#allocation86_spill] sm:$0xff] %v10519_v33  ;;  %v2351_v8 = vmax.f32 %v1827_v31, 0.0 }
 0x303   : > { %v2885_v18 = vpop.f32.mrf.mxu1 }
 0x304   : > { %v2568_v54 = vpack.c.bf16 %v2351_v8, %v2350_v15  ;;  %v2886_v19 = vadd.f32 %v10442_v29, %v2885_v18 }
 0x305   : > { %v10521_v38 = vpop.f32.mrf.mxu3 }
 0x306   : > { %13796 = vst [vmem:[#allocation87_spill] sm:$0xff] %v10521_v38  ;;  %2924 = vmatmul.bf16.gmra.mxu1 %v2568_v54  ;;  %v3435_v35 = vmax.f32 %v2886_v19, 0.0 }
 0x307   : > { %v1829_v27 = vpop.f32.mrf.mxu0 }
 0x308   : > { %v1830_v62 = vadd.f32 %v10356_v25, %v1829_v27 }
 0x30a   : > { %8513 = vmatmul.msk.bf16.gmra.mxu0 %vm1236_vm1, %v8806_v24  ;;  %8578 = vmatmul.msk.bf16.gmra.mxu3 %vm1236_vm1, %v8871_v5  ;;  %v2352_v18 = vmax.f32 %v1830_v62, 0.0 }
 0x30b   : > { %v2887_v12 = vpop.f32.mrf.mxu1 }
 0x30c   : > { %v2888_v1 = vadd.f32 %v10442_v29, %v2887_v12  ;;  %v8872_v12 = vld [vmem:[%s9935_s27 + $0x388] sm:$0xff] }
 0x30d   : > { %v10529_v44 = vpop.f32.mrf.mxu3 }
 0x30e   : > { %13797 = vst [vmem:[#allocation88_spill] sm:$0xff] %v10529_v44  ;;  %v3436_v2 = vmax.f32 %v2888_v1, 0.0  ;;  %v8808_v44 = vld [vmem:[%s9935_s27 + $0x188] sm:$0xff] }
 0x30f   : > { %v1831_v31 = vpop.f32.mrf.mxu0 }
 0x310   : > { %v1832_v15 = vadd.f32 %v10356_v25, %v1831_v31  ;;  %v10533_v8 = vpack.c.bf16 %v3436_v2, %v3435_v35 }
 0x312   : > { %13798 = vst [vmem:[#allocation89_spill] sm:$0xff] %v10533_v8  ;;  %v2353_v24 = vmax.f32 %v1832_v15, 0.0 }
 0x313   : > { %v2890_v54 = vpop.f32.mrf.mxu1 }
 0x314   : > { %v2569_v5 = vpack.c.bf16 %v2353_v24, %v2352_v18  ;;  %v2891_v19 = vadd.f32 %v10442_v29, %v2890_v54 }
 0x315   : > { %v10535_v38 = vpop.f32.mrf.mxu3 }
 0x316   : > { %13799 = vst [vmem:[#allocation90_spill] sm:$0xff] %v10535_v38  ;;  %2929 = vmatmul.bf16.gmra.mxu1 %v2569_v5  ;;  %v3437_v62 = vmax.f32 %v2891_v19, 0.0 }
 0x317   : > { %v1834_v33 = vpop.f32.mrf.mxu0 }
 0x318   : > { %v1835_v2 = vadd.f32 %v10356_v25, %v1834_v33 }
 0x31a   : > { %8514 = vmatmul.msk.bf16.gmra.mxu0 %vm1236_vm1, %v8807_v20  ;;  %8579 = vmatmul.msk.bf16.gmra.mxu3 %vm1236_vm1, %v8872_v12  ;;  %v2354_v54 = vmax.f32 %v1835_v2, 0.0 }
 0x31b   : > { %v2892_v27 = vpop.f32.mrf.mxu1 }
 0x31c   : > { %v2893_v1 = vadd.f32 %v10442_v29, %v2892_v27  ;;  %v8873_v27 = vld [vmem:[%s9935_s27 + $0x390] sm:$0xff] }
 0x31d   : > { %v10543_v35 = vpop.f32.mrf.mxu3 }
 0x31e   : > { %13800 = vst [vmem:[#allocation91_spill] sm:$0xff] %v10543_v35  ;;  %v3438_v31 = vmax.f32 %v2893_v1, 0.0  ;;  %v8809_v35 = vld [vmem:[%s9935_s27 + $0x190] sm:$0xff] }
 0x31f   : > { %v1836_v15 = vpop.f32.mrf.mxu0 }
 0x320   : > { %v1837_v18 = vadd.f32 %v10356_v25, %v1836_v15  ;;  %v10547_v24 = vpack.c.bf16 %v3438_v31, %v3437_v62 }
 0x322   : > { %13801 = vst [vmem:[#allocation92_spill] sm:$0xff] %v10547_v24  ;;  %v2355_v20 = vmax.f32 %v1837_v18, 0.0 }
 0x323   : > { %v2895_v5 = vpop.f32.mrf.mxu1 }
 0x324   : > { %v2570_v12 = vpack.c.bf16 %v2355_v20, %v2354_v54  ;;  %v2896_v19 = vadd.f32 %v10442_v29, %v2895_v5 }
 0x325   : > { %v10549_v38 = vpop.f32.mrf.mxu3 }
 0x326   : > { %13802 = vst [vmem:[#allocation93_spill] sm:$0xff] %v10549_v38  ;;  %2934 = vmatmul.bf16.gmra.mxu1 %v2570_v12  ;;  %v3439_v2 = vmax.f32 %v2896_v19, 0.0 }
 0x327   : > { %v1839_v8 = vpop.f32.mrf.mxu0 }
 0x328   : > { %v1840_v31 = vadd.f32 %v10356_v25, %v1839_v8 }
 0x32a   : > { %8515 = vmatmul.msk.bf16.gmra.mxu0 %vm1236_vm1, %v8808_v44  ;;  %8580 = vmatmul.msk.bf16.gmra.mxu3 %vm1236_vm1, %v8873_v27  ;;  %v2356_v5 = vmax.f32 %v1840_v31, 0.0 }
 0x32b   : > { %v2897_v33 = vpop.f32.mrf.mxu1 }
 0x32c   : > { %v2898_v1 = vadd.f32 %v10442_v29, %v2897_v33  ;;  %v8874_v33 = vld [vmem:[%s9935_s27 + $0x398] sm:$0xff] }
 0x32d   : > { %v10557_v62 = vpop.f32.mrf.mxu3 }
 0x32e   : > { %13803 = vst [vmem:[#allocation94_spill] sm:$0xff] %v10557_v62  ;;  %v3440_v15 = vmax.f32 %v2898_v1, 0.0  ;;  %v8810_v62 = vld [vmem:[%s9935_s27 + $0x198] sm:$0xff] }
 0x32f   : > { %v1841_v18 = vpop.f32.mrf.mxu0 }
 0x330   : > { %v1842_v54 = vadd.f32 %v10356_v25, %v1841_v18  ;;  %v10561_v20 = vpack.c.bf16 %v3440_v15, %v3439_v2 }
 0x332   : > { %13804 = vst [vmem:[#allocation95_spill] sm:$0xff] %v10561_v20  ;;  %v2357_v44 = vmax.f32 %v1842_v54, 0.0 }
 0x333   : > { %v2900_v12 = vpop.f32.mrf.mxu1 }
 0x334   : > { %v2571_v27 = vpack.c.bf16 %v2357_v44, %v2356_v5  ;;  %v2901_v19 = vadd.f32 %v10442_v29, %v2900_v12 }
 0x335   : > { %v10563_v38 = vpop.f32.mrf.mxu3 }
 0x336   : > { %13805 = vst [vmem:[#allocation96_spill] sm:$0xff] %v10563_v38  ;;  %2939 = vmatmul.bf16.gmra.mxu1 %v2571_v27  ;;  %v3441_v31 = vmax.f32 %v2901_v19, 0.0 }
 0x337   : > { %v1844_v24 = vpop.f32.mrf.mxu0 }
 0x338   : > { %v1845_v15 = vadd.f32 %v10356_v25, %v1844_v24 }
 0x33a   : > { %8516 = vmatmul.msk.bf16.gmra.mxu0 %vm1236_vm1, %v8809_v35  ;;  %8581 = vmatmul.msk.bf16.gmra.mxu3 %vm1236_vm1, %v8874_v33  ;;  %v2358_v12 = vmax.f32 %v1845_v15, 0.0 }
 0x33b   : > { %v2902_v8 = vpop.f32.mrf.mxu1 }
 0x33c   : > { %v2903_v1 = vadd.f32 %v10442_v29, %v2902_v8  ;;  %v8875_v8 = vld [vmem:[%s9935_s27 + $0x3a0] sm:$0xff] }
 0x33d   : > { %v10571_v2 = vpop.f32.mrf.mxu3 }
 0x33e   : > { %13806 = vst [vmem:[#allocation97_spill] sm:$0xff] %v10571_v2  ;;  %v3442_v18 = vmax.f32 %v2903_v1, 0.0  ;;  %v8811_v2 = vld [vmem:[%s9935_s27 + $0x1a0] sm:$0xff] }
 0x33f   : > { %v1846_v54 = vpop.f32.mrf.mxu0 }
 0x340   : > { %v1847_v5 = vadd.f32 %v10356_v25, %v1846_v54  ;;  %v10575_v44 = vpack.c.bf16 %v3442_v18, %v3441_v31 }
 0x342   : > { %13807 = vst [vmem:[#allocation98_spill] sm:$0xff] %v10575_v44  ;;  %v2359_v35 = vmax.f32 %v1847_v5, 0.0 }
 0x343   : > { %v2905_v27 = vpop.f32.mrf.mxu1 }
 0x344   : > { %v2572_v33 = vpack.c.bf16 %v2359_v35, %v2358_v12  ;;  %v2906_v19 = vadd.f32 %v10442_v29, %v2905_v27 }
 0x345   : > { %v10577_v38 = vpop.f32.mrf.mxu3 }
 0x346   : > { %13808 = vst [vmem:[#allocation99_spill] sm:$0xff] %v10577_v38  ;;  %2944 = vmatmul.bf16.gmra.mxu1 %v2572_v33  ;;  %v3443_v15 = vmax.f32 %v2906_v19, 0.0 }
 0x347   : > { %v1849_v20 = vpop.f32.mrf.mxu0 }
 0x348   : > { %v1850_v18 = vadd.f32 %v10356_v25, %v1849_v20 }
 0x34a   : > { %8517 = vmatmul.msk.bf16.gmra.mxu0 %vm1236_vm1, %v8810_v62  ;;  %8582 = vmatmul.msk.bf16.gmra.mxu3 %vm1236_vm1, %v8875_v8  ;;  %v2360_v27 = vmax.f32 %v1850_v18, 0.0 }
 0x34b   : > { %v2907_v24 = vpop.f32.mrf.mxu1 }
 0x34c   : > { %v2908_v1 = vadd.f32 %v10442_v29, %v2907_v24  ;;  %v8876_v24 = vld [vmem:[%s9935_s27 + $0x3a8] sm:$0xff] }
 0x34d   : > { %v10585_v31 = vpop.f32.mrf.mxu3 }
 0x34e   : > { %13809 = vst [vmem:[#allocation100_spill] sm:$0xff] %v10585_v31  ;;  %v3444_v54 = vmax.f32 %v2908_v1, 0.0  ;;  %v8812_v31 = vld [vmem:[%s9935_s27 + $0x1a8] sm:$0xff] }
 0x34f   : > { %v1851_v5 = vpop.f32.mrf.mxu0 }
 0x350   : > { %v1852_v12 = vadd.f32 %v10356_v25, %v1851_v5  ;;  %v10589_v35 = vpack.c.bf16 %v3444_v54, %v3443_v15 }
 0x352   : > { %13810 = vst [vmem:[#allocation101_spill] sm:$0xff] %v10589_v35  ;;  %v2361_v62 = vmax.f32 %v1852_v12, 0.0 }
 0x353   : > { %v2910_v33 = vpop.f32.mrf.mxu1 }
 0x354   : > { %v2573_v8 = vpack.c.bf16 %v2361_v62, %v2360_v27  ;;  %v2911_v19 = vadd.f32 %v10442_v29, %v2910_v33 }
 0x355   : > { %v10591_v38 = vpop.f32.mrf.mxu3 }
 0x356   : > { %13811 = vst [vmem:[#allocation102_spill] sm:$0xff] %v10591_v38  ;;  %2949 = vmatmul.bf16.gmra.mxu1 %v2573_v8  ;;  %v3445_v18 = vmax.f32 %v2911_v19, 0.0 }
 0x357   : > { %v1854_v44 = vpop.f32.mrf.mxu0 }
 0x358   : > { %v1855_v54 = vadd.f32 %v10356_v25, %v1854_v44 }
 0x35a   : > { %8518 = vmatmul.msk.bf16.gmra.mxu0 %vm1236_vm1, %v8811_v2  ;;  %8583 = vmatmul.msk.bf16.gmra.mxu3 %vm1236_vm1, %v8876_v24  ;;  %v2362_v33 = vmax.f32 %v1855_v54, 0.0 }
 0x35b   : > { %v2912_v20 = vpop.f32.mrf.mxu1 }
 0x35c   : > { %v2913_v1 = vadd.f32 %v10442_v29, %v2912_v20  ;;  %v8877_v20 = vld [vmem:[%s9935_s27 + $0x3b0] sm:$0xff] }
 0x35d   : > { %v10599_v15 = vpop.f32.mrf.mxu3 }
 0x35e   : > { %13812 = vst [vmem:[#allocation103_spill] sm:$0xff] %v10599_v15  ;;  %v3446_v5 = vmax.f32 %v2913_v1, 0.0  ;;  %v8813_v15 = vld [vmem:[%s9935_s27 + $0x1b0] sm:$0xff] }
 0x35f   : > { %v1856_v12 = vpop.f32.mrf.mxu0 }
 0x360   : > { %v1857_v27 = vadd.f32 %v10356_v25, %v1856_v12  ;;  %v10603_v62 = vpack.c.bf16 %v3446_v5, %v3445_v18 }
 0x362   : > { %13813 = vst [vmem:[#allocation104_spill] sm:$0xff] %v10603_v62  ;;  %v2363_v2 = vmax.f32 %v1857_v27, 0.0 }
 0x363   : > { %v2915_v8 = vpop.f32.mrf.mxu1 }
 0x364   : > { %v2574_v24 = vpack.c.bf16 %v2363_v2, %v2362_v33  ;;  %v2916_v19 = vadd.f32 %v10442_v29, %v2915_v8 }
 0x365   : > { %v10605_v38 = vpop.f32.mrf.mxu3 }
 0x366   : > { %13814 = vst [vmem:[#allocation105_spill] sm:$0xff] %v10605_v38  ;;  %2954 = vmatmul.bf16.gmra.mxu1 %v2574_v24  ;;  %v3447_v54 = vmax.f32 %v2916_v19, 0.0 }
 0x367   : > { %v1859_v35 = vpop.f32.mrf.mxu0 }
 0x368   : > { %v1860_v5 = vadd.f32 %v10356_v25, %v1859_v35 }
 0x36a   : > { %8519 = vmatmul.msk.bf16.gmra.mxu0 %vm1236_vm1, %v8812_v31  ;;  %8584 = vmatmul.msk.bf16.gmra.mxu3 %vm1236_vm1, %v8877_v20  ;;  %v2364_v8 = vmax.f32 %v1860_v5, 0.0 }
 0x36b   : > { %v2917_v44 = vpop.f32.mrf.mxu1 }
 0x36c   : > { %v2918_v1 = vadd.f32 %v10442_v29, %v2917_v44  ;;  %v8878_v44 = vld [vmem:[%s9935_s27 + $0x3b8] sm:$0xff] }
 0x36d   : > { %v10613_v18 = vpop.f32.mrf.mxu3 }
 0x36e   : > { %13815 = vst [vmem:[#allocation106_spill] sm:$0xff] %v10613_v18  ;;  %v3448_v12 = vmax.f32 %v2918_v1, 0.0  ;;  %v8814_v18 = vld [vmem:[%s9935_s27 + $0x1b8] sm:$0xff] }
 0x36f   : > { %v1861_v27 = vpop.f32.mrf.mxu0 }
 0x370   : > { %v1862_v33 = vadd.f32 %v10356_v25, %v1861_v27  ;;  %v10617_v2 = vpack.c.bf16 %v3448_v12, %v3447_v54 }
 0x372   : > { %13816 = vst [vmem:[#allocation107_spill] sm:$0xff] %v10617_v2  ;;  %v2365_v31 = vmax.f32 %v1862_v33, 0.0 }
 0x373   : > { %v2920_v24 = vpop.f32.mrf.mxu1 }
 0x374   : > { %v2575_v20 = vpack.c.bf16 %v2365_v31, %v2364_v8  ;;  %v2921_v19 = vadd.f32 %v10442_v29, %v2920_v24 }
 0x375   : > { %v10619_v38 = vpop.f32.mrf.mxu3 }
 0x376   : > { %13817 = vst [vmem:[#allocation108_spill] sm:$0xff] %v10619_v38  ;;  %2959 = vmatmul.bf16.gmra.mxu1 %v2575_v20  ;;  %v3449_v5 = vmax.f32 %v2921_v19, 0.0 }
 0x377   : > { %v1864_v62 = vpop.f32.mrf.mxu0 }
 0x378   : > { %v1865_v12 = vadd.f32 %v10356_v25, %v1864_v62 }
 0x37a   : > { %8520 = vmatmul.msk.bf16.gmra.mxu0 %vm1236_vm1, %v8813_v15  ;;  %8585 = vmatmul.msk.bf16.gmra.mxu3 %vm1236_vm1, %v8878_v44  ;;  %v2366_v24 = vmax.f32 %v1865_v12, 0.0 }
 0x37b   : > { %v2922_v35 = vpop.f32.mrf.mxu1 }
 0x37c   : > { %v2923_v1 = vadd.f32 %v10442_v29, %v2922_v35  ;;  %v8879_v35 = vld [vmem:[%s9935_s27 + $0x3c0] sm:$0xff] }
 0x37d   : > { %v10627_v54 = vpop.f32.mrf.mxu3 }
 0x37e   : > { %13818 = vst [vmem:[#allocation109_spill] sm:$0xff] %v10627_v54  ;;  %v3450_v27 = vmax.f32 %v2923_v1, 0.0  ;;  %v8815_v54 = vld [vmem:[%s9935_s27 + $0x1c0] sm:$0xff] }
 0x37f   : > { %v1866_v33 = vpop.f32.mrf.mxu0 }
 0x380   : > { %v1867_v8 = vadd.f32 %v10356_v25, %v1866_v33  ;;  %v10631_v31 = vpack.c.bf16 %v3450_v27, %v3449_v5 }
 0x382   : > { %13819 = vst [vmem:[#allocation110_spill] sm:$0xff] %v10631_v31  ;;  %v2367_v15 = vmax.f32 %v1867_v8, 0.0 }
 0x383   : > { %v2925_v20 = vpop.f32.mrf.mxu1 }
 0x384   : > { %v2576_v44 = vpack.c.bf16 %v2367_v15, %v2366_v24  ;;  %v2926_v19 = vadd.f32 %v10442_v29, %v2925_v20 }
 0x385   : > { %v10633_v38 = vpop.f32.mrf.mxu3 }
 0x386   : > { %13820 = vst [vmem:[#allocation111_spill] sm:$0xff] %v10633_v38  ;;  %2964 = vmatmul.bf16.gmra.mxu1 %v2576_v44  ;;  %v3451_v12 = vmax.f32 %v2926_v19, 0.0 }
 0x387   : > { %v1869_v2 = vpop.f32.mrf.mxu0 }
 0x388   : > { %v1870_v27 = vadd.f32 %v10356_v25, %v1869_v2 }
 0x38a   : > { %8521 = vmatmul.msk.bf16.gmra.mxu0 %vm1236_vm1, %v8814_v18  ;;  %8586 = vmatmul.msk.bf16.gmra.mxu3 %vm1236_vm1, %v8879_v35  ;;  %v2368_v20 = vmax.f32 %v1870_v27, 0.0 }
 0x38b   : > { %v2927_v62 = vpop.f32.mrf.mxu1 }
 0x38c   : > { %v2928_v1 = vadd.f32 %v10442_v29, %v2927_v62  ;;  %v8880_v62 = vld [vmem:[%s9935_s27 + $0x3c8] sm:$0xff] }
 0x38d   : > { %v10641_v5 = vpop.f32.mrf.mxu3 }
 0x38e   : > { %13821 = vst [vmem:[#allocation112_spill] sm:$0xff] %v10641_v5  ;;  %v3452_v33 = vmax.f32 %v2928_v1, 0.0  ;;  %v8816_v5 = vld [vmem:[%s9935_s27 + $0x1c8] sm:$0xff] }
 0x38f   : > { %v1871_v8 = vpop.f32.mrf.mxu0 }
 0x390   : > { %v1872_v24 = vadd.f32 %v10356_v25, %v1871_v8  ;;  %v10645_v15 = vpack.c.bf16 %v3452_v33, %v3451_v12 }
 0x392   : > { %13822 = vst [vmem:[#allocation113_spill] sm:$0xff] %v10645_v15  ;;  %v2369_v18 = vmax.f32 %v1872_v24, 0.0 }
 0x393   : > { %v2930_v44 = vpop.f32.mrf.mxu1 }
 0x394   : > { %v2577_v35 = vpack.c.bf16 %v2369_v18, %v2368_v20  ;;  %v2931_v19 = vadd.f32 %v10442_v29, %v2930_v44 }
 0x395   : > { %v10647_v38 = vpop.f32.mrf.mxu3 }
 0x396   : > { %13823 = vst [vmem:[#allocation114_spill] sm:$0xff] %v10647_v38  ;;  %2969 = vmatmul.bf16.gmra.mxu1 %v2577_v35  ;;  %v3453_v27 = vmax.f32 %v2931_v19, 0.0 }
 0x397   : > { %v1874_v31 = vpop.f32.mrf.mxu0 }
 0x398   : > { %v1875_v33 = vadd.f32 %v10356_v25, %v1874_v31 }
 0x39a   : > { %8522 = vmatmul.msk.bf16.gmra.mxu0 %vm1236_vm1, %v8815_v54  ;;  %8587 = vmatmul.msk.bf16.gmra.mxu3 %vm1236_vm1, %v8880_v62  ;;  %v2370_v44 = vmax.f32 %v1875_v33, 0.0 }
 0x39b   : > { %v2932_v2 = vpop.f32.mrf.mxu1 }
 0x39c   : > { %v2933_v1 = vadd.f32 %v10442_v29, %v2932_v2  ;;  %v8881_v2 = vld [vmem:[%s9935_s27 + $0x3d0] sm:$0xff] }
 0x39d   : > { %v10655_v12 = vpop.f32.mrf.mxu3 }
 0x39e   : > { %13824 = vst [vmem:[#allocation115_spill] sm:$0xff] %v10655_v12  ;;  %v3454_v8 = vmax.f32 %v2933_v1, 0.0  ;;  %v8817_v12 = vld [vmem:[%s9935_s27 + $0x1d0] sm:$0xff] }
 0x39f   : > { %v1876_v24 = vpop.f32.mrf.mxu0 }
 0x3a0   : > { %v1877_v20 = vadd.f32 %v10356_v25, %v1876_v24  ;;  %v10659_v18 = vpack.c.bf16 %v3454_v8, %v3453_v27 }
 0x3a2   : > { %13825 = vst [vmem:[#allocation116_spill] sm:$0xff] %v10659_v18  ;;  %v2371_v54 = vmax.f32 %v1877_v20, 0.0 }
 0x3a3   : > { %v2935_v35 = vpop.f32.mrf.mxu1 }
 0x3a4   : > { %v2578_v62 = vpack.c.bf16 %v2371_v54, %v2370_v44  ;;  %v2936_v19 = vadd.f32 %v10442_v29, %v2935_v35 }
 0x3a5   : > { %v10661_v38 = vpop.f32.mrf.mxu3 }
 0x3a6   : > { %13826 = vst [vmem:[#allocation117_spill] sm:$0xff] %v10661_v38  ;;  %2974 = vmatmul.bf16.gmra.mxu1 %v2578_v62  ;;  %v3455_v33 = vmax.f32 %v2936_v19, 0.0 }
 0x3a7   : > { %v1879_v15 = vpop.f32.mrf.mxu0 }
 0x3a8   : > { %v1880_v8 = vadd.f32 %v10356_v25, %v1879_v15 }
 0x3aa   : > { %8523 = vmatmul.msk.bf16.gmra.mxu0 %vm1236_vm1, %v8816_v5  ;;  %8588 = vmatmul.msk.bf16.gmra.mxu3 %vm1236_vm1, %v8881_v2  ;;  %v2372_v35 = vmax.f32 %v1880_v8, 0.0 }
 0x3ab   : > { %v2937_v31 = vpop.f32.mrf.mxu1 }
 0x3ac   : > { %v2938_v1 = vadd.f32 %v10442_v29, %v2937_v31  ;;  %v8882_v31 = vld [vmem:[%s9935_s27 + $0x3d8] sm:$0xff] }
 0x3ad   : > { %v10669_v27 = vpop.f32.mrf.mxu3 }
 0x3ae   : > { %13827 = vst [vmem:[#allocation118_spill] sm:$0xff] %v10669_v27  ;;  %v3456_v24 = vmax.f32 %v2938_v1, 0.0  ;;  %v8818_v27 = vld [vmem:[%s9935_s27 + $0x1d8] sm:$0xff] }
 0x3af   : > { %v1881_v20 = vpop.f32.mrf.mxu0 }
 0x3b0   : > { %v1882_v44 = vadd.f32 %v10356_v25, %v1881_v20  ;;  %v10673_v54 = vpack.c.bf16 %v3456_v24, %v3455_v33 }
 0x3b2   : > { %13828 = vst [vmem:[#allocation119_spill] sm:$0xff] %v10673_v54  ;;  %v2373_v5 = vmax.f32 %v1882_v44, 0.0 }
 0x3b3   : > { %v2940_v62 = vpop.f32.mrf.mxu1 }
 0x3b4   : > { %v2579_v2 = vpack.c.bf16 %v2373_v5, %v2372_v35  ;;  %v2941_v19 = vadd.f32 %v10442_v29, %v2940_v62 }
 0x3b5   : > { %v10675_v38 = vpop.f32.mrf.mxu3 }
 0x3b6   : > { %13829 = vst [vmem:[#allocation120_spill] sm:$0xff] %v10675_v38  ;;  %2979 = vmatmul.bf16.gmra.mxu1 %v2579_v2  ;;  %v3457_v8 = vmax.f32 %v2941_v19, 0.0  ;;  %v8686_v19 = vld [vmem:[%s13582_s5 + $0x78] sm:$0xf0] }
 0x3b7   : > { %v1884_v18 = vpop.f32.mrf.mxu0 }
 0x3b8   : > { %v1885_v24 = vadd.f32 %v10356_v25, %v1884_v18  ;;  %v8909_v18 = vld [vmem:[%s13582_s5 + $0x74] sm:$0xf] }
 0x3ba   : > { %8524 = vmatmul.msk.bf16.gmra.mxu0 %vm1236_vm1, %v8817_v12  ;;  %8589 = vmatmul.msk.bf16.gmra.mxu3 %vm1236_vm1, %v8882_v31  ;;  %v2374_v62 = vmax.f32 %v1885_v24, 0.0 }
 0x3bb   : > { %v2942_v15 = vpop.f32.mrf.mxu1 }
 0x3bc   : > { %v2943_v1 = vadd.f32 %v10442_v29, %v2942_v15  ;;  %v8883_v15 = vld [vmem:[%s9935_s27 + $0x3e0] sm:$0xff] }
 0x3bd   : > { %v10683_v33 = vpop.f32.mrf.mxu3 }
 0x3be   : > { %13830 = vst [vmem:[#allocation121_spill] sm:$0xff] %v10683_v33  ;;  %v3458_v20 = vmax.f32 %v2943_v1, 0.0 }
 0x3bf   : > { %v1886_v44 = vpop.f32.mrf.mxu0 }
 0x3c0   : > { %v1887_v35 = vadd.f32 %v10356_v25, %v1886_v44  ;;  %v10687_v5 = vpack.c.bf16 %v3458_v20, %v3457_v8  ;;  %v8689_v8 = vor.u32 %v8909_v18, %v8686_v19  ;;  %v8907_v44 = vld [vmem:[%s13582_s5 + $0x64] sm:$0xf]  ;;  %v10715_v18 = vld [vmem:[%s13579_s2] ss:$0 sm:$0xff] }
 0x3c2   : > { %13831 = vst [vmem:[#allocation122_spill] sm:$0xff] %v10687_v5  ;;  %v2375_v12 = vmax.f32 %v1887_v35, 0.0  ;;  %4510 = vmatpush.bf16.msrb.mxu3 %v8689_v8  ;;  %v8678_v35 = vld [vmem:[%s13582_s5 + $0x68] sm:$0xf0]  ;;  %v8905_v8 = vld [vmem:[%s13582_s5 + $0x54] sm:$0xf] }
 0x3c3   : > { %v2945_v2 = vpop.f32.mrf.mxu1 }
 0x3c4   : > { %v2580_v31 = vpack.c.bf16 %v2375_v12, %v2374_v62  ;;  %v2946_v1 = vadd.f32 %v10442_v29, %v2945_v2  ;;  %v8681_v12 = vor.u32 %v8907_v44, %v8678_v35 }
 0x3c5   : > { %v10689_v38 = vpop.f32.mrf.mxu3 }
 0x3c6   : > { %13832 = vst [vmem:[#allocation123_spill] sm:$0xff] %v10689_v38  ;;  %2984 = vmatmul.bf16.gmra.mxu1 %v2580_v31  ;;  %v3459_v2 = vmax.f32 %v2946_v1, 0.0  ;;  %4511 = vmatpush.bf16.msrb.mxu3 %v8681_v12  ;;  %v8903_v12 = vld [vmem:[%s13582_s5 + $0x44] sm:$0xf] }
 0x3c7   : > { %v1889_v54 = vpop.f32.mrf.mxu0 }
 0x3ca   : > { %8525 = vmatmul.msk.bf16.gmra.mxu0 %vm1236_vm1, %v8818_v27  ;;  %8590 = vmatmul.msk.bf16.gmra.mxu3 %vm1236_vm1, %v8883_v15  ;;  %v1890_v27 = vadd.f32 %v10356_v25, %v1889_v54  ;;  %v8670_v25 = vld [vmem:[%s13582_s5 + $0x58] sm:$0xf0] }
 0x3cb   : > { %v2947_v24 = vpop.f32.mrf.mxu1  ;;  %v8673_v1 = vor.u32 %v8905_v8, %v8670_v25 }
 0x3cc   : > { %v2948_v20 = vadd.f32 %v10442_v29, %v2947_v24  ;;  %v2376_v24 = vmax.f32 %v1890_v27, 0.0  ;;  %v8901_v27 = vld [vmem:[%s13582_s5 + $0x34] sm:$0xf] }
 0x3cd   : > { %v10709_v62 = vpop.f32.mrf.mxu3  ;;  %4512 = vmatpush.bf16.msrb.mxu3 %v8673_v1 }
 0x3ce   : > { %13833 = vst [vmem:[#allocation124_spill] sm:$0xff] %v10709_v62  ;;  %v3460_v31 = vmax.f32 %v2948_v20, 0.0 }
 0x3cf   : > { %v1891_v15 = vpop.f32.mrf.mxu0 }
 0x3d0   : > { %v1892_v19 = vadd.f32 %v10715_v18, %v1891_v15  ;;  %v10724_v54 = vpack.c.bf16 %v3460_v31, %v3459_v2  ;;  %v8662_v15 = vld [vmem:[%s13582_s5 + $0x48] sm:$0xf0]  ;;  %v8819_v2 = vld [vmem:[%s9935_s27 + $0x1e0] sm:$0xff] }
 0x3d1   : > { %v8665_v38 = vor.u32 %v8903_v12, %v8662_v15  ;;  %v8884_v31 = vld [vmem:[%s9935_s27 + $0x3e8] sm:$0xff] }
 0x3d2   : > { %13834 = vst [vmem:[#allocation125_spill] sm:$0xff] %v10724_v54  ;;  %v2377_v20 = vmax.f32 %v1892_v19, 0.0  ;;  %v8654_v19 = vld [vmem:[%s13582_s5 + $0x38] sm:$0xf0]  ;;  %v8821_v54 = vld [vmem:[%s9935_s27 + $0x1f0] sm:$0xff] }
 0x3d3   : > { %v2950_v44 = vpop.f32.mrf.mxu1  ;;  %4513 = vmatpush.bf16.msrb.mxu3 %v8665_v38  ;;  %v8657_v1 = vor.u32 %v8901_v27, %v8654_v19  ;;  %v8899_v38 = vld [vmem:[%s13582_s5 + $0x24] sm:$0xf] }
 0x3d4   : > { %v2581_v35 = vpack.c.bf16 %v2377_v20, %v2376_v24  ;;  %v2951_v25 = vadd.f32 %v10442_v29, %v2950_v44 }
 0x3d5   : > { %v10732_v62 = vpop.f32.mrf.mxu3 }
 0x3d6   : > { %13835 = vst [vmem:[#allocation126_spill] sm:$0xff] %v10732_v62  ;;  %2989 = vmatmul.bf16.gmra.mxu1 %v2581_v35  ;;  %v8646_v35 = vld [vmem:[%s13582_s5 + $0x28] sm:$0xf0]  ;;  %v3461_v15 = vmax.f32 %v2951_v25, 0.0 }
 0x3d7   : > { %v1894_v8 = vpop.f32.mrf.mxu0  ;;  %4514 = vmatpush.bf16.msrb.mxu3 %v8657_v1  ;;  %v8649_v44 = vor.u32 %v8899_v38, %v8646_v35  ;;  %v8897_v1 = vld [vmem:[%s13582_s5 + $0x14] sm:$0xf] }
 0x3da   : > { %8526 = vmatmul.msk.bf16.gmra.mxu0 %vm1236_vm1, %v8819_v2  ;;  %8591 = vmatmul.msk.bf16.gmra.mxu3 %vm1236_vm1, %v8884_v31  ;;  %v1895_v2 = vadd.f32 %v10715_v18, %v1894_v8 }
 0x3db   : > { %v2952_v24 = vpop.f32.mrf.mxu1  ;;  %4515 = vmatpush.bf16.msrb.mxu3 %v8649_v44  ;;  %v8895_v44 = vld [vmem:[%s13582_s5 + $0x4] sm:$0xf] }
 0x3dc   : > { %v2953_v20 = vadd.f32 %v10442_v29, %v2952_v24  ;;  %v8638_v24 = vld [vmem:[%s13582_s5 + $0x18] sm:$0xf0]  ;;  %v2378_v38 = vmax.f32 %v1895_v2, 0.0 }
 0x3dd   : > { %v10752_v12 = vpop.f32.mrf.mxu3  ;;  %v8641_v25 = vor.u32 %v8897_v1, %v8638_v24 }
 0x3de   : > { %13836 = vst [vmem:[#allocation127_spill] sm:$0xff] %v10752_v12  ;;  %v3462_v31 = vmax.f32 %v2953_v20, 0.0 }
 0x3df   : > { %v1896_v27 = vpop.f32.mrf.mxu0  ;;  %4516 = vmatpush.bf16.msrb.mxu3 %v8641_v25 }
 0x3e0   : > { %v1897_v19 = vadd.f32 %v10715_v18, %v1896_v27  ;;  %v10762_v12 = vpack.c.bf16 %v3462_v31, %v3461_v15  ;;  %v8630_v27 = vld [vmem:[%s13582_s5 + $0x8] sm:$0xf0]  ;;  %v8885_v31 = vld [vmem:[%s9935_s27 + $0x3f0] sm:$0xff] }
 0x3e1   : > { %v8633_v33 = vor.u32 %v8895_v44, %v8630_v27  ;;  %v8820_v15 = vld [vmem:[%s9935_s27 + $0x1e8] sm:$0xff] }
 0x3e2   : > { %13837 = vst [vmem:[#allocation128_spill] sm:$0xff] %v10762_v12  ;;  %v2379_v8 = vmax.f32 %v1897_v19, 0.0 }
 0x3e3   : > { %v2955_v20 = vpop.f32.mrf.mxu1  ;;  %4517 = vmatpush.bf16.msrb.mxu3 %v8633_v33 }
 0x3e4   : > { %v2582_v35 = vpack.c.bf16 %v2379_v8, %v2378_v38  ;;  %v2956_v2 = vadd.f32 %v10442_v29, %v2955_v20 }
 0x3e5   : > { %v10770_v62 = vpop.f32.mrf.mxu3 }
 0x3e6   : > { %13838 = vst [vmem:[#allocation129_spill] sm:$0xff] %v10770_v62  ;;  %2994 = vmatmul.bf16.gmra.mxu1 %v2582_v35  ;;  %v3463_v38 = vmax.f32 %v2956_v2, 0.0 }
 0x3e7   : > { %v1899_v1 = vpop.f32.mrf.mxu0 }
 0x3e8   : > { %v1900_v8 = vadd.f32 %v10715_v18, %v1899_v1 }
 0x3ea   : > { %8527 = vmatmul.msk.bf16.gmra.mxu0 %vm1236_vm1, %v8820_v15  ;;  %8592 = vmatmul.msk.bf16.gmra.mxu3 %vm1236_vm1, %v8885_v31  ;;  %v2380_v20 = vmax.f32 %v1900_v8, 0.0 }
 0x3eb   : > { %v2957_v19 = vpop.f32.mrf.mxu1 }
 0x3ec   : > { %v2958_v24 = vadd.f32 %v10442_v29, %v2957_v19  ;;  %v8886_v19 = vld [vmem:[%s9935_s27 + $0x3f8] sm:$0xff] }
 0x3ed   : > { %v10778_v25 = vpop.f32.mrf.mxu3 }
 0x3ee   : > { %13839 = vst [vmem:[#allocation130_spill] sm:$0xff] %v10778_v25  ;;  %v3464_v35 = vmax.f32 %v2958_v24, 0.0  ;;  %v8822_v25 = vld [vmem:[%s9935_s27 + $0x1f8] sm:$0xff] }
 0x3ef   : > { %v1901_v44 = vpop.f32.mrf.mxu0 }
 0x3f0   : > { %v1902_v33 = vadd.f32 %v10715_v18, %v1901_v44  ;;  %v10782_v27 = vpack.c.bf16 %v3464_v35, %v3463_v38 }
 0x3f2   : > { %13840 = vst [vmem:[#allocation131_spill] sm:$0xff] %v10782_v27  ;;  %v2381_v15 = vmax.f32 %v1902_v33, 0.0 }
 0x3f3   : > { %v2960_v62 = vpop.f32.mrf.mxu1 }
 0x3f4   : > { %v2583_v31 = vpack.c.bf16 %v2381_v15, %v2380_v20  ;;  %v2961_v2 = vadd.f32 %v10442_v29, %v2960_v62 }
 0x3f5   : > { %v10784_v12 = vpop.f32.mrf.mxu3 }
 0x3f6   : > { %13841 = vst [vmem:[#allocation132_spill] sm:$0xff] %v10784_v12  ;;  %2999 = vmatmul.bf16.gmra.mxu1 %v2583_v31  ;;  %v3465_v8 = vmax.f32 %v2961_v2, 0.0 }
 0x3f7   : > { %v1904_v5 = vpop.f32.mrf.mxu0 }
 0x3f8   : > { %v1905_v35 = vadd.f32 %v10715_v18, %v1904_v5 }
 0x3fa   : > { %8528 = vmatmul.msk.bf16.gmra.mxu0 %vm1236_vm1, %v8821_v54  ;;  %8593 = vmatmul.msk.bf16.gmra.mxu3 %vm1236_vm1, %v8886_v19  ;;  %v2382_v62 = vmax.f32 %v1905_v35, 0.0 }
 0x3fb   : > { %v2962_v1 = vpop.f32.mrf.mxu1 }
 0x3fc   : > { %v2963_v24 = vadd.f32 %v10442_v29, %v2962_v1 }
 0x3fd   : > { %v10792_v38 = vpop.f32.mrf.mxu3 }
 0x3fe   : > { %13842 = vst [vmem:[#allocation133_spill] sm:$0xff] %v10792_v38  ;;  %v3466_v44 = vmax.f32 %v2963_v24, 0.0 }
 0x3ff   : > { %v1906_v33 = vpop.f32.mrf.mxu0 }
 0x400   : > { %v1907_v20 = vadd.f32 %v10715_v18, %v1906_v33  ;;  %v10796_v15 = vpack.c.bf16 %v3466_v44, %v3465_v8 }
 0x402   : > { %13843 = vst [vmem:[#allocation134_spill] sm:$0xff] %v10796_v15  ;;  %v2383_v31 = vmax.f32 %v1907_v20, 0.0 }
 0x403   : > { %v2965_v54 = vpop.f32.mrf.mxu1 }
 0x404   : > { %v2584_v12 = vpack.c.bf16 %v2383_v31, %v2382_v62  ;;  %v2966_v38 = vadd.f32 %v10442_v29, %v2965_v54 }
 0x405   : > { %v10798_v19 = vpop.f32.mrf.mxu3 }
 0x406   : > { %13844 = vst [vmem:[#allocation135_spill] sm:$0xff] %v10798_v19  ;;  %3004 = vmatmul.bf16.gmra.mxu1 %v2584_v12  ;;  %v3467_v8 = vmax.f32 %v2966_v38, 0.0  ;;  %v8823_v19 = vld [vmem:[%s9935_s27 + $0x200] sm:$0xff]  ;;  %s12270_s27 = scalar_lea.vmem [#allocation2], %s7951_s17 }
 0x407   : > { %v1909_v1 = vpop.f32.mrf.mxu0  ;;  %s7882_s25 = sshll.u32 %s12270_s27, 4  ;;  %s7883_s25 = int_to_ptr.vmem [resolvable:$true] %s7882_s25 }
 0x408   : > { %v1910_v35 = vadd.f32 %v10715_v18, %v1909_v1  ;;  %v10820_v1 = vld [vmem:[%s13581_s4] ss:$0 sm:$0xff] }
 0x40a   : > { %8529 = vmatmul.msk.bf16.gmra.mxu0 %vm1236_vm1, %v8822_v25  ;;  %4518 = vmatmul.bf16.vlgmr.msrb.gmra.mxu3 %v10102_v23  ;;  %v2384_v62 = vmax.f32 %v1910_v35, 0.0 }
 0x40b   : > { %v2967_v5 = vpop.f32.mrf.mxu1 }
 0x40c   : > { %v2968_v2 = vadd.f32 %v10442_v29, %v2967_v5 }
 0x40d   : > { %v10805_v24 = vpop.f32.mrf.mxu3 }
 0x40e   : > { %13845 = vst [vmem:[#allocation136_spill] sm:$0xff] %v10805_v24  ;;  %v3468_v44 = vmax.f32 %v2968_v2, 0.0 }
 0x40f   : > { %v1911_v33 = vpop.f32.mrf.mxu0 }
 0x410   : > { %v1912_v12 = vadd.f32 %v10715_v18, %v1911_v33  ;;  %v10809_v20 = vpack.c.bf16 %v3468_v44, %v3467_v8 }
 0x412   : > { %13846 = vst [vmem:[#allocation137_spill] sm:$0xff] %v10809_v20  ;;  %v2385_v31 = vmax.f32 %v1912_v12, 0.0 }
 0x413   : > { %v2970_v25 = vpop.f32.mrf.mxu1 }
 0x414   : > { %v2585_v54 = vpack.c.bf16 %v2385_v31, %v2384_v62  ;;  %v2971_v24 = vadd.f32 %v10442_v29, %v2970_v25 }
 0x415   : > { %v10811_v23 = vpop.f32.mrf.mxu3 }
 0x416   : > { %13847 = vst [vmem:[#allocation138_spill] sm:$0xff] %v10811_v23  ;;  %3009 = vmatmul.bf16.gmra.mxu1 %v2585_v54  ;;  %v3469_v35 = vmax.f32 %v2971_v24, 0.0 }
 0x417   : > { %v1914_v5 = vpop.f32.mrf.mxu0 }
 0x418   : > { %v1915_v44 = vadd.f32 %v10715_v18, %v1914_v5 }
 0x41a   : > { %8530 = vmatmul.msk.bf16.gmra.mxu0 %vm1236_vm1, %v8823_v19  ;;  %4523 = vmatmul.bf16.gmra.mxu3 %v10117_v51  ;;  %v2386_v62 = vmax.f32 %v1915_v44, 0.0 }
 0x41b   : > { %v2972_v38 = vpop.f32.mrf.mxu1 }
 0x41c   : > { %v2973_v2 = vadd.f32 %v10820_v1, %v2972_v38 }
 0x41d   : > { %v10823_v8 = vpop.f32.mrf.mxu3 }
 0x41e   : > { %13848 = vst [vmem:[#allocation139_spill] sm:$0xff] %v10823_v8  ;;  %v3470_v33 = vmax.f32 %v2973_v2, 0.0 }
 0x41f   : > { %v1916_v12 = vpop.f32.mrf.mxu0 }
 0x420   : > { %v1917_v29 = vadd.f32 %v10715_v18, %v1916_v12  ;;  %v10827_v19 = vpack.c.bf16 %v3470_v33, %v3469_v35 }
 0x422   : > { %13849 = vst [vmem:[#allocation140_spill] sm:$0xff] %v10827_v19  ;;  %v2387_v31 = vmax.f32 %v1917_v29, 0.0 }
 0x423   : > { %v2975_v25 = vpop.f32.mrf.mxu1 }
 0x424   : > { %v2586_v54 = vpack.c.bf16 %v2387_v31, %v2386_v62  ;;  %v2976_v38 = vadd.f32 %v10820_v1, %v2975_v25 }
 0x425   : > { %v10829_v51 = vpop.f32.mrf.mxu3 }
 0x426   : > { %13850 = vst [vmem:[#allocation141_spill] sm:$0xff] %v10829_v51  ;;  %3014 = vmatmul.bf16.gmra.mxu1 %v2586_v54  ;;  %v3471_v12 = vmax.f32 %v2976_v38, 0.0 }
 0x427   : > { %v1919_v23 = vpop.f32.mrf.mxu0 }
 0x428   : > { %v1920_v35 = vadd.f32 %v10715_v18, %v1919_v23 }
 0x42a   : > { %4528 = vmatmul.bf16.gmra.mxu3 %v10131_v14  ;;  %v2388_v31 = vmax.f32 %v1920_v35, 0.0 }
 0x42b   : > { %v2977_v24 = vpop.f32.mrf.mxu1 }
 0x42c   : > { %v2978_v5 = vadd.f32 %v10820_v1, %v2977_v24 }
 0x42d   : > { %v10834_v2 = vpop.f32.mrf.mxu3 }
 0x42e   : > { %13851 = vst [vmem:[#allocation142_spill] sm:$0xff] %v10834_v2  ;;  %v3472_v44 = vmax.f32 %v2978_v5, 0.0 }
 0x42f   : > { %v1921_v33 = vpop.f32.mrf.mxu0 }
 0x430   : > { %v1922_v29 = vadd.f32 %v10715_v18, %v1921_v33  ;;  %v10838_v62 = vpack.c.bf16 %v3472_v44, %v3471_v12 }
 0x432   : > { %13852 = vst [vmem:[#allocation143_spill] sm:$0xff] %v10838_v62  ;;  %v2389_v54 = vmax.f32 %v1922_v29, 0.0 }
 0x433   : > { %v2980_v51 = vpop.f32.mrf.mxu1 }
 0x434   : > { %v2587_v25 = vpack.c.bf16 %v2389_v54, %v2388_v31  ;;  %v2981_v24 = vadd.f32 %v10820_v1, %v2980_v51 }
 0x435   : > { %v10840_v8 = vpop.f32.mrf.mxu3 }
 0x436   : > { %13853 = vst [vmem:[#allocation144_spill] sm:$0xff] %v10840_v8  ;;  %3019 = vmatmul.bf16.gmra.mxu1 %v2587_v25  ;;  %v3473_v33 = vmax.f32 %v2981_v24, 0.0 }
 0x437   : > { %v1924_v14 = vpop.f32.mrf.mxu0 }
 0x438   : > { %v1925_v12 = vadd.f32 %v10715_v18, %v1924_v14 }
 0x43a   : > { %4533 = vmatmul.bf16.gmra.mxu3 %v10145_v45  ;;  %v2390_v54 = vmax.f32 %v1925_v12, 0.0 }
 0x43b   : > { %v2982_v38 = vpop.f32.mrf.mxu1 }
 0x43c   : > { %v2983_v23 = vadd.f32 %v10820_v1, %v2982_v38 }
 0x43d   : > { %v10845_v5 = vpop.f32.mrf.mxu3 }
 0x43e   : > { %13854 = vst [vmem:[#allocation145_spill] sm:$0xff] %v10845_v5  ;;  %v3474_v35 = vmax.f32 %v2983_v23, 0.0 }
 0x43f   : > { %v1926_v44 = vpop.f32.mrf.mxu0 }
 0x440   : > { %v1927_v29 = vadd.f32 %v10715_v18, %v1926_v44  ;;  %v10849_v31 = vpack.c.bf16 %v3474_v35, %v3473_v33 }
 0x442   : > { %13855 = vst [vmem:[#allocation146_spill] sm:$0xff] %v10849_v31  ;;  %v2391_v25 = vmax.f32 %v1927_v29, 0.0 }
 0x443   : > { %v2985_v8 = vpop.f32.mrf.mxu1 }
 0x444   : > { %v2588_v51 = vpack.c.bf16 %v2391_v25, %v2390_v54  ;;  %v2986_v38 = vadd.f32 %v10820_v1, %v2985_v8 }
 0x445   : > { %v10851_v2 = vpop.f32.mrf.mxu3 }
 0x446   : > { %13856 = vst [vmem:[#allocation147_spill] sm:$0xff] %v10851_v2  ;;  %3024 = vmatmul.bf16.gmra.mxu1 %v2588_v51  ;;  %v3475_v44 = vmax.f32 %v2986_v38, 0.0 }
 0x447   : > { %v1929_v45 = vpop.f32.mrf.mxu0 }
 0x448   : > { %v1930_v33 = vadd.f32 %v10715_v18, %v1929_v45 }
 0x44a   : > { %4538 = vmatmul.bf16.gmra.mxu3 %v10159_v13  ;;  %v2392_v25 = vmax.f32 %v1930_v33, 0.0 }
 0x44b   : > { %v2987_v24 = vpop.f32.mrf.mxu1 }
 0x44c   : > { %v2988_v14 = vadd.f32 %v10820_v1, %v2987_v24 }
 0x44d   : > { %v10856_v23 = vpop.f32.mrf.mxu3 }
 0x44e   : > { %13857 = vst [vmem:[#allocation148_spill] sm:$0xff] %v10856_v23  ;;  %v3476_v12 = vmax.f32 %v2988_v14, 0.0 }
 0x44f   : > { %v1931_v35 = vpop.f32.mrf.mxu0 }
 0x450   : > { %v1932_v29 = vadd.f32 %v10715_v18, %v1931_v35  ;;  %v10860_v54 = vpack.c.bf16 %v3476_v12, %v3475_v44 }
 0x452   : > { %13858 = vst [vmem:[#allocation149_spill] sm:$0xff] %v10860_v54  ;;  %v2393_v51 = vmax.f32 %v1932_v29, 0.0 }
 0x453   : > { %v2990_v2 = vpop.f32.mrf.mxu1 }
 0x454   : > { %v2589_v8 = vpack.c.bf16 %v2393_v51, %v2392_v25  ;;  %v2991_v24 = vadd.f32 %v10820_v1, %v2990_v2 }
 0x455   : > { %v10862_v5 = vpop.f32.mrf.mxu3 }
 0x456   : > { %13859 = vst [vmem:[#allocation150_spill] sm:$0xff] %v10862_v5  ;;  %3029 = vmatmul.bf16.gmra.mxu1 %v2589_v8  ;;  %v3477_v35 = vmax.f32 %v2991_v24, 0.0 }
 0x457   : > { %v1934_v13 = vpop.f32.mrf.mxu0 }
 0x458   : > { %v1935_v44 = vadd.f32 %v10715_v18, %v1934_v13  ;;  %v8925_v13 = vld [vmem:[%s13584_s7 + $0x70] sm:$0xff] }
 0x45a   : > { %4543 = vmatmul.bf16.gmra.mxu3 %v10173_v50  ;;  %v2394_v51 = vmax.f32 %v1935_v44, 0.0 }
 0x45b   : > { %v2992_v38 = vpop.f32.mrf.mxu1 }
 0x45c   : > { %v2993_v45 = vadd.f32 %v10820_v1, %v2992_v38  ;;  %v8926_v38 = vld [vmem:[%s13584_s7 + $0x78] sm:$0xff] }
 0x45d   : > { %v10867_v14 = vpop.f32.mrf.mxu3  ;;  %6708 = vmatpush.bf16.msrb.mxu1 %v8926_v38 }
 0x45e   : > { %13860 = vst [vmem:[#allocation151_spill] sm:$0xff] %v10867_v14  ;;  %v3478_v33 = vmax.f32 %v2993_v45, 0.0 }
 0x45f   : > { %v1936_v12 = vpop.f32.mrf.mxu0 }
 0x460   : > { %v1937_v29 = vadd.f32 %v10715_v18, %v1936_v12  ;;  %v10871_v25 = vpack.c.bf16 %v3478_v33, %v3477_v35  ;;  %v8924_v12 = vld [vmem:[%s13584_s7 + $0x68] sm:$0xff] }
 0x461   : > { %6709 = vmatpush.bf16.msrb.mxu1 %v8925_v13  ;;  %v8923_v13 = vld [vmem:[%s13584_s7 + $0x60] sm:$0xff] }
 0x462   : > { %13861 = vst [vmem:[#allocation152_spill] sm:$0xff] %v10871_v25  ;;  %v2395_v8 = vmax.f32 %v1937_v29, 0.0 }
 0x463   : > { %v2995_v5 = vpop.f32.mrf.mxu1 }
 0x464   : > { %v2590_v2 = vpack.c.bf16 %v2395_v8, %v2394_v51  ;;  %v2996_v45 = vadd.f32 %v10820_v1, %v2995_v5 }
 0x465   : > { %v10873_v23 = vpop.f32.mrf.mxu3  ;;  %6710 = vmatpush.bf16.msrb.mxu1 %v8924_v12 }
 0x466   : > { %13862 = vst [vmem:[#allocation153_spill] sm:$0xff] %v10873_v23  ;;  %3034 = vmatmul.bf16.gmra.mxu1 %v2590_v2  ;;  %v3479_v29 = vmax.f32 %v2996_v45, 0.0 }
 0x467   : > { %v1939_v24 = vpop.f32.mrf.mxu0 }
 0x468   : > { %v1940_v51 = vadd.f32 %v10715_v18, %v1939_v24  ;;  %v8922_v24 = vld [vmem:[%s13584_s7 + $0x58] sm:$0xff] }
 0x469   : > { %6711 = vmatpush.bf16.msrb.mxu1 %v8923_v13 }
 0x46a   : > { %4548 = vmatmul.bf16.gmra.mxu3 %v10187_v26 }
 0x46b   : > { %v2997_v35 = vpop.f32.mrf.mxu1 }
 0x46c   : > { %v2998_v44 = vadd.f32 %v10820_v1, %v2997_v35  ;;  %v2396_v35 = vmax.f32 %v1940_v51, 0.0 }
 0x46d   : > { %v10884_v33 = vpop.f32.mrf.mxu3  ;;  %6712 = vmatpush.bf16.msrb.mxu1 %v8922_v24  ;;  %v8919_v24 = vld [vmem:[%s13584_s7 + $0x40] sm:$0xff] }
 0x46e   : > { %13863 = vst [vmem:[#allocation154_spill] sm:$0xff] %v10884_v33  ;;  %v3480_v8 = vmax.f32 %v2998_v44, 0.0  ;;  %v8921_v44 = vld [vmem:[%s13584_s7 + $0x50] sm:$0xff] }
 0x46f   : > { %v1941_v2 = vpop.f32.mrf.mxu0 }
 0x470   : > { %v1942_v5 = vadd.f32 %v10715_v18, %v1941_v2  ;;  %v10891_v38 = vpack.c.bf16 %v3480_v8, %v3479_v29 }
 0x471   : > { %6713 = vmatpush.bf16.msrb.mxu1 %v8921_v44 }
 0x472   : > { %13864 = vst [vmem:[#allocation155_spill] sm:$0xff] %v10891_v38  ;;  %v2397_v26 = vmax.f32 %v1942_v5, 0.0 }
 0x473   : > { %v3000_v50 = vpop.f32.mrf.mxu1 }
 0x474   : > { %v2591_v33 = vpack.c.bf16 %v2397_v26, %v2396_v35  ;;  %v3001_v12 = vadd.f32 %v10820_v1, %v3000_v50 }
 0x475   : > { %v10896_v23 = vpop.f32.mrf.mxu3 }
 0x476   : > { %13865 = vst [vmem:[#allocation156_spill] sm:$0xff] %v10896_v23  ;;  %3039 = vmatmul.bf16.gmra.mxu1 %v2591_v33  ;;  %v8920_v33 = vld [vmem:[%s13584_s7 + $0x48] sm:$0xff]  ;;  %v3481_v8 = vmax.f32 %v3001_v12, 0.0  ;;  %v1960_v12 = vadd.f32 %v10715_v18, %v10002_v30 }
 0x477   : > { %v1944_v45 = vpop.f32.mrf.mxu0  ;;  %6714 = vmatpush.bf16.msrb.mxu1 %v8920_v33 }
 0x478   : > { %v1945_v2 = vadd.f32 %v10715_v18, %v1944_v45  ;;  %v1962_v45 = vadd.f32 %v10715_v18, %v10006_v37 }
 0x47a   : > { %4553 = vmatmul.bf16.gmra.mxu3 %v10201_v9  ;;  %v2398_v44 = vmax.f32 %v1945_v2, 0.0  ;;  %v8684_v2 = vld [vmem:[%s13582_s5 + $0x70] sm:$0xf] }
 0x47b   : > { %v3002_v29 = vpop.f32.mrf.mxu1  ;;  %6715 = vmatpush.bf16.msrb.mxu1 %v8919_v24 }
 0x47c   : > { %v3003_v26 = vadd.f32 %v10820_v1, %v3002_v29 }
 0x47d   : > { %v10907_v51 = vpop.f32.mrf.mxu3 }
 0x47e   : > { %13866 = vst [vmem:[#allocation157_spill] sm:$0xff] %v10907_v51  ;;  %v3482_v5 = vmax.f32 %v3003_v26, 0.0 }
 0x47f   : > { %v1946_v13 = vpop.f32.mrf.mxu0 }
 0x480   : > { %v1947_v50 = vadd.f32 %v10715_v18, %v1946_v13  ;;  %v10914_v35 = vpack.c.bf16 %v3482_v5, %v3481_v8  ;;  %v2404_v5 = vmax.f32 %v1960_v12, 0.0  ;;  %v2405_v13 = vmax.f32 %v1962_v45, 0.0 }
 0x482   : > { %13867 = vst [vmem:[#allocation158_spill] sm:$0xff] %v10914_v35  ;;  %v2399_v29 = vmax.f32 %v1947_v50, 0.0  ;;  %v8910_v50 = vld [vmem:[%s13582_s5 + $0x74] sm:$0xf0] }
 0x483   : > { %v3005_v9 = vpop.f32.mrf.mxu1  ;;  %v8685_v24 = vor.u32 %v8910_v50, %v8684_v2 }
 0x484   : > { %v2592_v26 = vpack.c.bf16 %v2399_v29, %v2398_v44  ;;  %v3006_v30 = vadd.f32 %v10820_v1, %v3005_v9  ;;  %v10934_v29 = vpack.c.bf16 %v2405_v13, %v2404_v5  ;;  %v1967_v5 = vadd.f32 %v10715_v18, %v10016_v48 }
 0x485   : > { %v10923_v33 = vpop.f32.mrf.mxu3  ;;  %3861 = vmatpush.bf16.msrb.mxu2 %v8685_v24  ;;  %v1965_v24 = vadd.f32 %v10715_v18, %v10012_v41 }
 0x486   : > { %13868 = vst [vmem:[#allocation159_spill] sm:$0xff] %v10923_v33  ;;  %3044 = vmatmul.bf16.gmra.mxu1 %v2592_v26  ;;  %v3483_v45 = vmax.f32 %v3006_v30, 0.0 }
 0x487   : > { %v1949_v8 = vpop.f32.mrf.mxu0 }
 0x488   : > { %v1950_v26 = vadd.f32 %v10715_v18, %v1949_v8  ;;  %v3775_v8 = vld [vmem:[%s13583_s6] sm:$0x3] }
 0x48a   : > { %4558 = vmatmul.bf16.gmra.mxu3 %v10215_v0  ;;  %v2400_v2 = vmax.f32 %v1950_v26, 0.0 }
 0x48b   : > { %v3007_v37 = vpop.f32.mrf.mxu1 }
 0x48c   : > { %v3008_v44 = vadd.f32 %v10820_v1, %v3007_v37 }
 0x48d   : > { %v4519_v12 = vpop.f32.mrf.mxu3 }
 0x48e   : > { %v3484_v33 = vmax.f32 %v3008_v44, 0.0  ;;  %v10947_v44 = vperm.slane %v3775_v8, 1 }
 0x48f   : > { %v1951_v51 = vpop.f32.mrf.mxu0 }
 0x490   : > { %v1952_v23 = vadd.f32 %v10715_v18, %v1951_v51  ;;  %v10938_v14 = vpack.c.bf16 %v3484_v33, %v3483_v45  ;;  %v2406_v51 = vmax.f32 %v1965_v24, 0.0  ;;  %v2407_v33 = vmax.f32 %v1967_v5, 0.0 }
 0x492   : > { %13869 = vst [vmem:[#allocation160_spill] sm:$0xff] %v10938_v14  ;;  %v2401_v9 = vmax.f32 %v1952_v23, 0.0  ;;  %v2596_v26 = vpack.c.bf16 %v2407_v33, %v2406_v51  ;;  %v1970_v51 = vadd.f32 %v10715_v18, %v10022_v52 }
 0x493   : > { %v3010_v50 = vpop.f32.mrf.mxu1 }
 0x494   : > { %v2593_v13 = vpack.c.bf16 %v2401_v9, %v2400_v2  ;;  %v3011_v23 = vadd.f32 %v10820_v1, %v3010_v50  ;;  %v4520_v9 = vadd.f32 %v4519_v12, %v10947_v44  ;;  %v1972_v12 = vadd.f32 %v10715_v18, %v10026_v59 }
 0x495   : > { %v4521_v37 = vpop.f32.mrf.mxu3 }
 0x496   : > { %3049 = vmatmul.bf16.gmra.mxu1 %v2593_v13  ;;  %v4522_v45 = vadd.f32 %v4521_v37, %v10947_v44  ;;  %v3485_v13 = vmax.f32 %v3011_v23, 0.0 }
 0x497   : > { %v1954_v30 = vpop.f32.mrf.mxu0 }
 0x498   : > { %v1955_v0 = vadd.f32 %v10715_v18, %v1954_v30  ;;  %v5162_v8 = vmax.f32 %v4522_v45, 0.0  ;;  %v2409_v45 = vmax.f32 %v1972_v12, 0.0 }
 0x49a   : > { %4563 = vmatmul.bf16.gmra.mxu3 %v10229_v60  ;;  %v5160_v60 = vmax.f32 %v4520_v9, 0.0  ;;  %v2402_v35 = vmax.f32 %v1955_v0, 0.0 }
 0x49b   : > { %v3012_v41 = vpop.f32.mrf.mxu1 }
 0x49c   : > { %v3013_v48 = vadd.f32 %v10820_v1, %v3012_v41  ;;  %v5672_v33 = vpack.c.bf16 %v5162_v8, %v5160_v60  ;;  %v2408_v41 = vmax.f32 %v1970_v51, 0.0  ;;  %v1977_v51 = vadd.f32 %v10715_v18, %v10036_v6 }
 0x49d   : > { %v4524_v2 = vpop.f32.mrf.mxu3 }
 0x49e   : > { %v3486_v24 = vmax.f32 %v3013_v48, 0.0  ;;  %v2597_v52 = vpack.c.bf16 %v2409_v45, %v2408_v41  ;;  %v4525_v59 = vadd.f32 %v4524_v2, %v10947_v44  ;;  %v2411_v2 = vmax.f32 %v1977_v51, 0.0 }
 0x49f   : > { %v1956_v5 = vpop.f32.mrf.mxu0 }
 0x4a0   : > { %v1957_v14 = vadd.f32 %v10715_v18, %v1956_v5  ;;  %v10956_v50 = vpack.c.bf16 %v3486_v24, %v3485_v13  ;;  %v5164_v5 = vmax.f32 %v4525_v59, 0.0 }
 0x4a2   : > { %13870 = vst [vmem:[#allocation161_spill] sm:$0xff] %v10956_v50  ;;  %v2403_v38 = vmax.f32 %v1957_v14, 0.0 }
 0x4a3   : > { %v3015_v37 = vpop.f32.mrf.mxu1 }
 0x4a4   : > { %v2594_v23 = vpack.c.bf16 %v2403_v38, %v2402_v35  ;;  %v3016_v48 = vadd.f32 %v10820_v1, %v3015_v37  ;;  %v1975_v37 = vadd.f32 %v10715_v18, %v10032_v63 }
 0x4a5   : > { %v4526_v30 = vpop.f32.mrf.mxu3 }
 0x4a6   : > { %3054 = vmatmul.bf16.vlgmr.msra.gmra.mxu2 %v2594_v23  ;;  %6716 = vmatmul.bf16.vlgmr.msrb.gmra.mxu1 %v5672_v33  ;;  %v4527_v14 = vadd.f32 %v4526_v30, %v10947_v44  ;;  %v3487_v60 = vmax.f32 %v3016_v48, 0.0  ;;  %v2410_v23 = vmax.f32 %v1975_v37, 0.0 }
 0x4a8   : > { %v5166_v35 = vmax.f32 %v4527_v14, 0.0  ;;  %v2598_v63 = vpack.c.bf16 %v2411_v2, %v2410_v23 }
 0x4aa   : > { %4568 = vmatmul.bf16.gmra.mxu3 %v10243_v3  ;;  %v5674_v12 = vpack.c.bf16 %v5166_v35, %v5164_v5  ;;  %v1980_v35 = vadd.f32 %v10715_v18, %v10042_v10  ;;  %v1982_v5 = vadd.f32 %v10715_v18, %v10046_v17 }
 0x4ab   : > { %v3017_v0 = vpop.f32.mrf.mxu1 }
 0x4ac   : > { %v3018_v9 = vadd.f32 %v10820_v1, %v3017_v0  ;;  %v2412_v51 = vmax.f32 %v1980_v35, 0.0 }
 0x4ad   : > { %v4529_v13 = vpop.f32.mrf.mxu3 }
 0x4ae   : > { %v3488_v38 = vmax.f32 %v3018_v9, 0.0  ;;  %v4530_v6 = vadd.f32 %v4529_v13, %v10947_v44 }
 0x4b0   : > { %v10967_v24 = vpack.c.bf16 %v3488_v38, %v3487_v60  ;;  %v5168_v60 = vmax.f32 %v4530_v6, 0.0 }
 0x4b2   : > { %13871 = vst [vmem:[#allocation162_spill] sm:$0xff] %v10967_v24 }
 0x4b3   : > { %v3020_v8 = vpop.f32.mrf.mxu1 }
 0x4b4   : > { %v3021_v30 = vadd.f32 %v10820_v1, %v3020_v8 }
 0x4b5   : > { %v4531_v33 = vpop.f32.mrf.mxu3 }
 0x4b6   : > { %3059 = vmatmul.bf16.gmra.mxu2 %v10934_v29  ;;  %6721 = vmatmul.bf16.gmra.mxu1 %v5674_v12  ;;  %v4532_v45 = vadd.f32 %v4531_v33, %v10947_v44  ;;  %v3489_v14 = vmax.f32 %v3021_v30, 0.0  ;;  %v2413_v12 = vmax.f32 %v1982_v5, 0.0 }
 0x4b8   : > { %v5170_v59 = vmax.f32 %v4532_v45, 0.0  ;;  %v2599_v30 = vpack.c.bf16 %v2413_v12, %v2412_v51 }
 0x4ba   : > { %4573 = vmatmul.bf16.gmra.mxu3 %v10257_v11  ;;  %v5676_v8 = vpack.c.bf16 %v5170_v59, %v5168_v60  ;;  %v1987_v59 = vadd.f32 %v10715_v18, %v10056_v28 }
 0x4bb   : > { %v3022_v41 = vpop.f32.mrf.mxu1 }
 0x4bc   : > { %v3023_v48 = vadd.f32 %v10820_v1, %v3022_v41  ;;  %v2415_v5 = vmax.f32 %v1987_v59, 0.0 }
 0x4bd   : > { %v4534_v0 = vpop.f32.mrf.mxu3 }
 0x4be   : > { %v3490_v9 = vmax.f32 %v3023_v48, 0.0  ;;  %v4535_v41 = vadd.f32 %v4534_v0, %v10947_v44 }
 0x4c0   : > { %v10979_v29 = vpack.c.bf16 %v3490_v9, %v3489_v14  ;;  %v5172_v6 = vmax.f32 %v4535_v41, 0.0  ;;  %v1985_v9 = vadd.f32 %v10715_v18, %v10052_v21 }
 0x4c2   : > { %13872 = vst [vmem:[#allocation163_spill] sm:$0xff] %v10979_v29  ;;  %v2414_v35 = vmax.f32 %v1985_v9, 0.0 }
 0x4c3   : > { %v3025_v38 = vpop.f32.mrf.mxu1 }
 0x4c4   : > { %v3026_v13 = vadd.f32 %v10820_v1, %v3025_v38  ;;  %v2600_v12 = vpack.c.bf16 %v2415_v5, %v2414_v35 }
 0x4c5   : > { %v4536_v37 = vpop.f32.mrf.mxu3 }
 0x4c6   : > { %3064 = vmatmul.bf16.gmra.mxu2 %v2596_v26  ;;  %6726 = vmatmul.bf16.gmra.mxu1 %v5676_v8  ;;  %v4537_v23 = vadd.f32 %v4536_v37, %v10947_v44  ;;  %v3491_v17 = vmax.f32 %v3026_v13, 0.0 }
 0x4c8   : > { %v5174_v48 = vmax.f32 %v4537_v23, 0.0 }
 0x4ca   : > { %4578 = vmatmul.bf16.gmra.mxu3 %v10271_v36  ;;  %v5678_v60 = vpack.c.bf16 %v5174_v48, %v5172_v6 }
 0x4cb   : > { %v3027_v33 = vpop.f32.mrf.mxu1 }
 0x4cc   : > { %v3028_v2 = vadd.f32 %v10820_v1, %v3027_v33 }
 0x4cd   : > { %v4539_v10 = vpop.f32.mrf.mxu3 }
 0x4ce   : > { %v3492_v45 = vmax.f32 %v3028_v2, 0.0  ;;  %v4540_v13 = vadd.f32 %v4539_v10, %v10947_v44 }
 0x4d0   : > { %v10990_v26 = vpack.c.bf16 %v3492_v45, %v3491_v17  ;;  %v5176_v2 = vmax.f32 %v4540_v13, 0.0  ;;  %v1990_v17 = vadd.f32 %v10715_v18, %v10062_v34  ;;  %v1992_v45 = vadd.f32 %v10715_v18, %v10066_v43 }
 0x4d1   : > { %v1995_v13 = vadd.f32 %v10715_v18, %v10072_v47 }
 0x4d2   : > { %13873 = vst [vmem:[#allocation164_spill] sm:$0xff] %v10990_v26  ;;  %v2417_v9 = vmax.f32 %v1992_v45, 0.0 }
 0x4d3   : > { %v3030_v14 = vpop.f32.mrf.mxu1 }
 0x4d4   : > { %v3031_v0 = vadd.f32 %v10820_v1, %v3030_v14  ;;  %v2416_v14 = vmax.f32 %v1990_v17, 0.0 }
 0x4d5   : > { %v4541_v38 = vpop.f32.mrf.mxu3 }
 0x4d6   : > { %3069 = vmatmul.bf16.gmra.mxu2 %v2597_v52  ;;  %6731 = vmatmul.bf16.gmra.mxu1 %v5678_v60  ;;  %v4542_v37 = vadd.f32 %v4541_v38, %v10947_v44  ;;  %v3493_v28 = vmax.f32 %v3031_v0, 0.0  ;;  %v2601_v35 = vpack.c.bf16 %v2417_v9, %v2416_v14 }
 0x4d8   : > { %v5178_v23 = vmax.f32 %v4542_v37, 0.0 }
 0x4da   : > { %4583 = vmatmul.bf16.gmra.mxu3 %v10285_v40  ;;  %v5680_v48 = vpack.c.bf16 %v5178_v23, %v5176_v2  ;;  %v2418_v2 = vmax.f32 %v1995_v13, 0.0 }
 0x4db   : > { %v3032_v8 = vpop.f32.mrf.mxu1 }
 0x4dc   : > { %v3033_v51 = vadd.f32 %v10820_v1, %v3032_v8 }
 0x4dd   : > { %v4544_v21 = vpop.f32.mrf.mxu3 }
 0x4de   : > { %v3494_v33 = vmax.f32 %v3033_v51, 0.0  ;;  %v4545_v5 = vadd.f32 %v4544_v21, %v10947_v44 }
 0x4e0   : > { %v11001_v52 = vpack.c.bf16 %v3494_v33, %v3493_v28  ;;  %v5180_v37 = vmax.f32 %v4545_v5, 0.0  ;;  %v1997_v28 = vadd.f32 %v10715_v18, %v10076_v56  ;;  %v2002_v5 = vadd.f32 %v10715_v18, %v10086_v7 }
 0x4e2   : > { %13874 = vst [vmem:[#allocation165_spill] sm:$0xff] %v11001_v52 }
 0x4e3   : > { %v3035_v41 = vpop.f32.mrf.mxu1 }
 0x4e4   : > { %v3036_v10 = vadd.f32 %v10820_v1, %v3035_v41  ;;  %v2419_v41 = vmax.f32 %v1997_v28, 0.0 }
 0x4e5   : > { %v4546_v6 = vpop.f32.mrf.mxu3 }
 0x4e6   : > { %3074 = vmatmul.bf16.gmra.mxu2 %v2598_v63  ;;  %6736 = vmatmul.bf16.gmra.mxu1 %v5680_v48  ;;  %v4547_v60 = vadd.f32 %v4546_v6, %v10947_v44  ;;  %v3495_v43 = vmax.f32 %v3036_v10, 0.0  ;;  %v2602_v6 = vpack.c.bf16 %v2419_v41, %v2418_v2 }
 0x4e8   : > { %v5182_v8 = vmax.f32 %v4547_v60, 0.0  ;;  %v2000_v60 = vadd.f32 %v10715_v18, %v10082_v61  ;;  %v8918_v61 = vld [vmem:[%s13584_s7 + $0x38] sm:$0xff] }
 0x4e9   : > { %6059 = vmatpush.bf16.msrb.mxu0 %v8918_v61 }
 0x4ea   : > { %4588 = vmatmul.bf16.gmra.mxu3 %v10299_v46  ;;  %v5682_v33 = vpack.c.bf16 %v5182_v8, %v5180_v37  ;;  %v2420_v8 = vmax.f32 %v2000_v60, 0.0  ;;  %v2421_v37 = vmax.f32 %v2002_v5, 0.0 }
 0x4eb   : > { %v3037_v59 = vpop.f32.mrf.mxu1 }
 0x4ec   : > { %v3038_v38 = vadd.f32 %v10820_v1, %v3037_v59 }
 0x4ed   : > { %v4549_v34 = vpop.f32.mrf.mxu3 }
 0x4ee   : > { %v3496_v0 = vmax.f32 %v3038_v38, 0.0  ;;  %v4550_v14 = vadd.f32 %v4549_v34, %v10947_v44  ;;  %v8676_v34 = vld [vmem:[%s13582_s5 + $0x60] sm:$0xf] }
 0x4f0   : > { %v11012_v63 = vpack.c.bf16 %v3496_v0, %v3495_v43  ;;  %v5184_v59 = vmax.f32 %v4550_v14, 0.0 }
 0x4f2   : > { %13875 = vst [vmem:[#allocation166_spill] sm:$0xff] %v11012_v63 }
 0x4f3   : > { %v3040_v51 = vpop.f32.mrf.mxu1 }
 0x4f4   : > { %v3041_v21 = vadd.f32 %v10820_v1, %v3040_v51  ;;  %v8908_v51 = vld [vmem:[%s13582_s5 + $0x64] sm:$0xf0] }
 0x4f5   : > { %v4551_v23 = vpop.f32.mrf.mxu3  ;;  %v8677_v13 = vor.u32 %v8908_v51, %v8676_v34 }
 0x4f6   : > { %3079 = vmatmul.bf16.gmra.mxu2 %v2599_v30  ;;  %6741 = vmatmul.bf16.gmra.mxu1 %v5682_v33  ;;  %v4552_v45 = vadd.f32 %v4551_v23, %v10947_v44  ;;  %v3497_v56 = vmax.f32 %v3041_v21, 0.0  ;;  %v2603_v23 = vpack.c.bf16 %v2421_v37, %v2420_v8 }
 0x4f7   : > { %3862 = vmatpush.bf16.msrb.mxu2 %v8677_v13 }
 0x4f8   : > { %v5186_v10 = vmax.f32 %v4552_v45, 0.0 }
 0x4fa   : > { %4593 = vmatmul.bf16.gmra.mxu3 %v10313_v49  ;;  %v5684_v43 = vpack.c.bf16 %v5186_v10, %v5184_v59  ;;  %v2007_v10 = vadd.f32 %v10715_v18, %v10105_v32 }
 0x4fb   : > { %v3042_v17 = vpop.f32.mrf.mxu1 }
 0x4fc   : > { %v3043_v48 = vadd.f32 %v10820_v1, %v3042_v17  ;;  %v2423_v5 = vmax.f32 %v2007_v10, 0.0 }
 0x4fd   : > { %v4554_v47 = vpop.f32.mrf.mxu3 }
 0x4fe   : > { %v3498_v9 = vmax.f32 %v3043_v48, 0.0  ;;  %v4555_v41 = vadd.f32 %v4554_v47, %v10947_v44 }
 0x500   : > { %v11023_v30 = vpack.c.bf16 %v3498_v9, %v3497_v56  ;;  %v5188_v14 = vmax.f32 %v4555_v41, 0.0  ;;  %v2005_v9 = vadd.f32 %v10715_v18, %v10099_v16 }
 0x502   : > { %13876 = vst [vmem:[#allocation167_spill] sm:$0xff] %v11023_v30 }
 0x503   : > { %v3045_v38 = vpop.f32.mrf.mxu1 }
 0x504   : > { %v3046_v7 = vadd.f32 %v10820_v1, %v3045_v38  ;;  %v2422_v38 = vmax.f32 %v2005_v9, 0.0 }
 0x505   : > { %v4556_v0 = vpop.f32.mrf.mxu3 }
 0x506   : > { %3084 = vmatmul.bf16.gmra.mxu2 %v2600_v12  ;;  %6746 = vmatmul.bf16.gmra.mxu1 %v5684_v43  ;;  %v4557_v28 = vadd.f32 %v4556_v0, %v10947_v44  ;;  %v3499_v21 = vmax.f32 %v3046_v7, 0.0  ;;  %v2604_v37 = vpack.c.bf16 %v2423_v5, %v2422_v38 }
 0x508   : > { %v5190_v45 = vmax.f32 %v4557_v28, 0.0  ;;  %v2012_v28 = vadd.f32 %v10715_v18, %v10119_v58 }
 0x50a   : > { %4598 = vmatmul.bf16.gmra.mxu3 %v10327_v53  ;;  %v5686_v59 = vpack.c.bf16 %v5190_v45, %v5188_v14 }
 0x50b   : > { %v3047_v12 = vpop.f32.mrf.mxu1 }
 0x50c   : > { %v3048_v33 = vadd.f32 %v10820_v1, %v3047_v12  ;;  %v2010_v12 = vadd.f32 %v10715_v18, %v10113_v42 }
 0x50d   : > { %v4559_v2 = vpop.f32.mrf.mxu3 }
 0x50e   : > { %v3500_v17 = vmax.f32 %v3048_v33, 0.0  ;;  %v4560_v34 = vadd.f32 %v4559_v2, %v10947_v44  ;;  %v2425_v2 = vmax.f32 %v2012_v28, 0.0 }
 0x510   : > { %v11043_v48 = vpack.c.bf16 %v3500_v17, %v3499_v21  ;;  %v5192_v13 = vmax.f32 %v4560_v34, 0.0  ;;  %v2424_v21 = vmax.f32 %v2010_v12, 0.0 }
 0x512   : > { %13877 = vst [vmem:[#allocation168_spill] sm:$0xff] %v11043_v48 }
 0x513   : > { %v3050_v56 = vpop.f32.mrf.mxu1 }
 0x514   : > { %v3051_v47 = vadd.f32 %v10820_v1, %v3050_v56  ;;  %v11066_v56 = vpack.c.bf16 %v2425_v2, %v2424_v21 }
 0x515   : > { %v4561_v60 = vpop.f32.mrf.mxu3 }
 0x516   : > { %3089 = vmatmul.bf16.gmra.mxu2 %v2601_v35  ;;  %6751 = vmatmul.bf16.gmra.mxu1 %v5686_v59  ;;  %v4562_v0 = vadd.f32 %v4561_v60, %v10947_v44  ;;  %v3501_v32 = vmax.f32 %v3051_v47, 0.0  ;;  %v11074_v60 = vld [vmem:[%s13579_s2] ss:$0 sm:$0xff] }
 0x517   : > { %v2015_v38 = vadd.f32 %v11074_v60, %v10127_v4  ;;  %v2017_v47 = vadd.f32 %v11074_v60, %v10133_v22 }
 0x518   : > { %v5194_v61 = vmax.f32 %v4562_v0, 0.0 }
 0x51a   : > { %4603 = vmatmul.bf16.gmra.mxu3 %v10341_v55  ;;  %v5688_v33 = vpack.c.bf16 %v5194_v61, %v5192_v13 }
 0x51b   : > { %v3052_v43 = vpop.f32.mrf.mxu1 }
 0x51c   : > { %v3053_v8 = vadd.f32 %v10820_v1, %v3052_v43 }
 0x51d   : > { %v4564_v16 = vpop.f32.mrf.mxu3 }
 0x51e   : > { %v3502_v51 = vmax.f32 %v3053_v8, 0.0  ;;  %v4565_v42 = vadd.f32 %v4564_v16, %v10947_v44 }
 0x520   : > { %v11054_v35 = vpack.c.bf16 %v3502_v51, %v3501_v32  ;;  %v2426_v32 = vmax.f32 %v2015_v38, 0.0  ;;  %v2427_v51 = vmax.f32 %v2017_v47, 0.0 }
 0x522   : > { %13878 = vst [vmem:[#allocation169_spill] sm:$0xff] %v11054_v35  ;;  %v2606_v12 = vpack.c.bf16 %v2427_v51, %v2426_v32 }
 0x523   : > { %v11056_v7 = vpop.f32.mrf.mxu1 }
 0x524   : > { %13879 = vst [vmem:[#allocation170_spill] sm:$0xff] %v11056_v7 }
 0x525   : > { %v4566_v41 = vpop.f32.mrf.mxu3 }
 0x526   : > { %3094 = vmatmul.bf16.gmra.mxu2 %v2602_v6  ;;  %6756 = vmatmul.bf16.gmra.mxu1 %v5688_v33  ;;  %v4567_v14 = vadd.f32 %v4566_v41, %v10947_v44  ;;  %v5196_v6 = vmax.f32 %v4565_v42, 0.0 }
 0x528   : > { %v5198_v10 = vmax.f32 %v4567_v14, 0.0 }
 0x529   : > { %v3055_v17 = vpop.f32.mrf.mxu2 }
 0x52a   : > { %4608 = vmatmul.bf16.gmra.mxu3 %v10360_v57  ;;  %v3056_v58 = vadd.f32 %v10820_v1, %v3055_v17  ;;  %v5690_v8 = vpack.c.bf16 %v5198_v10, %v5196_v6  ;;  %v13884_v17 = vld [vmem:[#allocation8_spill] sm:$0xff]  ;;  %v13886_v10 = vld [vmem:[#allocation10_spill] sm:$0xff] }
 0x52b   : > { %v11063_v45 = vpop.f32.mrf.mxu1  ;;  %v2020_v14 = vadd.f32 %v11074_v60, %v13884_v17 }
 0x52c   : > { %13880 = vst [vmem:[#allocation171_spill] sm:$0xff] %v11063_v45  ;;  %v3503_v43 = vmax.f32 %v3056_v58, 0.0  ;;  %v2022_v58 = vadd.f32 %v11074_v60, %v13886_v10 }
 0x52d   : > { %v4569_v9 = vpop.f32.mrf.mxu3  ;;  %v2428_v47 = vmax.f32 %v2020_v14, 0.0  ;;  %v13892_v14 = vld [vmem:[#allocation13_spill] sm:$0xff] }
 0x52e   : > { %v4570_v22 = vadd.f32 %v4569_v9, %v10947_v44  ;;  %v2027_v10 = vadd.f32 %v11074_v60, %v13892_v14  ;;  %v13896_v14 = vld [vmem:[#allocation14_spill] sm:$0xff] }
 0x530   : > { %v5200_v21 = vmax.f32 %v4570_v22, 0.0 }
 0x531   : > { %v3057_v18 = vpop.f32.mrf.mxu2 }
 0x532   : > { %v3058_v59 = vadd.f32 %v10820_v1, %v3057_v18 }
 0x533   : > { %v11078_v5 = vpop.f32.mrf.mxu1 }
 0x534   : > { %13881 = vst [vmem:[#allocation172_spill] sm:$0xff] %v11078_v5  ;;  %v3504_v0 = vmax.f32 %v3058_v59, 0.0 }
 0x535   : > { %v4571_v16 = vpop.f32.mrf.mxu3 }
 0x536   : > { %3099 = vmatmul.bf16.gmra.mxu2 %v2603_v23  ;;  %6761 = vmatmul.bf16.gmra.mxu1 %v5690_v8  ;;  %v11082_v34 = vpack.c.bf16 %v3504_v0, %v3503_v43  ;;  %v4572_v4 = vadd.f32 %v4571_v16, %v10947_v44  ;;  %v2429_v43 = vmax.f32 %v2022_v58, 0.0  ;;  %v13888_v8 = vld [vmem:[#allocation59_spill] sm:$0xff] }
 0x538   : > { %13882 = vst [vmem:[#allocation173_spill] sm:$0xff] %v11082_v34  ;;  %v5202_v33 = vmax.f32 %v4572_v4, 0.0  ;;  %v2607_v51 = vpack.c.bf16 %v2429_v43, %v2428_v47  ;;  %v2431_v47 = vmax.f32 %v2027_v10, 0.0  ;;  %v2030_v10 = vadd.f32 %v11074_v60, %v13896_v14 }
 0x539   : > { %v3060_v61 = vpop.f32.mrf.mxu2 }
 0x53a   : > { %4613 = vmatmul.bf16.gmra.mxu3 %v10374_v39  ;;  %v3061_v41 = vadd.f32 %v10820_v1, %v3060_v61  ;;  %v5692_v59 = vpack.c.bf16 %v5202_v33, %v5200_v21  ;;  %v13890_v21 = vld [vmem:[#allocation11_spill] sm:$0xff] }
 0x53b   : > { %v11085_v13 = vpop.f32.mrf.mxu1 }
 0x53c   : > { %13883 = vst [vmem:[#allocation174_spill] sm:$0xff] %v11085_v13  ;;  %v3505_v18 = vmax.f32 %v3061_v41, 0.0 }
 0x53d   : > { %v4574_v28 = vpop.f32.mrf.mxu3 }
 0x53e   : > { %v4575_v4 = vadd.f32 %v4574_v28, %v10947_v44 }
 0x540   : > { %v5204_v41 = vmax.f32 %v4575_v4, 0.0 }
 0x541   : > { %v3062_v23 = vpop.f32.mrf.mxu2 }
 0x542   : > { %v3063_v2 = vadd.f32 %v10820_v1, %v3062_v23 }
 0x543   : > { %v11093_v42 = vpop.f32.mrf.mxu1 }
 0x544   : > { %13885 = vst [vmem:[#allocation8_spill] sm:$0xff] %v11093_v42  ;;  %v3506_v6 = vmax.f32 %v3063_v2, 0.0  ;;  %v2025_v2 = vadd.f32 %v11074_v60, %v13890_v21 }
 0x545   : > { %v4576_v38 = vpop.f32.mrf.mxu3 }
 0x546   : > { %3104 = vmatmul.bf16.gmra.mxu2 %v2604_v37  ;;  %6766 = vmatmul.bf16.gmra.mxu1 %v5692_v59  ;;  %v11097_v9 = vpack.c.bf16 %v3506_v6, %v3505_v18  ;;  %v4577_v32 = vadd.f32 %v4576_v38, %v10947_v44  ;;  %v2430_v38 = vmax.f32 %v2025_v2, 0.0 }
 0x548   : > { %13887 = vst [vmem:[#allocation10_spill] sm:$0xff] %v11097_v9  ;;  %v5206_v22 = vmax.f32 %v4577_v32, 0.0 }
 0x549   : > { %v3065_v0 = vpop.f32.mrf.mxu2 }
 0x54a   : > { %4618 = vmatmul.bf16.gmra.mxu3 %v13888_v8  ;;  %v3066_v33 = vadd.f32 %v10820_v1, %v3065_v0  ;;  %v5694_v6 = vpack.c.bf16 %v5206_v22, %v5204_v41  ;;  %v13894_v0 = vld [vmem:[#allocation62_spill] sm:$0xff] }
 0x54b   : > { %v11100_v16 = vpop.f32.mrf.mxu1 }
 0x54c   : > { %13889 = vst [vmem:[#allocation175_spill] sm:$0xff] %v11100_v16  ;;  %v3507_v58 = vmax.f32 %v3066_v33, 0.0 }
 0x54d   : > { %v4579_v61 = vpop.f32.mrf.mxu3 }
 0x54e   : > { %v4580_v22 = vadd.f32 %v4579_v61, %v10947_v44 }
 0x550   : > { %v5208_v21 = vmax.f32 %v4580_v22, 0.0 }
 0x551   : > { %v3067_v37 = vpop.f32.mrf.mxu2 }
 0x552   : > { %v3068_v23 = vadd.f32 %v10820_v1, %v3067_v37  ;;  %v11119_v37 = vpack.c.bf16 %v2431_v47, %v2430_v38 }
 0x553   : > { %v11108_v17 = vpop.f32.mrf.mxu1 }
 0x554   : > { %13891 = vst [vmem:[#allocation11_spill] sm:$0xff] %v11108_v17  ;;  %v3508_v18 = vmax.f32 %v3068_v23, 0.0 }
 0x555   : > { %v4581_v59 = vpop.f32.mrf.mxu3 }
 0x556   : > { %3109 = vmatmul.bf16.gmra.mxu2 %v11066_v56  ;;  %6771 = vmatmul.bf16.gmra.mxu1 %v5694_v6  ;;  %v11113_v28 = vpack.c.bf16 %v3508_v18, %v3507_v58  ;;  %v4582_v4 = vadd.f32 %v4581_v59, %v10947_v44  ;;  %v13898_v18 = vld [vmem:[#allocation16_spill] sm:$0xff] }
 0x557   : > { %v2032_v6 = vadd.f32 %v11074_v60, %v13898_v18 }
 0x558   : > { %13893 = vst [vmem:[#allocation13_spill] sm:$0xff] %v11113_v28  ;;  %v5210_v41 = vmax.f32 %v4582_v4, 0.0 }
 0x559   : > { %v3070_v43 = vpop.f32.mrf.mxu2  ;;  %v2433_v4 = vmax.f32 %v2032_v6, 0.0  ;;  %v13902_v6 = vld [vmem:[#allocation17_spill] sm:$0xff] }
 0x55a   : > { %4623 = vmatmul.bf16.gmra.mxu3 %v13894_v0  ;;  %v3071_v56 = vadd.f32 %v10820_v1, %v3070_v43  ;;  %v5696_v47 = vpack.c.bf16 %v5210_v41, %v5208_v21  ;;  %v2432_v43 = vmax.f32 %v2030_v10, 0.0 }
 0x55b   : > { %v11116_v32 = vpop.f32.mrf.mxu1 }
 0x55c   : > { %13895 = vst [vmem:[#allocation176_spill] sm:$0xff] %v11116_v32  ;;  %v3509_v59 = vmax.f32 %v3071_v56, 0.0 }
 0x55d   : > { %v4584_v33 = vpop.f32.mrf.mxu3 }
 0x55e   : > { %v4585_v56 = vadd.f32 %v4584_v33, %v10947_v44 }
 0x561   : > { %v3072_v23 = vpop.f32.mrf.mxu2 }
 0x562   : > { %v3073_v2 = vadd.f32 %v10820_v1, %v3072_v23  ;;  %v13900_v23 = vld [vmem:[#allocation65_spill] sm:$0xff] }
 0x563   : > { %v11126_v58 = vpop.f32.mrf.mxu1 }
 0x564   : > { %13897 = vst [vmem:[#allocation14_spill] sm:$0xff] %v11126_v58  ;;  %v3510_v38 = vmax.f32 %v3073_v2, 0.0  ;;  %v11136_v58 = vpack.c.bf16 %v2433_v4, %v2432_v43  ;;  %v5212_v2 = vmax.f32 %v4585_v56, 0.0 }
 0x565   : > { %v4586_v0 = vpop.f32.mrf.mxu3 }
 0x566   : > { %3114 = vmatmul.bf16.gmra.mxu2 %v2606_v12  ;;  %6776 = vmatmul.bf16.gmra.mxu1 %v5696_v47  ;;  %v11130_v61 = vpack.c.bf16 %v3510_v38, %v3509_v59  ;;  %v4587_v14 = vadd.f32 %v4586_v0, %v10947_v44  ;;  %v2035_v59 = vadd.f32 %v11074_v60, %v13902_v6  ;;  %v13904_v47 = vld [vmem:[#allocation19_spill] sm:$0xff] }
 0x567   : > { %v2037_v0 = vadd.f32 %v11074_v60, %v13904_v47 }
 0x568   : > { %13899 = vst [vmem:[#allocation16_spill] sm:$0xff] %v11130_v61  ;;  %v5214_v41 = vmax.f32 %v4587_v14, 0.0 }
 0x569   : > { %v3075_v22 = vpop.f32.mrf.mxu2  ;;  %v2435_v14 = vmax.f32 %v2037_v0, 0.0  ;;  %v13908_v0 = vld [vmem:[#allocation20_spill] sm:$0xff] }
 0x56a   : > { %4628 = vmatmul.bf16.gmra.mxu3 %v13900_v23  ;;  %v3076_v12 = vadd.f32 %v10820_v1, %v3075_v22  ;;  %v5698_v23 = vpack.c.bf16 %v5214_v41, %v5212_v2  ;;  %v2434_v22 = vmax.f32 %v2035_v59, 0.0 }
 0x56b   : > { %v11133_v32 = vpop.f32.mrf.mxu1 }
 0x56c   : > { %13901 = vst [vmem:[#allocation177_spill] sm:$0xff] %v11133_v32  ;;  %v3511_v43 = vmax.f32 %v3076_v12, 0.0 }
 0x56d   : > { %v4589_v18 = vpop.f32.mrf.mxu3 }
 0x56e   : > { %v4590_v12 = vadd.f32 %v4589_v18, %v10947_v44 }
 0x570   : > { %v5216_v2 = vmax.f32 %v4590_v12, 0.0 }
 0x571   : > { %v3077_v21 = vpop.f32.mrf.mxu2 }
 0x572   : > { %v3078_v10 = vadd.f32 %v10820_v1, %v3077_v21  ;;  %v13906_v21 = vld [vmem:[#allocation68_spill] sm:$0xff] }
 0x573   : > { %v11143_v38 = vpop.f32.mrf.mxu1 }
 0x574   : > { %13903 = vst [vmem:[#allocation17_spill] sm:$0xff] %v11143_v38  ;;  %v3512_v4 = vmax.f32 %v3078_v10, 0.0  ;;  %v11153_v38 = vpack.c.bf16 %v2435_v14, %v2434_v22  ;;  %v11160_v10 = vld [vmem:[%s13581_s4] ss:$0 sm:$0xff] }
 0x575   : > { %v4591_v32 = vpop.f32.mrf.mxu3 }
 0x576   : > { %3119 = vmatmul.bf16.gmra.mxu2 %v2607_v51  ;;  %6781 = vmatmul.bf16.gmra.mxu1 %v5698_v23  ;;  %v11147_v33 = vpack.c.bf16 %v3512_v4, %v3511_v43  ;;  %v4592_v6 = vadd.f32 %v4591_v32, %v10947_v44  ;;  %v2040_v32 = vadd.f32 %v11074_v60, %v13908_v0  ;;  %v13910_v4 = vld [vmem:[#allocation22_spill] sm:$0xff]  ;;  %v8906_v0 = vld [vmem:[%s13582_s5 + $0x54] sm:$0xf0] }
 0x577   : > { %v2042_v18 = vadd.f32 %v11074_v60, %v13910_v4 }
 0x578   : > { %13905 = vst [vmem:[#allocation19_spill] sm:$0xff] %v11147_v33  ;;  %v5218_v41 = vmax.f32 %v4592_v6, 0.0  ;;  %v2436_v12 = vmax.f32 %v2040_v32, 0.0 }
 0x579   : > { %v3080_v56 = vpop.f32.mrf.mxu2 }
 0x57a   : > { %4633 = vmatmul.bf16.gmra.mxu3 %v13906_v21  ;;  %v3081_v51 = vadd.f32 %v10820_v1, %v3080_v56  ;;  %v5700_v1 = vpack.c.bf16 %v5218_v41, %v5216_v2  ;;  %v2437_v21 = vmax.f32 %v2042_v18, 0.0  ;;  %v8917_v2 = vld [vmem:[%s13584_s7 + $0x30] sm:$0xff] }
 0x57b   : > { %v11150_v17 = vpop.f32.mrf.mxu1  ;;  %6060 = vmatpush.bf16.msrb.mxu0 %v8917_v2 }
 0x57c   : > { %13907 = vst [vmem:[#allocation178_spill] sm:$0xff] %v11150_v17  ;;  %v3513_v22 = vmax.f32 %v3081_v51, 0.0  ;;  %v11185_v32 = vpack.c.bf16 %v2437_v21, %v2436_v12 }
 0x57d   : > { %v4594_v47 = vpop.f32.mrf.mxu3 }
 0x581   : > { %v3082_v23 = vpop.f32.mrf.mxu2 }
 0x582   : > { %v3083_v59 = vadd.f32 %v11160_v10, %v3082_v23  ;;  %v8668_v23 = vld [vmem:[%s13582_s5 + $0x50] sm:$0xf] }
 0x583   : > { %v11165_v43 = vpop.f32.mrf.mxu1  ;;  %v8669_v51 = vor.u32 %v8906_v0, %v8668_v23 }
 0x584   : > { %13909 = vst [vmem:[#allocation20_spill] sm:$0xff] %v11165_v43  ;;  %v3514_v14 = vmax.f32 %v3083_v59, 0.0  ;;  %v13912_v59 = vld [vmem:[#allocation71_spill] sm:$0xff]  ;;  %v13916_v43 = vld [vmem:[#allocation25_spill] sm:$0xff] }
 0x585   : > { %v4596_v56 = vpop.f32.mrf.mxu3  ;;  %3863 = vmatpush.bf16.msrb.mxu2 %v8669_v51  ;;  %v13914_v51 = vld [vmem:[#allocation23_spill] sm:$0xff]  ;;  %v2047_v21 = vadd.f32 %v11074_v60, %v13916_v43 }
 0x586   : > { %3124 = vmatmul.bf16.gmra.mxu2 %v11119_v37  ;;  %6786 = vmatmul.bf16.gmra.mxu1 %v5700_v1  ;;  %v11170_v6 = vpack.c.bf16 %v3514_v14, %v3513_v22  ;;  %v4597_v37 = vadd.f32 %v4596_v56, %v10947_v44  ;;  %v4595_v22 = vadd.f32 %v4594_v47, %v10947_v44 }
 0x587   : > { %v2045_v56 = vadd.f32 %v11074_v60, %v13914_v51  ;;  %v2439_v2 = vmax.f32 %v2047_v21, 0.0 }
 0x588   : > { %13911 = vst [vmem:[#allocation22_spill] sm:$0xff] %v11170_v6  ;;  %v5222_v14 = vmax.f32 %v4597_v37, 0.0  ;;  %v5220_v0 = vmax.f32 %v4595_v22, 0.0 }
 0x589   : > { %v3085_v4 = vpop.f32.mrf.mxu2  ;;  %v2438_v37 = vmax.f32 %v2045_v56, 0.0 }
 0x58a   : > { %4638 = vmatmul.bf16.gmra.mxu3 %v13912_v59  ;;  %v3086_v1 = vadd.f32 %v11160_v10, %v3085_v4  ;;  %v5702_v8 = vpack.c.bf16 %v5222_v14, %v5220_v0  ;;  %v13919_v0 = vld [vmem:[#allocation26_spill] sm:$0xff] }
 0x58b   : > { %v11179_v41 = vpop.f32.mrf.mxu1  ;;  %v2612_v16 = vpack.c.bf16 %v2439_v2, %v2438_v37  ;;  %v2050_v56 = vadd.f32 %v11074_v60, %v13919_v0 }
 0x58c   : > { %13913 = vst [vmem:[#allocation179_spill] sm:$0xff] %v11179_v41  ;;  %v3515_v12 = vmax.f32 %v3086_v1, 0.0 }
 0x58d   : > { %v4599_v18 = vpop.f32.mrf.mxu3 }
 0x591   : > { %v3087_v23 = vpop.f32.mrf.mxu2 }
 0x592   : > { %v3088_v59 = vadd.f32 %v11160_v10, %v3087_v23  ;;  %v13917_v23 = vld [vmem:[#allocation74_spill] sm:$0xff] }
 0x593   : > { %v11192_v41 = vpop.f32.mrf.mxu1 }
 0x594   : > { %13915 = vst [vmem:[#allocation23_spill] sm:$0xff] %v11192_v41  ;;  %v3516_v17 = vmax.f32 %v3088_v59, 0.0  ;;  %v4600_v59 = vadd.f32 %v4599_v18, %v10947_v44  ;;  %v2440_v18 = vmax.f32 %v2050_v56, 0.0  ;;  %v13924_v56 = vld [vmem:[#allocation29_spill] sm:$0xff] }
 0x595   : > { %v4601_v47 = vpop.f32.mrf.mxu3 }
 0x596   : > { %3129 = vmatmul.bf16.gmra.mxu2 %v11136_v58  ;;  %6791 = vmatmul.bf16.gmra.mxu1 %v5702_v8  ;;  %v11197_v4 = vpack.c.bf16 %v3516_v17, %v3515_v12  ;;  %v4602_v41 = vadd.f32 %v4601_v47, %v10947_v44  ;;  %v5224_v8 = vmax.f32 %v4600_v59, 0.0  ;;  %v13921_v12 = vld [vmem:[#allocation28_spill] sm:$0xff] }
 0x598   : > { %v5226_v14 = vmax.f32 %v4602_v41, 0.0 }
 0x599   : > { %v3090_v22 = vpop.f32.mrf.mxu2 }
 0x59a   : > { %4643 = vmatmul.bf16.gmra.mxu3 %v13917_v23  ;;  %v3091_v1 = vadd.f32 %v11160_v10, %v3090_v22  ;;  %v2052_v23 = vadd.f32 %v11074_v60, %v13921_v12  ;;  %v5704_v2 = vpack.c.bf16 %v5226_v14, %v5224_v8 }
 0x59b   : > { %v11200_v51 = vpop.f32.mrf.mxu1 }
 0x59c   : > { %13918 = vst [vmem:[#allocation25_spill] sm:$0xff] %v11200_v51  ;;  %v3517_v47 = vmax.f32 %v3091_v1, 0.0  ;;  %v2441_v22 = vmax.f32 %v2052_v23, 0.0  ;;  %v2055_v23 = vadd.f32 %v11074_v60, %v13924_v56 }
 0x59d   : > { %v4604_v43 = vpop.f32.mrf.mxu3 }
 0x59e   : > { %v2613_v42 = vpack.c.bf16 %v2441_v22, %v2440_v18  ;;  %v4605_v1 = vadd.f32 %v4604_v43, %v10947_v44 }
 0x5a1   : > { %v3092_v58 = vpop.f32.mrf.mxu2 }
 0x5a2   : > { %v3093_v17 = vadd.f32 %v11160_v10, %v3092_v58  ;;  %v13922_v58 = vld [vmem:[#allocation77_spill] sm:$0xff] }
 0x5a3   : > { %v11208_v21 = vpop.f32.mrf.mxu1 }
 0x5a4   : > { %13920 = vst [vmem:[#allocation26_spill] sm:$0xff] %v11208_v21  ;;  %v3518_v37 = vmax.f32 %v3093_v17, 0.0  ;;  %v5228_v17 = vmax.f32 %v4605_v1, 0.0 }
 0x5a5   : > { %v4606_v51 = vpop.f32.mrf.mxu3 }
 0x5a6   : > { %3134 = vmatmul.bf16.gmra.mxu2 %v11153_v38  ;;  %6796 = vmatmul.bf16.gmra.mxu1 %v5704_v2  ;;  %v11213_v41 = vpack.c.bf16 %v3518_v37, %v3517_v47  ;;  %v4607_v21 = vadd.f32 %v4606_v51, %v10947_v44  ;;  %v13926_v2 = vld [vmem:[#allocation30_spill] sm:$0xff] }
 0x5a8   : > { %v5230_v14 = vmax.f32 %v4607_v21, 0.0  ;;  %v2442_v21 = vmax.f32 %v2055_v23, 0.0  ;;  %v13930_v23 = vld [vmem:[#allocation31_spill] sm:$0xff] }
 0x5a9   : > { %v3095_v59 = vpop.f32.mrf.mxu2 }
 0x5aa   : > { %4648 = vmatmul.bf16.gmra.mxu3 %v13922_v58  ;;  %v3096_v8 = vadd.f32 %v11160_v10, %v3095_v59  ;;  %v2057_v58 = vadd.f32 %v11074_v60, %v13926_v2  ;;  %v5706_v22 = vpack.c.bf16 %v5230_v14, %v5228_v17 }
 0x5ab   : > { %v11216_v0 = vpop.f32.mrf.mxu1 }
 0x5ac   : > { %13923 = vst [vmem:[#allocation28_spill] sm:$0xff] %v11216_v0  ;;  %v3519_v51 = vmax.f32 %v3096_v8, 0.0  ;;  %v2443_v59 = vmax.f32 %v2057_v58, 0.0  ;;  %v2060_v58 = vadd.f32 %v11074_v60, %v13930_v23 }
 0x5ad   : > { %v4609_v12 = vpop.f32.mrf.mxu3 }
 0x5ae   : > { %v2614_v39 = vpack.c.bf16 %v2443_v59, %v2442_v21  ;;  %v4610_v8 = vadd.f32 %v4609_v12, %v10947_v44 }
 0x5b1   : > { %v3097_v38 = vpop.f32.mrf.mxu2 }
 0x5b2   : > { %v3098_v47 = vadd.f32 %v11160_v10, %v3097_v38  ;;  %v13928_v38 = vld [vmem:[#allocation80_spill] sm:$0xff] }
 0x5b3   : > { %v11224_v37 = vpop.f32.mrf.mxu1 }
 0x5b4   : > { %13925 = vst [vmem:[#allocation29_spill] sm:$0xff] %v11224_v37  ;;  %v3520_v18 = vmax.f32 %v3098_v47, 0.0  ;;  %v5232_v47 = vmax.f32 %v4610_v8, 0.0 }
 0x5b5   : > { %v4611_v0 = vpop.f32.mrf.mxu3 }
 0x5b6   : > { %3139 = vmatmul.bf16.gmra.mxu2 %v11185_v32  ;;  %6801 = vmatmul.bf16.gmra.mxu1 %v5706_v22  ;;  %v11229_v43 = vpack.c.bf16 %v3520_v18, %v3519_v51  ;;  %v4612_v37 = vadd.f32 %v4611_v0, %v10947_v44  ;;  %v13932_v22 = vld [vmem:[#allocation33_spill] sm:$0xff] }
 0x5b8   : > { %13927 = vst [vmem:[#allocation30_spill] sm:$0xff] %v11229_v43  ;;  %v5234_v14 = vmax.f32 %v4612_v37, 0.0  ;;  %v2444_v37 = vmax.f32 %v2060_v58, 0.0  ;;  %v13936_v58 = vld [vmem:[#allocation34_spill] sm:$0xff] }
 0x5b9   : > { %v3100_v1 = vpop.f32.mrf.mxu2 }
 0x5ba   : > { %4653 = vmatmul.bf16.gmra.mxu3 %v13928_v38  ;;  %v3101_v17 = vadd.f32 %v11160_v10, %v3100_v1  ;;  %v2062_v38 = vadd.f32 %v11074_v60, %v13932_v22  ;;  %v5708_v59 = vpack.c.bf16 %v5234_v14, %v5232_v47 }
 0x5bb   : > { %v11232_v56 = vpop.f32.mrf.mxu1 }
 0x5bc   : > { %13929 = vst [vmem:[#allocation180_spill] sm:$0xff] %v11232_v56  ;;  %v3521_v0 = vmax.f32 %v3101_v17, 0.0  ;;  %v2445_v1 = vmax.f32 %v2062_v38, 0.0  ;;  %v2065_v38 = vadd.f32 %v11074_v60, %v13936_v58 }
 0x5bd   : > { %v4614_v2 = vpop.f32.mrf.mxu3 }
 0x5be   : > { %v4615_v17 = vadd.f32 %v4614_v2, %v10947_v44 }
 0x5c0   : > { %v5236_v47 = vmax.f32 %v4615_v17, 0.0 }
 0x5c1   : > { %v3102_v32 = vpop.f32.mrf.mxu2 }
 0x5c2   : > { %v3103_v51 = vadd.f32 %v11160_v10, %v3102_v32  ;;  %v13934_v32 = vld [vmem:[#allocation83_spill] sm:$0xff] }
 0x5c3   : > { %v11240_v18 = vpop.f32.mrf.mxu1 }
 0x5c4   : > { %13931 = vst [vmem:[#allocation31_spill] sm:$0xff] %v11240_v18  ;;  %v3522_v21 = vmax.f32 %v3103_v51, 0.0  ;;  %v2615_v18 = vpack.c.bf16 %v2445_v1, %v2444_v37 }
 0x5c5   : > { %v4616_v56 = vpop.f32.mrf.mxu3 }
 0x5c6   : > { %3144 = vmatmul.bf16.gmra.mxu2 %v2612_v16  ;;  %6806 = vmatmul.bf16.gmra.mxu1 %v5708_v59  ;;  %v11244_v12 = vpack.c.bf16 %v3522_v21, %v3521_v0  ;;  %v4617_v23 = vadd.f32 %v4616_v56, %v10947_v44  ;;  %v13938_v21 = vld [vmem:[#allocation36_spill] sm:$0xff] }
 0x5c7   : > { %v2067_v59 = vadd.f32 %v11074_v60, %v13938_v21 }
 0x5c8   : > { %13933 = vst [vmem:[#allocation33_spill] sm:$0xff] %v11244_v12  ;;  %v5238_v51 = vmax.f32 %v4617_v23, 0.0 }
 0x5c9   : > { %v3105_v8 = vpop.f32.mrf.mxu2  ;;  %v2447_v23 = vmax.f32 %v2067_v59, 0.0 }
 0x5ca   : > { %4658 = vmatmul.bf16.gmra.mxu3 %v13934_v32  ;;  %v3106_v14 = vadd.f32 %v11160_v10, %v3105_v8  ;;  %v5710_v1 = vpack.c.bf16 %v5238_v51, %v5236_v47  ;;  %v2446_v8 = vmax.f32 %v2065_v38, 0.0  ;;  %v13942_v38 = vld [vmem:[#allocation37_spill] sm:$0xff] }
 0x5cb   : > { %v11247_v13 = vpop.f32.mrf.mxu1  ;;  %v2070_v59 = vadd.f32 %v11074_v60, %v13942_v38 }
 0x5cc   : > { %13935 = vst [vmem:[#allocation181_spill] sm:$0xff] %v11247_v13  ;;  %v3523_v56 = vmax.f32 %v3106_v14, 0.0 }
 0x5cd   : > { %v4619_v5 = vpop.f32.mrf.mxu3 }
 0x5ce   : > { %v4620_v14 = vadd.f32 %v4619_v5, %v10947_v44 }
 0x5d0   : > { %v5240_v47 = vmax.f32 %v4620_v14, 0.0 }
 0x5d1   : > { %v3107_v16 = vpop.f32.mrf.mxu2 }
 0x5d2   : > { %v3108_v22 = vadd.f32 %v11160_v10, %v3107_v16  ;;  %v13940_v16 = vld [vmem:[#allocation86_spill] sm:$0xff] }
 0x5d3   : > { %v11255_v0 = vpop.f32.mrf.mxu1 }
 0x5d4   : > { %13937 = vst [vmem:[#allocation34_spill] sm:$0xff] %v11255_v0  ;;  %v3524_v37 = vmax.f32 %v3108_v22, 0.0  ;;  %v2616_v0 = vpack.c.bf16 %v2447_v23, %v2446_v8 }
 0x5d5   : > { %v4621_v32 = vpop.f32.mrf.mxu3 }
 0x5d6   : > { %3149 = vmatmul.bf16.gmra.mxu2 %v2613_v42  ;;  %6811 = vmatmul.bf16.gmra.mxu1 %v5710_v1  ;;  %v11259_v2 = vpack.c.bf16 %v3524_v37, %v3523_v56  ;;  %v4622_v58 = vadd.f32 %v4621_v32, %v10947_v44  ;;  %v13944_v37 = vld [vmem:[#allocation39_spill] sm:$0xff] }
 0x5d7   : > { %v2072_v1 = vadd.f32 %v11074_v60, %v13944_v37 }
 0x5d8   : > { %13939 = vst [vmem:[#allocation36_spill] sm:$0xff] %v11259_v2  ;;  %v5242_v22 = vmax.f32 %v4622_v58, 0.0 }
 0x5d9   : > { %v3110_v17 = vpop.f32.mrf.mxu2  ;;  %v2449_v58 = vmax.f32 %v2072_v1, 0.0  ;;  %v13948_v1 = vld [vmem:[#allocation40_spill] sm:$0xff] }
 0x5da   : > { %4663 = vmatmul.bf16.gmra.mxu3 %v13940_v16  ;;  %v3111_v51 = vadd.f32 %v11160_v10, %v3110_v17  ;;  %v5712_v23 = vpack.c.bf16 %v5242_v22, %v5240_v47  ;;  %v2448_v17 = vmax.f32 %v2070_v59, 0.0 }
 0x5db   : > { %v11262_v13 = vpop.f32.mrf.mxu1 }
 0x5dc   : > { %13941 = vst [vmem:[#allocation182_spill] sm:$0xff] %v11262_v13  ;;  %v3525_v32 = vmax.f32 %v3111_v51, 0.0 }
 0x5dd   : > { %v4624_v57 = vpop.f32.mrf.mxu3 }
 0x5de   : > { %v4625_v51 = vadd.f32 %v4624_v57, %v10947_v44 }
 0x5e1   : > { %v3112_v42 = vpop.f32.mrf.mxu2 }
 0x5e2   : > { %v3113_v21 = vadd.f32 %v11160_v10, %v3112_v42  ;;  %v13946_v42 = vld [vmem:[#allocation89_spill] sm:$0xff] }
 0x5e3   : > { %v11270_v56 = vpop.f32.mrf.mxu1 }
 0x5e4   : > { %13943 = vst [vmem:[#allocation37_spill] sm:$0xff] %v11270_v56  ;;  %v3526_v8 = vmax.f32 %v3113_v21, 0.0  ;;  %v11280_v56 = vpack.c.bf16 %v2449_v58, %v2448_v17  ;;  %v5244_v21 = vmax.f32 %v4625_v51, 0.0 }
 0x5e5   : > { %v4626_v16 = vpop.f32.mrf.mxu3 }
 0x5e6   : > { %3154 = vmatmul.bf16.gmra.mxu2 %v2614_v39  ;;  %6816 = vmatmul.bf16.gmra.mxu1 %v5712_v23  ;;  %v11274_v5 = vpack.c.bf16 %v3526_v8, %v3525_v32  ;;  %v4627_v38 = vadd.f32 %v4626_v16, %v10947_v44  ;;  %v2075_v32 = vadd.f32 %v11074_v60, %v13948_v1  ;;  %v13950_v23 = vld [vmem:[#allocation42_spill] sm:$0xff] }
 0x5e7   : > { %v2077_v16 = vadd.f32 %v11074_v60, %v13950_v23 }
 0x5e8   : > { %13945 = vst [vmem:[#allocation39_spill] sm:$0xff] %v11274_v5  ;;  %v5246_v22 = vmax.f32 %v4627_v38, 0.0 }
 0x5e9   : > { %v3115_v14 = vpop.f32.mrf.mxu2  ;;  %v2451_v38 = vmax.f32 %v2077_v16, 0.0 }
 0x5ea   : > { %4668 = vmatmul.bf16.gmra.mxu3 %v13946_v42  ;;  %v3116_v39 = vadd.f32 %v11160_v10, %v3115_v14  ;;  %v5714_v42 = vpack.c.bf16 %v5246_v22, %v5244_v21  ;;  %v2450_v14 = vmax.f32 %v2075_v32, 0.0  ;;  %v13954_v32 = vld [vmem:[#allocation43_spill] sm:$0xff] }
 0x5eb   : > { %v11277_v13 = vpop.f32.mrf.mxu1  ;;  %v2080_v16 = vadd.f32 %v11074_v60, %v13954_v32 }
 0x5ec   : > { %13947 = vst [vmem:[#allocation183_spill] sm:$0xff] %v11277_v13  ;;  %v3527_v17 = vmax.f32 %v3116_v39, 0.0 }
 0x5ed   : > { %v4629_v37 = vpop.f32.mrf.mxu3 }
 0x5ee   : > { %v4630_v39 = vadd.f32 %v4629_v37, %v10947_v44 }
 0x5f0   : > { %v5248_v21 = vmax.f32 %v4630_v39, 0.0  ;;  %v8660_v39 = vld [vmem:[%s13582_s5 + $0x40] sm:$0xf] }
 0x5f1   : > { %v3117_v47 = vpop.f32.mrf.mxu2 }
 0x5f2   : > { %v3118_v59 = vadd.f32 %v11160_v10, %v3117_v47  ;;  %v13952_v47 = vld [vmem:[#allocation92_spill] sm:$0xff] }
 0x5f3   : > { %v11287_v8 = vpop.f32.mrf.mxu1 }
 0x5f4   : > { %13949 = vst [vmem:[#allocation40_spill] sm:$0xff] %v11287_v8  ;;  %v3528_v58 = vmax.f32 %v3118_v59, 0.0  ;;  %v11297_v8 = vpack.c.bf16 %v2451_v38, %v2450_v14 }
 0x5f5   : > { %v4631_v13 = vpop.f32.mrf.mxu3 }
 0x5f6   : > { %3159 = vmatmul.bf16.gmra.mxu2 %v2615_v18  ;;  %6821 = vmatmul.bf16.gmra.mxu1 %v5714_v42  ;;  %v11291_v57 = vpack.c.bf16 %v3528_v58, %v3527_v17  ;;  %v4632_v1 = vadd.f32 %v4631_v13, %v10947_v44  ;;  %v13956_v58 = vld [vmem:[#allocation45_spill] sm:$0xff] }
 0x5f7   : > { %v2082_v13 = vadd.f32 %v11074_v60, %v13956_v58 }
 0x5f8   : > { %13951 = vst [vmem:[#allocation42_spill] sm:$0xff] %v11291_v57  ;;  %v5250_v22 = vmax.f32 %v4632_v1, 0.0 }
 0x5f9   : > { %v3120_v51 = vpop.f32.mrf.mxu2  ;;  %v2453_v1 = vmax.f32 %v2082_v13, 0.0 }
 0x5fa   : > { %4673 = vmatmul.bf16.gmra.mxu3 %v13952_v47  ;;  %v3121_v18 = vadd.f32 %v11160_v10, %v3120_v51  ;;  %v5716_v47 = vpack.c.bf16 %v5250_v22, %v5248_v21  ;;  %v2452_v51 = vmax.f32 %v2080_v16, 0.0 }
 0x5fb   : > { %v11294_v45 = vpop.f32.mrf.mxu1 }
 0x5fc   : > { %13953 = vst [vmem:[#allocation184_spill] sm:$0xff] %v11294_v45  ;;  %v3529_v14 = vmax.f32 %v3121_v18, 0.0  ;;  %v13958_v18 = vld [vmem:[#allocation95_spill] sm:$0xff]  ;;  %v11323_v21 = vpack.c.bf16 %v2453_v1, %v2452_v51 }
 0x5fd   : > { %v4634_v23 = vpop.f32.mrf.mxu3 }
 0x5fe   : > { %v4635_v16 = vadd.f32 %v4634_v23, %v10947_v44 }
 0x601   : > { %v3122_v42 = vpop.f32.mrf.mxu2 }
 0x602   : > { %v3123_v59 = vadd.f32 %v11160_v10, %v3122_v42  ;;  %v8904_v42 = vld [vmem:[%s13582_s5 + $0x44] sm:$0xf0] }
 0x603   : > { %v11304_v17 = vpop.f32.mrf.mxu1  ;;  %v8661_v58 = vor.u32 %v8904_v42, %v8660_v39  ;;  %v5252_v39 = vmax.f32 %v4635_v16, 0.0 }
 0x604   : > { %13955 = vst [vmem:[#allocation43_spill] sm:$0xff] %v11304_v17  ;;  %v3530_v38 = vmax.f32 %v3123_v59, 0.0 }
 0x605   : > { %v4636_v45 = vpop.f32.mrf.mxu3  ;;  %3864 = vmatpush.bf16.msrb.mxu2 %v8661_v58  ;;  %v13960_v58 = vld [vmem:[#allocation46_spill] sm:$0xff] }
 0x606   : > { %3164 = vmatmul.bf16.gmra.mxu2 %v2616_v0  ;;  %6826 = vmatmul.bf16.gmra.mxu1 %v5716_v47  ;;  %v11308_v37 = vpack.c.bf16 %v3530_v38, %v3529_v14  ;;  %v4637_v0 = vadd.f32 %v4636_v45, %v10947_v44  ;;  %v8916_v47 = vld [vmem:[%s13584_s7 + $0x28] sm:$0xff]  ;;  %v2085_v45 = vadd.f32 %v11074_v60, %v13960_v58 }
 0x607   : > { %6061 = vmatpush.bf16.msrb.mxu0 %v8916_v47 }
 0x608   : > { %13957 = vst [vmem:[#allocation45_spill] sm:$0xff] %v11308_v37  ;;  %v5254_v13 = vmax.f32 %v4637_v0, 0.0  ;;  %v2454_v0 = vmax.f32 %v2085_v45, 0.0 }
 0x609   : > { %v3125_v32 = vpop.f32.mrf.mxu2 }
 0x60a   : > { %4678 = vmatmul.bf16.gmra.mxu3 %v13958_v18  ;;  %v3126_v14 = vadd.f32 %v11160_v10, %v3125_v32  ;;  %v5718_v7 = vpack.c.bf16 %v5254_v13, %v5252_v39 }
 0x60b   : > { %v11317_v22 = vpop.f32.mrf.mxu1 }
 0x60c   : > { %13959 = vst [vmem:[#allocation185_spill] sm:$0xff] %v11317_v22  ;;  %v13962_v22 = vld [vmem:[#allocation48_spill] sm:$0xff]  ;;  %v3531_v1 = vmax.f32 %v3126_v14, 0.0 }
 0x60d   : > { %v4639_v59 = vpop.f32.mrf.mxu3  ;;  %v2087_v51 = vadd.f32 %v11074_v60, %v13962_v22 }
 0x60e   : > { %v4640_v14 = vadd.f32 %v4639_v59, %v10947_v44 }
 0x60f   : > { %v2455_v47 = vmax.f32 %v2087_v51, 0.0 }
 0x611   : > { %v3127_v38 = vpop.f32.mrf.mxu2  ;;  %v2620_v55 = vpack.c.bf16 %v2455_v47, %v2454_v0 }
 0x612   : > { %v3128_v42 = vadd.f32 %v11160_v10, %v3127_v38  ;;  %v13964_v38 = vld [vmem:[#allocation98_spill] sm:$0xff] }
 0x613   : > { %v11330_v18 = vpop.f32.mrf.mxu1 }
 0x614   : > { %13961 = vst [vmem:[#allocation46_spill] sm:$0xff] %v11330_v18  ;;  %v3532_v17 = vmax.f32 %v3128_v42, 0.0  ;;  %v13966_v42 = vld [vmem:[#allocation49_spill] sm:$0xff] }
 0x615   : > { %v4641_v23 = vpop.f32.mrf.mxu3  ;;  %v2090_v45 = vadd.f32 %v11074_v60, %v13966_v42 }
 0x616   : > { %3169 = vmatmul.bf16.gmra.mxu2 %v11280_v56  ;;  %6831 = vmatmul.bf16.gmra.mxu1 %v5718_v7  ;;  %v11335_v32 = vpack.c.bf16 %v3532_v17, %v3531_v1  ;;  %v4642_v18 = vadd.f32 %v4641_v23, %v10947_v44  ;;  %v5256_v7 = vmax.f32 %v4640_v14, 0.0  ;;  %v13968_v1 = vld [vmem:[#allocation51_spill] sm:$0xff] }
 0x617   : > { %v2456_v59 = vmax.f32 %v2090_v45, 0.0  ;;  %v13972_v45 = vld [vmem:[#allocation52_spill] sm:$0xff] }
 0x618   : > { %13963 = vst [vmem:[#allocation48_spill] sm:$0xff] %v11335_v32  ;;  %v5258_v13 = vmax.f32 %v4642_v18, 0.0 }
 0x619   : > { %v3130_v16 = vpop.f32.mrf.mxu2 }
 0x61a   : > { %4683 = vmatmul.bf16.gmra.mxu3 %v13964_v38  ;;  %v3131_v39 = vadd.f32 %v11160_v10, %v3130_v16  ;;  %v2092_v38 = vadd.f32 %v11074_v60, %v13968_v1  ;;  %v5720_v47 = vpack.c.bf16 %v5258_v13, %v5256_v7 }
 0x61b   : > { %v11338_v58 = vpop.f32.mrf.mxu1 }
 0x61c   : > { %13965 = vst [vmem:[#allocation186_spill] sm:$0xff] %v11338_v58  ;;  %v3533_v23 = vmax.f32 %v3131_v39, 0.0  ;;  %v2457_v16 = vmax.f32 %v2092_v38, 0.0  ;;  %v2095_v38 = vadd.f32 %v11074_v60, %v13972_v45 }
 0x61d   : > { %v4644_v22 = vpop.f32.mrf.mxu3 }
 0x61e   : > { %v2621_v53 = vpack.c.bf16 %v2457_v16, %v2456_v59  ;;  %v4645_v39 = vadd.f32 %v4644_v22, %v10947_v44 }
 0x621   : > { %v3132_v56 = vpop.f32.mrf.mxu2 }
 0x622   : > { %v3133_v17 = vadd.f32 %v11160_v10, %v3132_v56  ;;  %v13970_v56 = vld [vmem:[#allocation101_spill] sm:$0xff] }
 0x623   : > { %v11346_v51 = vpop.f32.mrf.mxu1 }
 0x624   : > { %13967 = vst [vmem:[#allocation49_spill] sm:$0xff] %v11346_v51  ;;  %v3534_v0 = vmax.f32 %v3133_v17, 0.0  ;;  %v5260_v17 = vmax.f32 %v4645_v39, 0.0 }
 0x625   : > { %v4646_v58 = vpop.f32.mrf.mxu3 }
 0x626   : > { %3174 = vmatmul.bf16.gmra.mxu2 %v11297_v8  ;;  %6836 = vmatmul.bf16.gmra.mxu1 %v5720_v47  ;;  %v11351_v18 = vpack.c.bf16 %v3534_v0, %v3533_v23  ;;  %v4647_v51 = vadd.f32 %v4646_v58, %v10947_v44  ;;  %v13974_v47 = vld [vmem:[#allocation54_spill] sm:$0xff] }
 0x628   : > { %13969 = vst [vmem:[#allocation51_spill] sm:$0xff] %v11351_v18  ;;  %v5262_v13 = vmax.f32 %v4647_v51, 0.0  ;;  %v2458_v51 = vmax.f32 %v2095_v38, 0.0  ;;  %v13978_v38 = vld [vmem:[#allocation55_spill] sm:$0xff] }
 0x629   : > { %v3135_v14 = vpop.f32.mrf.mxu2 }
 0x62a   : > { %4688 = vmatmul.bf16.gmra.mxu3 %v13970_v56  ;;  %v3136_v7 = vadd.f32 %v11160_v10, %v3135_v14  ;;  %v2097_v56 = vadd.f32 %v11074_v60, %v13974_v47  ;;  %v5722_v16 = vpack.c.bf16 %v5262_v13, %v5260_v17 }
 0x62b   : > { %v11354_v42 = vpop.f32.mrf.mxu1 }
 0x62c   : > { %13971 = vst [vmem:[#allocation187_spill] sm:$0xff] %v11354_v42  ;;  %v3535_v58 = vmax.f32 %v3136_v7, 0.0  ;;  %v2459_v14 = vmax.f32 %v2097_v56, 0.0  ;;  %v2100_v56 = vadd.f32 %v11074_v60, %v13978_v38 }
 0x62d   : > { %v4649_v1 = vpop.f32.mrf.mxu3 }
 0x62e   : > { %v2622_v49 = vpack.c.bf16 %v2459_v14, %v2458_v51  ;;  %v4650_v7 = vadd.f32 %v4649_v1, %v10947_v44 }
 0x631   : > { %v3137_v8 = vpop.f32.mrf.mxu2 }
 0x632   : > { %v3138_v23 = vadd.f32 %v11160_v10, %v3137_v8  ;;  %v13976_v8 = vld [vmem:[#allocation104_spill] sm:$0xff] }
 0x633   : > { %v11362_v0 = vpop.f32.mrf.mxu1 }
 0x634   : > { %13973 = vst [vmem:[#allocation52_spill] sm:$0xff] %v11362_v0  ;;  %v3536_v59 = vmax.f32 %v3138_v23, 0.0  ;;  %v5264_v23 = vmax.f32 %v4650_v7, 0.0 }
 0x635   : > { %v4651_v42 = vpop.f32.mrf.mxu3 }
 0x636   : > { %3179 = vmatmul.bf16.gmra.mxu2 %v11323_v21  ;;  %6841 = vmatmul.bf16.gmra.mxu1 %v5722_v16  ;;  %v11367_v22 = vpack.c.bf16 %v3536_v59, %v3535_v58  ;;  %v4652_v0 = vadd.f32 %v4651_v42, %v10947_v44  ;;  %v13980_v16 = vld [vmem:[#allocation57_spill] sm:$0xff] }
 0x638   : > { %13975 = vst [vmem:[#allocation54_spill] sm:$0xff] %v11367_v22  ;;  %v5266_v13 = vmax.f32 %v4652_v0, 0.0  ;;  %v2460_v0 = vmax.f32 %v2100_v56, 0.0  ;;  %v13984_v56 = vld [vmem:[#allocation58_spill] sm:$0xff] }
 0x639   : > { %v3140_v39 = vpop.f32.mrf.mxu2 }
 0x63a   : > { %4693 = vmatmul.bf16.gmra.mxu3 %v13976_v8  ;;  %v3141_v17 = vadd.f32 %v11160_v10, %v3140_v39  ;;  %v2102_v8 = vadd.f32 %v11074_v60, %v13980_v16  ;;  %v5724_v14 = vpack.c.bf16 %v5266_v13, %v5264_v23 }
 0x63b   : > { %v11370_v45 = vpop.f32.mrf.mxu1 }
 0x63c   : > { %13977 = vst [vmem:[#allocation188_spill] sm:$0xff] %v11370_v45  ;;  %v3537_v42 = vmax.f32 %v3141_v17, 0.0  ;;  %v2461_v39 = vmax.f32 %v2102_v8, 0.0  ;;  %v2105_v8 = vadd.f32 %v11074_v60, %v13984_v56 }
 0x63d   : > { %v4654_v47 = vpop.f32.mrf.mxu3 }
 0x63e   : > { %v4655_v17 = vadd.f32 %v4654_v47, %v10947_v44 }
 0x640   : > { %v5268_v23 = vmax.f32 %v4655_v17, 0.0 }
 0x641   : > { %v3142_v21 = vpop.f32.mrf.mxu2 }
 0x642   : > { %v3143_v58 = vadd.f32 %v11160_v10, %v3142_v21  ;;  %v13982_v21 = vld [vmem:[#allocation107_spill] sm:$0xff] }
 0x643   : > { %v11378_v59 = vpop.f32.mrf.mxu1 }
 0x644   : > { %13979 = vst [vmem:[#allocation55_spill] sm:$0xff] %v11378_v59  ;;  %v3538_v51 = vmax.f32 %v3143_v58, 0.0  ;;  %v2623_v59 = vpack.c.bf16 %v2461_v39, %v2460_v0 }
 0x645   : > { %v4656_v45 = vpop.f32.mrf.mxu3 }
 0x646   : > { %3184 = vmatmul.bf16.gmra.mxu2 %v2620_v55  ;;  %6846 = vmatmul.bf16.gmra.mxu1 %v5724_v14  ;;  %v11382_v1 = vpack.c.bf16 %v3538_v51, %v3537_v42  ;;  %v4657_v38 = vadd.f32 %v4656_v45, %v10947_v44  ;;  %v13986_v51 = vld [vmem:[#allocation60_spill] sm:$0xff] }
 0x647   : > { %v2107_v14 = vadd.f32 %v11074_v60, %v13986_v51 }
 0x648   : > { %13981 = vst [vmem:[#allocation57_spill] sm:$0xff] %v11382_v1  ;;  %v5270_v58 = vmax.f32 %v4657_v38, 0.0 }
 0x649   : > { %v3145_v7 = vpop.f32.mrf.mxu2  ;;  %v2463_v38 = vmax.f32 %v2107_v14, 0.0  ;;  %v13990_v14 = vld [vmem:[#allocation61_spill] sm:$0xff] }
 0x64a   : > { %4698 = vmatmul.bf16.gmra.mxu3 %v13982_v21  ;;  %v3146_v13 = vadd.f32 %v11160_v10, %v3145_v7  ;;  %v5726_v39 = vpack.c.bf16 %v5270_v58, %v5268_v23  ;;  %v2462_v7 = vmax.f32 %v2105_v8, 0.0 }
 0x64b   : > { %v11385_v46 = vpop.f32.mrf.mxu1 }
 0x64c   : > { %13983 = vst [vmem:[#allocation189_spill] sm:$0xff] %v11385_v46  ;;  %v3539_v45 = vmax.f32 %v3146_v13, 0.0 }
 0x64d   : > { %v4659_v40 = vpop.f32.mrf.mxu3 }
 0x64e   : > { %v4660_v13 = vadd.f32 %v4659_v40, %v10947_v44 }
 0x651   : > { %v3147_v55 = vpop.f32.mrf.mxu2 }
 0x652   : > { %v3148_v16 = vadd.f32 %v11160_v10, %v3147_v55  ;;  %v13988_v55 = vld [vmem:[#allocation110_spill] sm:$0xff] }
 0x653   : > { %v11393_v42 = vpop.f32.mrf.mxu1 }
 0x654   : > { %13985 = vst [vmem:[#allocation58_spill] sm:$0xff] %v11393_v42  ;;  %v3540_v0 = vmax.f32 %v3148_v16, 0.0  ;;  %v11403_v42 = vpack.c.bf16 %v2463_v38, %v2462_v7  ;;  %v5272_v16 = vmax.f32 %v4660_v13, 0.0 }
 0x655   : > { %v4661_v21 = vpop.f32.mrf.mxu3 }
 0x656   : > { %3189 = vmatmul.bf16.gmra.mxu2 %v2621_v53  ;;  %6851 = vmatmul.bf16.gmra.mxu1 %v5726_v39  ;;  %v11397_v47 = vpack.c.bf16 %v3540_v0, %v3539_v45  ;;  %v4662_v56 = vadd.f32 %v4661_v21, %v10947_v44  ;;  %v2110_v45 = vadd.f32 %v11074_v60, %v13990_v14  ;;  %v13992_v39 = vld [vmem:[#allocation63_spill] sm:$0xff] }
 0x657   : > { %v2112_v21 = vadd.f32 %v11074_v60, %v13992_v39 }
 0x658   : > { %13987 = vst [vmem:[#allocation60_spill] sm:$0xff] %v11397_v47  ;;  %v5274_v58 = vmax.f32 %v4662_v56, 0.0 }
 0x659   : > { %v3150_v17 = vpop.f32.mrf.mxu2  ;;  %v2465_v56 = vmax.f32 %v2112_v21, 0.0 }
 0x65a   : > { %4703 = vmatmul.bf16.gmra.mxu3 %v13988_v55  ;;  %v3151_v53 = vadd.f32 %v11160_v10, %v3150_v17  ;;  %v5728_v55 = vpack.c.bf16 %v5274_v58, %v5272_v16  ;;  %v2464_v17 = vmax.f32 %v2110_v45, 0.0  ;;  %v13996_v45 = vld [vmem:[#allocation64_spill] sm:$0xff] }
 0x65b   : > { %v11400_v46 = vpop.f32.mrf.mxu1  ;;  %v2115_v21 = vadd.f32 %v11074_v60, %v13996_v45 }
 0x65c   : > { %13989 = vst [vmem:[#allocation190_spill] sm:$0xff] %v11400_v46  ;;  %v3541_v7 = vmax.f32 %v3151_v53, 0.0 }
 0x65d   : > { %v4664_v51 = vpop.f32.mrf.mxu3 }
 0x65e   : > { %v4665_v53 = vadd.f32 %v4664_v51, %v10947_v44 }
 0x660   : > { %v5276_v16 = vmax.f32 %v4665_v53, 0.0 }
 0x661   : > { %v3152_v23 = vpop.f32.mrf.mxu2 }
 0x662   : > { %v3153_v8 = vadd.f32 %v11160_v10, %v3152_v23  ;;  %v13994_v23 = vld [vmem:[#allocation113_spill] sm:$0xff] }
 0x663   : > { %v11410_v0 = vpop.f32.mrf.mxu1 }
 0x664   : > { %13991 = vst [vmem:[#allocation61_spill] sm:$0xff] %v11410_v0  ;;  %v3542_v38 = vmax.f32 %v3153_v8, 0.0  ;;  %v11420_v0 = vpack.c.bf16 %v2465_v56, %v2464_v17 }
 0x665   : > { %v4666_v46 = vpop.f32.mrf.mxu3 }
 0x666   : > { %3194 = vmatmul.bf16.gmra.mxu2 %v2622_v49  ;;  %6856 = vmatmul.bf16.gmra.mxu1 %v5728_v55  ;;  %v11414_v40 = vpack.c.bf16 %v3542_v38, %v3541_v7  ;;  %v4667_v14 = vadd.f32 %v4666_v46, %v10947_v44  ;;  %v13998_v38 = vld [vmem:[#allocation66_spill] sm:$0xff] }
 0x667   : > { %v2117_v46 = vadd.f32 %v11074_v60, %v13998_v38  ;;  %v14002_v38 = vld [vmem:[#allocation67_spill] sm:$0xff] }
 0x668   : > { %13993 = vst [vmem:[#allocation63_spill] sm:$0xff] %v11414_v40  ;;  %v5278_v58 = vmax.f32 %v4667_v14, 0.0 }
 0x669   : > { %v3155_v13 = vpop.f32.mrf.mxu2  ;;  %v2467_v14 = vmax.f32 %v2117_v46, 0.0 }
 0x66a   : > { %4708 = vmatmul.bf16.gmra.mxu3 %v13994_v23  ;;  %v3156_v49 = vadd.f32 %v11160_v10, %v3155_v13  ;;  %v5730_v23 = vpack.c.bf16 %v5278_v58, %v5276_v16  ;;  %v2466_v13 = vmax.f32 %v2115_v21, 0.0  ;;  %v11445_v21 = vld [vmem:[%s13579_s2] ss:$0 sm:$0xff] }
 0x66b   : > { %v11417_v36 = vpop.f32.mrf.mxu1 }
 0x66c   : > { %13995 = vst [vmem:[#allocation191_spill] sm:$0xff] %v11417_v36  ;;  %v3543_v17 = vmax.f32 %v3156_v49, 0.0 }
 0x66d   : > { %v4669_v39 = vpop.f32.mrf.mxu3 }
 0x66e   : > { %v4670_v49 = vadd.f32 %v4669_v39, %v10947_v44 }
 0x670   : > { %v5280_v16 = vmax.f32 %v4670_v49, 0.0 }
 0x671   : > { %v3157_v55 = vpop.f32.mrf.mxu2 }
 0x672   : > { %v3158_v8 = vadd.f32 %v11160_v10, %v3157_v55  ;;  %v14000_v55 = vld [vmem:[#allocation116_spill] sm:$0xff] }
 0x673   : > { %v11427_v7 = vpop.f32.mrf.mxu1 }
 0x674   : > { %13997 = vst [vmem:[#allocation64_spill] sm:$0xff] %v11427_v7  ;;  %v3544_v56 = vmax.f32 %v3158_v8, 0.0  ;;  %v11437_v7 = vpack.c.bf16 %v2467_v14, %v2466_v13 }
 0x675   : > { %v4671_v36 = vpop.f32.mrf.mxu3 }
 0x676   : > { %3199 = vmatmul.bf16.gmra.mxu2 %v2623_v59  ;;  %6861 = vmatmul.bf16.gmra.mxu1 %v5730_v23  ;;  %v11431_v51 = vpack.c.bf16 %v3544_v56, %v3543_v17  ;;  %v4672_v45 = vadd.f32 %v4671_v36, %v10947_v44  ;;  %v2120_v36 = vadd.f32 %v11445_v21, %v14002_v38  ;;  %v14004_v17 = vld [vmem:[#allocation69_spill] sm:$0xff]  ;;  %v8652_v38 = vld [vmem:[%s13582_s5 + $0x30] sm:$0xf] }
 0x677   : > { %v2122_v39 = vadd.f32 %v11445_v21, %v14004_v17 }
 0x678   : > { %13999 = vst [vmem:[#allocation66_spill] sm:$0xff] %v11431_v51  ;;  %v5282_v58 = vmax.f32 %v4672_v45, 0.0  ;;  %v2468_v49 = vmax.f32 %v2120_v36, 0.0 }
 0x679   : > { %v3160_v53 = vpop.f32.mrf.mxu2 }
 0x67a   : > { %4713 = vmatmul.bf16.gmra.mxu3 %v14000_v55  ;;  %v3161_v59 = vadd.f32 %v11160_v10, %v3160_v53  ;;  %v5732_v14 = vpack.c.bf16 %v5282_v58, %v5280_v16 }
 0x67b   : > { %v11434_v11 = vpop.f32.mrf.mxu1 }
 0x67c   : > { %14001 = vst [vmem:[#allocation192_spill] sm:$0xff] %v11434_v11  ;;  %v3545_v56 = vmax.f32 %v3161_v59, 0.0 }
 0x67d   : > { %v4674_v60 = vpop.f32.mrf.mxu3 }
 0x681   : > { %v3162_v23 = vpop.f32.mrf.mxu2 }
 0x682   : > { %v3163_v8 = vadd.f32 %v11160_v10, %v3162_v23  ;;  %v2469_v23 = vmax.f32 %v2122_v39, 0.0  ;;  %v4675_v39 = vadd.f32 %v4674_v60, %v10947_v44 }
 0x683   : > { %v11449_v46 = vpop.f32.mrf.mxu1 }
 0x684   : > { %14003 = vst [vmem:[#allocation67_spill] sm:$0xff] %v11449_v46  ;;  %v3546_v13 = vmax.f32 %v3163_v8, 0.0  ;;  %v8902_v46 = vld [vmem:[%s13582_s5 + $0x34] sm:$0xf0]  ;;  %v14006_v8 = vld [vmem:[#allocation119_spill] sm:$0xff]  ;;  %v11466_v16 = vpack.c.bf16 %v2469_v23, %v2468_v49 }
 0x685   : > { %v4676_v53 = vpop.f32.mrf.mxu3  ;;  %v8653_v59 = vor.u32 %v8902_v46, %v8652_v38  ;;  %v5284_v38 = vmax.f32 %v4675_v39, 0.0  ;;  %v14010_v23 = vld [vmem:[#allocation72_spill] sm:$0xff] }
 0x686   : > { %3204 = vmatmul.bf16.gmra.mxu2 %v11403_v42  ;;  %6866 = vmatmul.bf16.gmra.mxu1 %v5732_v14  ;;  %v11454_v45 = vpack.c.bf16 %v3546_v13, %v3545_v56  ;;  %v4677_v42 = vadd.f32 %v4676_v53, %v10947_v44  ;;  %v8915_v14 = vld [vmem:[%s13584_s7 + $0x20] sm:$0xff]  ;;  %v2127_v60 = vadd.f32 %v11445_v21, %v14010_v23 }
 0x687   : > { %3865 = vmatpush.bf16.msrb.mxu2 %v8653_v59  ;;  %6062 = vmatpush.bf16.msrb.mxu0 %v8915_v14  ;;  %v14008_v59 = vld [vmem:[#allocation70_spill] sm:$0xff] }
 0x688   : > { %14005 = vst [vmem:[#allocation69_spill] sm:$0xff] %v11454_v45  ;;  %v5286_v56 = vmax.f32 %v4677_v42, 0.0  ;;  %v2125_v53 = vadd.f32 %v11445_v21, %v14008_v59  ;;  %v14012_v45 = vld [vmem:[#allocation122_spill] sm:$0xff] }
 0x689   : > { %v3165_v17 = vpop.f32.mrf.mxu2 }
 0x68a   : > { %4718 = vmatmul.bf16.gmra.mxu3 %v14006_v8  ;;  %v3166_v13 = vadd.f32 %v11160_v10, %v3165_v17  ;;  %v5734_v17 = vpack.c.bf16 %v5286_v56, %v5284_v38  ;;  %v2470_v39 = vmax.f32 %v2125_v53, 0.0  ;;  %v14014_v53 = vld [vmem:[#allocation73_spill] sm:$0xff] }
 0x68b   : > { %v11463_v58 = vpop.f32.mrf.mxu1 }
 0x68c   : > { %14007 = vst [vmem:[#allocation193_spill] sm:$0xff] %v11463_v58  ;;  %v3547_v42 = vmax.f32 %v3166_v13, 0.0 }
 0x68d   : > { %v4679_v36 = vpop.f32.mrf.mxu3 }
 0x691   : > { %v3167_v46 = vpop.f32.mrf.mxu2 }
 0x692   : > { %v3168_v8 = vadd.f32 %v11160_v10, %v3167_v46  ;;  %v2471_v46 = vmax.f32 %v2127_v60, 0.0  ;;  %v2130_v60 = vadd.f32 %v11445_v21, %v14014_v53 }
 0x693   : > { %v11476_v49 = vpop.f32.mrf.mxu1 }
 0x694   : > { %14009 = vst [vmem:[#allocation70_spill] sm:$0xff] %v11476_v49  ;;  %v3548_v58 = vmax.f32 %v3168_v8, 0.0  ;;  %v2628_v51 = vpack.c.bf16 %v2471_v46, %v2470_v39  ;;  %v4680_v8 = vadd.f32 %v4679_v36, %v10947_v44 }
 0x695   : > { %v4681_v55 = vpop.f32.mrf.mxu3 }
 0x696   : > { %3209 = vmatmul.bf16.gmra.mxu2 %v11420_v0  ;;  %6871 = vmatmul.bf16.gmra.mxu1 %v5734_v17  ;;  %v11481_v11 = vpack.c.bf16 %v3548_v58, %v3547_v42  ;;  %v4682_v49 = vadd.f32 %v4681_v55, %v10947_v44  ;;  %v5288_v38 = vmax.f32 %v4680_v8, 0.0  ;;  %v14016_v17 = vld [vmem:[#allocation75_spill] sm:$0xff] }
 0x698   : > { %14011 = vst [vmem:[#allocation72_spill] sm:$0xff] %v11481_v11  ;;  %v5290_v56 = vmax.f32 %v4682_v49, 0.0  ;;  %v2472_v49 = vmax.f32 %v2130_v60, 0.0 }
 0x699   : > { %v3170_v14 = vpop.f32.mrf.mxu2 }
 0x69a   : > { %4723 = vmatmul.bf16.gmra.mxu3 %v14012_v45  ;;  %v3171_v13 = vadd.f32 %v11160_v10, %v3170_v14  ;;  %v2132_v45 = vadd.f32 %v11445_v21, %v14016_v17  ;;  %v5736_v46 = vpack.c.bf16 %v5290_v56, %v5288_v38 }
 0x69b   : > { %v11484_v59 = vpop.f32.mrf.mxu1 }
 0x69c   : > { %14013 = vst [vmem:[#allocation194_spill] sm:$0xff] %v11484_v59  ;;  %v3549_v55 = vmax.f32 %v3171_v13, 0.0  ;;  %v2473_v14 = vmax.f32 %v2132_v45, 0.0  ;;  %v14020_v45 = vld [vmem:[#allocation76_spill] sm:$0xff] }
 0x69d   : > { %v4684_v23 = vpop.f32.mrf.mxu3 }
 0x69e   : > { %v11503_v11 = vpack.c.bf16 %v2473_v14, %v2472_v49  ;;  %v4685_v56 = vadd.f32 %v4684_v23, %v10947_v44 }
 0x6a0   : > { %v5292_v17 = vmax.f32 %v4685_v56, 0.0 }
 0x6a1   : > { %v3172_v0 = vpop.f32.mrf.mxu2 }
 0x6a2   : > { %v3173_v58 = vadd.f32 %v11160_v10, %v3172_v0  ;;  %v14018_v0 = vld [vmem:[#allocation125_spill] sm:$0xff] }
 0x6a3   : > { %v11492_v42 = vpop.f32.mrf.mxu1 }
 0x6a4   : > { %14015 = vst [vmem:[#allocation73_spill] sm:$0xff] %v11492_v42  ;;  %v3550_v39 = vmax.f32 %v3173_v58, 0.0 }
 0x6a5   : > { %v4686_v59 = vpop.f32.mrf.mxu3 }
 0x6a6   : > { %3214 = vmatmul.bf16.gmra.mxu2 %v11437_v7  ;;  %6876 = vmatmul.bf16.gmra.mxu1 %v5736_v46  ;;  %v11497_v36 = vpack.c.bf16 %v3550_v39, %v3549_v55  ;;  %v4687_v42 = vadd.f32 %v4686_v59, %v10947_v44  ;;  %v2135_v55 = vadd.f32 %v11445_v21, %v14020_v45  ;;  %v14022_v46 = vld [vmem:[#allocation78_spill] sm:$0xff] }
 0x6a7   : > { %v2137_v59 = vadd.f32 %v11445_v21, %v14022_v46  ;;  %v14026_v46 = vld [vmem:[#allocation79_spill] sm:$0xff] }
 0x6a8   : > { %14017 = vst [vmem:[#allocation75_spill] sm:$0xff] %v11497_v36  ;;  %v5294_v38 = vmax.f32 %v4687_v42, 0.0  ;;  %v2474_v42 = vmax.f32 %v2135_v55, 0.0 }
 0x6a9   : > { %v3175_v8 = vpop.f32.mrf.mxu2 }
 0x6aa   : > { %4728 = vmatmul.bf16.gmra.mxu3 %v14018_v0  ;;  %v3176_v7 = vadd.f32 %v11160_v10, %v3175_v8  ;;  %v5738_v0 = vpack.c.bf16 %v5294_v38, %v5292_v17  ;;  %v2475_v8 = vmax.f32 %v2137_v59, 0.0  ;;  %v2140_v59 = vadd.f32 %v11445_v21, %v14026_v46 }
 0x6ab   : > { %v11500_v53 = vpop.f32.mrf.mxu1 }
 0x6ac   : > { %14019 = vst [vmem:[#allocation195_spill] sm:$0xff] %v11500_v53  ;;  %v3551_v49 = vmax.f32 %v3176_v7, 0.0  ;;  %v11521_v36 = vpack.c.bf16 %v2475_v8, %v2474_v42 }
 0x6ad   : > { %v4689_v13 = vpop.f32.mrf.mxu3 }
 0x6ae   : > { %v4690_v38 = vadd.f32 %v4689_v13, %v10947_v44 }
 0x6b1   : > { %v3177_v58 = vpop.f32.mrf.mxu2 }
 0x6b2   : > { %v3178_v60 = vadd.f32 %v11160_v10, %v3177_v58  ;;  %v14024_v58 = vld [vmem:[#allocation128_spill] sm:$0xff] }
 0x6b3   : > { %v11510_v39 = vpop.f32.mrf.mxu1 }
 0x6b4   : > { %14021 = vst [vmem:[#allocation76_spill] sm:$0xff] %v11510_v39  ;;  %v3552_v14 = vmax.f32 %v3178_v60, 0.0  ;;  %v5296_v60 = vmax.f32 %v4690_v38, 0.0 }
 0x6b5   : > { %v4691_v53 = vpop.f32.mrf.mxu3 }
 0x6b6   : > { %3219 = vmatmul.bf16.gmra.mxu2 %v11466_v16  ;;  %6881 = vmatmul.bf16.gmra.mxu1 %v5738_v0  ;;  %v11515_v23 = vpack.c.bf16 %v3552_v14, %v3551_v49  ;;  %v4692_v39 = vadd.f32 %v4691_v53, %v10947_v44  ;;  %v14028_v14 = vld [vmem:[#allocation81_spill] sm:$0xff] }
 0x6b7   : > { %v2142_v53 = vadd.f32 %v11445_v21, %v14028_v14 }
 0x6b8   : > { %14023 = vst [vmem:[#allocation78_spill] sm:$0xff] %v11515_v23  ;;  %v5298_v17 = vmax.f32 %v4692_v39, 0.0  ;;  %v2476_v39 = vmax.f32 %v2140_v59, 0.0 }
 0x6b9   : > { %v3180_v56 = vpop.f32.mrf.mxu2 }
 0x6ba   : > { %4733 = vmatmul.bf16.gmra.mxu3 %v14024_v58  ;;  %v3181_v16 = vadd.f32 %v11160_v10, %v3180_v56  ;;  %v5740_v58 = vpack.c.bf16 %v5298_v17, %v5296_v60  ;;  %v2477_v56 = vmax.f32 %v2142_v53, 0.0  ;;  %v14031_v53 = vld [vmem:[#allocation82_spill] sm:$0xff] }
 0x6bb   : > { %v11518_v45 = vpop.f32.mrf.mxu1 }
 0x6bc   : > { %14025 = vst [vmem:[#allocation196_spill] sm:$0xff] %v11518_v45  ;;  %v3553_v42 = vmax.f32 %v3181_v16, 0.0  ;;  %v11538_v46 = vpack.c.bf16 %v2477_v56, %v2476_v39 }
 0x6bd   : > { %v4694_v7 = vpop.f32.mrf.mxu3 }
 0x6be   : > { %v4695_v16 = vadd.f32 %v4694_v7, %v10947_v44 }
 0x6c1   : > { %v3182_v0 = vpop.f32.mrf.mxu2 }
 0x6c2   : > { %v3183_v55 = vadd.f32 %v11160_v10, %v3182_v0 }
 0x6c3   : > { %v11528_v49 = vpop.f32.mrf.mxu1 }
 0x6c4   : > { %14027 = vst [vmem:[#allocation79_spill] sm:$0xff] %v11528_v49  ;;  %v3554_v8 = vmax.f32 %v3183_v55, 0.0  ;;  %v5300_v55 = vmax.f32 %v4695_v16, 0.0 }
 0x6c5   : > { %v4696_v45 = vpop.f32.mrf.mxu3 }
 0x6c6   : > { %3224 = vmatmul.bf16.gmra.mxu2 %v2628_v51  ;;  %6886 = vmatmul.bf16.gmra.mxu1 %v5740_v58  ;;  %v11532_v13 = vpack.c.bf16 %v3554_v8, %v3553_v42  ;;  %v4697_v0 = vadd.f32 %v4696_v45, %v10947_v44  ;;  %v11544_v51 = vld [vmem:[%s13581_s4] ss:$0 sm:$0xff]  ;;  %v2145_v45 = vadd.f32 %v11445_v21, %v14031_v53  ;;  %v14033_v8 = vld [vmem:[#allocation84_spill] sm:$0xff] }
 0x6c7   : > { %v2147_v7 = vadd.f32 %v11445_v21, %v14033_v8 }
 0x6c8   : > { %14029 = vst [vmem:[#allocation81_spill] sm:$0xff] %v11532_v13  ;;  %v5302_v17 = vmax.f32 %v4697_v0, 0.0  ;;  %v2478_v16 = vmax.f32 %v2145_v45, 0.0  ;;  %v14036_v45 = vld [vmem:[#allocation85_spill] sm:$0xff] }
 0x6c9   : > { %v3185_v38 = vpop.f32.mrf.mxu2 }
 0x6ca   : > { %4738 = vmatmul.bf16.gmra.mxu3 %v10782_v27  ;;  %v3186_v58 = vadd.f32 %v11544_v51, %v3185_v38  ;;  %v5742_v0 = vpack.c.bf16 %v5302_v17, %v5300_v55 }
 0x6cb   : > { %v11535_v10 = vpop.f32.mrf.mxu1 }
 0x6cc   : > { %14030 = vst [vmem:[#allocation197_spill] sm:$0xff] %v11535_v10  ;;  %v3555_v39 = vmax.f32 %v3186_v58, 0.0  ;;  %v2479_v10 = vmax.f32 %v2147_v7, 0.0  ;;  %v2150_v7 = vadd.f32 %v11445_v21, %v14036_v45 }
 0x6cd   : > { %v4699_v14 = vpop.f32.mrf.mxu3 }
 0x6ce   : > { %v2632_v49 = vpack.c.bf16 %v2479_v10, %v2478_v16  ;;  %v4700_v58 = vadd.f32 %v4699_v14, %v10947_v44 }
 0x6d1   : > { %v3187_v60 = vpop.f32.mrf.mxu2 }
 0x6d2   : > { %v3188_v59 = vadd.f32 %v11544_v51, %v3187_v60 }
 0x6d3   : > { %v11550_v42 = vpop.f32.mrf.mxu1 }
 0x6d4   : > { %14032 = vst [vmem:[#allocation82_spill] sm:$0xff] %v11550_v42  ;;  %v3556_v56 = vmax.f32 %v3188_v59, 0.0  ;;  %v5304_v59 = vmax.f32 %v4700_v58, 0.0 }
 0x6d5   : > { %v4701_v27 = vpop.f32.mrf.mxu3 }
 0x6d6   : > { %3229 = vmatmul.bf16.gmra.mxu2 %v11503_v11  ;;  %6891 = vmatmul.bf16.gmra.mxu1 %v5742_v0  ;;  %v11555_v38 = vpack.c.bf16 %v3556_v56, %v3555_v39  ;;  %v4702_v42 = vadd.f32 %v4701_v27, %v10947_v44  ;;  %v14038_v0 = vld [vmem:[#allocation87_spill] sm:$0xff] }
 0x6d8   : > { %14034 = vst [vmem:[#allocation84_spill] sm:$0xff] %v11555_v38  ;;  %v5306_v17 = vmax.f32 %v4702_v42, 0.0  ;;  %v2480_v42 = vmax.f32 %v2150_v7, 0.0 }
 0x6d9   : > { %v3190_v60 = vpop.f32.mrf.mxu2 }
 0x6da   : > { %4743 = vmatmul.bf16.gmra.mxu3 %v10796_v15  ;;  %v3191_v55 = vadd.f32 %v11544_v51, %v3190_v60  ;;  %v2152_v15 = vadd.f32 %v11445_v21, %v14038_v0  ;;  %v5744_v16 = vpack.c.bf16 %v5306_v17, %v5304_v59 }
 0x6db   : > { %v11558_v53 = vpop.f32.mrf.mxu1 }
 0x6dc   : > { %14035 = vst [vmem:[#allocation198_spill] sm:$0xff] %v11558_v53  ;;  %v3557_v27 = vmax.f32 %v3191_v55, 0.0  ;;  %v2481_v60 = vmax.f32 %v2152_v15, 0.0  ;;  %v14041_v15 = vld [vmem:[#allocation88_spill] sm:$0xff] }
 0x6dd   : > { %v4704_v8 = vpop.f32.mrf.mxu3 }
 0x6de   : > { %v4705_v17 = vadd.f32 %v4704_v8, %v10947_v44 }
 0x6e0   : > { %v5308_v0 = vmax.f32 %v4705_v17, 0.0 }
 0x6e1   : > { %v3192_v11 = vpop.f32.mrf.mxu2 }
 0x6e2   : > { %v3193_v39 = vadd.f32 %v11544_v51, %v3192_v11 }
 0x6e3   : > { %v11566_v56 = vpop.f32.mrf.mxu1 }
 0x6e4   : > { %14037 = vst [vmem:[#allocation85_spill] sm:$0xff] %v11566_v56  ;;  %v3558_v10 = vmax.f32 %v3193_v39, 0.0  ;;  %v11577_v56 = vpack.c.bf16 %v2481_v60, %v2480_v42 }
 0x6e5   : > { %v4706_v53 = vpop.f32.mrf.mxu3 }
 0x6e6   : > { %3234 = vmatmul.bf16.gmra.mxu2 %v11521_v36  ;;  %6896 = vmatmul.bf16.gmra.mxu1 %v5744_v16  ;;  %v11571_v14 = vpack.c.bf16 %v3558_v10, %v3557_v27  ;;  %v4707_v45 = vadd.f32 %v4706_v53, %v10947_v44  ;;  %v2155_v27 = vadd.f32 %v11445_v21, %v14041_v15  ;;  %v14043_v16 = vld [vmem:[#allocation90_spill] sm:$0xff] }
 0x6e7   : > { %v2157_v53 = vadd.f32 %v11445_v21, %v14043_v16  ;;  %v14046_v16 = vld [vmem:[#allocation91_spill] sm:$0xff] }
 0x6e8   : > { %14039 = vst [vmem:[#allocation87_spill] sm:$0xff] %v11571_v14  ;;  %v5310_v59 = vmax.f32 %v4707_v45, 0.0 }
 0x6e9   : > { %v3195_v58 = vpop.f32.mrf.mxu2  ;;  %v2483_v45 = vmax.f32 %v2157_v53, 0.0  ;;  %v2160_v53 = vadd.f32 %v11445_v21, %v14046_v16 }
 0x6ea   : > { %4748 = vmatmul.bf16.gmra.mxu3 %v10809_v20  ;;  %v3196_v36 = vadd.f32 %v11544_v51, %v3195_v58  ;;  %v5746_v20 = vpack.c.bf16 %v5310_v59, %v5308_v0  ;;  %v2482_v58 = vmax.f32 %v2155_v27, 0.0 }
 0x6eb   : > { %v11574_v11 = vpop.f32.mrf.mxu1 }
 0x6ec   : > { %14040 = vst [vmem:[#allocation199_spill] sm:$0xff] %v11574_v11  ;;  %v3559_v42 = vmax.f32 %v3196_v36, 0.0 }
 0x6ed   : > { %v4709_v55 = vpop.f32.mrf.mxu3 }
 0x6ee   : > { %v4710_v59 = vadd.f32 %v4709_v55, %v10947_v44 }
 0x6f1   : > { %v3197_v39 = vpop.f32.mrf.mxu2 }
 0x6f2   : > { %v3198_v7 = vadd.f32 %v11544_v51, %v3197_v39 }
 0x6f3   : > { %v11584_v10 = vpop.f32.mrf.mxu1 }
 0x6f4   : > { %14042 = vst [vmem:[#allocation88_spill] sm:$0xff] %v11584_v10  ;;  %v3560_v60 = vmax.f32 %v3198_v7, 0.0  ;;  %v11595_v10 = vpack.c.bf16 %v2483_v45, %v2482_v58  ;;  %v5312_v7 = vmax.f32 %v4710_v59, 0.0  ;;  %v8644_v59 = vld [vmem:[%s13582_s5 + $0x20] sm:$0xf] }
 0x6f5   : > { %v4711_v11 = vpop.f32.mrf.mxu3 }
 0x6f6   : > { %3239 = vmatmul.bf16.gmra.mxu2 %v11538_v46  ;;  %6901 = vmatmul.bf16.gmra.mxu1 %v5746_v20  ;;  %v11589_v8 = vpack.c.bf16 %v3560_v60, %v3559_v42  ;;  %v4712_v15 = vadd.f32 %v4711_v11, %v10947_v44  ;;  %v14048_v60 = vld [vmem:[#allocation93_spill] sm:$0xff] }
 0x6f7   : > { %v2162_v11 = vadd.f32 %v11445_v21, %v14048_v60 }
 0x6f8   : > { %14044 = vst [vmem:[#allocation90_spill] sm:$0xff] %v11589_v8  ;;  %v5314_v0 = vmax.f32 %v4712_v15, 0.0 }
 0x6f9   : > { %v3200_v17 = vpop.f32.mrf.mxu2  ;;  %v2485_v15 = vmax.f32 %v2162_v11, 0.0  ;;  %v8914_v11 = vld [vmem:[%s13584_s7 + $0x18] sm:$0xff] }
 0x6fa   : > { %4753 = vmatmul.bf16.gmra.mxu3 %v10827_v19  ;;  %v3201_v46 = vadd.f32 %v11544_v51, %v3200_v17  ;;  %v5748_v19 = vpack.c.bf16 %v5314_v0, %v5312_v7  ;;  %v2484_v17 = vmax.f32 %v2160_v53, 0.0  ;;  %6063 = vmatpush.bf16.msrb.mxu0 %v8914_v11 }
 0x6fb   : > { %v11592_v39 = vpop.f32.mrf.mxu1 }
 0x6fc   : > { %14045 = vst [vmem:[#allocation200_spill] sm:$0xff] %v11592_v39  ;;  %v3561_v58 = vmax.f32 %v3201_v46, 0.0 }
 0x6fd   : > { %v4714_v36 = vpop.f32.mrf.mxu3 }
 0x6fe   : > { %v4715_v7 = vadd.f32 %v4714_v36, %v10947_v44 }
 0x701   : > { %v3202_v20 = vpop.f32.mrf.mxu2 }
 0x702   : > { %v3203_v27 = vadd.f32 %v11544_v51, %v3202_v20  ;;  %v8900_v20 = vld [vmem:[%s13582_s5 + $0x24] sm:$0xf0] }
 0x703   : > { %v11602_v42 = vpop.f32.mrf.mxu1  ;;  %v8645_v60 = vor.u32 %v8900_v20, %v8644_v59  ;;  %v14051_v20 = vld [vmem:[#allocation94_spill] sm:$0xff] }
 0x704   : > { %14047 = vst [vmem:[#allocation91_spill] sm:$0xff] %v11602_v42  ;;  %v3562_v45 = vmax.f32 %v3203_v27, 0.0 }
 0x705   : > { %v4716_v39 = vpop.f32.mrf.mxu3  ;;  %3866 = vmatpush.bf16.msrb.mxu2 %v8645_v60 }
 0x706   : > { %3244 = vmatmul.bf16.gmra.mxu2 %v2632_v49  ;;  %6906 = vmatmul.bf16.gmra.mxu1 %v5748_v19  ;;  %v11606_v55 = vpack.c.bf16 %v3562_v45, %v3561_v58  ;;  %v4717_v19 = vadd.f32 %v4716_v39, %v10947_v44  ;;  %v11618_v49 = vpack.c.bf16 %v2485_v15, %v2484_v17  ;;  %v5316_v45 = vmax.f32 %v4715_v7, 0.0  ;;  %v14053_v15 = vld [vmem:[#allocation96_spill] sm:$0xff] }
 0x707   : > { %v2165_v39 = vadd.f32 %v11445_v21, %v14051_v20  ;;  %v2167_v36 = vadd.f32 %v11445_v21, %v14053_v15 }
 0x708   : > { %14049 = vst [vmem:[#allocation93_spill] sm:$0xff] %v11606_v55  ;;  %v5318_v27 = vmax.f32 %v4717_v19, 0.0 }
 0x709   : > { %v3205_v16 = vpop.f32.mrf.mxu2  ;;  %v2486_v7 = vmax.f32 %v2165_v39, 0.0  ;;  %v14056_v39 = vld [vmem:[#allocation97_spill] sm:$0xff] }
 0x70a   : > { %4758 = vmatmul.bf16.gmra.mxu3 %v10838_v62  ;;  %v3206_v53 = vadd.f32 %v11544_v51, %v3205_v16  ;;  %v5750_v16 = vpack.c.bf16 %v5318_v27, %v5316_v45 }
 0x70b   : > { %v11615_v0 = vpop.f32.mrf.mxu1 }
 0x70c   : > { %14050 = vst [vmem:[#allocation201_spill] sm:$0xff] %v11615_v0  ;;  %v3563_v60 = vmax.f32 %v3206_v53, 0.0 }
 0x70d   : > { %v4719_v46 = vpop.f32.mrf.mxu3 }
 0x70e   : > { %v4720_v53 = vadd.f32 %v4719_v46, %v10947_v44 }
 0x711   : > { %v3207_v58 = vpop.f32.mrf.mxu2 }
 0x712   : > { %v3208_v59 = vadd.f32 %v11544_v51, %v3207_v58  ;;  %v2487_v58 = vmax.f32 %v2167_v36, 0.0  ;;  %v2170_v36 = vadd.f32 %v11445_v21, %v14056_v39 }
 0x713   : > { %v11628_v17 = vpop.f32.mrf.mxu1 }
 0x714   : > { %14052 = vst [vmem:[#allocation94_spill] sm:$0xff] %v11628_v17  ;;  %v3564_v19 = vmax.f32 %v3208_v59, 0.0  ;;  %v2636_v42 = vpack.c.bf16 %v2487_v58, %v2486_v7  ;;  %v5320_v59 = vmax.f32 %v4720_v53, 0.0 }
 0x715   : > { %v4721_v62 = vpop.f32.mrf.mxu3 }
 0x716   : > { %3249 = vmatmul.bf16.gmra.mxu2 %v11577_v56  ;;  %6911 = vmatmul.bf16.gmra.mxu1 %v5750_v16  ;;  %v11633_v0 = vpack.c.bf16 %v3564_v19, %v3563_v60  ;;  %v4722_v17 = vadd.f32 %v4721_v62, %v10947_v44  ;;  %v14058_v16 = vld [vmem:[#allocation99_spill] sm:$0xff] }
 0x718   : > { %14054 = vst [vmem:[#allocation96_spill] sm:$0xff] %v11633_v0  ;;  %v5322_v27 = vmax.f32 %v4722_v17, 0.0  ;;  %v2488_v17 = vmax.f32 %v2170_v36, 0.0  ;;  %v14061_v36 = vld [vmem:[#allocation100_spill] sm:$0xff] }
 0x719   : > { %v3210_v11 = vpop.f32.mrf.mxu2 }
 0x71a   : > { %4763 = vmatmul.bf16.gmra.mxu3 %v10849_v31  ;;  %v3211_v45 = vadd.f32 %v11544_v51, %v3210_v11  ;;  %v2172_v31 = vadd.f32 %v11445_v21, %v14058_v16  ;;  %v5752_v58 = vpack.c.bf16 %v5322_v27, %v5320_v59 }
 0x71b   : > { %v11636_v20 = vpop.f32.mrf.mxu1 }
 0x71c   : > { %14055 = vst [vmem:[#allocation202_spill] sm:$0xff] %v11636_v20  ;;  %v3565_v62 = vmax.f32 %v3211_v45, 0.0  ;;  %v2489_v11 = vmax.f32 %v2172_v31, 0.0  ;;  %v2175_v31 = vadd.f32 %v11445_v21, %v14061_v36 }
 0x71d   : > { %v4724_v15 = vpop.f32.mrf.mxu3 }
 0x71e   : > { %v4725_v45 = vadd.f32 %v4724_v15, %v10947_v44 }
 0x721   : > { %v3212_v56 = vpop.f32.mrf.mxu2 }
 0x722   : > { %v3213_v60 = vadd.f32 %v11544_v51, %v3212_v56 }
 0x723   : > { %v11644_v19 = vpop.f32.mrf.mxu1 }
 0x724   : > { %14057 = vst [vmem:[#allocation97_spill] sm:$0xff] %v11644_v19  ;;  %v3566_v7 = vmax.f32 %v3213_v60, 0.0  ;;  %v2637_v19 = vpack.c.bf16 %v2489_v11, %v2488_v17  ;;  %v5324_v60 = vmax.f32 %v4725_v45, 0.0 }
 0x725   : > { %v4726_v20 = vpop.f32.mrf.mxu3 }
 0x726   : > { %3254 = vmatmul.bf16.gmra.mxu2 %v11595_v10  ;;  %6916 = vmatmul.bf16.gmra.mxu1 %v5752_v58  ;;  %v11649_v46 = vpack.c.bf16 %v3566_v7, %v3565_v62  ;;  %v4727_v39 = vadd.f32 %v4726_v20, %v10947_v44  ;;  %v14063_v58 = vld [vmem:[#allocation102_spill] sm:$0xff] }
 0x728   : > { %14059 = vst [vmem:[#allocation99_spill] sm:$0xff] %v11649_v46  ;;  %v5326_v27 = vmax.f32 %v4727_v39, 0.0 }
 0x729   : > { %v3215_v53 = vpop.f32.mrf.mxu2 }
 0x72a   : > { %4768 = vmatmul.bf16.gmra.mxu3 %v10860_v54  ;;  %v3216_v59 = vadd.f32 %v11544_v51, %v3215_v53  ;;  %v2177_v54 = vadd.f32 %v11445_v21, %v14063_v58  ;;  %v5754_v11 = vpack.c.bf16 %v5326_v27, %v5324_v60  ;;  %v2490_v53 = vmax.f32 %v2175_v31, 0.0  ;;  %v14066_v31 = vld [vmem:[#allocation103_spill] sm:$0xff] }
 0x72b   : > { %v11652_v56 = vpop.f32.mrf.mxu1 }
 0x72c   : > { %14060 = vst [vmem:[#allocation203_spill] sm:$0xff] %v11652_v56  ;;  %v3567_v20 = vmax.f32 %v3216_v59, 0.0  ;;  %v2491_v39 = vmax.f32 %v2177_v54, 0.0  ;;  %v2180_v54 = vadd.f32 %v11445_v21, %v14066_v31 }
 0x72d   : > { %v4729_v16 = vpop.f32.mrf.mxu3 }
 0x72e   : > { %v4730_v59 = vadd.f32 %v4729_v16, %v10947_v44 }
 0x731   : > { %v3217_v10 = vpop.f32.mrf.mxu2 }
 0x732   : > { %v3218_v62 = vadd.f32 %v11544_v51, %v3217_v10 }
 0x733   : > { %v11660_v7 = vpop.f32.mrf.mxu1 }
 0x734   : > { %14062 = vst [vmem:[#allocation100_spill] sm:$0xff] %v11660_v7  ;;  %v3568_v17 = vmax.f32 %v3218_v62, 0.0  ;;  %v2638_v7 = vpack.c.bf16 %v2491_v39, %v2490_v53  ;;  %v5328_v62 = vmax.f32 %v4730_v59, 0.0 }
 0x735   : > { %v4731_v56 = vpop.f32.mrf.mxu3 }
 0x736   : > { %3259 = vmatmul.bf16.gmra.mxu2 %v11618_v49  ;;  %6921 = vmatmul.bf16.gmra.mxu1 %v5754_v11  ;;  %v11665_v15 = vpack.c.bf16 %v3568_v17, %v3567_v20  ;;  %v4732_v36 = vadd.f32 %v4731_v56, %v10947_v44  ;;  %v14068_v11 = vld [vmem:[#allocation105_spill] sm:$0xff] }
 0x738   : > { %14064 = vst [vmem:[#allocation102_spill] sm:$0xff] %v11665_v15  ;;  %v5330_v27 = vmax.f32 %v4732_v36, 0.0 }
 0x739   : > { %v3220_v45 = vpop.f32.mrf.mxu2 }
 0x73a   : > { %4773 = vmatmul.bf16.gmra.mxu3 %v10871_v25  ;;  %v3221_v60 = vadd.f32 %v11544_v51, %v3220_v45  ;;  %v2182_v25 = vadd.f32 %v11445_v21, %v14068_v11  ;;  %v5756_v39 = vpack.c.bf16 %v5330_v27, %v5328_v62  ;;  %v2492_v45 = vmax.f32 %v2180_v54, 0.0  ;;  %v14072_v54 = vld [vmem:[#allocation106_spill] sm:$0xff] }
 0x73b   : > { %v11668_v10 = vpop.f32.mrf.mxu1 }
 0x73c   : > { %14065 = vst [vmem:[#allocation204_spill] sm:$0xff] %v11668_v10  ;;  %v3569_v56 = vmax.f32 %v3221_v60, 0.0  ;;  %v2493_v36 = vmax.f32 %v2182_v25, 0.0  ;;  %v2185_v25 = vadd.f32 %v11445_v21, %v14072_v54 }
 0x73d   : > { %v4734_v58 = vpop.f32.mrf.mxu3 }
 0x73e   : > { %v4735_v60 = vadd.f32 %v4734_v58, %v10947_v44 }
 0x740   : > { %v5332_v62 = vmax.f32 %v4735_v60, 0.0 }
 0x741   : > { %v3222_v49 = vpop.f32.mrf.mxu2 }
 0x742   : > { %v3223_v20 = vadd.f32 %v11544_v51, %v3222_v49  ;;  %v14070_v49 = vld [vmem:[#allocation155_spill] sm:$0xff] }
 0x743   : > { %v11676_v17 = vpop.f32.mrf.mxu1 }
 0x744   : > { %14067 = vst [vmem:[#allocation103_spill] sm:$0xff] %v11676_v17  ;;  %v3570_v53 = vmax.f32 %v3223_v20, 0.0  ;;  %v2639_v17 = vpack.c.bf16 %v2493_v36, %v2492_v45 }
 0x745   : > { %v4736_v10 = vpop.f32.mrf.mxu3 }
 0x746   : > { %3264 = vmatmul.bf16.gmra.mxu2 %v2636_v42  ;;  %6926 = vmatmul.bf16.gmra.mxu1 %v5756_v39  ;;  %v11680_v16 = vpack.c.bf16 %v3570_v53, %v3569_v56  ;;  %v4737_v31 = vadd.f32 %v4736_v10, %v10947_v44  ;;  %v14074_v53 = vld [vmem:[#allocation108_spill] sm:$0xff] }
 0x747   : > { %v2187_v39 = vadd.f32 %v11445_v21, %v14074_v53 }
 0x748   : > { %14069 = vst [vmem:[#allocation105_spill] sm:$0xff] %v11680_v16  ;;  %v5334_v20 = vmax.f32 %v4737_v31, 0.0 }
 0x749   : > { %v3225_v59 = vpop.f32.mrf.mxu2  ;;  %v2495_v31 = vmax.f32 %v2187_v39, 0.0 }
 0x74a   : > { %4778 = vmatmul.bf16.gmra.mxu3 %v14070_v49  ;;  %v3226_v27 = vadd.f32 %v11544_v51, %v3225_v59  ;;  %v5758_v36 = vpack.c.bf16 %v5334_v20, %v5332_v62  ;;  %v2494_v59 = vmax.f32 %v2185_v25, 0.0  ;;  %v14078_v25 = vld [vmem:[#allocation109_spill] sm:$0xff] }
 0x74b   : > { %v11683_v15 = vpop.f32.mrf.mxu1  ;;  %v2190_v39 = vadd.f32 %v11445_v21, %v14078_v25 }
 0x74c   : > { %14071 = vst [vmem:[#allocation205_spill] sm:$0xff] %v11683_v15  ;;  %v3571_v10 = vmax.f32 %v3226_v27, 0.0 }
 0x74d   : > { %v4739_v46 = vpop.f32.mrf.mxu3 }
 0x74e   : > { %v4740_v27 = vadd.f32 %v4739_v46, %v10947_v44 }
 0x750   : > { %v5336_v62 = vmax.f32 %v4740_v27, 0.0 }
 0x751   : > { %v3227_v42 = vpop.f32.mrf.mxu2 }
 0x752   : > { %v3228_v11 = vadd.f32 %v11544_v51, %v3227_v42  ;;  %v14076_v42 = vld [vmem:[#allocation158_spill] sm:$0xff] }
 0x753   : > { %v11691_v56 = vpop.f32.mrf.mxu1 }
 0x754   : > { %14073 = vst [vmem:[#allocation106_spill] sm:$0xff] %v11691_v56  ;;  %v3572_v45 = vmax.f32 %v3228_v11, 0.0  ;;  %v2640_v56 = vpack.c.bf16 %v2495_v31, %v2494_v59 }
 0x755   : > { %v4741_v49 = vpop.f32.mrf.mxu3 }
 0x756   : > { %3269 = vmatmul.bf16.gmra.mxu2 %v2637_v19  ;;  %6931 = vmatmul.bf16.gmra.mxu1 %v5758_v36  ;;  %v11695_v58 = vpack.c.bf16 %v3572_v45, %v3571_v10  ;;  %v4742_v54 = vadd.f32 %v4741_v49, %v10947_v44  ;;  %v14080_v45 = vld [vmem:[#allocation111_spill] sm:$0xff] }
 0x757   : > { %v2192_v36 = vadd.f32 %v11445_v21, %v14080_v45 }
 0x758   : > { %14075 = vst [vmem:[#allocation108_spill] sm:$0xff] %v11695_v58  ;;  %v5338_v11 = vmax.f32 %v4742_v54, 0.0 }
 0x759   : > { %v3230_v60 = vpop.f32.mrf.mxu2  ;;  %v2497_v54 = vmax.f32 %v2192_v36, 0.0  ;;  %v14084_v36 = vld [vmem:[#allocation112_spill] sm:$0xff] }
 0x75a   : > { %4783 = vmatmul.bf16.gmra.mxu3 %v14076_v42  ;;  %v3231_v20 = vadd.f32 %v11544_v51, %v3230_v60  ;;  %v5760_v31 = vpack.c.bf16 %v5338_v11, %v5336_v62  ;;  %v2496_v60 = vmax.f32 %v2190_v39, 0.0 }
 0x75b   : > { %v11698_v15 = vpop.f32.mrf.mxu1 }
 0x75c   : > { %14077 = vst [vmem:[#allocation206_spill] sm:$0xff] %v11698_v15  ;;  %v3573_v49 = vmax.f32 %v3231_v20, 0.0 }
 0x75d   : > { %v4744_v16 = vpop.f32.mrf.mxu3 }
 0x75e   : > { %v4745_v20 = vadd.f32 %v4744_v16, %v10947_v44 }
 0x761   : > { %v3232_v19 = vpop.f32.mrf.mxu2 }
 0x762   : > { %v3233_v53 = vadd.f32 %v11544_v51, %v3232_v19  ;;  %v14082_v19 = vld [vmem:[#allocation160_spill] sm:$0xff] }
 0x763   : > { %v11706_v10 = vpop.f32.mrf.mxu1 }
 0x764   : > { %14079 = vst [vmem:[#allocation109_spill] sm:$0xff] %v11706_v10  ;;  %v3574_v59 = vmax.f32 %v3233_v53, 0.0  ;;  %v11716_v10 = vpack.c.bf16 %v2497_v54, %v2496_v60  ;;  %v5340_v53 = vmax.f32 %v4745_v20, 0.0 }
 0x765   : > { %v4746_v42 = vpop.f32.mrf.mxu3 }
 0x766   : > { %3274 = vmatmul.bf16.gmra.mxu2 %v2638_v7  ;;  %6936 = vmatmul.bf16.gmra.mxu1 %v5760_v31  ;;  %v11710_v46 = vpack.c.bf16 %v3574_v59, %v3573_v49  ;;  %v4747_v25 = vadd.f32 %v4746_v42, %v10947_v44  ;;  %v2195_v49 = vadd.f32 %v11445_v21, %v14084_v36  ;;  %v14086_v31 = vld [vmem:[#allocation114_spill] sm:$0xff] }
 0x767   : > { %v2197_v42 = vadd.f32 %v11445_v21, %v14086_v31 }
 0x768   : > { %14081 = vst [vmem:[#allocation111_spill] sm:$0xff] %v11710_v46  ;;  %v5342_v11 = vmax.f32 %v4747_v25, 0.0 }
 0x769   : > { %v3235_v27 = vpop.f32.mrf.mxu2  ;;  %v2499_v25 = vmax.f32 %v2197_v42, 0.0 }
 0x76a   : > { %4788 = vmatmul.bf16.gmra.mxu3 %v14082_v19  ;;  %v3236_v7 = vadd.f32 %v11544_v51, %v3235_v27  ;;  %v5762_v19 = vpack.c.bf16 %v5342_v11, %v5340_v53  ;;  %v2498_v27 = vmax.f32 %v2195_v49, 0.0  ;;  %v14089_v49 = vld [vmem:[#allocation115_spill] sm:$0xff] }
 0x76b   : > { %v11713_v15 = vpop.f32.mrf.mxu1  ;;  %v2200_v42 = vadd.f32 %v11445_v21, %v14089_v49 }
 0x76c   : > { %14083 = vst [vmem:[#allocation207_spill] sm:$0xff] %v11713_v15  ;;  %v3575_v60 = vmax.f32 %v3236_v7, 0.0 }
 0x76d   : > { %v4749_v45 = vpop.f32.mrf.mxu3 }
 0x76e   : > { %v4750_v7 = vadd.f32 %v4749_v45, %v10947_v44 }
 0x770   : > { %v5344_v53 = vmax.f32 %v4750_v7, 0.0  ;;  %v8636_v7 = vld [vmem:[%s13582_s5 + $0x10] sm:$0xf] }
 0x771   : > { %v3237_v62 = vpop.f32.mrf.mxu2 }
 0x772   : > { %v3238_v39 = vadd.f32 %v11544_v51, %v3237_v62 }
 0x773   : > { %v11723_v59 = vpop.f32.mrf.mxu1 }
 0x774   : > { %14085 = vst [vmem:[#allocation112_spill] sm:$0xff] %v11723_v59  ;;  %v3576_v54 = vmax.f32 %v3238_v39, 0.0  ;;  %v11733_v59 = vpack.c.bf16 %v2499_v25, %v2498_v27 }
 0x775   : > { %v4751_v15 = vpop.f32.mrf.mxu3 }
 0x776   : > { %3279 = vmatmul.bf16.gmra.mxu2 %v2639_v17  ;;  %6941 = vmatmul.bf16.gmra.mxu1 %v5762_v19  ;;  %v11727_v16 = vpack.c.bf16 %v3576_v54, %v3575_v60  ;;  %v4752_v36 = vadd.f32 %v4751_v15, %v10947_v44  ;;  %v14091_v54 = vld [vmem:[#allocation117_spill] sm:$0xff] }
 0x777   : > { %v2202_v15 = vadd.f32 %v11445_v21, %v14091_v54 }
 0x778   : > { %14087 = vst [vmem:[#allocation114_spill] sm:$0xff] %v11727_v16  ;;  %v5346_v11 = vmax.f32 %v4752_v36, 0.0 }
 0x779   : > { %v3240_v20 = vpop.f32.mrf.mxu2  ;;  %v2501_v36 = vmax.f32 %v2202_v15, 0.0 }
 0x77a   : > { %4793 = vmatmul.bf16.gmra.mxu3 %v10956_v50  ;;  %v3241_v17 = vadd.f32 %v11544_v51, %v3240_v20  ;;  %v5764_v50 = vpack.c.bf16 %v5346_v11, %v5344_v53  ;;  %v2500_v20 = vmax.f32 %v2200_v42, 0.0 }
 0x77b   : > { %v11730_v62 = vpop.f32.mrf.mxu1 }
 0x77c   : > { %14088 = vst [vmem:[#allocation208_spill] sm:$0xff] %v11730_v62  ;;  %v3577_v27 = vmax.f32 %v3241_v17, 0.0 }
 0x77d   : > { %v4754_v31 = vpop.f32.mrf.mxu3 }
 0x77e   : > { %v4755_v53 = vadd.f32 %v4754_v31, %v10947_v44  ;;  %v8913_v31 = vld [vmem:[%s13584_s7 + $0x10] sm:$0xff] }
 0x77f   : > { %6064 = vmatpush.bf16.msrb.mxu0 %v8913_v31 }
 0x781   : > { %v3242_v19 = vpop.f32.mrf.mxu2 }
 0x782   : > { %v3243_v39 = vadd.f32 %v11544_v51, %v3242_v19  ;;  %v8898_v19 = vld [vmem:[%s13582_s5 + $0x14] sm:$0xf0] }
 0x783   : > { %v11740_v60 = vpop.f32.mrf.mxu1  ;;  %v8637_v54 = vor.u32 %v8898_v19, %v8636_v7  ;;  %v14094_v7 = vld [vmem:[#allocation118_spill] sm:$0xff] }
 0x784   : > { %14090 = vst [vmem:[#allocation115_spill] sm:$0xff] %v11740_v60  ;;  %v3578_v25 = vmax.f32 %v3243_v39, 0.0  ;;  %v2205_v19 = vadd.f32 %v11445_v21, %v14094_v7 }
 0x785   : > { %v4756_v62 = vpop.f32.mrf.mxu3  ;;  %3867 = vmatpush.bf16.msrb.mxu2 %v8637_v54  ;;  %v14096_v54 = vld [vmem:[#allocation120_spill] sm:$0xff] }
 0x786   : > { %3284 = vmatmul.bf16.gmra.mxu2 %v2640_v56  ;;  %6946 = vmatmul.bf16.gmra.mxu1 %v5764_v50  ;;  %v11744_v45 = vpack.c.bf16 %v3578_v25, %v3577_v27  ;;  %v4757_v50 = vadd.f32 %v4756_v62, %v10947_v44  ;;  %v11756_v56 = vpack.c.bf16 %v2501_v36, %v2500_v20  ;;  %v5348_v27 = vmax.f32 %v4755_v53, 0.0 }
 0x787   : > { %v2207_v62 = vadd.f32 %v11445_v21, %v14096_v54  ;;  %v2502_v53 = vmax.f32 %v2205_v19, 0.0  ;;  %v14099_v19 = vld [vmem:[#allocation121_spill] sm:$0xff] }
 0x788   : > { %14092 = vst [vmem:[#allocation117_spill] sm:$0xff] %v11744_v45  ;;  %v5350_v39 = vmax.f32 %v4757_v50, 0.0 }
 0x789   : > { %v3245_v49 = vpop.f32.mrf.mxu2 }
 0x78a   : > { %4798 = vmatmul.bf16.gmra.mxu3 %v10967_v24  ;;  %v3246_v42 = vadd.f32 %v11544_v51, %v3245_v49 }
 0x78b   : > { %v11753_v11 = vpop.f32.mrf.mxu1 }
 0x78c   : > { %14093 = vst [vmem:[#allocation209_spill] sm:$0xff] %v11753_v11  ;;  %v3579_v20 = vmax.f32 %v3246_v42, 0.0  ;;  %v5766_v11 = vpack.c.bf16 %v5350_v39, %v5348_v27 }
 0x78d   : > { %v4759_v17 = vpop.f32.mrf.mxu3 }
 0x791   : > { %v3247_v15 = vpop.f32.mrf.mxu2 }
 0x792   : > { %v3248_v25 = vadd.f32 %v11544_v51, %v3247_v15  ;;  %v2503_v15 = vmax.f32 %v2207_v62, 0.0  ;;  %v2210_v62 = vadd.f32 %v11445_v21, %v14099_v19 }
 0x793   : > { %v11763_v24 = vpop.f32.mrf.mxu1 }
 0x794   : > { %14095 = vst [vmem:[#allocation118_spill] sm:$0xff] %v11763_v24  ;;  %v3580_v36 = vmax.f32 %v3248_v25, 0.0  ;;  %v2644_v42 = vpack.c.bf16 %v2503_v15, %v2502_v53  ;;  %v4760_v25 = vadd.f32 %v4759_v17, %v10947_v44 }
 0x795   : > { %v4761_v49 = vpop.f32.mrf.mxu3 }
 0x796   : > { %3289 = vmatmul.bf16.gmra.mxu2 %v11716_v10  ;;  %6951 = vmatmul.bf16.gmra.mxu1 %v5766_v11  ;;  %v11771_v50 = vpack.c.bf16 %v3580_v36, %v3579_v20  ;;  %v4762_v39 = vadd.f32 %v4761_v49, %v10947_v44  ;;  %v5352_v20 = vmax.f32 %v4760_v25, 0.0 }
 0x798   : > { %14097 = vst [vmem:[#allocation120_spill] sm:$0xff] %v11771_v50  ;;  %v5354_v24 = vmax.f32 %v4762_v39, 0.0 }
 0x799   : > { %v3250_v7 = vpop.f32.mrf.mxu2 }
 0x79a   : > { %4803 = vmatmul.bf16.gmra.mxu3 %v10979_v29  ;;  %v3251_v10 = vadd.f32 %v11544_v51, %v3250_v7  ;;  %v14101_v29 = vld [vmem:[#allocation123_spill] sm:$0xff]  ;;  %v5768_v15 = vpack.c.bf16 %v5354_v24, %v5352_v20  ;;  %v2504_v7 = vmax.f32 %v2210_v62, 0.0 }
 0x79b   : > { %v11774_v54 = vpop.f32.mrf.mxu1 }
 0x79c   : > { %14098 = vst [vmem:[#allocation210_spill] sm:$0xff] %v11774_v54  ;;  %v2212_v54 = vadd.f32 %v11445_v21, %v14101_v29  ;;  %v3581_v49 = vmax.f32 %v3251_v10, 0.0 }
 0x79d   : > { %v4764_v27 = vpop.f32.mrf.mxu3 }
 0x79e   : > { %v2505_v39 = vmax.f32 %v2212_v54, 0.0  ;;  %v4765_v24 = vadd.f32 %v4764_v27, %v10947_v44  ;;  %v14104_v54 = vld [vmem:[#allocation124_spill] sm:$0xff] }
 0x7a1   : > { %v3252_v11 = vpop.f32.mrf.mxu2 }
 0x7a2   : > { %v3253_v36 = vadd.f32 %v11544_v51, %v3252_v11 }
 0x7a3   : > { %v11782_v31 = vpop.f32.mrf.mxu1 }
 0x7a4   : > { %14100 = vst [vmem:[#allocation121_spill] sm:$0xff] %v11782_v31  ;;  %v3582_v53 = vmax.f32 %v3253_v36, 0.0  ;;  %v11793_v31 = vpack.c.bf16 %v2505_v39, %v2504_v7  ;;  %v5356_v36 = vmax.f32 %v4765_v24, 0.0 }
 0x7a5   : > { %v4766_v60 = vpop.f32.mrf.mxu3 }
 0x7a6   : > { %3294 = vmatmul.bf16.gmra.mxu2 %v11733_v59  ;;  %6956 = vmatmul.bf16.gmra.mxu1 %v5768_v15  ;;  %v11787_v17 = vpack.c.bf16 %v3582_v53, %v3581_v49  ;;  %v4767_v19 = vadd.f32 %v4766_v60, %v10947_v44  ;;  %v2215_v49 = vadd.f32 %v11445_v21, %v14104_v54  ;;  %v14106_v15 = vld [vmem:[#allocation126_spill] sm:$0xff] }
 0x7a7   : > { %v2217_v60 = vadd.f32 %v11445_v21, %v14106_v15  ;;  %v14109_v15 = vld [vmem:[#allocation127_spill] sm:$0xff] }
 0x7a8   : > { %14102 = vst [vmem:[#allocation123_spill] sm:$0xff] %v11787_v17  ;;  %v5358_v10 = vmax.f32 %v4767_v19, 0.0 }
 0x7a9   : > { %v3255_v25 = vpop.f32.mrf.mxu2  ;;  %v2507_v19 = vmax.f32 %v2217_v60, 0.0  ;;  %v2220_v60 = vadd.f32 %v11445_v21, %v14109_v15 }
 0x7aa   : > { %4808 = vmatmul.bf16.gmra.mxu3 %v10990_v26  ;;  %v3256_v59 = vadd.f32 %v11544_v51, %v3255_v25  ;;  %v5770_v26 = vpack.c.bf16 %v5358_v10, %v5356_v36  ;;  %v2506_v25 = vmax.f32 %v2215_v49, 0.0 }
 0x7ab   : > { %v11790_v11 = vpop.f32.mrf.mxu1 }
 0x7ac   : > { %14103 = vst [vmem:[#allocation211_spill] sm:$0xff] %v11790_v11  ;;  %v3583_v7 = vmax.f32 %v3256_v59, 0.0 }
 0x7ad   : > { %v4769_v29 = vpop.f32.mrf.mxu3 }
 0x7ae   : > { %v4770_v10 = vadd.f32 %v4769_v29, %v10947_v44 }
 0x7b1   : > { %v3257_v20 = vpop.f32.mrf.mxu2 }
 0x7b2   : > { %v3258_v62 = vadd.f32 %v11544_v51, %v3257_v20 }
 0x7b3   : > { %v11800_v53 = vpop.f32.mrf.mxu1 }
 0x7b4   : > { %14105 = vst [vmem:[#allocation124_spill] sm:$0xff] %v11800_v53  ;;  %v3584_v39 = vmax.f32 %v3258_v62, 0.0  ;;  %v11811_v53 = vpack.c.bf16 %v2507_v19, %v2506_v25  ;;  %v5360_v62 = vmax.f32 %v4770_v10, 0.0 }
 0x7b5   : > { %v4771_v11 = vpop.f32.mrf.mxu3 }
 0x7b6   : > { %3299 = vmatmul.bf16.gmra.mxu2 %v11756_v56  ;;  %6961 = vmatmul.bf16.gmra.mxu1 %v5770_v26  ;;  %v11805_v27 = vpack.c.bf16 %v3584_v39, %v3583_v7  ;;  %v4772_v54 = vadd.f32 %v4771_v11, %v10947_v44  ;;  %v14111_v39 = vld [vmem:[#allocation129_spill] sm:$0xff] }
 0x7b7   : > { %v2222_v11 = vadd.f32 %v11445_v21, %v14111_v39  ;;  %v14114_v39 = vld [vmem:[#allocation130_spill] sm:$0xff] }
 0x7b8   : > { %14107 = vst [vmem:[#allocation126_spill] sm:$0xff] %v11805_v27  ;;  %v5362_v36 = vmax.f32 %v4772_v54, 0.0 }
 0x7b9   : > { %v3260_v24 = vpop.f32.mrf.mxu2  ;;  %v2509_v54 = vmax.f32 %v2222_v11, 0.0 }
 0x7ba   : > { %4813 = vmatmul.bf16.gmra.mxu3 %v11001_v52  ;;  %v3261_v56 = vadd.f32 %v11544_v51, %v3260_v24  ;;  %v5772_v52 = vpack.c.bf16 %v5362_v36, %v5360_v62  ;;  %v2508_v24 = vmax.f32 %v2220_v60, 0.0  ;;  %v11836_v60 = vld [vmem:[%s13579_s2] ss:$0 sm:$0xff] }
 0x7bb   : > { %v11808_v20 = vpop.f32.mrf.mxu1 }
 0x7bc   : > { %14108 = vst [vmem:[#allocation212_spill] sm:$0xff] %v11808_v20  ;;  %v3585_v25 = vmax.f32 %v3261_v56, 0.0 }
 0x7bd   : > { %v4774_v59 = vpop.f32.mrf.mxu3 }
 0x7be   : > { %v4775_v56 = vadd.f32 %v4774_v59, %v10947_v44 }
 0x7c0   : > { %v5364_v62 = vmax.f32 %v4775_v56, 0.0 }
 0x7c1   : > { %v3262_v26 = vpop.f32.mrf.mxu2 }
 0x7c2   : > { %v3263_v49 = vadd.f32 %v11544_v51, %v3262_v26 }
 0x7c3   : > { %v11818_v7 = vpop.f32.mrf.mxu1 }
 0x7c4   : > { %14110 = vst [vmem:[#allocation127_spill] sm:$0xff] %v11818_v7  ;;  %v3586_v19 = vmax.f32 %v3263_v49, 0.0  ;;  %v11828_v7 = vpack.c.bf16 %v2509_v54, %v2508_v24 }
 0x7c5   : > { %v4776_v20 = vpop.f32.mrf.mxu3 }
 0x7c6   : > { %3304 = vmatmul.bf16.gmra.mxu2 %v2644_v42  ;;  %6966 = vmatmul.bf16.gmra.mxu1 %v5772_v52  ;;  %v11822_v29 = vpack.c.bf16 %v3586_v19, %v3585_v25  ;;  %v4777_v15 = vadd.f32 %v4776_v20, %v10947_v44  ;;  %v2225_v20 = vadd.f32 %v11836_v60, %v14114_v39  ;;  %v14116_v25 = vld [vmem:[#allocation132_spill] sm:$0xff] }
 0x7c7   : > { %v2227_v59 = vadd.f32 %v11836_v60, %v14116_v25 }
 0x7c8   : > { %14112 = vst [vmem:[#allocation129_spill] sm:$0xff] %v11822_v29  ;;  %v5366_v36 = vmax.f32 %v4777_v15, 0.0  ;;  %v2510_v56 = vmax.f32 %v2225_v20, 0.0  ;;  %v14119_v20 = vld [vmem:[#allocation133_spill] sm:$0xff] }
 0x7c9   : > { %v3265_v10 = vpop.f32.mrf.mxu2 }
 0x7ca   : > { %4818 = vmatmul.bf16.gmra.mxu3 %v11012_v63  ;;  %v3266_v42 = vadd.f32 %v11544_v51, %v3265_v10  ;;  %v5774_v54 = vpack.c.bf16 %v5366_v36, %v5364_v62 }
 0x7cb   : > { %v11825_v26 = vpop.f32.mrf.mxu1 }
 0x7cc   : > { %14113 = vst [vmem:[#allocation213_spill] sm:$0xff] %v11825_v26  ;;  %v3587_v19 = vmax.f32 %v3266_v42, 0.0 }
 0x7cd   : > { %v4779_v21 = vpop.f32.mrf.mxu3 }
 0x7ce   : > { %v4780_v42 = vadd.f32 %v4779_v21, %v10947_v44 }
 0x7d1   : > { %v3267_v52 = vpop.f32.mrf.mxu2 }
 0x7d2   : > { %v3268_v49 = vadd.f32 %v11544_v51, %v3267_v52  ;;  %v2511_v52 = vmax.f32 %v2227_v59, 0.0  ;;  %v2230_v59 = vadd.f32 %v11836_v60, %v14119_v20 }
 0x7d3   : > { %v11840_v11 = vpop.f32.mrf.mxu1 }
 0x7d4   : > { %14115 = vst [vmem:[#allocation130_spill] sm:$0xff] %v11840_v11  ;;  %v3588_v24 = vmax.f32 %v3268_v49, 0.0  ;;  %v2648_v26 = vpack.c.bf16 %v2511_v52, %v2510_v56  ;;  %v5368_v49 = vmax.f32 %v4780_v42, 0.0  ;;  %v2512_v21 = vmax.f32 %v2230_v59, 0.0 }
 0x7d5   : > { %v4781_v10 = vpop.f32.mrf.mxu3 }
 0x7d6   : > { %3309 = vmatmul.bf16.gmra.mxu2 %v11793_v31  ;;  %6971 = vmatmul.bf16.gmra.mxu1 %v5774_v54  ;;  %v11845_v15 = vpack.c.bf16 %v3588_v24, %v3587_v19  ;;  %v4782_v11 = vadd.f32 %v4781_v10, %v10947_v44  ;;  %v14121_v54 = vld [vmem:[#allocation135_spill] sm:$0xff] }
 0x7d8   : > { %14117 = vst [vmem:[#allocation132_spill] sm:$0xff] %v11845_v15  ;;  %v5370_v36 = vmax.f32 %v4782_v11, 0.0 }
 0x7d9   : > { %v3270_v63 = vpop.f32.mrf.mxu2 }
 0x7da   : > { %4823 = vmatmul.bf16.gmra.mxu3 %v11023_v30  ;;  %v3271_v62 = vadd.f32 %v11544_v51, %v3270_v63  ;;  %v2232_v30 = vadd.f32 %v11836_v60, %v14121_v54  ;;  %v5776_v52 = vpack.c.bf16 %v5370_v36, %v5368_v49 }
 0x7db   : > { %v11848_v39 = vpop.f32.mrf.mxu1 }
 0x7dc   : > { %14118 = vst [vmem:[#allocation214_spill] sm:$0xff] %v11848_v39  ;;  %v3589_v10 = vmax.f32 %v3271_v62, 0.0  ;;  %v2513_v11 = vmax.f32 %v2232_v30, 0.0  ;;  %v14124_v30 = vld [vmem:[#allocation136_spill] sm:$0xff] }
 0x7dd   : > { %v4784_v25 = vpop.f32.mrf.mxu3 }
 0x7de   : > { %v4785_v36 = vadd.f32 %v4784_v25, %v10947_v44 }
 0x7e0   : > { %v5372_v54 = vmax.f32 %v4785_v36, 0.0 }
 0x7e1   : > { %v3272_v31 = vpop.f32.mrf.mxu2 }
 0x7e2   : > { %v3273_v19 = vadd.f32 %v11544_v51, %v3272_v31 }
 0x7e3   : > { %v11856_v24 = vpop.f32.mrf.mxu1 }
 0x7e4   : > { %14120 = vst [vmem:[#allocation133_spill] sm:$0xff] %v11856_v24  ;;  %v3590_v56 = vmax.f32 %v3273_v19, 0.0  ;;  %v11867_v24 = vpack.c.bf16 %v2513_v11, %v2512_v21 }
 0x7e5   : > { %v4786_v39 = vpop.f32.mrf.mxu3 }
 0x7e6   : > { %3314 = vmatmul.bf16.gmra.mxu2 %v11811_v53  ;;  %6976 = vmatmul.bf16.gmra.mxu1 %v5776_v52  ;;  %v11861_v63 = vpack.c.bf16 %v3590_v56, %v3589_v10  ;;  %v4787_v20 = vadd.f32 %v4786_v39, %v10947_v44  ;;  %v2235_v10 = vadd.f32 %v11836_v60, %v14124_v30  ;;  %v14126_v52 = vld [vmem:[#allocation138_spill] sm:$0xff] }
 0x7e7   : > { %v2237_v39 = vadd.f32 %v11836_v60, %v14126_v52  ;;  %v14129_v52 = vld [vmem:[#allocation139_spill] sm:$0xff] }
 0x7e8   : > { %14122 = vst [vmem:[#allocation135_spill] sm:$0xff] %v11861_v63  ;;  %v5374_v49 = vmax.f32 %v4787_v20, 0.0 }
 0x7e9   : > { %v3275_v42 = vpop.f32.mrf.mxu2  ;;  %v2515_v20 = vmax.f32 %v2237_v39, 0.0  ;;  %v2240_v39 = vadd.f32 %v11836_v60, %v14129_v52 }
 0x7ea   : > { %4828 = vmatmul.bf16.gmra.mxu3 %v11043_v48  ;;  %v3276_v53 = vadd.f32 %v11544_v51, %v3275_v42  ;;  %v5778_v48 = vpack.c.bf16 %v5374_v49, %v5372_v54  ;;  %v2514_v42 = vmax.f32 %v2235_v10, 0.0 }
 0x7eb   : > { %v11864_v31 = vpop.f32.mrf.mxu1 }
 0x7ec   : > { %14123 = vst [vmem:[#allocation215_spill] sm:$0xff] %v11864_v31  ;;  %v3591_v21 = vmax.f32 %v3276_v53, 0.0 }
 0x7ed   : > { %v4789_v62 = vpop.f32.mrf.mxu3 }
 0x7ee   : > { %v4790_v49 = vadd.f32 %v4789_v62, %v10947_v44 }
 0x7f1   : > { %v3277_v19 = vpop.f32.mrf.mxu2 }
 0x7f2   : > { %v3278_v59 = vadd.f32 %v11544_v51, %v3277_v19 }
 0x7f3   : > { %v11874_v56 = vpop.f32.mrf.mxu1 }
 0x7f4   : > { %14125 = vst [vmem:[#allocation136_spill] sm:$0xff] %v11874_v56  ;;  %v3592_v11 = vmax.f32 %v3278_v59, 0.0  ;;  %v11885_v56 = vpack.c.bf16 %v2515_v20, %v2514_v42  ;;  %v5376_v59 = vmax.f32 %v4790_v49, 0.0  ;;  %v8628_v49 = vld [vmem:[%s13582_s5] sm:$0xf] }
 0x7f5   : > { %v4791_v31 = vpop.f32.mrf.mxu3 }
 0x7f6   : > { %3319 = vmatmul.bf16.gmra.mxu2 %v11828_v7  ;;  %6981 = vmatmul.bf16.gmra.mxu1 %v5778_v48  ;;  %v11879_v25 = vpack.c.bf16 %v3592_v11, %v3591_v21  ;;  %v4792_v30 = vadd.f32 %v4791_v31, %v10947_v44  ;;  %v14131_v11 = vld [vmem:[#allocation141_spill] sm:$0xff] }
 0x7f7   : > { %v2242_v31 = vadd.f32 %v11836_v60, %v14131_v11 }
 0x7f8   : > { %14127 = vst [vmem:[#allocation138_spill] sm:$0xff] %v11879_v25  ;;  %v5378_v54 = vmax.f32 %v4792_v30, 0.0 }
 0x7f9   : > { %v3280_v36 = vpop.f32.mrf.mxu2  ;;  %v2517_v30 = vmax.f32 %v2242_v31, 0.0 }
 0x7fa   : > { %4833 = vmatmul.bf16.gmra.mxu3 %v11054_v35  ;;  %v3281_v7 = vadd.f32 %v11544_v51, %v3280_v36  ;;  %v5780_v35 = vpack.c.bf16 %v5378_v54, %v5376_v59  ;;  %v2516_v36 = vmax.f32 %v2240_v39, 0.0 }
 0x7fb   : > { %v11882_v19 = vpop.f32.mrf.mxu1 }
 0x7fc   : > { %14128 = vst [vmem:[#allocation216_spill] sm:$0xff] %v11882_v19  ;;  %v3593_v42 = vmax.f32 %v3281_v7, 0.0 }
 0x7fd   : > { %v4794_v53 = vpop.f32.mrf.mxu3 }
 0x7fe   : > { %v4795_v59 = vadd.f32 %v4794_v53, %v10947_v44  ;;  %v8912_v53 = vld [vmem:[%s13584_s7 + $0x8] sm:$0xff] }
 0x7ff   : > { %6065 = vmatpush.bf16.msrb.mxu0 %v8912_v53 }
 0x801   : > { %v3282_v48 = vpop.f32.mrf.mxu2 }
 0x802   : > { %v3283_v10 = vadd.f32 %v11544_v51, %v3282_v48  ;;  %v8896_v48 = vld [vmem:[%s13582_s5 + $0x4] sm:$0xf0] }
 0x803   : > { %v11892_v21 = vpop.f32.mrf.mxu1  ;;  %v8629_v11 = vor.u32 %v8896_v48, %v8628_v49  ;;  %v14134_v49 = vld [vmem:[#allocation142_spill] sm:$0xff] }
 0x804   : > { %14130 = vst [vmem:[#allocation139_spill] sm:$0xff] %v11892_v21  ;;  %v3594_v20 = vmax.f32 %v3283_v10, 0.0  ;;  %v2245_v48 = vadd.f32 %v11836_v60, %v14134_v49 }
 0x805   : > { %v4796_v19 = vpop.f32.mrf.mxu3  ;;  %3868 = vmatpush.bf16.msrb.mxu2 %v8629_v11  ;;  %v14136_v11 = vld [vmem:[#allocation144_spill] sm:$0xff] }
 0x806   : > { %3324 = vmatmul.bf16.gmra.mxu2 %v2648_v26  ;;  %6986 = vmatmul.bf16.gmra.mxu1 %v5780_v35  ;;  %v11896_v62 = vpack.c.bf16 %v3594_v20, %v3593_v42  ;;  %v4797_v35 = vadd.f32 %v4796_v19, %v10947_v44  ;;  %v11908_v26 = vpack.c.bf16 %v2517_v30, %v2516_v36  ;;  %v5380_v42 = vmax.f32 %v4795_v59, 0.0 }
 0x807   : > { %v2247_v19 = vadd.f32 %v11836_v60, %v14136_v11 }
 0x808   : > { %14132 = vst [vmem:[#allocation141_spill] sm:$0xff] %v11896_v62  ;;  %v5382_v10 = vmax.f32 %v4797_v35, 0.0  ;;  %v2518_v35 = vmax.f32 %v2245_v48, 0.0 }
 0x809   : > { %v3285_v52 = vpop.f32.mrf.mxu2  ;;  %v2519_v59 = vmax.f32 %v2247_v19, 0.0 }
 0x80a   : > { %4838 = vmatmul.bf16.gmra.mxu3 %v11082_v34  ;;  %v3286_v39 = vadd.f32 %v11544_v51, %v3285_v52 }
 0x80b   : > { %v11905_v54 = vpop.f32.mrf.mxu1 }
 0x80c   : > { %14133 = vst [vmem:[#allocation217_spill] sm:$0xff] %v11905_v54  ;;  %v3595_v36 = vmax.f32 %v3286_v39, 0.0  ;;  %v5782_v54 = vpack.c.bf16 %v5382_v10, %v5380_v42  ;;  %v11929_v39 = vpack.c.bf16 %v2519_v59, %v2518_v35  ;;  %v14141_v35 = vld [vmem:[#allocation147_spill] sm:$0xff] }
 0x80d   : > { %v4799_v7 = vpop.f32.mrf.mxu3 }
 0x811   : > { %v3287_v31 = vpop.f32.mrf.mxu2 }
 0x812   : > { %v3288_v20 = vadd.f32 %v11544_v51, %v3287_v31 }
 0x813   : > { %v11915_v34 = vpop.f32.mrf.mxu1 }
 0x814   : > { %14135 = vst [vmem:[#allocation142_spill] sm:$0xff] %v11915_v34  ;;  %v3596_v30 = vmax.f32 %v3288_v20, 0.0  ;;  %v4800_v20 = vadd.f32 %v4799_v7, %v10947_v44  ;;  %v2252_v7 = vadd.f32 %v11836_v60, %v14141_v35 }
 0x815   : > { %v4801_v52 = vpop.f32.mrf.mxu3 }
 0x816   : > { %3329 = vmatmul.bf16.gmra.mxu2 %v11867_v24  ;;  %6991 = vmatmul.bf16.gmra.mxu1 %v5782_v54  ;;  %v11923_v51 = vpack.c.bf16 %v3596_v30, %v3595_v36  ;;  %v4802_v10 = vadd.f32 %v4801_v52, %v10947_v44  ;;  %v11935_v24 = vld [vmem:[%s13581_s4] ss:$0 sm:$0xff]  ;;  %v5384_v19 = vmax.f32 %v4800_v20, 0.0  ;;  %v2521_v34 = vmax.f32 %v2252_v7, 0.0 }
 0x817   : > { %v14139_v30 = vld [vmem:[#allocation145_spill] sm:$0xff] }
 0x818   : > { %14137 = vst [vmem:[#allocation144_spill] sm:$0xff] %v11923_v51  ;;  %v5386_v11 = vmax.f32 %v4802_v10, 0.0  ;;  %v2250_v53 = vadd.f32 %v11836_v60, %v14139_v30 }
 0x819   : > { %v3290_v31 = vpop.f32.mrf.mxu2 }
 0x81a   : > { %4843 = vmatmul.bf16.gmra.mxu3 %v11097_v9  ;;  %v3291_v54 = vadd.f32 %v11935_v24, %v3290_v31  ;;  %v5784_v9 = vpack.c.bf16 %v5386_v11, %v5384_v19  ;;  %v2520_v20 = vmax.f32 %v2250_v53, 0.0  ;;  %v14144_v53 = vld [vmem:[#allocation148_spill] sm:$0xff] }
 0x81b   : > { %v11926_v49 = vpop.f32.mrf.mxu1  ;;  %v2255_v7 = vadd.f32 %v11836_v60, %v14144_v53 }
 0x81c   : > { %14138 = vst [vmem:[#allocation218_spill] sm:$0xff] %v11926_v49  ;;  %v3597_v59 = vmax.f32 %v3291_v54, 0.0  ;;  %v2653_v21 = vpack.c.bf16 %v2521_v34, %v2520_v20 }
 0x81d   : > { %v4804_v42 = vpop.f32.mrf.mxu3 }
 0x81e   : > { %v4805_v54 = vadd.f32 %v4804_v42, %v10947_v44 }
 0x821   : > { %v3292_v48 = vpop.f32.mrf.mxu2 }
 0x822   : > { %v3293_v36 = vadd.f32 %v11935_v24, %v3292_v48 }
 0x823   : > { %v11941_v52 = vpop.f32.mrf.mxu1 }
 0x824   : > { %14140 = vst [vmem:[#allocation145_spill] sm:$0xff] %v11941_v52  ;;  %v3598_v10 = vmax.f32 %v3293_v36, 0.0 }
 0x825   : > { %v4806_v49 = vpop.f32.mrf.mxu3 }
 0x826   : > { %3334 = vmatmul.bf16.gmra.mxu2 %v11885_v56  ;;  %6996 = vmatmul.bf16.gmra.mxu1 %v5784_v9  ;;  %v11946_v31 = vpack.c.bf16 %v3598_v10, %v3597_v59  ;;  %v4807_v52 = vadd.f32 %v4806_v49, %v10947_v44  ;;  %v5388_v9 = vmax.f32 %v4805_v54, 0.0  ;;  %v14146_v10 = vld [vmem:[#allocation150_spill] sm:$0xff] }
 0x828   : > { %14142 = vst [vmem:[#allocation147_spill] sm:$0xff] %v11946_v31  ;;  %v5390_v11 = vmax.f32 %v4807_v52, 0.0  ;;  %v2522_v52 = vmax.f32 %v2255_v7, 0.0  ;;  %v14149_v7 = vld [vmem:[#allocation151_spill] sm:$0xff] }
 0x829   : > { %v3295_v48 = vpop.f32.mrf.mxu2 }
 0x82a   : > { %4848 = vmatmul.bf16.gmra.mxu3 %v11113_v28  ;;  %v3296_v19 = vadd.f32 %v11935_v24, %v3295_v48  ;;  %v2257_v28 = vadd.f32 %v11836_v60, %v14146_v10  ;;  %v5786_v20 = vpack.c.bf16 %v5390_v11, %v5388_v9 }
 0x82b   : > { %v11949_v30 = vpop.f32.mrf.mxu1 }
 0x82c   : > { %14143 = vst [vmem:[#allocation219_spill] sm:$0xff] %v11949_v30  ;;  %v3599_v49 = vmax.f32 %v3296_v19, 0.0  ;;  %v2523_v48 = vmax.f32 %v2257_v28, 0.0  ;;  %v2260_v28 = vadd.f32 %v11836_v60, %v14149_v7 }
 0x82d   : > { %v4809_v35 = vpop.f32.mrf.mxu3 }
 0x82e   : > { %v4810_v19 = vadd.f32 %v4809_v35, %v10947_v44 }
 0x831   : > { %v3297_v56 = vpop.f32.mrf.mxu2 }
 0x832   : > { %v3298_v36 = vadd.f32 %v11935_v24, %v3297_v56 }
 0x833   : > { %v11957_v59 = vpop.f32.mrf.mxu1 }
 0x834   : > { %14145 = vst [vmem:[#allocation148_spill] sm:$0xff] %v11957_v59  ;;  %v3600_v34 = vmax.f32 %v3298_v36, 0.0  ;;  %v2654_v59 = vpack.c.bf16 %v2523_v48, %v2522_v52  ;;  %v5392_v36 = vmax.f32 %v4810_v19, 0.0 }
 0x835   : > { %v4811_v30 = vpop.f32.mrf.mxu3 }
 0x836   : > { %3339 = vmatmul.bf16.gmra.mxu2 %v11908_v26  ;;  %7001 = vmatmul.bf16.gmra.mxu1 %v5786_v20  ;;  %v11962_v42 = vpack.c.bf16 %v3600_v34, %v3599_v49  ;;  %v4812_v53 = vadd.f32 %v4811_v30, %v10947_v44  ;;  %v14151_v20 = vld [vmem:[#allocation153_spill] sm:$0xff] }
 0x838   : > { %14147 = vst [vmem:[#allocation150_spill] sm:$0xff] %v11962_v42  ;;  %v5394_v11 = vmax.f32 %v4812_v53, 0.0 }
 0x839   : > { %v3300_v54 = vpop.f32.mrf.mxu2 }
 0x83a   : > { %4853 = vmatmul.bf16.gmra.mxu3 %v11130_v61  ;;  %v3301_v9 = vadd.f32 %v11935_v24, %v3300_v54  ;;  %v2262_v61 = vadd.f32 %v11836_v60, %v14151_v20  ;;  %v5788_v48 = vpack.c.bf16 %v5394_v11, %v5392_v36  ;;  %v2524_v54 = vmax.f32 %v2260_v28, 0.0  ;;  %v14154_v28 = vld [vmem:[#allocation154_spill] sm:$0xff] }
 0x83b   : > { %v11965_v56 = vpop.f32.mrf.mxu1 }
 0x83c   : > { %14148 = vst [vmem:[#allocation220_spill] sm:$0xff] %v11965_v56  ;;  %v3601_v30 = vmax.f32 %v3301_v9, 0.0  ;;  %v2525_v53 = vmax.f32 %v2262_v61, 0.0  ;;  %v2265_v61 = vadd.f32 %v11836_v60, %v14154_v28 }
 0x83d   : > { %v4814_v10 = vpop.f32.mrf.mxu3 }
 0x83e   : > { %v4815_v9 = vadd.f32 %v4814_v10, %v10947_v44 }
 0x841   : > { %v3302_v26 = vpop.f32.mrf.mxu2 }
 0x842   : > { %v3303_v49 = vadd.f32 %v11935_v24, %v3302_v26 }
 0x843   : > { %v11973_v34 = vpop.f32.mrf.mxu1 }
 0x844   : > { %14150 = vst [vmem:[#allocation151_spill] sm:$0xff] %v11973_v34  ;;  %v3602_v52 = vmax.f32 %v3303_v49, 0.0  ;;  %v2655_v34 = vpack.c.bf16 %v2525_v53, %v2524_v54  ;;  %v5396_v49 = vmax.f32 %v4815_v9, 0.0 }
 0x845   : > { %v4816_v56 = vpop.f32.mrf.mxu3 }
 0x846   : > { %3344 = vmatmul.bf16.gmra.mxu2 %v11929_v39  ;;  %7006 = vmatmul.bf16.gmra.mxu1 %v5788_v48  ;;  %v11978_v35 = vpack.c.bf16 %v3602_v52, %v3601_v30  ;;  %v4817_v7 = vadd.f32 %v4816_v56, %v10947_v44  ;;  %v14156_v48 = vld [vmem:[#allocation156_spill] sm:$0xff] }
 0x848   : > { %14152 = vst [vmem:[#allocation153_spill] sm:$0xff] %v11978_v35  ;;  %v5398_v11 = vmax.f32 %v4817_v7, 0.0 }
 0x849   : > { %v3305_v19 = vpop.f32.mrf.mxu2 }
 0x84a   : > { %4858 = vmatmul.bf16.gmra.mxu3 %v11147_v33  ;;  %v3306_v36 = vadd.f32 %v11935_v24, %v3305_v19  ;;  %v2267_v33 = vadd.f32 %v11836_v60, %v14156_v48  ;;  %v5790_v53 = vpack.c.bf16 %v5398_v11, %v5396_v49  ;;  %v2526_v19 = vmax.f32 %v2265_v61, 0.0  ;;  %v14159_v61 = vld [vmem:[#allocation157_spill] sm:$0xff] }
 0x84b   : > { %v11981_v26 = vpop.f32.mrf.mxu1 }
 0x84c   : > { %14153 = vst [vmem:[#allocation221_spill] sm:$0xff] %v11981_v26  ;;  %v3603_v56 = vmax.f32 %v3306_v36, 0.0  ;;  %v2527_v7 = vmax.f32 %v2267_v33, 0.0  ;;  %v2270_v33 = vadd.f32 %v11836_v60, %v14159_v61 }
 0x84d   : > { %v4819_v20 = vpop.f32.mrf.mxu3 }
 0x84e   : > { %v4820_v36 = vadd.f32 %v4819_v20, %v10947_v44 }
 0x850   : > { %v5400_v49 = vmax.f32 %v4820_v36, 0.0 }
 0x851   : > { %v3307_v39 = vpop.f32.mrf.mxu2 }
 0x852   : > { %v3308_v30 = vadd.f32 %v11935_v24, %v3307_v39 }
 0x853   : > { %v11989_v52 = vpop.f32.mrf.mxu1 }
 0x854   : > { %14155 = vst [vmem:[#allocation154_spill] sm:$0xff] %v11989_v52  ;;  %v3604_v54 = vmax.f32 %v3308_v30, 0.0  ;;  %v2656_v52 = vpack.c.bf16 %v2527_v7, %v2526_v19 }
 0x855   : > { %v4821_v26 = vpop.f32.mrf.mxu3 }
 0x856   : > { %3349 = vmatmul.bf16.gmra.mxu2 %v2653_v21  ;;  %7011 = vmatmul.bf16.gmra.mxu1 %v5790_v53  ;;  %v11993_v10 = vpack.c.bf16 %v3604_v54, %v3603_v56  ;;  %v4822_v28 = vadd.f32 %v4821_v26, %v10947_v44  ;;  %v14161_v54 = vld [vmem:[#allocation159_spill] sm:$0xff] }
 0x857   : > { %v2272_v53 = vadd.f32 %v11836_v60, %v14161_v54 }
 0x858   : > { %14157 = vst [vmem:[#allocation156_spill] sm:$0xff] %v11993_v10  ;;  %v5402_v30 = vmax.f32 %v4822_v28, 0.0 }
 0x859   : > { %v3310_v9 = vpop.f32.mrf.mxu2  ;;  %v2529_v28 = vmax.f32 %v2272_v53, 0.0 }
 0x85a   : > { %4863 = vmatmul.bf16.gmra.mxu3 %v11170_v6  ;;  %v3311_v11 = vadd.f32 %v11935_v24, %v3310_v9  ;;  %v5792_v7 = vpack.c.bf16 %v5402_v30, %v5400_v49  ;;  %v2528_v9 = vmax.f32 %v2270_v33, 0.0 }
 0x85b   : > { %v11996_v39 = vpop.f32.mrf.mxu1 }
 0x85c   : > { %14158 = vst [vmem:[#allocation222_spill] sm:$0xff] %v11996_v39  ;;  %v3605_v26 = vmax.f32 %v3311_v11, 0.0 }
 0x85d   : > { %v4824_v35 = vpop.f32.mrf.mxu3 }
 0x85e   : > { %v4825_v60 = vadd.f32 %v4824_v35, %v10947_v44 }
 0x860   : > { %v5404_v49 = vmax.f32 %v4825_v60, 0.0 }
 0x861   : > { %v3312_v21 = vpop.f32.mrf.mxu2 }
 0x862   : > { %v3313_v48 = vadd.f32 %v11935_v24, %v3312_v21 }
 0x863   : > { %v12004_v56 = vpop.f32.mrf.mxu1 }
 0x864   : > { %14160 = vst [vmem:[#allocation157_spill] sm:$0xff] %v12004_v56  ;;  %v3606_v19 = vmax.f32 %v3313_v48, 0.0  ;;  %v2657_v56 = vpack.c.bf16 %v2529_v28, %v2528_v9 }
 0x865   : > { %v4826_v6 = vpop.f32.mrf.mxu3 }
 0x866   : > { %3354 = vmatmul.bf16.gmra.mxu2 %v2654_v59  ;;  %7016 = vmatmul.bf16.gmra.mxu1 %v5792_v7  ;;  %v12008_v20 = vpack.c.bf16 %v3606_v19, %v3605_v26  ;;  %v4827_v61 = vadd.f32 %v4826_v6, %v10947_v44 }
 0x868   : > { %14162 = vst [vmem:[#allocation159_spill] sm:$0xff] %v12008_v20  ;;  %v5406_v11 = vmax.f32 %v4827_v61, 0.0 }
 0x869   : > { %v3315_v36 = vpop.f32.mrf.mxu2 }
 0x86a   : > { %4868 = vmatmul.bf16.gmra.mxu3 %v11197_v4  ;;  %v3316_v30 = vadd.f32 %v11935_v24, %v3315_v36  ;;  %v5794_v26 = vpack.c.bf16 %v5406_v11, %v5404_v49 }
 0x86b   : > { %v12011_v21 = vpop.f32.mrf.mxu1 }
 0x86c   : > { %v3607_v54 = vmax.f32 %v3316_v30, 0.0 }
 0x86d   : > { %v4829_v39 = vpop.f32.mrf.mxu3 }
 0x86e   : > { %v4830_v36 = vadd.f32 %v4829_v39, %v10947_v44 }
 0x870   : > { %v5408_v11 = vmax.f32 %v4830_v36, 0.0 }
 0x871   : > { %v3317_v59 = vpop.f32.mrf.mxu2 }
 0x872   : > { %v3318_v48 = vadd.f32 %v11935_v24, %v3317_v59 }
 0x873   : > { %v12017_v33 = vpop.f32.mrf.mxu1 }
 0x874   : > { %v3608_v53 = vmax.f32 %v3318_v48, 0.0 }
 0x875   : > { %v4831_v19 = vpop.f32.mrf.mxu3 }
 0x876   : > { %3359 = vmatmul.bf16.gmra.mxu2 %v2655_v34  ;;  %7021 = vmatmul.bf16.gmra.mxu1 %v5794_v26  ;;  %v12019_v6 = vpack.c.bf16 %v3608_v53, %v3607_v54  ;;  %v4832_v9 = vadd.f32 %v4831_v19, %v10947_v44 }
 0x878   : > { %14163 = vst [vmem:[#allocation223_spill] sm:$0xff] %v12019_v6  ;;  %v5410_v61 = vmax.f32 %v4832_v9, 0.0 }
 0x879   : > { %v3320_v7 = vpop.f32.mrf.mxu2 }
 0x87a   : > { %4873 = vmatmul.bf16.gmra.mxu3 %v11213_v41  ;;  %v3321_v60 = vadd.f32 %v11935_v24, %v3320_v7  ;;  %v5796_v54 = vpack.c.bf16 %v5410_v61, %v5408_v11 }
 0x87b   : > { %v12022_v35 = vpop.f32.mrf.mxu1 }
 0x87c   : > { %v3609_v49 = vmax.f32 %v3321_v60, 0.0 }
 0x87d   : > { %v4834_v28 = vpop.f32.mrf.mxu3 }
 0x87e   : > { %v4835_v36 = vadd.f32 %v4834_v28, %v10947_v44  ;;  %v8911_v28 = vld [vmem:[%s13584_s7] sm:$0xff] }
 0x87f   : > { %6066 = vmatpush.bf16.msrb.mxu0 %v8911_v28 }
 0x880   : > { %v5412_v61 = vmax.f32 %v4835_v36, 0.0 }
 0x881   : > { %v3322_v30 = vpop.f32.mrf.mxu2 }
 0x882   : > { %v3323_v34 = vadd.f32 %v11935_v24, %v3322_v30 }
 0x883   : > { %v12028_v59 = vpop.f32.mrf.mxu1 }
 0x884   : > { %v3610_v48 = vmax.f32 %v3323_v34, 0.0 }
 0x885   : > { %v4836_v53 = vpop.f32.mrf.mxu3 }
 0x886   : > { %3364 = vmatmul.bf16.gmra.mxu2 %v2656_v52  ;;  %7026 = vmatmul.bf16.gmra.mxu1 %v5796_v54  ;;  %v12030_v26 = vpack.c.bf16 %v3610_v48, %v3609_v49  ;;  %v4837_v7 = vadd.f32 %v4836_v53, %v10947_v44 }
 0x888   : > { %14164 = vst [vmem:[#allocation224_spill] sm:$0xff] %v12030_v26  ;;  %v5414_v30 = vmax.f32 %v4837_v7, 0.0 }
 0x889   : > { %v3325_v19 = vpop.f32.mrf.mxu2 }
 0x88a   : > { %4878 = vmatmul.bf16.gmra.mxu3 %v11229_v43  ;;  %v3326_v60 = vadd.f32 %v11935_v24, %v3325_v19  ;;  %v5798_v54 = vpack.c.bf16 %v5414_v30, %v5412_v61 }
 0x88b   : > { %v12033_v39 = vpop.f32.mrf.mxu1 }
 0x88c   : > { %14165 = vst [vmem:[#allocation225_spill] sm:$0xff] %v12033_v39  ;;  %v3611_v49 = vmax.f32 %v3326_v60, 0.0 }
 0x88d   : > { %v4839_v9 = vpop.f32.mrf.mxu3 }
 0x88e   : > { %v4840_v30 = vadd.f32 %v4839_v9, %v10947_v44 }
 0x890   : > { %v5416_v61 = vmax.f32 %v4840_v30, 0.0 }
 0x891   : > { %v3327_v34 = vpop.f32.mrf.mxu2 }
 0x892   : > { %v3328_v52 = vadd.f32 %v11935_v24, %v3327_v34 }
 0x893   : > { %v12039_v11 = vpop.f32.mrf.mxu1 }
 0x894   : > { %14166 = vst [vmem:[#allocation226_spill] sm:$0xff] %v12039_v11  ;;  %v3612_v48 = vmax.f32 %v3328_v52, 0.0  ;;  %v14170_v11 = vld [vmem:[#allocation5_spill] sm:$0xff] }
 0x895   : > { %v4841_v43 = vpop.f32.mrf.mxu3 }
 0x896   : > { %3369 = vmatmul.bf16.gmra.mxu2 %v2657_v56  ;;  %7031 = vmatmul.bf16.gmra.mxu1 %v5798_v54  ;;  %v12041_v39 = vpack.c.bf16 %v3612_v48, %v3611_v49  ;;  %v4842_v7 = vadd.f32 %v4841_v43, %v10947_v44 }
 0x898   : > { %14167 = vst [vmem:[#allocation227_spill] sm:$0xff] %v12041_v39  ;;  %v5418_v60 = vmax.f32 %v4842_v7, 0.0 }
 0x899   : > { %v3330_v53 = vpop.f32.mrf.mxu2 }
 0x89a   : > { %4883 = vmatmul.bf16.gmra.mxu3 %v11244_v12  ;;  %v3331_v56 = vadd.f32 %v11935_v24, %v3330_v53  ;;  %v5800_v12 = vpack.c.bf16 %v5418_v60, %v5416_v61 }
 0x89b   : > { %v12047_v19 = vpop.f32.mrf.mxu1 }
 0x89c   : > { %14168 = vst [vmem:[#allocation228_spill] sm:$0xff] %v12047_v19  ;;  %v3613_v48 = vmax.f32 %v3331_v56, 0.0 }
 0x89d   : > { %v4844_v36 = vpop.f32.mrf.mxu3 }
 0x89e   : > { %v4845_v30 = vadd.f32 %v4844_v36, %v10947_v44 }
 0x8a0   : > { %v5420_v61 = vmax.f32 %v4845_v30, 0.0 }
 0x8a1   : > { %v3332_v34 = vpop.f32.mrf.mxu2 }
 0x8a2   : > { %v3333_v52 = vadd.f32 %v11935_v24, %v3332_v34 }
 0x8a3   : > { %v12053_v49 = vpop.f32.mrf.mxu1 }
 0x8a4   : > { %14169 = vst [vmem:[#allocation229_spill] sm:$0xff] %v12053_v49  ;;  %v3614_v54 = vmax.f32 %v3333_v52, 0.0  ;;  %v14174_v49 = vld [vmem:[#allocation6_spill] sm:$0xff] }
 0x8a5   : > { %v4846_v28 = vpop.f32.mrf.mxu3 }
 0x8a6   : > { %3869 = vmatmul.bf16.vlgmr.msrb.gmra.mxu2 %v14170_v11  ;;  %7036 = vmatmul.bf16.gmra.mxu1 %v5800_v12  ;;  %v12056_v43 = vpack.c.bf16 %v3614_v54, %v3613_v48  ;;  %v4847_v53 = vadd.f32 %v4846_v28, %v10947_v44 }
 0x8a8   : > { %14171 = vst [vmem:[#allocation5_spill] sm:$0xff] %v12056_v43  ;;  %v5422_v34 = vmax.f32 %v4847_v53, 0.0 }
 0x8a9   : > { %v3335_v19 = vpop.f32.mrf.mxu2 }
 0x8aa   : > { %4888 = vmatmul.bf16.gmra.mxu3 %v11259_v2  ;;  %v3336_v56 = vadd.f32 %v11935_v24, %v3335_v19  ;;  %v5802_v54 = vpack.c.bf16 %v5422_v34, %v5420_v61 }
 0x8ab   : > { %v12059_v9 = vpop.f32.mrf.mxu1 }
 0x8ac   : > { %14172 = vst [vmem:[#allocation230_spill] sm:$0xff] %v12059_v9  ;;  %v3615_v52 = vmax.f32 %v3336_v56, 0.0 }
 0x8ad   : > { %v4849_v7 = vpop.f32.mrf.mxu3 }
 0x8ae   : > { %v4850_v30 = vadd.f32 %v4849_v7, %v10947_v44 }
 0x8b0   : > { %v5424_v61 = vmax.f32 %v4850_v30, 0.0 }
 0x8b1   : > { %v3337_v60 = vpop.f32.mrf.mxu2 }
 0x8b2   : > { %v3338_v11 = vadd.f32 %v11935_v24, %v3337_v60 }
 0x8b3   : > { %v12065_v12 = vpop.f32.mrf.mxu1 }
 0x8b4   : > { %14173 = vst [vmem:[#allocation231_spill] sm:$0xff] %v12065_v12  ;;  %v3616_v48 = vmax.f32 %v3338_v11, 0.0  ;;  %v14178_v12 = vld [vmem:[#allocation7_spill] sm:$0xff] }
 0x8b5   : > { %v4851_v2 = vpop.f32.mrf.mxu3 }
 0x8b6   : > { %3874 = vmatmul.bf16.gmra.mxu2 %v14174_v49  ;;  %7041 = vmatmul.bf16.gmra.mxu1 %v5802_v54  ;;  %v12068_v28 = vpack.c.bf16 %v3616_v48, %v3615_v52  ;;  %v4852_v19 = vadd.f32 %v4851_v2, %v10947_v44 }
 0x8b8   : > { %14175 = vst [vmem:[#allocation6_spill] sm:$0xff] %v12068_v28  ;;  %v5426_v60 = vmax.f32 %v4852_v19, 0.0 }
 0x8b9   : > { %v3340_v9 = vpop.f32.mrf.mxu2 }
 0x8ba   : > { %4893 = vmatmul.bf16.gmra.mxu3 %v11274_v5  ;;  %v3341_v56 = vadd.f32 %v11935_v24, %v3340_v9  ;;  %v5804_v54 = vpack.c.bf16 %v5426_v60, %v5424_v61 }
 0x8bb   : > { %v12071_v36 = vpop.f32.mrf.mxu1 }
 0x8bc   : > { %14176 = vst [vmem:[#allocation232_spill] sm:$0xff] %v12071_v36  ;;  %v3617_v52 = vmax.f32 %v3341_v56, 0.0 }
 0x8bd   : > { %v4854_v53 = vpop.f32.mrf.mxu3 }
 0x8be   : > { %v4855_v30 = vadd.f32 %v4854_v53, %v10947_v44 }
 0x8c0   : > { %v5428_v61 = vmax.f32 %v4855_v30, 0.0 }
 0x8c1   : > { %v3342_v34 = vpop.f32.mrf.mxu2 }
 0x8c2   : > { %v3343_v49 = vadd.f32 %v11935_v24, %v3342_v34 }
 0x8c3   : > { %v12077_v11 = vpop.f32.mrf.mxu1 }
 0x8c4   : > { %14177 = vst [vmem:[#allocation233_spill] sm:$0xff] %v12077_v11  ;;  %v3618_v48 = vmax.f32 %v3343_v49, 0.0  ;;  %v14182_v11 = vld [vmem:[#allocation9_spill] sm:$0xff] }
 0x8c5   : > { %v4856_v5 = vpop.f32.mrf.mxu3 }
 0x8c6   : > { %3879 = vmatmul.bf16.gmra.mxu2 %v14178_v12  ;;  %7046 = vmatmul.bf16.gmra.mxu1 %v5804_v54  ;;  %v12080_v2 = vpack.c.bf16 %v3618_v48, %v3617_v52  ;;  %v4857_v9 = vadd.f32 %v4856_v5, %v10947_v44 }
 0x8c8   : > { %14179 = vst [vmem:[#allocation7_spill] sm:$0xff] %v12080_v2  ;;  %v5430_v34 = vmax.f32 %v4857_v9, 0.0 }
 0x8c9   : > { %v3345_v36 = vpop.f32.mrf.mxu2 }
 0x8ca   : > { %4898 = vmatmul.bf16.gmra.mxu3 %v11291_v57  ;;  %v3346_v56 = vadd.f32 %v11935_v24, %v3345_v36  ;;  %v5806_v54 = vpack.c.bf16 %v5430_v34, %v5428_v61 }
 0x8cb   : > { %v12083_v7 = vpop.f32.mrf.mxu1 }
 0x8cc   : > { %14180 = vst [vmem:[#allocation234_spill] sm:$0xff] %v12083_v7  ;;  %v3619_v52 = vmax.f32 %v3346_v56, 0.0 }
 0x8cd   : > { %v4859_v19 = vpop.f32.mrf.mxu3 }
 0x8ce   : > { %v4860_v30 = vadd.f32 %v4859_v19, %v10947_v44 }
 0x8d0   : > { %v5432_v61 = vmax.f32 %v4860_v30, 0.0 }
 0x8d1   : > { %v3347_v60 = vpop.f32.mrf.mxu2 }
 0x8d2   : > { %v3348_v12 = vadd.f32 %v11935_v24, %v3347_v60 }
 0x8d3   : > { %v12089_v49 = vpop.f32.mrf.mxu1 }
 0x8d4   : > { %14181 = vst [vmem:[#allocation235_spill] sm:$0xff] %v12089_v49  ;;  %v3620_v48 = vmax.f32 %v3348_v12, 0.0  ;;  %v14186_v49 = vld [vmem:[#allocation12_spill] sm:$0xff] }
 0x8d5   : > { %v4861_v57 = vpop.f32.mrf.mxu3 }
 0x8d6   : > { %3884 = vmatmul.bf16.gmra.mxu2 %v14182_v11  ;;  %7051 = vmatmul.bf16.gmra.mxu1 %v5806_v54  ;;  %v12092_v5 = vpack.c.bf16 %v3620_v48, %v3619_v52  ;;  %v4862_v36 = vadd.f32 %v4861_v57, %v10947_v44 }
 0x8d8   : > { %14183 = vst [vmem:[#allocation9_spill] sm:$0xff] %v12092_v5  ;;  %v5434_v60 = vmax.f32 %v4862_v36, 0.0 }
 0x8d9   : > { %v3350_v7 = vpop.f32.mrf.mxu2 }
 0x8da   : > { %4903 = vmatmul.bf16.gmra.mxu3 %v11308_v37  ;;  %v3351_v56 = vadd.f32 %v11935_v24, %v3350_v7  ;;  %v5808_v54 = vpack.c.bf16 %v5434_v60, %v5432_v61 }
 0x8db   : > { %v12095_v53 = vpop.f32.mrf.mxu1 }
 0x8dc   : > { %14184 = vst [vmem:[#allocation236_spill] sm:$0xff] %v12095_v53  ;;  %v3621_v52 = vmax.f32 %v3351_v56, 0.0 }
 0x8dd   : > { %v4864_v9 = vpop.f32.mrf.mxu3 }
 0x8de   : > { %v4865_v30 = vadd.f32 %v4864_v9, %v10947_v44 }
 0x8e0   : > { %v5436_v61 = vmax.f32 %v4865_v30, 0.0 }
 0x8e1   : > { %v3352_v34 = vpop.f32.mrf.mxu2 }
 0x8e2   : > { %v3353_v11 = vadd.f32 %v11935_v24, %v3352_v34 }
 0x8e3   : > { %v12101_v12 = vpop.f32.mrf.mxu1 }
 0x8e4   : > { %14185 = vst [vmem:[#allocation237_spill] sm:$0xff] %v12101_v12  ;;  %v3622_v48 = vmax.f32 %v3353_v11, 0.0  ;;  %v14190_v12 = vld [vmem:[#allocation15_spill] sm:$0xff] }
 0x8e5   : > { %v4866_v37 = vpop.f32.mrf.mxu3 }
 0x8e6   : > { %3889 = vmatmul.bf16.gmra.mxu2 %v14186_v49  ;;  %7056 = vmatmul.bf16.gmra.mxu1 %v5808_v54  ;;  %v12104_v57 = vpack.c.bf16 %v3622_v48, %v3621_v52  ;;  %v4867_v7 = vadd.f32 %v4866_v37, %v10947_v44 }
 0x8e8   : > { %14187 = vst [vmem:[#allocation12_spill] sm:$0xff] %v12104_v57  ;;  %v5438_v34 = vmax.f32 %v4867_v7, 0.0 }
 0x8e9   : > { %v3355_v53 = vpop.f32.mrf.mxu2 }
 0x8ea   : > { %4908 = vmatmul.bf16.gmra.mxu3 %v11335_v32  ;;  %v3356_v56 = vadd.f32 %v11935_v24, %v3355_v53  ;;  %v5810_v54 = vpack.c.bf16 %v5438_v34, %v5436_v61 }
 0x8eb   : > { %v12107_v19 = vpop.f32.mrf.mxu1 }
 0x8ec   : > { %14188 = vst [vmem:[#allocation238_spill] sm:$0xff] %v12107_v19  ;;  %v3623_v52 = vmax.f32 %v3356_v56, 0.0 }
 0x8ed   : > { %v4869_v36 = vpop.f32.mrf.mxu3 }
 0x8ee   : > { %v4870_v30 = vadd.f32 %v4869_v36, %v10947_v44 }
 0x8f0   : > { %v5440_v61 = vmax.f32 %v4870_v30, 0.0 }
 0x8f1   : > { %v3357_v60 = vpop.f32.mrf.mxu2 }
 0x8f2   : > { %v3358_v49 = vadd.f32 %v11935_v24, %v3357_v60 }
 0x8f3   : > { %v12113_v11 = vpop.f32.mrf.mxu1 }
 0x8f4   : > { %14189 = vst [vmem:[#allocation239_spill] sm:$0xff] %v12113_v11  ;;  %v3624_v48 = vmax.f32 %v3358_v49, 0.0  ;;  %v14194_v11 = vld [vmem:[#allocation18_spill] sm:$0xff] }
 0x8f5   : > { %v4871_v32 = vpop.f32.mrf.mxu3 }
 0x8f6   : > { %3894 = vmatmul.bf16.gmra.mxu2 %v14190_v12  ;;  %7061 = vmatmul.bf16.gmra.mxu1 %v5810_v54  ;;  %v12116_v37 = vpack.c.bf16 %v3624_v48, %v3623_v52  ;;  %v4872_v53 = vadd.f32 %v4871_v32, %v10947_v44 }
 0x8f8   : > { %14191 = vst [vmem:[#allocation15_spill] sm:$0xff] %v12116_v37  ;;  %v5442_v60 = vmax.f32 %v4872_v53, 0.0 }
 0x8f9   : > { %v3360_v19 = vpop.f32.mrf.mxu2 }
 0x8fa   : > { %4913 = vmatmul.bf16.gmra.mxu3 %v11351_v18  ;;  %v3361_v56 = vadd.f32 %v11935_v24, %v3360_v19  ;;  %v5812_v54 = vpack.c.bf16 %v5442_v60, %v5440_v61 }
 0x8fb   : > { %v12119_v9 = vpop.f32.mrf.mxu1 }
 0x8fc   : > { %14192 = vst [vmem:[#allocation240_spill] sm:$0xff] %v12119_v9  ;;  %v3625_v52 = vmax.f32 %v3361_v56, 0.0 }
 0x8fd   : > { %v4874_v7 = vpop.f32.mrf.mxu3 }
 0x8fe   : > { %v4875_v30 = vadd.f32 %v4874_v7, %v10947_v44 }
 0x900   : > { %v5444_v61 = vmax.f32 %v4875_v30, 0.0 }
 0x901   : > { %v3362_v34 = vpop.f32.mrf.mxu2 }
 0x902   : > { %v3363_v12 = vadd.f32 %v11935_v24, %v3362_v34 }
 0x903   : > { %v12125_v49 = vpop.f32.mrf.mxu1 }
 0x904   : > { %14193 = vst [vmem:[#allocation241_spill] sm:$0xff] %v12125_v49  ;;  %v3626_v48 = vmax.f32 %v3363_v12, 0.0  ;;  %v14198_v49 = vld [vmem:[#allocation21_spill] sm:$0xff] }
 0x905   : > { %v4876_v18 = vpop.f32.mrf.mxu3 }
 0x906   : > { %3899 = vmatmul.bf16.gmra.mxu2 %v14194_v11  ;;  %7066 = vmatmul.bf16.gmra.mxu1 %v5812_v54  ;;  %v12128_v32 = vpack.c.bf16 %v3626_v48, %v3625_v52  ;;  %v4877_v19 = vadd.f32 %v4876_v18, %v10947_v44 }
 0x908   : > { %14195 = vst [vmem:[#allocation18_spill] sm:$0xff] %v12128_v32  ;;  %v5446_v34 = vmax.f32 %v4877_v19, 0.0 }
 0x909   : > { %v3365_v9 = vpop.f32.mrf.mxu2 }
 0x90a   : > { %4918 = vmatmul.bf16.gmra.mxu3 %v11367_v22  ;;  %v3366_v56 = vadd.f32 %v11935_v24, %v3365_v9  ;;  %v5814_v54 = vpack.c.bf16 %v5446_v34, %v5444_v61 }
 0x90b   : > { %v12131_v36 = vpop.f32.mrf.mxu1 }
 0x90c   : > { %14196 = vst [vmem:[#allocation242_spill] sm:$0xff] %v12131_v36  ;;  %v3627_v52 = vmax.f32 %v3366_v56, 0.0 }
 0x90d   : > { %v4879_v53 = vpop.f32.mrf.mxu3 }
 0x90e   : > { %v4880_v30 = vadd.f32 %v4879_v53, %v10947_v44 }
 0x910   : > { %v5448_v61 = vmax.f32 %v4880_v30, 0.0 }
 0x911   : > { %v3367_v60 = vpop.f32.mrf.mxu2 }
 0x912   : > { %v3368_v11 = vadd.f32 %v11935_v24, %v3367_v60 }
 0x913   : > { %v12137_v12 = vpop.f32.mrf.mxu1 }
 0x914   : > { %14197 = vst [vmem:[#allocation243_spill] sm:$0xff] %v12137_v12  ;;  %v3628_v48 = vmax.f32 %v3368_v11, 0.0  ;;  %v14202_v12 = vld [vmem:[#allocation24_spill] sm:$0xff] }
 0x915   : > { %v4881_v22 = vpop.f32.mrf.mxu3 }
 0x916   : > { %3904 = vmatmul.bf16.gmra.mxu2 %v14198_v49  ;;  %7071 = vmatmul.bf16.gmra.mxu1 %v5814_v54  ;;  %v12140_v18 = vpack.c.bf16 %v3628_v48, %v3627_v52  ;;  %v4882_v9 = vadd.f32 %v4881_v22, %v10947_v44 }
 0x918   : > { %14199 = vst [vmem:[#allocation21_spill] sm:$0xff] %v12140_v18  ;;  %v5450_v60 = vmax.f32 %v4882_v9, 0.0 }
 0x919   : > { %v3370_v36 = vpop.f32.mrf.mxu2 }
 0x91a   : > { %4923 = vmatmul.bf16.gmra.mxu3 %v11382_v1  ;;  %v3371_v56 = vadd.f32 %v11935_v24, %v3370_v36  ;;  %v5816_v54 = vpack.c.bf16 %v5450_v60, %v5448_v61 }
 0x91b   : > { %v12143_v7 = vpop.f32.mrf.mxu1 }
 0x91c   : > { %14200 = vst [vmem:[#allocation244_spill] sm:$0xff] %v12143_v7  ;;  %v3629_v52 = vmax.f32 %v3371_v56, 0.0 }
 0x91d   : > { %v4884_v19 = vpop.f32.mrf.mxu3 }
 0x91e   : > { %v4885_v60 = vadd.f32 %v4884_v19, %v10947_v44 }
 0x920   : > { %v5452_v61 = vmax.f32 %v4885_v60, 0.0 }
 0x921   : > { %v3372_v34 = vpop.f32.mrf.mxu2 }
 0x922   : > { %v3373_v49 = vadd.f32 %v11935_v24, %v3372_v34  ;;  %v9758_v24 = vld [vmem:[%s13583_s6] sm:$0x3] }
 0x923   : > { %v12149_v11 = vpop.f32.mrf.mxu1  ;;  %v12161_v9 = vperm.slane %v9758_v24, 0 }
 0x924   : > { %14201 = vst [vmem:[#allocation245_spill] sm:$0xff] %v12149_v11  ;;  %v3630_v48 = vmax.f32 %v3373_v49, 0.0  ;;  %v14205_v11 = vld [vmem:[#allocation27_spill] sm:$0xff] }
 0x925   : > { %v4886_v1 = vpop.f32.mrf.mxu3 }
 0x926   : > { %3909 = vmatmul.bf16.gmra.mxu2 %v14202_v12  ;;  %7076 = vmatmul.bf16.gmra.mxu1 %v5816_v54  ;;  %v12152_v22 = vpack.c.bf16 %v3630_v48, %v3629_v52  ;;  %v4887_v36 = vadd.f32 %v4886_v1, %v10947_v44 }
 0x928   : > { %14203 = vst [vmem:[#allocation24_spill] sm:$0xff] %v12152_v22  ;;  %v5454_v12 = vmax.f32 %v4887_v36, 0.0 }
 0x929   : > { %v3870_v7 = vpop.f32.mrf.mxu2 }
 0x92a   : > { %4928 = vmatmul.bf16.gmra.mxu3 %v11397_v47  ;;  %v3871_v56 = vadd.f32 %v3870_v7, %v12161_v9  ;;  %v5818_v54 = vpack.c.bf16 %v5454_v12, %v5452_v61 }
 0x92b   : > { %v12155_v53 = vpop.f32.mrf.mxu1 }
 0x92c   : > { %14204 = vst [vmem:[#allocation246_spill] sm:$0xff] %v12155_v53  ;;  %v5159_v48 = vmax.f32 %v3871_v56, 0.0 }
 0x92d   : > { %v4889_v30 = vpop.f32.mrf.mxu3 }
 0x92e   : > { %v4890_v60 = vadd.f32 %v4889_v30, %v10947_v44  ;;  %v14207_v30 = vld [vmem:[#allocation66_spill] sm:$0xff] }
 0x930   : > { %v5456_v61 = vmax.f32 %v4890_v60, 0.0 }
 0x931   : > { %v3872_v34 = vpop.f32.mrf.mxu2 }
 0x932   : > { %v3873_v49 = vadd.f32 %v3872_v34, %v12161_v9 }
 0x933   : > { %v12166_v52 = vpop.f32.mrf.mxu1 }
 0x934   : > { %v5161_v1 = vmax.f32 %v3873_v49, 0.0 }
 0x935   : > { %v4891_v47 = vpop.f32.mrf.mxu3 }
 0x936   : > { %v5671_v53 = vpack.c.bf16 %v5161_v1, %v5159_v48  ;;  %3914 = vmatmul.bf16.gmra.mxu2 %v14205_v11  ;;  %7081 = vmatmul.bf16.gmra.mxu1 %v5818_v54  ;;  %v4892_v7 = vadd.f32 %v4891_v47, %v10947_v44 }
 0x938   : > { %6067 = vmatmul.bf16.vlgmr.msrb.gmra.mxu0 %v5671_v53  ;;  %v5458_v34 = vmax.f32 %v4892_v7, 0.0 }
 0x939   : > { %v3875_v24 = vpop.f32.mrf.mxu2 }
 0x93a   : > { %4933 = vmatmul.bf16.gmra.mxu3 %v11414_v40  ;;  %v3876_v56 = vadd.f32 %v3875_v24, %v12161_v9  ;;  %v5820_v1 = vpack.c.bf16 %v5458_v34, %v5456_v61 }
 0x93b   : > { %v12170_v19 = vpop.f32.mrf.mxu1 }
 0x93c   : > { %v5163_v53 = vmax.f32 %v3876_v56, 0.0 }
 0x93d   : > { %v4894_v36 = vpop.f32.mrf.mxu3 }
 0x941   : > { %v3877_v12 = vpop.f32.mrf.mxu2 }
 0x942   : > { %v3878_v49 = vadd.f32 %v3877_v12, %v12161_v9  ;;  %v4895_v12 = vadd.f32 %v4894_v36, %v10947_v44  ;;  %v14211_v36 = vld [vmem:[#allocation69_spill] sm:$0xff] }
 0x943   : > { %v12176_v11 = vpop.f32.mrf.mxu1 }
 0x944   : > { %14206 = vst [vmem:[#allocation27_spill] sm:$0xff] %v12176_v11  ;;  %v5165_v48 = vmax.f32 %v3878_v49, 0.0  ;;  %v5460_v61 = vmax.f32 %v4895_v12, 0.0 }
 0x945   : > { %v4896_v54 = vpop.f32.mrf.mxu3 }
 0x946   : > { %3919 = vmatmul.bf16.gmra.mxu2 %v10243_v3  ;;  %7086 = vmatmul.bf16.gmra.mxu1 %v5820_v1  ;;  %v5673_v47 = vpack.c.bf16 %v5165_v48, %v5163_v53  ;;  %v4897_v24 = vadd.f32 %v4896_v54, %v10947_v44 }
 0x948   : > { %6072 = vmatmul.bf16.gmra.mxu0 %v5673_v47  ;;  %v5462_v11 = vmax.f32 %v4897_v24, 0.0 }
 0x949   : > { %v3880_v40 = vpop.f32.mrf.mxu2 }
 0x94a   : > { %4938 = vmatmul.bf16.gmra.mxu3 %v14207_v30  ;;  %v3881_v56 = vadd.f32 %v3880_v40, %v12161_v9  ;;  %v5822_v1 = vpack.c.bf16 %v5462_v11, %v5460_v61  ;;  %v14210_v30 = vld [vmem:[#allocation32_spill] sm:$0xff] }
 0x94b   : > { %v12180_v7 = vpop.f32.mrf.mxu1 }
 0x94c   : > { %14208 = vst [vmem:[#allocation247_spill] sm:$0xff] %v12180_v7  ;;  %v5167_v53 = vmax.f32 %v3881_v56, 0.0 }
 0x94d   : > { %v4899_v60 = vpop.f32.mrf.mxu3 }
 0x951   : > { %v3882_v34 = vpop.f32.mrf.mxu2 }
 0x952   : > { %v3883_v3 = vadd.f32 %v3882_v34, %v12161_v9  ;;  %v4900_v34 = vadd.f32 %v4899_v60, %v10947_v44  ;;  %v14215_v60 = vld [vmem:[#allocation72_spill] sm:$0xff] }
 0x953   : > { %v12186_v49 = vpop.f32.mrf.mxu1 }
 0x954   : > { %14209 = vst [vmem:[#allocation248_spill] sm:$0xff] %v12186_v49  ;;  %v5169_v48 = vmax.f32 %v3883_v3, 0.0  ;;  %v5464_v61 = vmax.f32 %v4900_v34, 0.0 }
 0x955   : > { %v4901_v47 = vpop.f32.mrf.mxu3 }
 0x956   : > { %3924 = vmatmul.bf16.gmra.mxu2 %v14210_v30  ;;  %7091 = vmatmul.bf16.gmra.mxu1 %v5822_v1  ;;  %v5675_v54 = vpack.c.bf16 %v5169_v48, %v5167_v53  ;;  %v4902_v40 = vadd.f32 %v4901_v47, %v10947_v44 }
 0x958   : > { %6077 = vmatmul.bf16.gmra.mxu0 %v5675_v54  ;;  %v5466_v49 = vmax.f32 %v4902_v40, 0.0 }
 0x959   : > { %v3885_v7 = vpop.f32.mrf.mxu2 }
 0x95a   : > { %4943 = vmatmul.bf16.gmra.mxu3 %v14211_v36  ;;  %v3886_v56 = vadd.f32 %v3885_v7, %v12161_v9  ;;  %v5824_v1 = vpack.c.bf16 %v5466_v49, %v5464_v61  ;;  %v14214_v36 = vld [vmem:[#allocation35_spill] sm:$0xff] }
 0x95b   : > { %v12190_v24 = vpop.f32.mrf.mxu1 }
 0x95c   : > { %14212 = vst [vmem:[#allocation32_spill] sm:$0xff] %v12190_v24  ;;  %v5171_v53 = vmax.f32 %v3886_v56, 0.0 }
 0x95d   : > { %v4904_v12 = vpop.f32.mrf.mxu3 }
 0x961   : > { %v3887_v11 = vpop.f32.mrf.mxu2 }
 0x962   : > { %v3888_v30 = vadd.f32 %v3887_v11, %v12161_v9  ;;  %v4905_v11 = vadd.f32 %v4904_v12, %v10947_v44  ;;  %v14219_v12 = vld [vmem:[#allocation75_spill] sm:$0xff] }
 0x963   : > { %v12196_v3 = vpop.f32.mrf.mxu1 }
 0x964   : > { %14213 = vst [vmem:[#allocation249_spill] sm:$0xff] %v12196_v3  ;;  %v5173_v48 = vmax.f32 %v3888_v30, 0.0  ;;  %v5468_v61 = vmax.f32 %v4905_v11, 0.0 }
 0x965   : > { %v4906_v54 = vpop.f32.mrf.mxu3 }
 0x966   : > { %3929 = vmatmul.bf16.gmra.mxu2 %v14214_v36  ;;  %7096 = vmatmul.bf16.gmra.mxu1 %v5824_v1  ;;  %v5677_v47 = vpack.c.bf16 %v5173_v48, %v5171_v53  ;;  %v4907_v7 = vadd.f32 %v4906_v54, %v10947_v44 }
 0x968   : > { %6082 = vmatmul.bf16.gmra.mxu0 %v5677_v47  ;;  %v5470_v3 = vmax.f32 %v4907_v7, 0.0 }
 0x969   : > { %v3890_v24 = vpop.f32.mrf.mxu2 }
 0x96a   : > { %4948 = vmatmul.bf16.gmra.mxu3 %v14215_v60  ;;  %v3891_v56 = vadd.f32 %v3890_v24, %v12161_v9  ;;  %v5826_v1 = vpack.c.bf16 %v5470_v3, %v5468_v61  ;;  %v14218_v60 = vld [vmem:[#allocation38_spill] sm:$0xff] }
 0x96b   : > { %v12200_v40 = vpop.f32.mrf.mxu1 }
 0x96c   : > { %14216 = vst [vmem:[#allocation35_spill] sm:$0xff] %v12200_v40  ;;  %v5175_v53 = vmax.f32 %v3891_v56, 0.0 }
 0x96d   : > { %v4909_v34 = vpop.f32.mrf.mxu3 }
 0x971   : > { %v3892_v49 = vpop.f32.mrf.mxu2 }
 0x972   : > { %v3893_v36 = vadd.f32 %v3892_v49, %v12161_v9  ;;  %v4910_v49 = vadd.f32 %v4909_v34, %v10947_v44 }
 0x973   : > { %v12206_v30 = vpop.f32.mrf.mxu1 }
 0x974   : > { %14217 = vst [vmem:[#allocation250_spill] sm:$0xff] %v12206_v30  ;;  %v5177_v48 = vmax.f32 %v3893_v36, 0.0  ;;  %v5472_v61 = vmax.f32 %v4910_v49, 0.0 }
 0x975   : > { %v4911_v47 = vpop.f32.mrf.mxu3 }
 0x976   : > { %3934 = vmatmul.bf16.gmra.mxu2 %v14218_v60  ;;  %7101 = vmatmul.bf16.gmra.mxu1 %v5826_v1  ;;  %v5679_v54 = vpack.c.bf16 %v5177_v48, %v5175_v53  ;;  %v4912_v24 = vadd.f32 %v4911_v47, %v10947_v44 }
 0x978   : > { %6087 = vmatmul.bf16.gmra.mxu0 %v5679_v54  ;;  %v5474_v30 = vmax.f32 %v4912_v24, 0.0 }
 0x979   : > { %v3895_v40 = vpop.f32.mrf.mxu2 }
 0x97a   : > { %4953 = vmatmul.bf16.gmra.mxu3 %v14219_v12  ;;  %v3896_v56 = vadd.f32 %v3895_v40, %v12161_v9  ;;  %v5828_v1 = vpack.c.bf16 %v5474_v30, %v5472_v61  ;;  %v14222_v12 = vld [vmem:[#allocation41_spill] sm:$0xff] }
 0x97b   : > { %v12210_v7 = vpop.f32.mrf.mxu1 }
 0x97c   : > { %14220 = vst [vmem:[#allocation38_spill] sm:$0xff] %v12210_v7  ;;  %v5179_v53 = vmax.f32 %v3896_v56, 0.0 }
 0x97d   : > { %v4914_v11 = vpop.f32.mrf.mxu3 }
 0x97e   : > { %v4915_v49 = vadd.f32 %v4914_v11, %v10947_v44 }
 0x980   : > { %v5476_v61 = vmax.f32 %v4915_v49, 0.0 }
 0x981   : > { %v3897_v3 = vpop.f32.mrf.mxu2 }
 0x982   : > { %v3898_v60 = vadd.f32 %v3897_v3, %v12161_v9 }
 0x983   : > { %v12216_v36 = vpop.f32.mrf.mxu1 }
 0x984   : > { %14221 = vst [vmem:[#allocation251_spill] sm:$0xff] %v12216_v36  ;;  %v5181_v48 = vmax.f32 %v3898_v60, 0.0 }
 0x985   : > { %v4916_v54 = vpop.f32.mrf.mxu3 }
 0x986   : > { %3939 = vmatmul.bf16.gmra.mxu2 %v14222_v12  ;;  %7106 = vmatmul.bf16.gmra.mxu1 %v5828_v1  ;;  %v5681_v47 = vpack.c.bf16 %v5181_v48, %v5179_v53  ;;  %v4917_v40 = vadd.f32 %v4916_v54, %v10947_v44 }
 0x988   : > { %6092 = vmatmul.bf16.gmra.mxu0 %v5681_v47  ;;  %v5478_v3 = vmax.f32 %v4917_v40, 0.0 }
 0x989   : > { %v3900_v7 = vpop.f32.mrf.mxu2 }
 0x98a   : > { %4958 = vmatmul.bf16.gmra.mxu3 %v11515_v23  ;;  %v3901_v56 = vadd.f32 %v3900_v7, %v12161_v9  ;;  %v5830_v1 = vpack.c.bf16 %v5478_v3, %v5476_v61  ;;  %v14225_v23 = vld [vmem:[#allocation44_spill] sm:$0xff] }
 0x98b   : > { %v12220_v34 = vpop.f32.mrf.mxu1 }
 0x98c   : > { %14223 = vst [vmem:[#allocation41_spill] sm:$0xff] %v12220_v34  ;;  %v5183_v53 = vmax.f32 %v3901_v56, 0.0 }
 0x98d   : > { %v4919_v24 = vpop.f32.mrf.mxu3 }
 0x98e   : > { %v4920_v49 = vadd.f32 %v4919_v24, %v10947_v44 }
 0x990   : > { %v5480_v61 = vmax.f32 %v4920_v49, 0.0 }
 0x991   : > { %v3902_v30 = vpop.f32.mrf.mxu2 }
 0x992   : > { %v3903_v12 = vadd.f32 %v3902_v30, %v12161_v9 }
 0x993   : > { %v12226_v60 = vpop.f32.mrf.mxu1 }
 0x994   : > { %14224 = vst [vmem:[#allocation252_spill] sm:$0xff] %v12226_v60  ;;  %v5185_v48 = vmax.f32 %v3903_v12, 0.0 }
 0x995   : > { %v4921_v47 = vpop.f32.mrf.mxu3 }
 0x996   : > { %3944 = vmatmul.bf16.gmra.mxu2 %v14225_v23  ;;  %7111 = vmatmul.bf16.gmra.mxu1 %v5830_v1  ;;  %v5683_v54 = vpack.c.bf16 %v5185_v48, %v5183_v53  ;;  %v4922_v7 = vadd.f32 %v4921_v47, %v10947_v44 }
 0x998   : > { %6097 = vmatmul.bf16.gmra.mxu0 %v5683_v54  ;;  %v5482_v30 = vmax.f32 %v4922_v7, 0.0 }
 0x999   : > { %v3905_v34 = vpop.f32.mrf.mxu2 }
 0x99a   : > { %4963 = vmatmul.bf16.gmra.mxu3 %v11532_v13  ;;  %v3906_v56 = vadd.f32 %v3905_v34, %v12161_v9  ;;  %v5832_v1 = vpack.c.bf16 %v5482_v30, %v5480_v61  ;;  %v14228_v13 = vld [vmem:[#allocation47_spill] sm:$0xff] }
 0x99b   : > { %v12230_v11 = vpop.f32.mrf.mxu1 }
 0x99c   : > { %14226 = vst [vmem:[#allocation44_spill] sm:$0xff] %v12230_v11  ;;  %v5187_v53 = vmax.f32 %v3906_v56, 0.0 }
 0x99d   : > { %v4924_v40 = vpop.f32.mrf.mxu3 }
 0x99e   : > { %v4925_v49 = vadd.f32 %v4924_v40, %v10947_v44 }
 0x9a0   : > { %v5484_v61 = vmax.f32 %v4925_v49, 0.0 }
 0x9a1   : > { %v3907_v3 = vpop.f32.mrf.mxu2 }
 0x9a2   : > { %v3908_v23 = vadd.f32 %v3907_v3, %v12161_v9 }
 0x9a3   : > { %v12236_v12 = vpop.f32.mrf.mxu1 }
 0x9a4   : > { %14227 = vst [vmem:[#allocation253_spill] sm:$0xff] %v12236_v12  ;;  %v5189_v48 = vmax.f32 %v3908_v23, 0.0 }
 0x9a5   : > { %v4926_v54 = vpop.f32.mrf.mxu3 }
 0x9a6   : > { %3949 = vmatmul.bf16.gmra.mxu2 %v14228_v13  ;;  %7116 = vmatmul.bf16.gmra.mxu1 %v5832_v1  ;;  %v5685_v47 = vpack.c.bf16 %v5189_v48, %v5187_v53  ;;  %v4927_v34 = vadd.f32 %v4926_v54, %v10947_v44  ;;  %v14231_v54 = vld [vmem:[#allocation50_spill] sm:$0xff] }
 0x9a8   : > { %6102 = vmatmul.bf16.gmra.mxu0 %v5685_v47  ;;  %v5486_v3 = vmax.f32 %v4927_v34, 0.0 }
 0x9a9   : > { %v3910_v11 = vpop.f32.mrf.mxu2 }
 0x9aa   : > { %4968 = vmatmul.bf16.gmra.mxu3 %v11555_v38  ;;  %v3911_v56 = vadd.f32 %v3910_v11, %v12161_v9  ;;  %v5834_v1 = vpack.c.bf16 %v5486_v3, %v5484_v61  ;;  %v12252_v11 = vld [vmem:[%s13585_s8] ss:$0 sm:$0xff] }
 0x9ab   : > { %v12240_v24 = vpop.f32.mrf.mxu1 }
 0x9ac   : > { %14229 = vst [vmem:[#allocation47_spill] sm:$0xff] %v12240_v24  ;;  %v5191_v53 = vmax.f32 %v3911_v56, 0.0 }
 0x9ad   : > { %v4929_v7 = vpop.f32.mrf.mxu3 }
 0x9b1   : > { %v3912_v30 = vpop.f32.mrf.mxu2 }
 0x9b2   : > { %v3913_v13 = vadd.f32 %v3912_v30, %v12161_v9 }
 0x9b3   : > { %v12246_v23 = vpop.f32.mrf.mxu1 }
 0x9b4   : > { %14230 = vst [vmem:[#allocation254_spill] sm:$0xff] %v12246_v23  ;;  %v5193_v48 = vmax.f32 %v3913_v13, 0.0  ;;  %v4930_v13 = vadd.f32 %v4929_v7, %v10947_v44 }
 0x9b5   : > { %v4931_v47 = vpop.f32.mrf.mxu3  ;;  %v6068_v38 = vpop.f32.mrf.mxu0 }
 0x9b6   : > { %3954 = vmatmul.bf16.gmra.mxu2 %v14231_v54  ;;  %7121 = vmatmul.bf16.gmra.mxu1 %v5834_v1  ;;  %v5687_v40 = vpack.c.bf16 %v5193_v48, %v5191_v53  ;;  %v4932_v3 = vadd.f32 %v4931_v47, %v10947_v44  ;;  %v6069_v56 = vadd.f32 %v12252_v11, %v6068_v38  ;;  %v14233_v1 = vld [vmem:[#allocation170_spill] sm:$0xff]  ;;  %v5488_v24 = vmax.f32 %v4930_v13, 0.0 }
 0x9b8   : > { %6107 = vmatmul.bf16.gmra.mxu0 %v5687_v40  ;;  %v5490_v48 = vmax.f32 %v4932_v3, 0.0  ;;  %v6718_v54 = vadd.f32 %v14233_v1, %v6069_v56  ;;  %v14236_v1 = vld [vmem:[#allocation53_spill] sm:$0xff] }
 0x9b9   : > { %v3915_v34 = vpop.f32.mrf.mxu2 }
 0x9ba   : > { %4973 = vmatmul.bf16.gmra.mxu3 %v11571_v14  ;;  %v3916_v40 = vadd.f32 %v3915_v34, %v12161_v9  ;;  %v14234_v14 = vld [vmem:[#allocation171_spill] sm:$0xff]  ;;  %v5836_v3 = vpack.c.bf16 %v5490_v48, %v5488_v24 }
 0x9bb   : > { %v12255_v49 = vpop.f32.mrf.mxu1 }
 0x9bc   : > { %14232 = vst [vmem:[#allocation50_spill] sm:$0xff] %v12255_v49  ;;  %v5195_v60 = vmax.f32 %v3916_v40, 0.0 }
 0x9bd   : > { %v4934_v30 = vpop.f32.mrf.mxu3  ;;  %v6070_v61 = vpop.f32.mrf.mxu0 }
 0x9be   : > { %v6071_v53 = vadd.f32 %v12252_v11, %v6070_v61  ;;  %v4935_v24 = vadd.f32 %v4934_v30, %v10947_v44 }
 0x9c0   : > { %v6720_v49 = vadd.f32 %v14234_v14, %v6071_v53 }
 0x9c1   : > { %v3917_v23 = vpop.f32.mrf.mxu2 }
 0x9c2   : > { %v8931_v47 = vpack.c.bf16 %v6720_v49, %v6718_v54  ;;  %v3918_v38 = vadd.f32 %v3917_v23, %v12161_v9 }
 0x9c3   : > { %v12268_v12 = vpop.f32.mrf.mxu1 }
 0x9c4   : > { %14235 = vst [vmem:[#allocation170_spill] sm:$0xff] %v12268_v12  ;;  %v5197_v7 = vmax.f32 %v3918_v38, 0.0 }
 0x9c5   : > { %8932 = vst [vmem:[%s12270_s27] sm:$0xff] %v8931_v47   ;;  %v4936_v61 = vpop.f32.mrf.mxu3  ;;  %v6073_v56 = vpop.f32.mrf.mxu0  ;;  %v14238_v47 = vld [vmem:[#allocation172_spill] sm:$0xff] }
 0x9c6   : > { %3959 = vmatmul.bf16.gmra.mxu2 %v14236_v1  ;;  %7126 = vmatmul.bf16.gmra.mxu1 %v5836_v3  ;;  %v5689_v14 = vpack.c.bf16 %v5197_v7, %v5195_v60  ;;  %v4937_v49 = vadd.f32 %v4936_v61, %v10947_v44  ;;  %v6074_v13 = vadd.f32 %v12252_v11, %v6073_v56  ;;  %v14239_v7 = vld [vmem:[#allocation174_spill] sm:$0xff] }
 0x9c8   : > { %6112 = vmatmul.bf16.gmra.mxu0 %v5689_v14  ;;  %v5494_v40 = vmax.f32 %v4937_v49, 0.0  ;;  %v6723_v60 = vadd.f32 %v14238_v47, %v6074_v13  ;;  %v5492_v14 = vmax.f32 %v4935_v24, 0.0  ;;  %v14240_v49 = vld [vmem:[#allocation56_spill] sm:$0xff] }
 0x9c9   : > { %v3920_v34 = vpop.f32.mrf.mxu2 }
 0x9ca   : > { %4978 = vmatmul.bf16.gmra.mxu3 %v11589_v8  ;;  %v3921_v38 = vadd.f32 %v3920_v34, %v12161_v9  ;;  %v5838_v30 = vpack.c.bf16 %v5494_v40, %v5492_v14  ;;  %v14243_v14 = vld [vmem:[#allocation175_spill] sm:$0xff] }
 0x9cb   : > { %v12275_v23 = vpop.f32.mrf.mxu1 }
 0x9cc   : > { %14237 = vst [vmem:[#allocation171_spill] sm:$0xff] %v12275_v23  ;;  %v5199_v56 = vmax.f32 %v3921_v38, 0.0 }
 0x9cd   : > { %v4939_v53 = vpop.f32.mrf.mxu3  ;;  %v6075_v54 = vpop.f32.mrf.mxu0 }
 0x9ce   : > { %v6076_v48 = vadd.f32 %v12252_v11, %v6075_v54  ;;  %v4940_v40 = vadd.f32 %v4939_v53, %v10947_v44 }
 0x9d0   : > { %v6725_v3 = vadd.f32 %v14239_v7, %v6076_v48 }
 0x9d1   : > { %v3922_v1 = vpop.f32.mrf.mxu2 }
 0x9d2   : > { %v8936_v8 = vpack.c.bf16 %v6725_v3, %v6723_v60  ;;  %v3923_v61 = vadd.f32 %v3922_v1, %v12161_v9  ;;  %v14242_v3 = vld [vmem:[#allocation8_spill] sm:$0xff] }
 0x9d3   : > { %v12285_v23 = vpop.f32.mrf.mxu1 }
 0x9d4   : > { %9568 = vst [vmem:[%s12270_s27 + $0x8] sm:$0xff] %v8936_v8   ;;  %v5201_v12 = vmax.f32 %v3923_v61, 0.0 }
 0x9d5   : > { %v4941_v36 = vpop.f32.mrf.mxu3  ;;  %v6078_v54 = vpop.f32.mrf.mxu0 }
 0x9d6   : > { %3964 = vmatmul.bf16.gmra.mxu2 %v14240_v49  ;;  %7131 = vmatmul.bf16.gmra.mxu1 %v5838_v30  ;;  %v5691_v13 = vpack.c.bf16 %v5201_v12, %v5199_v56  ;;  %v4942_v48 = vadd.f32 %v4941_v36, %v10947_v44  ;;  %v6079_v47 = vadd.f32 %v12252_v11, %v6078_v54  ;;  %v5496_v30 = vmax.f32 %v4940_v40, 0.0 }
 0x9d8   : > { %6117 = vmatmul.bf16.gmra.mxu0 %v5691_v13  ;;  %v5498_v7 = vmax.f32 %v4942_v48, 0.0  ;;  %v6728_v12 = vadd.f32 %v14242_v3, %v6079_v47  ;;  %v14244_v48 = vld [vmem:[#allocation59_spill] sm:$0xff] }
 0x9d9   : > { %v3925_v34 = vpop.f32.mrf.mxu2 }
 0x9da   : > { %4983 = vmatmul.bf16.gmra.mxu3 %v11606_v55  ;;  %v3926_v1 = vadd.f32 %v3925_v34, %v12161_v9  ;;  %v5840_v53 = vpack.c.bf16 %v5498_v7, %v5496_v30 }
 0x9db   : > { %v12290_v24 = vpop.f32.mrf.mxu1 }
 0x9dc   : > { %14241 = vst [vmem:[#allocation53_spill] sm:$0xff] %v12290_v24  ;;  %v5203_v54 = vmax.f32 %v3926_v1, 0.0 }
 0x9dd   : > { %v4944_v8 = vpop.f32.mrf.mxu3  ;;  %v6080_v60 = vpop.f32.mrf.mxu0 }
 0x9de   : > { %v6081_v38 = vadd.f32 %v12252_v11, %v6080_v60  ;;  %v4945_v7 = vadd.f32 %v4944_v8, %v10947_v44 }
 0x9e0   : > { %v6730_v61 = vadd.f32 %v14243_v14, %v6081_v38 }
 0x9e1   : > { %v3927_v56 = vpop.f32.mrf.mxu2 }
 0x9e2   : > { %v8941_v49 = vpack.c.bf16 %v6730_v61, %v6728_v12  ;;  %v3928_v36 = vadd.f32 %v3927_v56, %v12161_v9  ;;  %v14246_v56 = vld [vmem:[#allocation11_spill] sm:$0xff] }
 0x9e3   : > { %v12300_v13 = vpop.f32.mrf.mxu1 }
 0x9e4   : > { %9569 = vst [vmem:[%s12270_s27 + $0x10] sm:$0xff] %v8941_v49   ;;  %v5205_v55 = vmax.f32 %v3928_v36, 0.0  ;;  %v14247_v49 = vld [vmem:[#allocation176_spill] sm:$0xff] }
 0x9e5   : > { %v4946_v24 = vpop.f32.mrf.mxu3  ;;  %v6083_v60 = vpop.f32.mrf.mxu0 }
 0x9e6   : > { %3969 = vmatmul.bf16.gmra.mxu2 %v14244_v48  ;;  %7136 = vmatmul.bf16.gmra.mxu1 %v5840_v53  ;;  %v5693_v47 = vpack.c.bf16 %v5205_v55, %v5203_v54  ;;  %v4947_v38 = vadd.f32 %v4946_v24, %v10947_v44  ;;  %v6084_v3 = vadd.f32 %v12252_v11, %v6083_v60  ;;  %v5500_v53 = vmax.f32 %v4945_v7, 0.0 }
 0x9e8   : > { %6122 = vmatmul.bf16.gmra.mxu0 %v5693_v47  ;;  %v5502_v61 = vmax.f32 %v4947_v38, 0.0  ;;  %v6733_v55 = vadd.f32 %v14246_v56, %v6084_v3  ;;  %v14249_v38 = vld [vmem:[#allocation62_spill] sm:$0xff] }
 0x9e9   : > { %v3930_v34 = vpop.f32.mrf.mxu2 }
 0x9ea   : > { %4988 = vmatmul.bf16.gmra.mxu3 %v11633_v0  ;;  %v3931_v30 = vadd.f32 %v3930_v34, %v12161_v9  ;;  %v5842_v8 = vpack.c.bf16 %v5502_v61, %v5500_v53  ;;  %v14252_v53 = vld [vmem:[#allocation14_spill] sm:$0xff] }
 0x9eb   : > { %v12305_v40 = vpop.f32.mrf.mxu1 }
 0x9ec   : > { %14245 = vst [vmem:[#allocation172_spill] sm:$0xff] %v12305_v40  ;;  %v5207_v60 = vmax.f32 %v3931_v30, 0.0 }
 0x9ed   : > { %v4949_v12 = vpop.f32.mrf.mxu3  ;;  %v6085_v1 = vpop.f32.mrf.mxu0 }
 0x9ee   : > { %v6086_v14 = vadd.f32 %v12252_v11, %v6085_v1  ;;  %v4950_v61 = vadd.f32 %v4949_v12, %v10947_v44 }
 0x9f0   : > { %v6735_v36 = vadd.f32 %v14247_v49, %v6086_v14  ;;  %v14250_v14 = vld [vmem:[#allocation99_spill] sm:$0xff] }
 0x9f1   : > { %v3932_v54 = vpop.f32.mrf.mxu2 }
 0x9f2   : > { %v8946_v48 = vpack.c.bf16 %v6735_v36, %v6733_v55  ;;  %v3933_v24 = vadd.f32 %v3932_v54, %v12161_v9 }
 0x9f3   : > { %v12315_v47 = vpop.f32.mrf.mxu1 }
 0x9f4   : > { %14248 = vst [vmem:[#allocation174_spill] sm:$0xff] %v12315_v47  ;;  %v5209_v0 = vmax.f32 %v3933_v24, 0.0  ;;  %v14253_v24 = vld [vmem:[#allocation177_spill] sm:$0xff] }
 0x9f5   : > { %9570 = vst [vmem:[%s12270_s27 + $0x18] sm:$0xff] %v8946_v48   ;;  %v4951_v40 = vpop.f32.mrf.mxu3  ;;  %v6088_v1 = vpop.f32.mrf.mxu0 }
 0x9f6   : > { %3974 = vmatmul.bf16.gmra.mxu2 %v14249_v38  ;;  %7141 = vmatmul.bf16.gmra.mxu1 %v5842_v8  ;;  %v5695_v3 = vpack.c.bf16 %v5209_v0, %v5207_v60  ;;  %v4952_v56 = vadd.f32 %v4951_v40, %v10947_v44  ;;  %v6089_v55 = vadd.f32 %v12252_v11, %v6088_v1  ;;  %v5504_v38 = vmax.f32 %v4950_v61, 0.0 }
 0x9f8   : > { %6127 = vmatmul.bf16.gmra.mxu0 %v5695_v3  ;;  %v5506_v54 = vmax.f32 %v4952_v56, 0.0  ;;  %v6738_v0 = vadd.f32 %v14252_v53, %v6089_v55  ;;  %v14255_v56 = vld [vmem:[#allocation65_spill] sm:$0xff] }
 0x9f9   : > { %v3935_v34 = vpop.f32.mrf.mxu2 }
 0x9fa   : > { %4993 = vmatmul.bf16.gmra.mxu3 %v14250_v14  ;;  %v3936_v48 = vadd.f32 %v3935_v34, %v12161_v9  ;;  %v5844_v12 = vpack.c.bf16 %v5506_v54, %v5504_v38  ;;  %v14258_v38 = vld [vmem:[#allocation17_spill] sm:$0xff] }
 0x9fb   : > { %v12320_v7 = vpop.f32.mrf.mxu1 }
 0x9fc   : > { %14251 = vst [vmem:[#allocation56_spill] sm:$0xff] %v12320_v7  ;;  %v5211_v1 = vmax.f32 %v3936_v48, 0.0 }
 0x9fd   : > { %v4954_v30 = vpop.f32.mrf.mxu3  ;;  %v6090_v49 = vpop.f32.mrf.mxu0 }
 0x9fe   : > { %v6091_v36 = vadd.f32 %v12252_v11, %v6090_v49  ;;  %v4955_v54 = vadd.f32 %v4954_v30, %v10947_v44 }
 0xa00   : > { %v6740_v60 = vadd.f32 %v14253_v24, %v6091_v36  ;;  %v14256_v36 = vld [vmem:[#allocation102_spill] sm:$0xff] }
 0xa01   : > { %v3937_v8 = vpop.f32.mrf.mxu2 }
 0xa02   : > { %v8951_v3 = vpack.c.bf16 %v6740_v60, %v6738_v0  ;;  %v3938_v40 = vadd.f32 %v3937_v8, %v12161_v9 }
 0xa03   : > { %v12330_v14 = vpop.f32.mrf.mxu1 }
 0xa04   : > { %14254 = vst [vmem:[#allocation8_spill] sm:$0xff] %v12330_v14  ;;  %v5213_v7 = vmax.f32 %v3938_v40, 0.0  ;;  %v14259_v40 = vld [vmem:[#allocation178_spill] sm:$0xff] }
 0xa05   : > { %9571 = vst [vmem:[%s12270_s27 + $0x20] sm:$0xff] %v8951_v3   ;;  %v4956_v47 = vpop.f32.mrf.mxu3  ;;  %v6093_v49 = vpop.f32.mrf.mxu0 }
 0xa06   : > { %3979 = vmatmul.bf16.gmra.mxu2 %v14255_v56  ;;  %7146 = vmatmul.bf16.gmra.mxu1 %v5844_v12  ;;  %v5697_v55 = vpack.c.bf16 %v5213_v7, %v5211_v1  ;;  %v4957_v53 = vadd.f32 %v4956_v47, %v10947_v44  ;;  %v6094_v0 = vadd.f32 %v12252_v11, %v6093_v49  ;;  %v5508_v56 = vmax.f32 %v4955_v54, 0.0 }
 0xa08   : > { %6132 = vmatmul.bf16.gmra.mxu0 %v5697_v55  ;;  %v5510_v8 = vmax.f32 %v4957_v53, 0.0  ;;  %v6743_v7 = vadd.f32 %v14258_v38, %v6094_v0  ;;  %v14261_v53 = vld [vmem:[#allocation68_spill] sm:$0xff] }
 0xa09   : > { %v3940_v34 = vpop.f32.mrf.mxu2 }
 0xa0a   : > { %4998 = vmatmul.bf16.gmra.mxu3 %v14256_v36  ;;  %v3941_v3 = vadd.f32 %v3940_v34, %v12161_v9  ;;  %v5846_v30 = vpack.c.bf16 %v5510_v8, %v5508_v56  ;;  %v14264_v56 = vld [vmem:[#allocation20_spill] sm:$0xff] }
 0xa0b   : > { %v12335_v61 = vpop.f32.mrf.mxu1 }
 0xa0c   : > { %14257 = vst [vmem:[#allocation175_spill] sm:$0xff] %v12335_v61  ;;  %v5215_v49 = vmax.f32 %v3941_v3, 0.0 }
 0xa0d   : > { %v4959_v48 = vpop.f32.mrf.mxu3  ;;  %v6095_v24 = vpop.f32.mrf.mxu0 }
 0xa0e   : > { %v6096_v60 = vadd.f32 %v12252_v11, %v6095_v24  ;;  %v4960_v8 = vadd.f32 %v4959_v48, %v10947_v44 }
 0xa10   : > { %v6745_v1 = vadd.f32 %v14259_v40, %v6096_v60  ;;  %v14262_v60 = vld [vmem:[#allocation105_spill] sm:$0xff] }
 0xa11   : > { %v3942_v12 = vpop.f32.mrf.mxu2 }
 0xa12   : > { %v8956_v55 = vpack.c.bf16 %v6745_v1, %v6743_v7  ;;  %v3943_v47 = vadd.f32 %v3942_v12, %v12161_v9 }
 0xa13   : > { %v12345_v36 = vpop.f32.mrf.mxu1 }
 0xa14   : > { %14260 = vst [vmem:[#allocation59_spill] sm:$0xff] %v12345_v36  ;;  %v5217_v61 = vmax.f32 %v3943_v47, 0.0  ;;  %v14265_v47 = vld [vmem:[#allocation179_spill] sm:$0xff] }
 0xa15   : > { %9572 = vst [vmem:[%s12270_s27 + $0x28] sm:$0xff] %v8956_v55   ;;  %v4961_v14 = vpop.f32.mrf.mxu3  ;;  %v6098_v24 = vpop.f32.mrf.mxu0 }
 0xa16   : > { %3984 = vmatmul.bf16.gmra.mxu2 %v14261_v53  ;;  %7151 = vmatmul.bf16.gmra.mxu1 %v5846_v30  ;;  %v5699_v0 = vpack.c.bf16 %v5217_v61, %v5215_v49  ;;  %v4962_v38 = vadd.f32 %v4961_v14, %v10947_v44  ;;  %v6099_v7 = vadd.f32 %v12252_v11, %v6098_v24  ;;  %v5512_v53 = vmax.f32 %v4960_v8, 0.0 }
 0xa18   : > { %6137 = vmatmul.bf16.gmra.mxu0 %v5699_v0  ;;  %v5514_v12 = vmax.f32 %v4962_v38, 0.0  ;;  %v6748_v61 = vadd.f32 %v14264_v56, %v6099_v7  ;;  %v14266_v38 = vld [vmem:[#allocation71_spill] sm:$0xff] }
 0xa19   : > { %v3945_v34 = vpop.f32.mrf.mxu2 }
 0xa1a   : > { %5003 = vmatmul.bf16.gmra.mxu3 %v14262_v60  ;;  %v3946_v55 = vadd.f32 %v3945_v34, %v12161_v9  ;;  %v5848_v48 = vpack.c.bf16 %v5514_v12, %v5512_v53 }
 0xa1b   : > { %v12350_v54 = vpop.f32.mrf.mxu1 }
 0xa1c   : > { %14263 = vst [vmem:[#allocation11_spill] sm:$0xff] %v12350_v54  ;;  %v5219_v24 = vmax.f32 %v3946_v55, 0.0 }
 0xa1d   : > { %v4964_v3 = vpop.f32.mrf.mxu3  ;;  %v6100_v40 = vpop.f32.mrf.mxu0 }
 0xa1e   : > { %v6101_v1 = vadd.f32 %v12252_v11, %v6100_v40  ;;  %v4965_v12 = vadd.f32 %v4964_v3, %v10947_v44 }
 0xa20   : > { %v6750_v49 = vadd.f32 %v14265_v47, %v6101_v1 }
 0xa21   : > { %v3947_v30 = vpop.f32.mrf.mxu2 }
 0xa22   : > { %v8961_v0 = vpack.c.bf16 %v6750_v49, %v6748_v61  ;;  %v3948_v14 = vadd.f32 %v3947_v30, %v12161_v9  ;;  %v14268_v30 = vld [vmem:[#allocation23_spill] sm:$0xff] }
 0xa23   : > { %v12360_v60 = vpop.f32.mrf.mxu1 }
 0xa24   : > { %9573 = vst [vmem:[%s12270_s27 + $0x30] sm:$0xff] %v8961_v0   ;;  %v5221_v54 = vmax.f32 %v3948_v14, 0.0  ;;  %v14269_v0 = vld [vmem:[#allocation25_spill] sm:$0xff] }
 0xa25   : > { %v4966_v36 = vpop.f32.mrf.mxu3  ;;  %v6103_v40 = vpop.f32.mrf.mxu0 }
 0xa26   : > { %3989 = vmatmul.bf16.gmra.mxu2 %v14266_v38  ;;  %7156 = vmatmul.bf16.gmra.mxu1 %v5848_v48  ;;  %v5701_v7 = vpack.c.bf16 %v5221_v54, %v5219_v24  ;;  %v4967_v1 = vadd.f32 %v4966_v36, %v10947_v44  ;;  %v6104_v56 = vadd.f32 %v12252_v11, %v6103_v40  ;;  %v5516_v48 = vmax.f32 %v4965_v12, 0.0 }
 0xa28   : > { %6142 = vmatmul.bf16.gmra.mxu0 %v5701_v7  ;;  %v5518_v49 = vmax.f32 %v4967_v1, 0.0  ;;  %v6753_v54 = vadd.f32 %v14268_v30, %v6104_v56  ;;  %v14270_v1 = vld [vmem:[#allocation74_spill] sm:$0xff] }
 0xa29   : > { %v3950_v34 = vpop.f32.mrf.mxu2 }
 0xa2a   : > { %5008 = vmatmul.bf16.gmra.mxu3 %v11695_v58  ;;  %v3951_v53 = vadd.f32 %v3950_v34, %v12161_v9  ;;  %v5850_v3 = vpack.c.bf16 %v5518_v49, %v5516_v48 }
 0xa2b   : > { %v12365_v8 = vpop.f32.mrf.mxu1 }
 0xa2c   : > { %14267 = vst [vmem:[#allocation176_spill] sm:$0xff] %v12365_v8  ;;  %v5223_v40 = vmax.f32 %v3951_v53, 0.0 }
 0xa2d   : > { %v4969_v61 = vpop.f32.mrf.mxu3  ;;  %v6105_v55 = vpop.f32.mrf.mxu0 }
 0xa2e   : > { %v6106_v47 = vadd.f32 %v12252_v11, %v6105_v55  ;;  %v4970_v49 = vadd.f32 %v4969_v61, %v10947_v44 }
 0xa30   : > { %v6755_v14 = vadd.f32 %v14269_v0, %v6106_v47 }
 0xa31   : > { %v3952_v24 = vpop.f32.mrf.mxu2 }
 0xa32   : > { %v8966_v38 = vpack.c.bf16 %v6755_v14, %v6753_v54  ;;  %v3953_v36 = vadd.f32 %v3952_v24, %v12161_v9  ;;  %v14272_v24 = vld [vmem:[#allocation26_spill] sm:$0xff] }
 0xa33   : > { %v12375_v7 = vpop.f32.mrf.mxu1 }
 0xa34   : > { %9574 = vst [vmem:[%s12270_s27 + $0x38] sm:$0xff] %v8966_v38   ;;  %v5225_v58 = vmax.f32 %v3953_v36, 0.0  ;;  %v14273_v38 = vld [vmem:[#allocation28_spill] sm:$0xff] }
 0xa35   : > { %v4971_v8 = vpop.f32.mrf.mxu3  ;;  %v6108_v55 = vpop.f32.mrf.mxu0 }
 0xa36   : > { %3994 = vmatmul.bf16.gmra.mxu2 %v14270_v1  ;;  %7161 = vmatmul.bf16.gmra.mxu1 %v5850_v3  ;;  %v5703_v56 = vpack.c.bf16 %v5225_v58, %v5223_v40  ;;  %v4972_v47 = vadd.f32 %v4971_v8, %v10947_v44  ;;  %v6109_v30 = vadd.f32 %v12252_v11, %v6108_v55  ;;  %v5520_v3 = vmax.f32 %v4970_v49, 0.0 }
 0xa38   : > { %6147 = vmatmul.bf16.gmra.mxu0 %v5703_v56  ;;  %v5522_v14 = vmax.f32 %v4972_v47, 0.0  ;;  %v6758_v58 = vadd.f32 %v14272_v24, %v6109_v30  ;;  %v14274_v47 = vld [vmem:[#allocation77_spill] sm:$0xff] }
 0xa39   : > { %v3955_v34 = vpop.f32.mrf.mxu2 }
 0xa3a   : > { %5013 = vmatmul.bf16.gmra.mxu3 %v11710_v46  ;;  %v3956_v48 = vadd.f32 %v3955_v34, %v12161_v9  ;;  %v5852_v61 = vpack.c.bf16 %v5522_v14, %v5520_v3 }
 0xa3b   : > { %v12380_v12 = vpop.f32.mrf.mxu1 }
 0xa3c   : > { %14271 = vst [vmem:[#allocation62_spill] sm:$0xff] %v12380_v12  ;;  %v5227_v55 = vmax.f32 %v3956_v48, 0.0 }
 0xa3d   : > { %v4974_v54 = vpop.f32.mrf.mxu3  ;;  %v6110_v53 = vpop.f32.mrf.mxu0 }
 0xa3e   : > { %v6111_v0 = vadd.f32 %v12252_v11, %v6110_v53  ;;  %v4975_v14 = vadd.f32 %v4974_v54, %v10947_v44 }
 0xa40   : > { %v6760_v36 = vadd.f32 %v14273_v38, %v6111_v0 }
 0xa41   : > { %v3957_v40 = vpop.f32.mrf.mxu2 }
 0xa42   : > { %v8971_v1 = vpack.c.bf16 %v6760_v36, %v6758_v58  ;;  %v3958_v8 = vadd.f32 %v3957_v40, %v12161_v9  ;;  %v14276_v40 = vld [vmem:[#allocation29_spill] sm:$0xff] }
 0xa43   : > { %v12390_v56 = vpop.f32.mrf.mxu1 }
 0xa44   : > { %9575 = vst [vmem:[%s12270_s27 + $0x40] sm:$0xff] %v8971_v1   ;;  %v5229_v46 = vmax.f32 %v3958_v8, 0.0  ;;  %v14277_v1 = vld [vmem:[#allocation180_spill] sm:$0xff] }
 0xa45   : > { %v4976_v12 = vpop.f32.mrf.mxu3  ;;  %v6113_v53 = vpop.f32.mrf.mxu0 }
 0xa46   : > { %3999 = vmatmul.bf16.gmra.mxu2 %v14274_v47  ;;  %7166 = vmatmul.bf16.gmra.mxu1 %v5852_v61  ;;  %v5705_v30 = vpack.c.bf16 %v5229_v46, %v5227_v55  ;;  %v4977_v0 = vadd.f32 %v4976_v12, %v10947_v44  ;;  %v6114_v24 = vadd.f32 %v12252_v11, %v6113_v53  ;;  %v5524_v61 = vmax.f32 %v4975_v14, 0.0 }
 0xa48   : > { %6152 = vmatmul.bf16.gmra.mxu0 %v5705_v30  ;;  %v5526_v36 = vmax.f32 %v4977_v0, 0.0  ;;  %v6763_v46 = vadd.f32 %v14276_v40, %v6114_v24  ;;  %v14278_v0 = vld [vmem:[#allocation80_spill] sm:$0xff] }
 0xa49   : > { %v3960_v34 = vpop.f32.mrf.mxu2 }
 0xa4a   : > { %5018 = vmatmul.bf16.gmra.mxu3 %v11727_v16  ;;  %v3961_v3 = vadd.f32 %v3960_v34, %v12161_v9  ;;  %v5854_v54 = vpack.c.bf16 %v5526_v36, %v5524_v61 }
 0xa4b   : > { %v12395_v49 = vpop.f32.mrf.mxu1 }
 0xa4c   : > { %14275 = vst [vmem:[#allocation14_spill] sm:$0xff] %v12395_v49  ;;  %v5231_v53 = vmax.f32 %v3961_v3, 0.0 }
 0xa4d   : > { %v4979_v58 = vpop.f32.mrf.mxu3  ;;  %v6115_v48 = vpop.f32.mrf.mxu0 }
 0xa4e   : > { %v6116_v38 = vadd.f32 %v12252_v11, %v6115_v48  ;;  %v4980_v36 = vadd.f32 %v4979_v58, %v10947_v44 }
 0xa50   : > { %v6765_v8 = vadd.f32 %v14277_v1, %v6116_v38 }
 0xa51   : > { %v3962_v55 = vpop.f32.mrf.mxu2 }
 0xa52   : > { %v8976_v47 = vpack.c.bf16 %v6765_v8, %v6763_v46  ;;  %v3963_v12 = vadd.f32 %v3962_v55, %v12161_v9  ;;  %v14280_v55 = vld [vmem:[#allocation31_spill] sm:$0xff] }
 0xa53   : > { %v12405_v30 = vpop.f32.mrf.mxu1 }
 0xa54   : > { %9576 = vst [vmem:[%s12270_s27 + $0x48] sm:$0xff] %v8976_v47   ;;  %v5233_v16 = vmax.f32 %v3963_v12, 0.0  ;;  %v14281_v47 = vld [vmem:[#allocation181_spill] sm:$0xff] }
 0xa55   : > { %v4981_v49 = vpop.f32.mrf.mxu3  ;;  %v6118_v48 = vpop.f32.mrf.mxu0 }
 0xa56   : > { %4004 = vmatmul.bf16.gmra.mxu2 %v14278_v0  ;;  %7171 = vmatmul.bf16.gmra.mxu1 %v5854_v54  ;;  %v5707_v24 = vpack.c.bf16 %v5233_v16, %v5231_v53  ;;  %v4982_v38 = vadd.f32 %v4981_v49, %v10947_v44  ;;  %v6119_v40 = vadd.f32 %v12252_v11, %v6118_v48  ;;  %v5528_v54 = vmax.f32 %v4980_v36, 0.0 }
 0xa58   : > { %6157 = vmatmul.bf16.gmra.mxu0 %v5707_v24  ;;  %v5530_v8 = vmax.f32 %v4982_v38, 0.0  ;;  %v6768_v16 = vadd.f32 %v14280_v55, %v6119_v40  ;;  %v14282_v38 = vld [vmem:[#allocation83_spill] sm:$0xff] }
 0xa59   : > { %v3965_v34 = vpop.f32.mrf.mxu2 }
 0xa5a   : > { %5023 = vmatmul.bf16.gmra.mxu3 %v11744_v45  ;;  %v3966_v61 = vadd.f32 %v3965_v34, %v12161_v9  ;;  %v5856_v58 = vpack.c.bf16 %v5530_v8, %v5528_v54 }
 0xa5b   : > { %v12410_v14 = vpop.f32.mrf.mxu1 }
 0xa5c   : > { %14279 = vst [vmem:[#allocation177_spill] sm:$0xff] %v12410_v14  ;;  %v5235_v48 = vmax.f32 %v3966_v61, 0.0 }
 0xa5d   : > { %v4984_v46 = vpop.f32.mrf.mxu3  ;;  %v6120_v3 = vpop.f32.mrf.mxu0 }
 0xa5e   : > { %v6121_v1 = vadd.f32 %v12252_v11, %v6120_v3  ;;  %v4985_v8 = vadd.f32 %v4984_v46, %v10947_v44 }
 0xa60   : > { %v6770_v12 = vadd.f32 %v14281_v47, %v6121_v1 }
 0xa61   : > { %v3967_v53 = vpop.f32.mrf.mxu2 }
 0xa62   : > { %v8981_v0 = vpack.c.bf16 %v6770_v12, %v6768_v16  ;;  %v3968_v49 = vadd.f32 %v3967_v53, %v12161_v9  ;;  %v14284_v53 = vld [vmem:[#allocation34_spill] sm:$0xff] }
 0xa63   : > { %v12420_v24 = vpop.f32.mrf.mxu1 }
 0xa64   : > { %9577 = vst [vmem:[%s12270_s27 + $0x50] sm:$0xff] %v8981_v0   ;;  %v5237_v45 = vmax.f32 %v3968_v49, 0.0  ;;  %v14285_v0 = vld [vmem:[#allocation182_spill] sm:$0xff] }
 0xa65   : > { %v4986_v14 = vpop.f32.mrf.mxu3  ;;  %v6123_v3 = vpop.f32.mrf.mxu0 }
 0xa66   : > { %4009 = vmatmul.bf16.gmra.mxu2 %v14282_v38  ;;  %7176 = vmatmul.bf16.gmra.mxu1 %v5856_v58  ;;  %v5709_v40 = vpack.c.bf16 %v5237_v45, %v5235_v48  ;;  %v4987_v1 = vadd.f32 %v4986_v14, %v10947_v44  ;;  %v6124_v55 = vadd.f32 %v12252_v11, %v6123_v3  ;;  %v5532_v58 = vmax.f32 %v4985_v8, 0.0 }
 0xa68   : > { %6162 = vmatmul.bf16.gmra.mxu0 %v5709_v40  ;;  %v5534_v12 = vmax.f32 %v4987_v1, 0.0  ;;  %v6773_v45 = vadd.f32 %v14284_v53, %v6124_v55  ;;  %v14286_v1 = vld [vmem:[#allocation86_spill] sm:$0xff] }
 0xa69   : > { %v3970_v34 = vpop.f32.mrf.mxu2 }
 0xa6a   : > { %5028 = vmatmul.bf16.gmra.mxu3 %v11771_v50  ;;  %v3971_v54 = vadd.f32 %v3970_v34, %v12161_v9  ;;  %v5858_v46 = vpack.c.bf16 %v5534_v12, %v5532_v58 }
 0xa6b   : > { %v12425_v36 = vpop.f32.mrf.mxu1 }
 0xa6c   : > { %14283 = vst [vmem:[#allocation65_spill] sm:$0xff] %v12425_v36  ;;  %v5239_v3 = vmax.f32 %v3971_v54, 0.0 }
 0xa6d   : > { %v4989_v16 = vpop.f32.mrf.mxu3  ;;  %v6125_v61 = vpop.f32.mrf.mxu0 }
 0xa6e   : > { %v6126_v47 = vadd.f32 %v12252_v11, %v6125_v61  ;;  %v4990_v12 = vadd.f32 %v4989_v16, %v10947_v44 }
 0xa70   : > { %v6775_v49 = vadd.f32 %v14285_v0, %v6126_v47 }
 0xa71   : > { %v3972_v48 = vpop.f32.mrf.mxu2 }
 0xa72   : > { %v8986_v38 = vpack.c.bf16 %v6775_v49, %v6773_v45  ;;  %v3973_v14 = vadd.f32 %v3972_v48, %v12161_v9  ;;  %v14288_v48 = vld [vmem:[#allocation37_spill] sm:$0xff] }
 0xa73   : > { %v12435_v40 = vpop.f32.mrf.mxu1 }
 0xa74   : > { %9578 = vst [vmem:[%s12270_s27 + $0x58] sm:$0xff] %v8986_v38   ;;  %v5241_v50 = vmax.f32 %v3973_v14, 0.0  ;;  %v14289_v38 = vld [vmem:[#allocation183_spill] sm:$0xff] }
 0xa75   : > { %v4991_v36 = vpop.f32.mrf.mxu3  ;;  %v6128_v61 = vpop.f32.mrf.mxu0 }
 0xa76   : > { %4014 = vmatmul.bf16.gmra.mxu2 %v14286_v1  ;;  %7181 = vmatmul.bf16.gmra.mxu1 %v5858_v46  ;;  %v5711_v55 = vpack.c.bf16 %v5241_v50, %v5239_v3  ;;  %v4992_v47 = vadd.f32 %v4991_v36, %v10947_v44  ;;  %v6129_v53 = vadd.f32 %v12252_v11, %v6128_v61  ;;  %v5536_v46 = vmax.f32 %v4990_v12, 0.0 }
 0xa78   : > { %6167 = vmatmul.bf16.gmra.mxu0 %v5711_v55  ;;  %v5538_v49 = vmax.f32 %v4992_v47, 0.0  ;;  %v6778_v50 = vadd.f32 %v14288_v48, %v6129_v53  ;;  %v14290_v47 = vld [vmem:[#allocation89_spill] sm:$0xff] }
 0xa79   : > { %v3975_v34 = vpop.f32.mrf.mxu2 }
 0xa7a   : > { %5033 = vmatmul.bf16.gmra.mxu3 %v11787_v17  ;;  %v3976_v58 = vadd.f32 %v3975_v34, %v12161_v9  ;;  %v5860_v16 = vpack.c.bf16 %v5538_v49, %v5536_v46 }
 0xa7b   : > { %v12440_v8 = vpop.f32.mrf.mxu1 }
 0xa7c   : > { %14287 = vst [vmem:[#allocation17_spill] sm:$0xff] %v12440_v8  ;;  %v5243_v61 = vmax.f32 %v3976_v58, 0.0 }
 0xa7d   : > { %v4994_v45 = vpop.f32.mrf.mxu3  ;;  %v6130_v54 = vpop.f32.mrf.mxu0 }
 0xa7e   : > { %v6131_v0 = vadd.f32 %v12252_v11, %v6130_v54  ;;  %v4995_v49 = vadd.f32 %v4994_v45, %v10947_v44 }
 0xa80   : > { %v6780_v14 = vadd.f32 %v14289_v38, %v6131_v0 }
 0xa81   : > { %v3977_v3 = vpop.f32.mrf.mxu2 }
 0xa82   : > { %v8991_v1 = vpack.c.bf16 %v6780_v14, %v6778_v50  ;;  %v3978_v36 = vadd.f32 %v3977_v3, %v12161_v9  ;;  %v14292_v3 = vld [vmem:[#allocation40_spill] sm:$0xff] }
 0xa83   : > { %v12450_v55 = vpop.f32.mrf.mxu1 }
 0xa84   : > { %9579 = vst [vmem:[%s12270_s27 + $0x60] sm:$0xff] %v8991_v1   ;;  %v5245_v17 = vmax.f32 %v3978_v36, 0.0  ;;  %v14293_v1 = vld [vmem:[#allocation184_spill] sm:$0xff] }
 0xa85   : > { %v4996_v8 = vpop.f32.mrf.mxu3  ;;  %v6133_v54 = vpop.f32.mrf.mxu0 }
 0xa86   : > { %4019 = vmatmul.bf16.gmra.mxu2 %v14290_v47  ;;  %7186 = vmatmul.bf16.gmra.mxu1 %v5860_v16  ;;  %v5713_v53 = vpack.c.bf16 %v5245_v17, %v5243_v61  ;;  %v4997_v0 = vadd.f32 %v4996_v8, %v10947_v44  ;;  %v6134_v48 = vadd.f32 %v12252_v11, %v6133_v54  ;;  %v5540_v16 = vmax.f32 %v4995_v49, 0.0 }
 0xa88   : > { %6172 = vmatmul.bf16.gmra.mxu0 %v5713_v53  ;;  %v5542_v14 = vmax.f32 %v4997_v0, 0.0  ;;  %v6783_v17 = vadd.f32 %v14292_v3, %v6134_v48  ;;  %v14294_v0 = vld [vmem:[#allocation92_spill] sm:$0xff] }
 0xa89   : > { %v3980_v34 = vpop.f32.mrf.mxu2 }
 0xa8a   : > { %5038 = vmatmul.bf16.gmra.mxu3 %v11805_v27  ;;  %v3981_v46 = vadd.f32 %v3980_v34, %v12161_v9  ;;  %v5862_v45 = vpack.c.bf16 %v5542_v14, %v5540_v16 }
 0xa8b   : > { %v12455_v12 = vpop.f32.mrf.mxu1 }
 0xa8c   : > { %14291 = vst [vmem:[#allocation178_spill] sm:$0xff] %v12455_v12  ;;  %v5247_v54 = vmax.f32 %v3981_v46, 0.0 }
 0xa8d   : > { %v4999_v50 = vpop.f32.mrf.mxu3  ;;  %v6135_v58 = vpop.f32.mrf.mxu0 }
 0xa8e   : > { %v6136_v38 = vadd.f32 %v12252_v11, %v6135_v58  ;;  %v5000_v14 = vadd.f32 %v4999_v50, %v10947_v44 }
 0xa90   : > { %v6785_v36 = vadd.f32 %v14293_v1, %v6136_v38 }
 0xa91   : > { %v3982_v61 = vpop.f32.mrf.mxu2 }
 0xa92   : > { %v8996_v47 = vpack.c.bf16 %v6785_v36, %v6783_v17  ;;  %v3983_v8 = vadd.f32 %v3982_v61, %v12161_v9  ;;  %v14296_v61 = vld [vmem:[#allocation43_spill] sm:$0xff] }
 0xa93   : > { %v12465_v53 = vpop.f32.mrf.mxu1 }
 0xa94   : > { %9580 = vst [vmem:[%s12270_s27 + $0x68] sm:$0xff] %v8996_v47   ;;  %v5249_v27 = vmax.f32 %v3983_v8, 0.0  ;;  %v14297_v47 = vld [vmem:[#allocation185_spill] sm:$0xff] }
 0xa95   : > { %v5001_v12 = vpop.f32.mrf.mxu3  ;;  %v6138_v58 = vpop.f32.mrf.mxu0 }
 0xa96   : > { %4024 = vmatmul.bf16.gmra.mxu2 %v14294_v0  ;;  %7191 = vmatmul.bf16.gmra.mxu1 %v5862_v45  ;;  %v5715_v48 = vpack.c.bf16 %v5249_v27, %v5247_v54  ;;  %v5002_v38 = vadd.f32 %v5001_v12, %v10947_v44  ;;  %v6139_v3 = vadd.f32 %v12252_v11, %v6138_v58  ;;  %v5544_v45 = vmax.f32 %v5000_v14, 0.0 }
 0xa98   : > { %6177 = vmatmul.bf16.gmra.mxu0 %v5715_v48  ;;  %v5546_v36 = vmax.f32 %v5002_v38, 0.0  ;;  %v6788_v27 = vadd.f32 %v14296_v61, %v6139_v3  ;;  %v14298_v38 = vld [vmem:[#allocation95_spill] sm:$0xff] }
 0xa99   : > { %v3985_v34 = vpop.f32.mrf.mxu2 }
 0xa9a   : > { %5043 = vmatmul.bf16.gmra.mxu3 %v11822_v29  ;;  %v3986_v16 = vadd.f32 %v3985_v34, %v12161_v9  ;;  %v5864_v50 = vpack.c.bf16 %v5546_v36, %v5544_v45 }
 0xa9b   : > { %v12470_v49 = vpop.f32.mrf.mxu1 }
 0xa9c   : > { %14295 = vst [vmem:[#allocation68_spill] sm:$0xff] %v12470_v49  ;;  %v5251_v58 = vmax.f32 %v3986_v16, 0.0 }
 0xa9d   : > { %v5004_v17 = vpop.f32.mrf.mxu3  ;;  %v6140_v46 = vpop.f32.mrf.mxu0 }
 0xa9e   : > { %v6141_v1 = vadd.f32 %v12252_v11, %v6140_v46  ;;  %v5005_v36 = vadd.f32 %v5004_v17, %v10947_v44 }
 0xaa0   : > { %v6790_v8 = vadd.f32 %v14297_v47, %v6141_v1 }
 0xaa1   : > { %v3987_v54 = vpop.f32.mrf.mxu2 }
 0xaa2   : > { %v9001_v0 = vpack.c.bf16 %v6790_v8, %v6788_v27  ;;  %v3988_v12 = vadd.f32 %v3987_v54, %v12161_v9  ;;  %v14300_v54 = vld [vmem:[#allocation46_spill] sm:$0xff] }
 0xaa3   : > { %v12480_v48 = vpop.f32.mrf.mxu1 }
 0xaa4   : > { %9581 = vst [vmem:[%s12270_s27 + $0x70] sm:$0xff] %v9001_v0   ;;  %v5253_v29 = vmax.f32 %v3988_v12, 0.0  ;;  %v14301_v0 = vld [vmem:[#allocation186_spill] sm:$0xff] }
 0xaa5   : > { %v5006_v49 = vpop.f32.mrf.mxu3  ;;  %v6143_v46 = vpop.f32.mrf.mxu0 }
 0xaa6   : > { %4029 = vmatmul.bf16.gmra.mxu2 %v14298_v38  ;;  %7196 = vmatmul.bf16.gmra.mxu1 %v5864_v50  ;;  %v5717_v3 = vpack.c.bf16 %v5253_v29, %v5251_v58  ;;  %v5007_v1 = vadd.f32 %v5006_v49, %v10947_v44  ;;  %v6144_v61 = vadd.f32 %v12252_v11, %v6143_v46  ;;  %v5548_v50 = vmax.f32 %v5005_v36, 0.0 }
 0xaa8   : > { %6182 = vmatmul.bf16.gmra.mxu0 %v5717_v3  ;;  %v5550_v8 = vmax.f32 %v5007_v1, 0.0  ;;  %v6793_v29 = vadd.f32 %v14300_v54, %v6144_v61  ;;  %v14302_v1 = vld [vmem:[#allocation98_spill] sm:$0xff] }
 0xaa9   : > { %v3990_v34 = vpop.f32.mrf.mxu2 }
 0xaaa   : > { %5048 = vmatmul.bf16.gmra.mxu3 %v11845_v15  ;;  %v3991_v45 = vadd.f32 %v3990_v34, %v12161_v9  ;;  %v5866_v17 = vpack.c.bf16 %v5550_v8, %v5548_v50 }
 0xaab   : > { %v12485_v14 = vpop.f32.mrf.mxu1 }
 0xaac   : > { %14299 = vst [vmem:[#allocation20_spill] sm:$0xff] %v12485_v14  ;;  %v5255_v46 = vmax.f32 %v3991_v45, 0.0 }
 0xaad   : > { %v5009_v27 = vpop.f32.mrf.mxu3  ;;  %v6145_v16 = vpop.f32.mrf.mxu0 }
 0xaae   : > { %v6146_v47 = vadd.f32 %v12252_v11, %v6145_v16  ;;  %v5010_v8 = vadd.f32 %v5009_v27, %v10947_v44 }
 0xab0   : > { %v6795_v12 = vadd.f32 %v14301_v0, %v6146_v47 }
 0xab1   : > { %v3992_v58 = vpop.f32.mrf.mxu2 }
 0xab2   : > { %v9006_v38 = vpack.c.bf16 %v6795_v12, %v6793_v29  ;;  %v3993_v49 = vadd.f32 %v3992_v58, %v12161_v9  ;;  %v14304_v58 = vld [vmem:[#allocation49_spill] sm:$0xff] }
 0xab3   : > { %v12495_v3 = vpop.f32.mrf.mxu1 }
 0xab4   : > { %9582 = vst [vmem:[%s12270_s27 + $0x78] sm:$0xff] %v9006_v38   ;;  %v5257_v15 = vmax.f32 %v3993_v49, 0.0  ;;  %v14305_v38 = vld [vmem:[#allocation187_spill] sm:$0xff] }
 0xab5   : > { %v5011_v14 = vpop.f32.mrf.mxu3  ;;  %v6148_v16 = vpop.f32.mrf.mxu0 }
 0xab6   : > { %4034 = vmatmul.bf16.gmra.mxu2 %v14302_v1  ;;  %7201 = vmatmul.bf16.gmra.mxu1 %v5866_v17  ;;  %v5719_v61 = vpack.c.bf16 %v5257_v15, %v5255_v46  ;;  %v5012_v47 = vadd.f32 %v5011_v14, %v10947_v44  ;;  %v6149_v54 = vadd.f32 %v12252_v11, %v6148_v16  ;;  %v5552_v17 = vmax.f32 %v5010_v8, 0.0 }
 0xab8   : > { %6187 = vmatmul.bf16.gmra.mxu0 %v5719_v61  ;;  %v5554_v12 = vmax.f32 %v5012_v47, 0.0  ;;  %v6798_v15 = vadd.f32 %v14304_v58, %v6149_v54  ;;  %v14306_v47 = vld [vmem:[#allocation101_spill] sm:$0xff] }
 0xab9   : > { %v3995_v34 = vpop.f32.mrf.mxu2 }
 0xaba   : > { %5053 = vmatmul.bf16.gmra.mxu3 %v11861_v63  ;;  %v3996_v50 = vadd.f32 %v3995_v34, %v12161_v9  ;;  %v5868_v27 = vpack.c.bf16 %v5554_v12, %v5552_v17 }
 0xabb   : > { %v12500_v36 = vpop.f32.mrf.mxu1 }
 0xabc   : > { %14303 = vst [vmem:[#allocation179_spill] sm:$0xff] %v12500_v36  ;;  %v5259_v16 = vmax.f32 %v3996_v50, 0.0 }
 0xabd   : > { %v5014_v29 = vpop.f32.mrf.mxu3  ;;  %v6150_v45 = vpop.f32.mrf.mxu0 }
 0xabe   : > { %v6151_v0 = vadd.f32 %v12252_v11, %v6150_v45  ;;  %v5015_v12 = vadd.f32 %v5014_v29, %v10947_v44 }
 0xac0   : > { %v6800_v49 = vadd.f32 %v14305_v38, %v6151_v0 }
 0xac1   : > { %v3997_v46 = vpop.f32.mrf.mxu2 }
 0xac2   : > { %v9011_v1 = vpack.c.bf16 %v6800_v49, %v6798_v15  ;;  %v3998_v14 = vadd.f32 %v3997_v46, %v12161_v9  ;;  %v14308_v46 = vld [vmem:[#allocation52_spill] sm:$0xff] }
 0xac3   : > { %v12510_v61 = vpop.f32.mrf.mxu1 }
 0xac4   : > { %9583 = vst [vmem:[%s12270_s27 + $0x80] sm:$0xff] %v9011_v1   ;;  %v5261_v63 = vmax.f32 %v3998_v14, 0.0  ;;  %v14309_v1 = vld [vmem:[#allocation188_spill] sm:$0xff] }
 0xac5   : > { %v5016_v36 = vpop.f32.mrf.mxu3  ;;  %v6153_v45 = vpop.f32.mrf.mxu0 }
 0xac6   : > { %4039 = vmatmul.bf16.gmra.mxu2 %v14306_v47  ;;  %7206 = vmatmul.bf16.gmra.mxu1 %v5868_v27  ;;  %v5721_v54 = vpack.c.bf16 %v5261_v63, %v5259_v16  ;;  %v5017_v0 = vadd.f32 %v5016_v36, %v10947_v44  ;;  %v6154_v58 = vadd.f32 %v12252_v11, %v6153_v45  ;;  %v5556_v27 = vmax.f32 %v5015_v12, 0.0 }
 0xac8   : > { %6192 = vmatmul.bf16.gmra.mxu0 %v5721_v54  ;;  %v5558_v49 = vmax.f32 %v5017_v0, 0.0  ;;  %v6803_v63 = vadd.f32 %v14308_v46, %v6154_v58  ;;  %v14310_v0 = vld [vmem:[#allocation104_spill] sm:$0xff] }
 0xac9   : > { %v4000_v34 = vpop.f32.mrf.mxu2 }
 0xaca   : > { %5058 = vmatmul.bf16.gmra.mxu3 %v11879_v25  ;;  %v4001_v17 = vadd.f32 %v4000_v34, %v12161_v9  ;;  %v5870_v29 = vpack.c.bf16 %v5558_v49, %v5556_v27 }
 0xacb   : > { %v12515_v8 = vpop.f32.mrf.mxu1 }
 0xacc   : > { %14307 = vst [vmem:[#allocation71_spill] sm:$0xff] %v12515_v8  ;;  %v5263_v45 = vmax.f32 %v4001_v17, 0.0 }
 0xacd   : > { %v5019_v15 = vpop.f32.mrf.mxu3  ;;  %v6155_v50 = vpop.f32.mrf.mxu0 }
 0xace   : > { %v6156_v38 = vadd.f32 %v12252_v11, %v6155_v50 }
 0xad0   : > { %v6805_v14 = vadd.f32 %v14309_v1, %v6156_v38  ;;  %v12536_v38 = vld [vmem:[%s13585_s8] ss:$0 sm:$0xff] }
 0xad1   : > { %v4002_v16 = vpop.f32.mrf.mxu2 }
 0xad2   : > { %v9016_v47 = vpack.c.bf16 %v6805_v14, %v6803_v63  ;;  %v4003_v36 = vadd.f32 %v4002_v16, %v12161_v9  ;;  %v14312_v14 = vld [vmem:[#allocation55_spill] sm:$0xff] }
 0xad3   : > { %v12525_v54 = vpop.f32.mrf.mxu1 }
 0xad4   : > { %9584 = vst [vmem:[%s12270_s27 + $0x88] sm:$0xff] %v9016_v47   ;;  %v5265_v25 = vmax.f32 %v4003_v36, 0.0 }
 0xad5   : > { %v5021_v8 = vpop.f32.mrf.mxu3  ;;  %v6158_v11 = vpop.f32.mrf.mxu0 }
 0xad6   : > { %4044 = vmatmul.bf16.gmra.mxu2 %v14310_v0  ;;  %7211 = vmatmul.bf16.gmra.mxu1 %v5870_v29  ;;  %v5723_v58 = vpack.c.bf16 %v5265_v25, %v5263_v45  ;;  %v5022_v12 = vadd.f32 %v5021_v8, %v10947_v44  ;;  %v6159_v49 = vadd.f32 %v12536_v38, %v6158_v11  ;;  %v14313_v8 = vld [vmem:[#allocation189_spill] sm:$0xff] }
 0xad7   : > { %v5020_v25 = vadd.f32 %v5019_v15, %v10947_v44 }
 0xad8   : > { %6197 = vmatmul.bf16.gmra.mxu0 %v5723_v58  ;;  %v5562_v1 = vmax.f32 %v5022_v12, 0.0  ;;  %v6808_v16 = vadd.f32 %v14312_v14, %v6159_v49  ;;  %v14314_v12 = vld [vmem:[#allocation107_spill] sm:$0xff] }
 0xad9   : > { %v4005_v34 = vpop.f32.mrf.mxu2  ;;  %v5560_v45 = vmax.f32 %v5020_v25, 0.0 }
 0xada   : > { %5063 = vmatmul.bf16.gmra.mxu3 %v11896_v62  ;;  %v4006_v27 = vadd.f32 %v4005_v34, %v12161_v9 }
 0xadb   : > { %v12530_v50 = vpop.f32.mrf.mxu1  ;;  %v5872_v15 = vpack.c.bf16 %v5562_v1, %v5560_v45 }
 0xadc   : > { %14311 = vst [vmem:[#allocation23_spill] sm:$0xff] %v12530_v50  ;;  %v5267_v11 = vmax.f32 %v4006_v27, 0.0 }
 0xadd   : > { %v5024_v46 = vpop.f32.mrf.mxu3  ;;  %v6160_v63 = vpop.f32.mrf.mxu0 }
 0xade   : > { %v6161_v17 = vadd.f32 %v12536_v38, %v6160_v63  ;;  %v5025_v1 = vadd.f32 %v5024_v46, %v10947_v44 }
 0xae0   : > { %v6810_v47 = vadd.f32 %v14313_v8, %v6161_v17 }
 0xae1   : > { %v4007_v36 = vpop.f32.mrf.mxu2 }
 0xae2   : > { %v9021_v29 = vpack.c.bf16 %v6810_v47, %v6808_v16  ;;  %v4008_v0 = vadd.f32 %v4007_v36, %v12161_v9  ;;  %v14316_v36 = vld [vmem:[#allocation58_spill] sm:$0xff] }
 0xae3   : > { %v12545_v58 = vpop.f32.mrf.mxu1 }
 0xae4   : > { %9585 = vst [vmem:[%s12270_s27 + $0x90] sm:$0xff] %v9021_v29   ;;  %v5269_v62 = vmax.f32 %v4008_v0, 0.0  ;;  %v14317_v29 = vld [vmem:[#allocation190_spill] sm:$0xff] }
 0xae5   : > { %v5026_v50 = vpop.f32.mrf.mxu3  ;;  %v6163_v63 = vpop.f32.mrf.mxu0 }
 0xae6   : > { %4049 = vmatmul.bf16.gmra.mxu2 %v14314_v12  ;;  %7216 = vmatmul.bf16.gmra.mxu1 %v5872_v15  ;;  %v5725_v49 = vpack.c.bf16 %v5269_v62, %v5267_v11  ;;  %v5027_v17 = vadd.f32 %v5026_v50, %v10947_v44  ;;  %v6164_v14 = vadd.f32 %v12536_v38, %v6163_v63  ;;  %v5564_v15 = vmax.f32 %v5025_v1, 0.0 }
 0xae8   : > { %6202 = vmatmul.bf16.gmra.mxu0 %v5725_v49  ;;  %v5566_v47 = vmax.f32 %v5027_v17, 0.0  ;;  %v6813_v62 = vadd.f32 %v14316_v36, %v6164_v14  ;;  %v14318_v17 = vld [vmem:[#allocation110_spill] sm:$0xff] }
 0xae9   : > { %v4010_v34 = vpop.f32.mrf.mxu2 }
 0xaea   : > { %5068 = vmatmul.bf16.gmra.mxu3 %v11923_v51  ;;  %v4011_v45 = vadd.f32 %v4010_v34, %v12161_v9  ;;  %v5874_v46 = vpack.c.bf16 %v5566_v47, %v5564_v15 }
 0xaeb   : > { %v12550_v25 = vpop.f32.mrf.mxu1 }
 0xaec   : > { %14315 = vst [vmem:[#allocation25_spill] sm:$0xff] %v12550_v25  ;;  %v5271_v63 = vmax.f32 %v4011_v45, 0.0 }
 0xaed   : > { %v5029_v16 = vpop.f32.mrf.mxu3  ;;  %v6165_v27 = vpop.f32.mrf.mxu0 }
 0xaee   : > { %v6166_v8 = vadd.f32 %v12536_v38, %v6165_v27  ;;  %v5030_v47 = vadd.f32 %v5029_v16, %v10947_v44 }
 0xaf0   : > { %v6815_v0 = vadd.f32 %v14317_v29, %v6166_v8 }
 0xaf1   : > { %v4012_v11 = vpop.f32.mrf.mxu2 }
 0xaf2   : > { %v9026_v12 = vpack.c.bf16 %v6815_v0, %v6813_v62  ;;  %v4013_v50 = vadd.f32 %v4012_v11, %v12161_v9  ;;  %v14320_v11 = vld [vmem:[#allocation61_spill] sm:$0xff] }
 0xaf3   : > { %v12560_v49 = vpop.f32.mrf.mxu1 }
 0xaf4   : > { %9586 = vst [vmem:[%s12270_s27 + $0x98] sm:$0xff] %v9026_v12   ;;  %v5273_v51 = vmax.f32 %v4013_v50, 0.0  ;;  %v14321_v12 = vld [vmem:[#allocation191_spill] sm:$0xff] }
 0xaf5   : > { %v5031_v25 = vpop.f32.mrf.mxu3  ;;  %v6168_v27 = vpop.f32.mrf.mxu0 }
 0xaf6   : > { %4054 = vmatmul.bf16.gmra.mxu2 %v14318_v17  ;;  %7221 = vmatmul.bf16.gmra.mxu1 %v5874_v46  ;;  %v5727_v14 = vpack.c.bf16 %v5273_v51, %v5271_v63  ;;  %v5032_v8 = vadd.f32 %v5031_v25, %v10947_v44  ;;  %v6169_v36 = vadd.f32 %v12536_v38, %v6168_v27  ;;  %v5568_v46 = vmax.f32 %v5030_v47, 0.0 }
 0xaf8   : > { %6207 = vmatmul.bf16.gmra.mxu0 %v5727_v14  ;;  %v5570_v0 = vmax.f32 %v5032_v8, 0.0  ;;  %v6818_v51 = vadd.f32 %v14320_v11, %v6169_v36  ;;  %v14322_v8 = vld [vmem:[#allocation113_spill] sm:$0xff] }
 0xaf9   : > { %v4015_v34 = vpop.f32.mrf.mxu2 }
 0xafa   : > { %5073 = vmatmul.bf16.gmra.mxu3 %v11946_v31  ;;  %v4016_v15 = vadd.f32 %v4015_v34, %v12161_v9  ;;  %v5876_v16 = vpack.c.bf16 %v5570_v0, %v5568_v46 }
 0xafb   : > { %v12565_v1 = vpop.f32.mrf.mxu1 }
 0xafc   : > { %14319 = vst [vmem:[#allocation74_spill] sm:$0xff] %v12565_v1  ;;  %v5275_v27 = vmax.f32 %v4016_v15, 0.0 }
 0xafd   : > { %v5034_v62 = vpop.f32.mrf.mxu3  ;;  %v6170_v45 = vpop.f32.mrf.mxu0 }
 0xafe   : > { %v6171_v29 = vadd.f32 %v12536_v38, %v6170_v45  ;;  %v5035_v0 = vadd.f32 %v5034_v62, %v10947_v44 }
 0xb00   : > { %v6820_v50 = vadd.f32 %v14321_v12, %v6171_v29 }
 0xb01   : > { %v4017_v63 = vpop.f32.mrf.mxu2 }
 0xb02   : > { %v9031_v17 = vpack.c.bf16 %v6820_v50, %v6818_v51  ;;  %v4018_v25 = vadd.f32 %v4017_v63, %v12161_v9  ;;  %v14324_v63 = vld [vmem:[#allocation64_spill] sm:$0xff] }
 0xb03   : > { %v12575_v14 = vpop.f32.mrf.mxu1 }
 0xb04   : > { %9587 = vst [vmem:[%s12270_s27 + $0xa0] sm:$0xff] %v9031_v17   ;;  %v5277_v31 = vmax.f32 %v4018_v25, 0.0  ;;  %v14325_v17 = vld [vmem:[#allocation192_spill] sm:$0xff] }
 0xb05   : > { %v5036_v1 = vpop.f32.mrf.mxu3  ;;  %v6173_v45 = vpop.f32.mrf.mxu0 }
 0xb06   : > { %4059 = vmatmul.bf16.gmra.mxu2 %v14322_v8  ;;  %7226 = vmatmul.bf16.gmra.mxu1 %v5876_v16  ;;  %v5729_v36 = vpack.c.bf16 %v5277_v31, %v5275_v27  ;;  %v5037_v29 = vadd.f32 %v5036_v1, %v10947_v44  ;;  %v6174_v11 = vadd.f32 %v12536_v38, %v6173_v45  ;;  %v5572_v16 = vmax.f32 %v5035_v0, 0.0 }
 0xb08   : > { %6212 = vmatmul.bf16.gmra.mxu0 %v5729_v36  ;;  %v5574_v50 = vmax.f32 %v5037_v29, 0.0  ;;  %v6823_v31 = vadd.f32 %v14324_v63, %v6174_v11  ;;  %v14327_v29 = vld [vmem:[#allocation116_spill] sm:$0xff] }
 0xb09   : > { %v4020_v34 = vpop.f32.mrf.mxu2 }
 0xb0a   : > { %5078 = vmatmul.bf16.gmra.mxu3 %v11962_v42  ;;  %v4021_v46 = vadd.f32 %v4020_v34, %v12161_v9  ;;  %v5878_v62 = vpack.c.bf16 %v5574_v50, %v5572_v16  ;;  %v14330_v16 = vld [vmem:[#allocation67_spill] sm:$0xff] }
 0xb0b   : > { %v12580_v47 = vpop.f32.mrf.mxu1 }
 0xb0c   : > { %14323 = vst [vmem:[#allocation26_spill] sm:$0xff] %v12580_v47  ;;  %v5279_v45 = vmax.f32 %v4021_v46, 0.0 }
 0xb0d   : > { %v5039_v51 = vpop.f32.mrf.mxu3  ;;  %v6175_v15 = vpop.f32.mrf.mxu0 }
 0xb0e   : > { %v6176_v12 = vadd.f32 %v12536_v38, %v6175_v15  ;;  %v5040_v50 = vadd.f32 %v5039_v51, %v10947_v44 }
 0xb10   : > { %v6825_v25 = vadd.f32 %v14325_v17, %v6176_v12  ;;  %v14328_v12 = vld [vmem:[#allocation153_spill] sm:$0xff] }
 0xb11   : > { %v4022_v27 = vpop.f32.mrf.mxu2 }
 0xb12   : > { %v9036_v8 = vpack.c.bf16 %v6825_v25, %v6823_v31  ;;  %v4023_v1 = vadd.f32 %v4022_v27, %v12161_v9 }
 0xb13   : > { %v12590_v36 = vpop.f32.mrf.mxu1 }
 0xb14   : > { %14326 = vst [vmem:[#allocation28_spill] sm:$0xff] %v12590_v36  ;;  %v5281_v42 = vmax.f32 %v4023_v1, 0.0  ;;  %v14331_v1 = vld [vmem:[#allocation193_spill] sm:$0xff] }
 0xb15   : > { %9588 = vst [vmem:[%s12270_s27 + $0xa8] sm:$0xff] %v9036_v8   ;;  %v5041_v47 = vpop.f32.mrf.mxu3  ;;  %v6178_v15 = vpop.f32.mrf.mxu0 }
 0xb16   : > { %4064 = vmatmul.bf16.gmra.mxu2 %v14327_v29  ;;  %7231 = vmatmul.bf16.gmra.mxu1 %v5878_v62  ;;  %v5731_v11 = vpack.c.bf16 %v5281_v42, %v5279_v45  ;;  %v5042_v63 = vadd.f32 %v5041_v47, %v10947_v44  ;;  %v6179_v31 = vadd.f32 %v12536_v38, %v6178_v15  ;;  %v5576_v29 = vmax.f32 %v5040_v50, 0.0 }
 0xb18   : > { %6217 = vmatmul.bf16.gmra.mxu0 %v5731_v11  ;;  %v5578_v27 = vmax.f32 %v5042_v63, 0.0  ;;  %v6828_v42 = vadd.f32 %v14330_v16, %v6179_v31  ;;  %v14332_v63 = vld [vmem:[#allocation119_spill] sm:$0xff] }
 0xb19   : > { %v4025_v34 = vpop.f32.mrf.mxu2 }
 0xb1a   : > { %5083 = vmatmul.bf16.gmra.mxu3 %v14328_v12  ;;  %v4026_v8 = vadd.f32 %v4025_v34, %v12161_v9  ;;  %v5880_v51 = vpack.c.bf16 %v5578_v27, %v5576_v29 }
 0xb1b   : > { %v12595_v0 = vpop.f32.mrf.mxu1 }
 0xb1c   : > { %14329 = vst [vmem:[#allocation77_spill] sm:$0xff] %v12595_v0  ;;  %v5283_v15 = vmax.f32 %v4026_v8, 0.0 }
 0xb1d   : > { %v5044_v46 = vpop.f32.mrf.mxu3  ;;  %v6180_v17 = vpop.f32.mrf.mxu0 }
 0xb1e   : > { %v6181_v25 = vadd.f32 %v12536_v38, %v6180_v17  ;;  %v5045_v27 = vadd.f32 %v5044_v46, %v10947_v44 }
 0xb20   : > { %v6830_v45 = vadd.f32 %v14331_v1, %v6181_v25 }
 0xb21   : > { %v4027_v62 = vpop.f32.mrf.mxu2 }
 0xb22   : > { %v9041_v11 = vpack.c.bf16 %v6830_v45, %v6828_v42  ;;  %v4028_v47 = vadd.f32 %v4027_v62, %v12161_v9  ;;  %v14334_v62 = vld [vmem:[#allocation70_spill] sm:$0xff] }
 0xb23   : > { %v12605_v12 = vpop.f32.mrf.mxu1 }
 0xb24   : > { %9589 = vst [vmem:[%s12270_s27 + $0xb0] sm:$0xff] %v9041_v11   ;;  %v5285_v0 = vmax.f32 %v4028_v47, 0.0  ;;  %v14335_v11 = vld [vmem:[#allocation194_spill] sm:$0xff] }
 0xb25   : > { %v5046_v36 = vpop.f32.mrf.mxu3  ;;  %v6183_v17 = vpop.f32.mrf.mxu0 }
 0xb26   : > { %4069 = vmatmul.bf16.gmra.mxu2 %v14332_v63  ;;  %7236 = vmatmul.bf16.gmra.mxu1 %v5880_v51  ;;  %v5733_v31 = vpack.c.bf16 %v5285_v0, %v5283_v15  ;;  %v5047_v25 = vadd.f32 %v5046_v36, %v10947_v44  ;;  %v6184_v16 = vadd.f32 %v12536_v38, %v6183_v17  ;;  %v5580_v51 = vmax.f32 %v5045_v27, 0.0 }
 0xb28   : > { %6222 = vmatmul.bf16.gmra.mxu0 %v5733_v31  ;;  %v5582_v45 = vmax.f32 %v5047_v25, 0.0  ;;  %v6833_v0 = vadd.f32 %v14334_v62, %v6184_v16  ;;  %v14336_v25 = vld [vmem:[#allocation122_spill] sm:$0xff] }
 0xb29   : > { %v4030_v34 = vpop.f32.mrf.mxu2 }
 0xb2a   : > { %5088 = vmatmul.bf16.gmra.mxu3 %v11993_v10  ;;  %v4031_v29 = vadd.f32 %v4030_v34, %v12161_v9  ;;  %v5882_v46 = vpack.c.bf16 %v5582_v45, %v5580_v51 }
 0xb2b   : > { %v12610_v50 = vpop.f32.mrf.mxu1 }
 0xb2c   : > { %14333 = vst [vmem:[#allocation29_spill] sm:$0xff] %v12610_v50  ;;  %v5287_v17 = vmax.f32 %v4031_v29, 0.0 }
 0xb2d   : > { %v5049_v42 = vpop.f32.mrf.mxu3  ;;  %v6185_v8 = vpop.f32.mrf.mxu0 }
 0xb2e   : > { %v6186_v1 = vadd.f32 %v12536_v38, %v6185_v8  ;;  %v5050_v45 = vadd.f32 %v5049_v42, %v10947_v44 }
 0xb30   : > { %v6835_v47 = vadd.f32 %v14335_v11, %v6186_v1 }
 0xb31   : > { %v4032_v15 = vpop.f32.mrf.mxu2 }
 0xb32   : > { %v9046_v63 = vpack.c.bf16 %v6835_v47, %v6833_v0  ;;  %v4033_v36 = vadd.f32 %v4032_v15, %v12161_v9  ;;  %v14338_v15 = vld [vmem:[#allocation73_spill] sm:$0xff] }
 0xb33   : > { %v12620_v31 = vpop.f32.mrf.mxu1 }
 0xb34   : > { %9590 = vst [vmem:[%s12270_s27 + $0xb8] sm:$0xff] %v9046_v63   ;;  %v5289_v10 = vmax.f32 %v4033_v36, 0.0  ;;  %v14339_v63 = vld [vmem:[#allocation195_spill] sm:$0xff] }
 0xb35   : > { %v5051_v50 = vpop.f32.mrf.mxu3  ;;  %v6188_v8 = vpop.f32.mrf.mxu0 }
 0xb36   : > { %4074 = vmatmul.bf16.gmra.mxu2 %v14336_v25  ;;  %7241 = vmatmul.bf16.gmra.mxu1 %v5882_v46  ;;  %v5735_v16 = vpack.c.bf16 %v5289_v10, %v5287_v17  ;;  %v5052_v1 = vadd.f32 %v5051_v50, %v10947_v44  ;;  %v6189_v62 = vadd.f32 %v12536_v38, %v6188_v8  ;;  %v5584_v46 = vmax.f32 %v5050_v45, 0.0 }
 0xb38   : > { %6227 = vmatmul.bf16.gmra.mxu0 %v5735_v16  ;;  %v5586_v47 = vmax.f32 %v5052_v1, 0.0  ;;  %v6838_v10 = vadd.f32 %v14338_v15, %v6189_v62  ;;  %v14340_v1 = vld [vmem:[#allocation125_spill] sm:$0xff] }
 0xb39   : > { %v4035_v34 = vpop.f32.mrf.mxu2 }
 0xb3a   : > { %5093 = vmatmul.bf16.gmra.mxu3 %v12008_v20  ;;  %v4036_v51 = vadd.f32 %v4035_v34, %v12161_v9  ;;  %v5884_v42 = vpack.c.bf16 %v5586_v47, %v5584_v46 }
 0xb3b   : > { %v12625_v27 = vpop.f32.mrf.mxu1 }
 0xb3c   : > { %14337 = vst [vmem:[#allocation180_spill] sm:$0xff] %v12625_v27  ;;  %v5291_v8 = vmax.f32 %v4036_v51, 0.0 }
 0xb3d   : > { %v5054_v0 = vpop.f32.mrf.mxu3  ;;  %v6190_v29 = vpop.f32.mrf.mxu0 }
 0xb3e   : > { %v6191_v11 = vadd.f32 %v12536_v38, %v6190_v29  ;;  %v5055_v47 = vadd.f32 %v5054_v0, %v10947_v44 }
 0xb40   : > { %v6840_v36 = vadd.f32 %v14339_v63, %v6191_v11 }
 0xb41   : > { %v4037_v17 = vpop.f32.mrf.mxu2 }
 0xb42   : > { %v9051_v25 = vpack.c.bf16 %v6840_v36, %v6838_v10  ;;  %v4038_v50 = vadd.f32 %v4037_v17, %v12161_v9  ;;  %v14342_v17 = vld [vmem:[#allocation76_spill] sm:$0xff] }
 0xb43   : > { %v12635_v16 = vpop.f32.mrf.mxu1 }
 0xb44   : > { %9591 = vst [vmem:[%s12270_s27 + $0xc0] sm:$0xff] %v9051_v25   ;;  %v5293_v20 = vmax.f32 %v4038_v50, 0.0  ;;  %v14343_v25 = vld [vmem:[#allocation196_spill] sm:$0xff] }
 0xb45   : > { %v5056_v27 = vpop.f32.mrf.mxu3  ;;  %v6193_v29 = vpop.f32.mrf.mxu0 }
 0xb46   : > { %4079 = vmatmul.bf16.gmra.mxu2 %v14340_v1  ;;  %7246 = vmatmul.bf16.gmra.mxu1 %v5884_v42  ;;  %v5737_v62 = vpack.c.bf16 %v5293_v20, %v5291_v8  ;;  %v5057_v11 = vadd.f32 %v5056_v27, %v10947_v44  ;;  %v6194_v15 = vadd.f32 %v12536_v38, %v6193_v29  ;;  %v5588_v42 = vmax.f32 %v5055_v47, 0.0 }
 0xb48   : > { %6232 = vmatmul.bf16.gmra.mxu0 %v5737_v62  ;;  %v5590_v36 = vmax.f32 %v5057_v11, 0.0  ;;  %v6843_v20 = vadd.f32 %v14342_v17, %v6194_v15  ;;  %v14344_v11 = vld [vmem:[#allocation128_spill] sm:$0xff] }
 0xb49   : > { %v4040_v34 = vpop.f32.mrf.mxu2 }
 0xb4a   : > { %5098 = vmatmul.bf16.gmra.mxu3 %v12019_v6  ;;  %v4041_v46 = vadd.f32 %v4040_v34, %v12161_v9  ;;  %v5886_v0 = vpack.c.bf16 %v5590_v36, %v5588_v42 }
 0xb4b   : > { %v12640_v45 = vpop.f32.mrf.mxu1 }
 0xb4c   : > { %14341 = vst [vmem:[#allocation80_spill] sm:$0xff] %v12640_v45  ;;  %v5295_v29 = vmax.f32 %v4041_v46, 0.0 }
 0xb4d   : > { %v5059_v10 = vpop.f32.mrf.mxu3  ;;  %v6195_v51 = vpop.f32.mrf.mxu0 }
 0xb4e   : > { %v6196_v63 = vadd.f32 %v12536_v38, %v6195_v51  ;;  %v5060_v36 = vadd.f32 %v5059_v10, %v10947_v44 }
 0xb50   : > { %v6845_v50 = vadd.f32 %v14343_v25, %v6196_v63 }
 0xb51   : > { %v4042_v8 = vpop.f32.mrf.mxu2 }
 0xb52   : > { %v9056_v1 = vpack.c.bf16 %v6845_v50, %v6843_v20  ;;  %v4043_v27 = vadd.f32 %v4042_v8, %v12161_v9  ;;  %v14346_v8 = vld [vmem:[#allocation79_spill] sm:$0xff] }
 0xb53   : > { %v12650_v62 = vpop.f32.mrf.mxu1 }
 0xb54   : > { %9592 = vst [vmem:[%s12270_s27 + $0xc8] sm:$0xff] %v9056_v1   ;;  %v5297_v6 = vmax.f32 %v4043_v27, 0.0  ;;  %v14347_v1 = vld [vmem:[#allocation197_spill] sm:$0xff] }
 0xb55   : > { %v5061_v45 = vpop.f32.mrf.mxu3  ;;  %v6198_v51 = vpop.f32.mrf.mxu0 }
 0xb56   : > { %4084 = vmatmul.bf16.gmra.mxu2 %v14344_v11  ;;  %7251 = vmatmul.bf16.gmra.mxu1 %v5886_v0  ;;  %v5739_v15 = vpack.c.bf16 %v5297_v6, %v5295_v29  ;;  %v5062_v63 = vadd.f32 %v5061_v45, %v10947_v44  ;;  %v6199_v17 = vadd.f32 %v12536_v38, %v6198_v51  ;;  %v5592_v0 = vmax.f32 %v5060_v36, 0.0 }
 0xb58   : > { %6237 = vmatmul.bf16.gmra.mxu0 %v5739_v15  ;;  %v5594_v50 = vmax.f32 %v5062_v63, 0.0  ;;  %v6848_v6 = vadd.f32 %v14346_v8, %v6199_v17  ;;  %v14348_v63 = vld [vmem:[#allocation131_spill] sm:$0xff] }
 0xb59   : > { %v4045_v34 = vpop.f32.mrf.mxu2 }
 0xb5a   : > { %5103 = vmatmul.bf16.gmra.mxu3 %v12030_v26  ;;  %v4046_v42 = vadd.f32 %v4045_v34, %v12161_v9  ;;  %v5888_v10 = vpack.c.bf16 %v5594_v50, %v5592_v0 }
 0xb5b   : > { %v12655_v47 = vpop.f32.mrf.mxu1 }
 0xb5c   : > { %14345 = vst [vmem:[#allocation31_spill] sm:$0xff] %v12655_v47  ;;  %v5299_v51 = vmax.f32 %v4046_v42, 0.0 }
 0xb5d   : > { %v5064_v20 = vpop.f32.mrf.mxu3  ;;  %v6200_v46 = vpop.f32.mrf.mxu0 }
 0xb5e   : > { %v6201_v25 = vadd.f32 %v12536_v38, %v6200_v46  ;;  %v5065_v50 = vadd.f32 %v5064_v20, %v10947_v44 }
 0xb60   : > { %v6850_v27 = vadd.f32 %v14347_v1, %v6201_v25 }
 0xb61   : > { %v4047_v29 = vpop.f32.mrf.mxu2 }
 0xb62   : > { %v9061_v11 = vpack.c.bf16 %v6850_v27, %v6848_v6  ;;  %v4048_v45 = vadd.f32 %v4047_v29, %v12161_v9  ;;  %v14350_v29 = vld [vmem:[#allocation82_spill] sm:$0xff] }
 0xb63   : > { %v12665_v15 = vpop.f32.mrf.mxu1 }
 0xb64   : > { %9593 = vst [vmem:[%s12270_s27 + $0xd0] sm:$0xff] %v9061_v11   ;;  %v5301_v26 = vmax.f32 %v4048_v45, 0.0  ;;  %v14351_v11 = vld [vmem:[#allocation198_spill] sm:$0xff] }
 0xb65   : > { %v5066_v47 = vpop.f32.mrf.mxu3  ;;  %v6203_v46 = vpop.f32.mrf.mxu0 }
 0xb66   : > { %4089 = vmatmul.bf16.gmra.mxu2 %v14348_v63  ;;  %7256 = vmatmul.bf16.gmra.mxu1 %v5888_v10  ;;  %v5741_v17 = vpack.c.bf16 %v5301_v26, %v5299_v51  ;;  %v5067_v25 = vadd.f32 %v5066_v47, %v10947_v44  ;;  %v6204_v8 = vadd.f32 %v12536_v38, %v6203_v46  ;;  %v5596_v10 = vmax.f32 %v5065_v50, 0.0 }
 0xb68   : > { %6242 = vmatmul.bf16.gmra.mxu0 %v5741_v17  ;;  %v5598_v27 = vmax.f32 %v5067_v25, 0.0  ;;  %v6853_v26 = vadd.f32 %v14350_v29, %v6204_v8  ;;  %v14353_v25 = vld [vmem:[#allocation134_spill] sm:$0xff] }
 0xb69   : > { %v4050_v34 = vpop.f32.mrf.mxu2 }
 0xb6a   : > { %5108 = vmatmul.bf16.gmra.mxu3 %v12041_v39  ;;  %v4051_v0 = vadd.f32 %v4050_v34, %v12161_v9  ;;  %v5890_v20 = vpack.c.bf16 %v5598_v27, %v5596_v10 }
 0xb6b   : > { %v12670_v36 = vpop.f32.mrf.mxu1 }
 0xb6c   : > { %14349 = vst [vmem:[#allocation181_spill] sm:$0xff] %v12670_v36  ;;  %v5303_v17 = vmax.f32 %v4051_v0, 0.0 }
 0xb6d   : > { %v5069_v6 = vpop.f32.mrf.mxu3  ;;  %v6205_v42 = vpop.f32.mrf.mxu0 }
 0xb6e   : > { %v6206_v1 = vadd.f32 %v12536_v38, %v6205_v42  ;;  %v5070_v0 = vadd.f32 %v5069_v6, %v10947_v44 }
 0xb70   : > { %v6855_v45 = vadd.f32 %v14351_v11, %v6206_v1 }
 0xb71   : > { %v4052_v51 = vpop.f32.mrf.mxu2 }
 0xb72   : > { %v9066_v63 = vpack.c.bf16 %v6855_v45, %v6853_v26  ;;  %v4053_v47 = vadd.f32 %v4052_v51, %v12161_v9  ;;  %v14355_v51 = vld [vmem:[#allocation85_spill] sm:$0xff] }
 0xb73   : > { %v12681_v39 = vpop.f32.mrf.mxu1 }
 0xb74   : > { %9594 = vst [vmem:[%s12270_s27 + $0xd8] sm:$0xff] %v9066_v63   ;;  %v5305_v46 = vmax.f32 %v4053_v47, 0.0  ;;  %v14356_v47 = vld [vmem:[#allocation199_spill] sm:$0xff] }
 0xb75   : > { %14352 = vst [vmem:[#allocation83_spill] sm:$0xff] %v12681_v39  ;;  %v5071_v36 = vpop.f32.mrf.mxu3  ;;  %v6208_v42 = vpop.f32.mrf.mxu0  ;;  %v14357_v39 = vld [vmem:[#allocation137_spill] sm:$0xff] }
 0xb76   : > { %4094 = vmatmul.bf16.gmra.mxu2 %v14353_v25  ;;  %7261 = vmatmul.bf16.gmra.mxu1 %v5890_v20  ;;  %v5743_v8 = vpack.c.bf16 %v5305_v46, %v5303_v17  ;;  %v5072_v50 = vadd.f32 %v5071_v36, %v10947_v44  ;;  %v6209_v1 = vadd.f32 %v12536_v38, %v6208_v42  ;;  %v5600_v36 = vmax.f32 %v5070_v0, 0.0 }
 0xb78   : > { %6247 = vmatmul.bf16.gmra.mxu0 %v5743_v8  ;;  %v5602_v45 = vmax.f32 %v5072_v50, 0.0  ;;  %v6858_v10 = vadd.f32 %v14355_v51, %v6209_v1 }
 0xb79   : > { %v4055_v34 = vpop.f32.mrf.mxu2 }
 0xb7a   : > { %5113 = vmatmul.bf16.gmra.mxu3 %v12056_v43  ;;  %v4056_v63 = vadd.f32 %v4055_v34, %v12161_v9  ;;  %v5892_v6 = vpack.c.bf16 %v5602_v45, %v5600_v36 }
 0xb7b   : > { %v12688_v27 = vpop.f32.mrf.mxu1 }
 0xb7c   : > { %14354 = vst [vmem:[#allocation34_spill] sm:$0xff] %v12688_v27  ;;  %v5307_v25 = vmax.f32 %v4056_v63, 0.0  ;;  %v14358_v63 = vld [vmem:[#allocation88_spill] sm:$0xff] }
 0xb7d   : > { %v5074_v29 = vpop.f32.mrf.mxu3  ;;  %v6210_v26 = vpop.f32.mrf.mxu0 }
 0xb7e   : > { %v6211_v11 = vadd.f32 %v12536_v38, %v6210_v26  ;;  %v5075_v45 = vadd.f32 %v5074_v29, %v10947_v44 }
 0xb80   : > { %v6860_v17 = vadd.f32 %v14356_v47, %v6211_v11 }
 0xb81   : > { %v4057_v46 = vpop.f32.mrf.mxu2 }
 0xb82   : > { %v9071_v20 = vpack.c.bf16 %v6860_v17, %v6858_v10  ;;  %v4058_v42 = vadd.f32 %v4057_v46, %v12161_v9  ;;  %v14359_v46 = vld [vmem:[#allocation200_spill] sm:$0xff] }
 0xb83   : > { %v12697_v1 = vpop.f32.mrf.mxu1 }
 0xb84   : > { %9595 = vst [vmem:[%s12270_s27 + $0xe0] sm:$0xff] %v9071_v20   ;;  %v5309_v8 = vmax.f32 %v4058_v42, 0.0  ;;  %v5604_v42 = vmax.f32 %v5075_v45, 0.0 }
 0xb85   : > { %v5076_v43 = vpop.f32.mrf.mxu3  ;;  %v6213_v27 = vpop.f32.mrf.mxu0 }
 0xb86   : > { %4099 = vmatmul.bf16.gmra.mxu2 %v14357_v39  ;;  %7266 = vmatmul.bf16.gmra.mxu1 %v5892_v6  ;;  %v5745_v50 = vpack.c.bf16 %v5309_v8, %v5307_v25  ;;  %v5077_v26 = vadd.f32 %v5076_v43, %v10947_v44  ;;  %v6214_v0 = vadd.f32 %v12536_v38, %v6213_v27 }
 0xb88   : > { %6252 = vmatmul.bf16.gmra.mxu0 %v5745_v50  ;;  %v5606_v39 = vmax.f32 %v5077_v26, 0.0  ;;  %v6863_v47 = vadd.f32 %v14358_v63, %v6214_v0  ;;  %v14360_v26 = vld [vmem:[#allocation140_spill] sm:$0xff] }
 0xb89   : > { %v4060_v34 = vpop.f32.mrf.mxu2 }
 0xb8a   : > { %5118 = vmatmul.bf16.gmra.mxu3 %v12068_v28  ;;  %v4061_v17 = vadd.f32 %v4060_v34, %v12161_v9  ;;  %v5894_v29 = vpack.c.bf16 %v5606_v39, %v5604_v42 }
 0xb8b   : > { %v12707_v25 = vpop.f32.mrf.mxu1 }
 0xb8c   : > { %v5311_v8 = vmax.f32 %v4061_v17, 0.0 }
 0xb8d   : > { %v5079_v11 = vpop.f32.mrf.mxu3  ;;  %v6215_v51 = vpop.f32.mrf.mxu0 }
 0xb8e   : > { %v6216_v10 = vadd.f32 %v12536_v38, %v6215_v51  ;;  %v5080_v39 = vadd.f32 %v5079_v11, %v10947_v44 }
 0xb90   : > { %v6865_v36 = vadd.f32 %v14359_v46, %v6216_v10 }
 0xb91   : > { %v4062_v20 = vpop.f32.mrf.mxu2 }
 0xb92   : > { %v9076_v43 = vpack.c.bf16 %v6865_v36, %v6863_v47  ;;  %v4063_v27 = vadd.f32 %v4062_v20, %v12161_v9  ;;  %v14362_v20 = vld [vmem:[#allocation91_spill] sm:$0xff] }
 0xb93   : > { %v12713_v45 = vpop.f32.mrf.mxu1 }
 0xb94   : > { %9596 = vst [vmem:[%s12270_s27 + $0xe8] sm:$0xff] %v9076_v43   ;;  %v5313_v6 = vmax.f32 %v4063_v27, 0.0  ;;  %v14363_v27 = vld [vmem:[#allocation201_spill] sm:$0xff] }
 0xb95   : > { %v5081_v50 = vpop.f32.mrf.mxu3  ;;  %v6218_v51 = vpop.f32.mrf.mxu0  ;;  %14361 = vst [vmem:[#allocation182_spill] sm:$0xff] %v12713_v45 }
 0xb96   : > { %4104 = vmatmul.bf16.gmra.mxu2 %v14360_v26  ;;  %7271 = vmatmul.bf16.gmra.mxu1 %v5894_v29  ;;  %v5747_v0 = vpack.c.bf16 %v5313_v6, %v5311_v8  ;;  %v5082_v10 = vadd.f32 %v5081_v50, %v10947_v44  ;;  %v6219_v63 = vadd.f32 %v12536_v38, %v6218_v51  ;;  %v5608_v29 = vmax.f32 %v5080_v39, 0.0 }
 0xb98   : > { %6257 = vmatmul.bf16.gmra.mxu0 %v5747_v0  ;;  %v5610_v36 = vmax.f32 %v5082_v10, 0.0  ;;  %v6868_v42 = vadd.f32 %v14362_v20, %v6219_v63  ;;  %v14364_v10 = vld [vmem:[#allocation143_spill] sm:$0xff] }
 0xb99   : > { %v4065_v34 = vpop.f32.mrf.mxu2 }
 0xb9a   : > { %5123 = vmatmul.bf16.gmra.mxu3 %v12080_v2  ;;  %v4066_v43 = vadd.f32 %v4065_v34, %v12161_v9  ;;  %v5896_v2 = vpack.c.bf16 %v5610_v36, %v5608_v29  ;;  %v14366_v29 = vld [vmem:[#allocation202_spill] sm:$0xff] }
 0xb9b   : > { %v12724_v28 = vpop.f32.mrf.mxu1 }
 0xb9c   : > { %v5315_v0 = vmax.f32 %v4066_v43, 0.0 }
 0xb9d   : > { %v5084_v47 = vpop.f32.mrf.mxu3  ;;  %v6220_v17 = vpop.f32.mrf.mxu0 }
 0xb9e   : > { %v6221_v46 = vadd.f32 %v12536_v38, %v6220_v17  ;;  %v5085_v36 = vadd.f32 %v5084_v47, %v10947_v44 }
 0xba0   : > { %v6870_v8 = vadd.f32 %v14363_v27, %v6221_v46 }
 0xba1   : > { %v4067_v6 = vpop.f32.mrf.mxu2 }
 0xba2   : > { %v9081_v26 = vpack.c.bf16 %v6870_v8, %v6868_v42  ;;  %v4068_v50 = vadd.f32 %v4067_v6, %v12161_v9 }
 0xba3   : > { %v12732_v43 = vpop.f32.mrf.mxu1 }
 0xba4   : > { %9597 = vst [vmem:[%s12270_s27 + $0xf0] sm:$0xff] %v9081_v26   ;;  %v5317_v51 = vmax.f32 %v4068_v50, 0.0 }
 0xba5   : > { %v5086_v45 = vpop.f32.mrf.mxu3  ;;  %v6223_v11 = vpop.f32.mrf.mxu0 }
 0xba6   : > { %4109 = vmatmul.bf16.gmra.mxu2 %v14364_v10  ;;  %7276 = vmatmul.bf16.gmra.mxu1 %v5896_v2  ;;  %v5749_v63 = vpack.c.bf16 %v5317_v51, %v5315_v0  ;;  %v5087_v17 = vadd.f32 %v5086_v45, %v10947_v44  ;;  %v6224_v39 = vadd.f32 %v12536_v38, %v6223_v11  ;;  %v14365_v2 = vld [vmem:[#allocation94_spill] sm:$0xff]  ;;  %v5612_v45 = vmax.f32 %v5085_v36, 0.0 }
 0xba8   : > { %6262 = vmatmul.bf16.gmra.mxu0 %v5749_v63  ;;  %v5614_v27 = vmax.f32 %v5087_v17, 0.0  ;;  %v6873_v8 = vadd.f32 %v14365_v2, %v6224_v39 }
 0xba9   : > { %v4070_v34 = vpop.f32.mrf.mxu2 }
 0xbaa   : > { %5128 = vmatmul.bf16.gmra.mxu3 %v12092_v5  ;;  %v4071_v6 = vadd.f32 %v4070_v34, %v12161_v9  ;;  %v5898_v47 = vpack.c.bf16 %v5614_v27, %v5612_v45  ;;  %v14367_v5 = vld [vmem:[#allocation146_spill] sm:$0xff]  ;;  %v14369_v45 = vld [vmem:[#allocation203_spill] sm:$0xff] }
 0xbab   : > { %v12740_v34 = vpop.f32.mrf.mxu1 }
 0xbac   : > { %v5319_v11 = vmax.f32 %v4071_v6, 0.0 }
 0xbad   : > { %v5089_v46 = vpop.f32.mrf.mxu3  ;;  %v6225_v20 = vpop.f32.mrf.mxu0 }
 0xbae   : > { %v6226_v42 = vadd.f32 %v12536_v38, %v6225_v20  ;;  %v5090_v27 = vadd.f32 %v5089_v46, %v10947_v44 }
 0xbb0   : > { %v6875_v26 = vadd.f32 %v14366_v29, %v6226_v42  ;;  %v14368_v29 = vld [vmem:[#allocation97_spill] sm:$0xff] }
 0xbb1   : > { %v4072_v50 = vpop.f32.mrf.mxu2 }
 0xbb2   : > { %v9086_v0 = vpack.c.bf16 %v6875_v26, %v6873_v8  ;;  %v4073_v51 = vadd.f32 %v4072_v50, %v12161_v9 }
 0xbb4   : > { %9598 = vst [vmem:[%s12270_s27 + $0xf8] sm:$0xff] %v9086_v0   ;;  %v5321_v10 = vmax.f32 %v4073_v51, 0.0 }
 0xbb5   : > { %v5091_v63 = vpop.f32.mrf.mxu3  ;;  %v6228_v20 = vpop.f32.mrf.mxu0 }
 0xbb6   : > { %4114 = vmatmul.bf16.gmra.mxu2 %v14367_v5  ;;  %7281 = vmatmul.bf16.gmra.mxu1 %v5898_v47  ;;  %v5751_v17 = vpack.c.bf16 %v5321_v10, %v5319_v11  ;;  %v5092_v36 = vadd.f32 %v5091_v63, %v10947_v44  ;;  %v6229_v42 = vadd.f32 %v12536_v38, %v6228_v20  ;;  %v5616_v11 = vmax.f32 %v5090_v27, 0.0  ;;  %v12751_v63 = vpop.f32.mrf.mxu1 }
 0xbb7   : > { %14370 = vst [vmem:[#allocation86_spill] sm:$0xff] %v12751_v63  ;;  %v14375_v63 = vld [vmem:[#allocation152_spill] sm:$0xff] }
 0xbb8   : > { %6267 = vmatmul.bf16.gmra.mxu0 %v5751_v17  ;;  %v5618_v5 = vmax.f32 %v5092_v36, 0.0  ;;  %v6878_v26 = vadd.f32 %v14368_v29, %v6229_v42  ;;  %v14371_v36 = vld [vmem:[#allocation149_spill] sm:$0xff] }
 0xbb9   : > { %v4075_v39 = vpop.f32.mrf.mxu2 }
 0xbba   : > { %5133 = vmatmul.bf16.gmra.mxu3 %v12104_v57  ;;  %v4076_v50 = vadd.f32 %v4075_v39, %v12161_v9  ;;  %v5900_v46 = vpack.c.bf16 %v5618_v5, %v5616_v11 }
 0xbbc   : > { %v5323_v20 = vmax.f32 %v4076_v50, 0.0 }
 0xbbd   : > { %v5094_v2 = vpop.f32.mrf.mxu3  ;;  %v6230_v8 = vpop.f32.mrf.mxu0 }
 0xbbe   : > { %v6231_v6 = vadd.f32 %v12536_v38, %v6230_v8  ;;  %v12758_v50 = vpop.f32.mrf.mxu1  ;;  %v5095_v5 = vadd.f32 %v5094_v2, %v10947_v44 }
 0xbbf   : > { %14372 = vst [vmem:[#allocation37_spill] sm:$0xff] %v12758_v50 }
 0xbc0   : > { %v6880_v0 = vadd.f32 %v14369_v45, %v6231_v6 }
 0xbc1   : > { %v4077_v51 = vpop.f32.mrf.mxu2 }
 0xbc2   : > { %v9091_v10 = vpack.c.bf16 %v6880_v0, %v6878_v26  ;;  %v4078_v47 = vadd.f32 %v4077_v51, %v12161_v9  ;;  %v14373_v51 = vld [vmem:[#allocation100_spill] sm:$0xff] }
 0xbc4   : > { %9599 = vst [vmem:[%s12270_s27 + $0x100] sm:$0xff] %v9091_v10   ;;  %v5325_v17 = vmax.f32 %v4078_v47, 0.0  ;;  %v14374_v47 = vld [vmem:[#allocation204_spill] sm:$0xff] }
 0xbc5   : > { %v5096_v57 = vpop.f32.mrf.mxu3  ;;  %v6233_v8 = vpop.f32.mrf.mxu0 }
 0xbc6   : > { %4119 = vmatmul.bf16.gmra.mxu2 %v14371_v36  ;;  %7286 = vmatmul.bf16.gmra.mxu1 %v5900_v46  ;;  %v5753_v42 = vpack.c.bf16 %v5325_v17, %v5323_v20  ;;  %v5097_v27 = vadd.f32 %v5096_v57, %v10947_v44  ;;  %v6234_v6 = vadd.f32 %v12536_v38, %v6233_v8  ;;  %v5620_v57 = vmax.f32 %v5095_v5, 0.0 }
 0xbc8   : > { %6272 = vmatmul.bf16.gmra.mxu0 %v5753_v42  ;;  %v5622_v0 = vmax.f32 %v5097_v27, 0.0  ;;  %v6883_v11 = vadd.f32 %v14373_v51, %v6234_v6  ;;  %v12768_v6 = vpop.f32.mrf.mxu1 }
 0xbc9   : > { %v4080_v39 = vpop.f32.mrf.mxu2 }
 0xbca   : > { %5138 = vmatmul.bf16.gmra.mxu3 %v12116_v37  ;;  %v4081_v10 = vadd.f32 %v4080_v39, %v12161_v9  ;;  %v5902_v37 = vpack.c.bf16 %v5622_v0, %v5620_v57 }
 0xbcc   : > { %v5327_v36 = vmax.f32 %v4081_v10, 0.0 }
 0xbcd   : > { %v5099_v29 = vpop.f32.mrf.mxu3  ;;  %v6235_v26 = vpop.f32.mrf.mxu0 }
 0xbce   : > { %v6236_v45 = vadd.f32 %v12536_v38, %v6235_v26  ;;  %v5100_v0 = vadd.f32 %v5099_v29, %v10947_v44 }
 0xbd0   : > { %v6885_v20 = vadd.f32 %v14374_v47, %v6236_v45 }
 0xbd1   : > { %v4082_v17 = vpop.f32.mrf.mxu2 }
 0xbd2   : > { %v9096_v46 = vpack.c.bf16 %v6885_v20, %v6883_v11  ;;  %v4083_v8 = vadd.f32 %v4082_v17, %v12161_v9  ;;  %v14377_v20 = vld [vmem:[#allocation205_spill] sm:$0xff] }
 0xbd4   : > { %9600 = vst [vmem:[%s12270_s27 + $0x108] sm:$0xff] %v9096_v46   ;;  %v5329_v42 = vmax.f32 %v4083_v8, 0.0  ;;  %v12778_v46 = vpop.f32.mrf.mxu1 }
 0xbd5   : > { %v5101_v50 = vpop.f32.mrf.mxu3  ;;  %v6238_v2 = vpop.f32.mrf.mxu0 }
 0xbd6   : > { %4124 = vmatmul.bf16.gmra.mxu2 %v14375_v63  ;;  %7291 = vmatmul.bf16.gmra.mxu1 %v5902_v37  ;;  %v5755_v27 = vpack.c.bf16 %v5329_v42, %v5327_v36  ;;  %v5102_v26 = vadd.f32 %v5101_v50, %v10947_v44  ;;  %v6239_v5 = vadd.f32 %v12536_v38, %v6238_v2  ;;  %v14376_v37 = vld [vmem:[#allocation103_spill] sm:$0xff]  ;;  %v5624_v50 = vmax.f32 %v5100_v0, 0.0 }
 0xbd8   : > { %6277 = vmatmul.bf16.gmra.mxu0 %v5755_v27  ;;  %v5626_v63 = vmax.f32 %v5102_v26, 0.0  ;;  %v6888_v10 = vadd.f32 %v14376_v37, %v6239_v5  ;;  %v14378_v26 = vld [vmem:[#allocation155_spill] sm:$0xff] }
 0xbd9   : > { %v4085_v39 = vpop.f32.mrf.mxu2 }
 0xbda   : > { %5143 = vmatmul.bf16.gmra.mxu3 %v12128_v32  ;;  %v4086_v47 = vadd.f32 %v4085_v39, %v12161_v9  ;;  %v5904_v42 = vpack.c.bf16 %v5626_v63, %v5624_v50 }
 0xbdc   : > { %v5331_v2 = vmax.f32 %v4086_v47, 0.0 }
 0xbdd   : > { %v5104_v45 = vpop.f32.mrf.mxu3  ;;  %v6240_v51 = vpop.f32.mrf.mxu0 }
 0xbde   : > { %v6241_v11 = vadd.f32 %v12536_v38, %v6240_v51  ;;  %v5105_v47 = vadd.f32 %v5104_v45, %v10947_v44 }
 0xbe0   : > { %v6890_v17 = vadd.f32 %v14377_v20, %v6241_v11  ;;  %v12784_v11 = vpop.f32.mrf.mxu1 }
 0xbe1   : > { %v4087_v57 = vpop.f32.mrf.mxu2  ;;  %14379 = vst [vmem:[#allocation183_spill] sm:$0xff] %v12784_v11 }
 0xbe2   : > { %v9101_v8 = vpack.c.bf16 %v6890_v17, %v6888_v10  ;;  %v4088_v36 = vadd.f32 %v4087_v57, %v12161_v9  ;;  %v14380_v57 = vld [vmem:[#allocation106_spill] sm:$0xff] }
 0xbe4   : > { %9601 = vst [vmem:[%s12270_s27 + $0x110] sm:$0xff] %v9101_v8   ;;  %v5333_v29 = vmax.f32 %v4088_v36, 0.0  ;;  %v14381_v36 = vld [vmem:[#allocation206_spill] sm:$0xff] }
 0xbe5   : > { %v5106_v27 = vpop.f32.mrf.mxu3  ;;  %v6243_v51 = vpop.f32.mrf.mxu0 }
 0xbe6   : > { %4129 = vmatmul.bf16.gmra.mxu2 %v14378_v26  ;;  %7296 = vmatmul.bf16.gmra.mxu1 %v5904_v42  ;;  %v5757_v5 = vpack.c.bf16 %v5333_v29, %v5331_v2  ;;  %v5107_v0 = vadd.f32 %v5106_v27, %v10947_v44  ;;  %v6244_v63 = vadd.f32 %v12536_v38, %v6243_v51  ;;  %v5628_v29 = vmax.f32 %v5105_v47, 0.0 }
 0xbe8   : > { %6282 = vmatmul.bf16.gmra.mxu0 %v5757_v5  ;;  %v5630_v17 = vmax.f32 %v5107_v0, 0.0  ;;  %v6893_v50 = vadd.f32 %v14380_v57, %v6244_v63  ;;  %v12795_v11 = vpop.f32.mrf.mxu1  ;;  %v14382_v0 = vld [vmem:[#allocation158_spill] sm:$0xff] }
 0xbe9   : > { %v4090_v39 = vpop.f32.mrf.mxu2 }
 0xbea   : > { %5148 = vmatmul.bf16.gmra.mxu3 %v12140_v18  ;;  %v4091_v8 = vadd.f32 %v4090_v39, %v12161_v9  ;;  %v5906_v5 = vpack.c.bf16 %v5630_v17, %v5628_v29  ;;  %v14385_v29 = vld [vmem:[#allocation207_spill] sm:$0xff] }
 0xbec   : > { %v5335_v51 = vmax.f32 %v4091_v8, 0.0 }
 0xbed   : > { %v5109_v37 = vpop.f32.mrf.mxu3  ;;  %v6245_v10 = vpop.f32.mrf.mxu0 }
 0xbee   : > { %v6246_v20 = vadd.f32 %v12536_v38, %v6245_v10  ;;  %v5110_v57 = vadd.f32 %v5109_v37, %v10947_v44 }
 0xbf0   : > { %v6895_v42 = vadd.f32 %v14381_v36, %v6246_v20  ;;  %v12803_v8 = vpop.f32.mrf.mxu1 }
 0xbf1   : > { %v4092_v2 = vpop.f32.mrf.mxu2  ;;  %14383 = vst [vmem:[#allocation89_spill] sm:$0xff] %v12803_v8  ;;  %v14395_v8 = vld [vmem:[#allocation162_spill] sm:$0xff] }
 0xbf2   : > { %v9106_v26 = vpack.c.bf16 %v6895_v42, %v6893_v50  ;;  %v4093_v27 = vadd.f32 %v4092_v2, %v12161_v9  ;;  %v14384_v42 = vld [vmem:[#allocation109_spill] sm:$0xff] }
 0xbf4   : > { %9602 = vst [vmem:[%s12270_s27 + $0x118] sm:$0xff] %v9106_v26   ;;  %v5337_v18 = vmax.f32 %v4093_v27, 0.0 }
 0xbf5   : > { %v5111_v32 = vpop.f32.mrf.mxu3  ;;  %v6248_v45 = vpop.f32.mrf.mxu0 }
 0xbf6   : > { %4134 = vmatmul.bf16.gmra.mxu2 %v14382_v0  ;;  %7301 = vmatmul.bf16.gmra.mxu1 %v5906_v5  ;;  %v5759_v63 = vpack.c.bf16 %v5337_v18, %v5335_v51  ;;  %v5112_v10 = vadd.f32 %v5111_v32, %v10947_v44  ;;  %v6249_v47 = vadd.f32 %v12536_v38, %v6248_v45  ;;  %v5632_v32 = vmax.f32 %v5110_v57, 0.0  ;;  %v12817_v57 = vld [vmem:[%s13585_s8] ss:$0 sm:$0xff] }
 0xbf8   : > { %6287 = vmatmul.bf16.gmra.mxu0 %v5759_v63  ;;  %v5634_v36 = vmax.f32 %v5112_v10, 0.0  ;;  %v6898_v18 = vadd.f32 %v14384_v42, %v6249_v47 }
 0xbf9   : > { %v4095_v39 = vpop.f32.mrf.mxu2 }
 0xbfa   : > { %5153 = vmatmul.bf16.gmra.mxu3 %v12152_v22  ;;  %v4096_v2 = vadd.f32 %v4095_v39, %v12161_v9  ;;  %v5908_v45 = vpack.c.bf16 %v5634_v36, %v5632_v32  ;;  %v12811_v39 = vpop.f32.mrf.mxu1 }
 0xbfb   : > { %14387 = vst [vmem:[#allocation40_spill] sm:$0xff] %v12811_v39 }
 0xbfc   : > { %v5339_v0 = vmax.f32 %v4096_v2, 0.0 }
 0xbfd   : > { %v5114_v20 = vpop.f32.mrf.mxu3  ;;  %v6250_v17 = vpop.f32.mrf.mxu0 }
 0xbfe   : > { %v6251_v50 = vadd.f32 %v12536_v38, %v6250_v17  ;;  %v14386_v17 = vld [vmem:[#allocation160_spill] sm:$0xff]  ;;  %v5115_v2 = vadd.f32 %v5114_v20, %v10947_v44 }
 0xc00   : > { %v6900_v26 = vadd.f32 %v14385_v29, %v6251_v50 }
 0xc01   : > { %v4097_v27 = vpop.f32.mrf.mxu2 }
 0xc02   : > { %v9111_v5 = vpack.c.bf16 %v6900_v26, %v6898_v18  ;;  %v4098_v51 = vadd.f32 %v4097_v27, %v12161_v9  ;;  %v14388_v27 = vld [vmem:[#allocation112_spill] sm:$0xff] }
 0xc04   : > { %9603 = vst [vmem:[%s12270_s27 + $0x120] sm:$0xff] %v9111_v5   ;;  %v5341_v37 = vmax.f32 %v4098_v51, 0.0  ;;  %v14389_v51 = vld [vmem:[#allocation208_spill] sm:$0xff] }
 0xc05   : > { %v5116_v63 = vpop.f32.mrf.mxu3  ;;  %v6253_v38 = vpop.f32.mrf.mxu0 }
 0xc06   : > { %4139 = vmatmul.bf16.gmra.mxu2 %v14386_v17  ;;  %7306 = vmatmul.bf16.gmra.mxu1 %v5908_v45  ;;  %v5761_v10 = vpack.c.bf16 %v5341_v37, %v5339_v0  ;;  %v5117_v50 = vadd.f32 %v5116_v63, %v10947_v44  ;;  %v6254_v36 = vadd.f32 %v12817_v57, %v6253_v38  ;;  %v5636_v37 = vmax.f32 %v5115_v2, 0.0  ;;  %v12826_v38 = vpop.f32.mrf.mxu1 }
 0xc07   : > { %14390 = vst [vmem:[#allocation184_spill] sm:$0xff] %v12826_v38 }
 0xc08   : > { %6292 = vmatmul.bf16.gmra.mxu0 %v5761_v10  ;;  %v5638_v26 = vmax.f32 %v5117_v50, 0.0  ;;  %v6903_v32 = vadd.f32 %v14388_v27, %v6254_v36  ;;  %v14391_v50 = vld [vmem:[#allocation161_spill] sm:$0xff] }
 0xc09   : > { %v4100_v47 = vpop.f32.mrf.mxu2 }
 0xc0a   : > { %v4101_v5 = vadd.f32 %v4100_v47, %v12161_v9  ;;  %v5910_v10 = vpack.c.bf16 %v5638_v26, %v5636_v37 }
 0xc0c   : > { %v5343_v22 = vmax.f32 %v4101_v5, 0.0 }
 0xc0d   : > { %v5119_v42 = vpop.f32.mrf.mxu3  ;;  %v6255_v18 = vpop.f32.mrf.mxu0 }
 0xc0e   : > { %v6256_v29 = vadd.f32 %v12817_v57, %v6255_v18  ;;  %v5120_v26 = vadd.f32 %v5119_v42, %v10947_v44 }
 0xc10   : > { %v6905_v45 = vadd.f32 %v14389_v51, %v6256_v29  ;;  %v12832_v51 = vpop.f32.mrf.mxu1 }
 0xc11   : > { %v4102_v0 = vpop.f32.mrf.mxu2  ;;  %14392 = vst [vmem:[#allocation92_spill] sm:$0xff] %v12832_v51 }
 0xc12   : > { %v9116_v63 = vpack.c.bf16 %v6905_v45, %v6903_v32  ;;  %v4103_v17 = vadd.f32 %v4102_v0, %v12161_v9  ;;  %v14393_v0 = vld [vmem:[#allocation115_spill] sm:$0xff] }
 0xc14   : > { %9604 = vst [vmem:[%s12270_s27 + $0x128] sm:$0xff] %v9116_v63   ;;  %v5345_v20 = vmax.f32 %v4103_v17, 0.0  ;;  %v14394_v63 = vld [vmem:[#allocation209_spill] sm:$0xff] }
 0xc15   : > { %v5121_v39 = vpop.f32.mrf.mxu3  ;;  %v6258_v18 = vpop.f32.mrf.mxu0 }
 0xc16   : > { %4144 = vmatmul.bf16.gmra.mxu2 %v14391_v50  ;;  %7311 = vmatmul.bf16.gmra.mxu1 %v5910_v10  ;;  %v5763_v36 = vpack.c.bf16 %v5345_v20, %v5343_v22  ;;  %v5122_v29 = vadd.f32 %v5121_v39, %v10947_v44  ;;  %v6259_v2 = vadd.f32 %v12817_v57, %v6258_v18  ;;  %v5640_v39 = vmax.f32 %v5120_v26, 0.0 }
 0xc18   : > { %6297 = vmatmul.bf16.gmra.mxu0 %v5763_v36  ;;  %v5642_v45 = vmax.f32 %v5122_v29, 0.0  ;;  %v6908_v37 = vadd.f32 %v14393_v0, %v6259_v2  ;;  %v12842_v2 = vpop.f32.mrf.mxu1 }
 0xc19   : > { %v4105_v47 = vpop.f32.mrf.mxu2  ;;  %14396 = vst [vmem:[#allocation43_spill] sm:$0xff] %v12842_v2 }
 0xc1a   : > { %v4106_v22 = vadd.f32 %v4105_v47, %v12161_v9  ;;  %v5912_v50 = vpack.c.bf16 %v5642_v45, %v5640_v39 }
 0xc1c   : > { %v5347_v36 = vmax.f32 %v4106_v22, 0.0 }
 0xc1d   : > { %v5124_v27 = vpop.f32.mrf.mxu3  ;;  %v6260_v32 = vpop.f32.mrf.mxu0 }
 0xc1e   : > { %v6261_v5 = vadd.f32 %v12817_v57, %v6260_v32  ;;  %v5125_v0 = vadd.f32 %v5124_v27, %v10947_v44 }
 0xc20   : > { %v6910_v17 = vadd.f32 %v14394_v63, %v6261_v5  ;;  %v14397_v63 = vld [vmem:[#allocation118_spill] sm:$0xff] }
 0xc21   : > { %v4107_v10 = vpop.f32.mrf.mxu2 }
 0xc22   : > { %v9121_v20 = vpack.c.bf16 %v6910_v17, %v6908_v37  ;;  %v4108_v18 = vadd.f32 %v4107_v10, %v12161_v9  ;;  %v14398_v17 = vld [vmem:[#allocation210_spill] sm:$0xff] }
 0xc24   : > { %9605 = vst [vmem:[%s12270_s27 + $0x130] sm:$0xff] %v9121_v20   ;;  %v5349_v51 = vmax.f32 %v4108_v18, 0.0  ;;  %v12851_v20 = vpop.f32.mrf.mxu1 }
 0xc25   : > { %v5126_v38 = vpop.f32.mrf.mxu3  ;;  %v6263_v42 = vpop.f32.mrf.mxu0  ;;  %14399 = vst [vmem:[#allocation185_spill] sm:$0xff] %v12851_v20 }
 0xc26   : > { %4149 = vmatmul.bf16.gmra.mxu2 %v14395_v8  ;;  %7316 = vmatmul.bf16.gmra.mxu1 %v5912_v50  ;;  %v5765_v29 = vpack.c.bf16 %v5349_v51, %v5347_v36  ;;  %v5127_v32 = vadd.f32 %v5126_v38, %v10947_v44  ;;  %v6264_v26 = vadd.f32 %v12817_v57, %v6263_v42  ;;  %v5644_v38 = vmax.f32 %v5125_v0, 0.0 }
 0xc28   : > { %6302 = vmatmul.bf16.gmra.mxu0 %v5765_v29  ;;  %v5646_v22 = vmax.f32 %v5127_v32, 0.0  ;;  %v6913_v8 = vadd.f32 %v14397_v63, %v6264_v26  ;;  %v14400_v32 = vld [vmem:[#allocation163_spill] sm:$0xff] }
 0xc29   : > { %v4110_v47 = vpop.f32.mrf.mxu2 }
 0xc2a   : > { %v4111_v51 = vadd.f32 %v4110_v47, %v12161_v9  ;;  %v5914_v36 = vpack.c.bf16 %v5646_v22, %v5644_v38 }
 0xc2c   : > { %v5351_v42 = vmax.f32 %v4111_v51, 0.0 }
 0xc2d   : > { %v5129_v5 = vpop.f32.mrf.mxu3  ;;  %v6265_v45 = vpop.f32.mrf.mxu0 }
 0xc2e   : > { %v6266_v37 = vadd.f32 %v12817_v57, %v6265_v45  ;;  %v5130_v51 = vadd.f32 %v5129_v5, %v10947_v44 }
 0xc30   : > { %v6915_v10 = vadd.f32 %v14398_v17, %v6266_v37  ;;  %v12856_v37 = vpop.f32.mrf.mxu1 }
 0xc31   : > { %v4112_v39 = vpop.f32.mrf.mxu2  ;;  %14401 = vst [vmem:[#allocation95_spill] sm:$0xff] %v12856_v37 }
 0xc32   : > { %v9126_v18 = vpack.c.bf16 %v6915_v10, %v6913_v8  ;;  %v4113_v50 = vadd.f32 %v4112_v39, %v12161_v9  ;;  %v14402_v39 = vld [vmem:[#allocation121_spill] sm:$0xff] }
 0xc34   : > { %9606 = vst [vmem:[%s12270_s27 + $0x138] sm:$0xff] %v9126_v18   ;;  %v5353_v27 = vmax.f32 %v4113_v50, 0.0  ;;  %v14403_v50 = vld [vmem:[#allocation211_spill] sm:$0xff] }
 0xc35   : > { %v5131_v29 = vpop.f32.mrf.mxu3  ;;  %v6268_v45 = vpop.f32.mrf.mxu0 }
 0xc36   : > { %4154 = vmatmul.bf16.gmra.mxu2 %v14400_v32  ;;  %7321 = vmatmul.bf16.gmra.mxu1 %v5914_v36  ;;  %v5767_v26 = vpack.c.bf16 %v5353_v27, %v5351_v42  ;;  %v5132_v63 = vadd.f32 %v5131_v29, %v10947_v44  ;;  %v6269_v0 = vadd.f32 %v12817_v57, %v6268_v45  ;;  %v5648_v27 = vmax.f32 %v5130_v51, 0.0 }
 0xc38   : > { %6307 = vmatmul.bf16.gmra.mxu0 %v5767_v26  ;;  %v5650_v10 = vmax.f32 %v5132_v63, 0.0  ;;  %v6918_v38 = vadd.f32 %v14402_v39, %v6269_v0  ;;  %v12867_v2 = vpop.f32.mrf.mxu1  ;;  %v14405_v63 = vld [vmem:[#allocation164_spill] sm:$0xff] }
 0xc39   : > { %v4115_v47 = vpop.f32.mrf.mxu2  ;;  %14404 = vst [vmem:[#allocation46_spill] sm:$0xff] %v12867_v2  ;;  %v14409_v2 = vld [vmem:[#allocation165_spill] sm:$0xff] }
 0xc3a   : > { %v4116_v18 = vadd.f32 %v4115_v47, %v12161_v9  ;;  %v5916_v26 = vpack.c.bf16 %v5650_v10, %v5648_v27  ;;  %v14408_v27 = vld [vmem:[#allocation212_spill] sm:$0xff] }
 0xc3c   : > { %v5355_v45 = vmax.f32 %v4116_v18, 0.0 }
 0xc3d   : > { %v5134_v8 = vpop.f32.mrf.mxu3  ;;  %v6270_v22 = vpop.f32.mrf.mxu0 }
 0xc3e   : > { %v6271_v17 = vadd.f32 %v12817_v57, %v6270_v22  ;;  %v5135_v39 = vadd.f32 %v5134_v8, %v10947_v44 }
 0xc40   : > { %v6920_v36 = vadd.f32 %v14403_v50, %v6271_v17  ;;  %v12874_v18 = vpop.f32.mrf.mxu1 }
 0xc41   : > { %v4117_v42 = vpop.f32.mrf.mxu2  ;;  %14406 = vst [vmem:[#allocation186_spill] sm:$0xff] %v12874_v18  ;;  %v14418_v18 = vld [vmem:[#allocation167_spill] sm:$0xff] }
 0xc42   : > { %v9131_v32 = vpack.c.bf16 %v6920_v36, %v6918_v38  ;;  %v4118_v29 = vadd.f32 %v4117_v42, %v12161_v9  ;;  %v14407_v36 = vld [vmem:[#allocation124_spill] sm:$0xff] }
 0xc44   : > { %9607 = vst [vmem:[%s12270_s27 + $0x140] sm:$0xff] %v9131_v32   ;;  %v5357_v37 = vmax.f32 %v4118_v29, 0.0 }
 0xc45   : > { %v5136_v20 = vpop.f32.mrf.mxu3  ;;  %v6273_v5 = vpop.f32.mrf.mxu0 }
 0xc46   : > { %4159 = vmatmul.bf16.gmra.mxu2 %v14405_v63  ;;  %7326 = vmatmul.bf16.gmra.mxu1 %v5916_v26  ;;  %v5769_v0 = vpack.c.bf16 %v5357_v37, %v5355_v45  ;;  %v5137_v22 = vadd.f32 %v5136_v20, %v10947_v44  ;;  %v6274_v51 = vadd.f32 %v12817_v57, %v6273_v5  ;;  %v5652_v20 = vmax.f32 %v5135_v39, 0.0 }
 0xc48   : > { %6312 = vmatmul.bf16.gmra.mxu0 %v5769_v0  ;;  %v5654_v50 = vmax.f32 %v5137_v22, 0.0  ;;  %v6923_v42 = vadd.f32 %v14407_v36, %v6274_v51 }
 0xc49   : > { %v4120_v47 = vpop.f32.mrf.mxu2 }
 0xc4a   : > { %v4121_v37 = vadd.f32 %v4120_v47, %v12161_v9  ;;  %v5918_v5 = vpack.c.bf16 %v5654_v50, %v5652_v20  ;;  %v12882_v47 = vpop.f32.mrf.mxu1  ;;  %v14412_v20 = vld [vmem:[#allocation213_spill] sm:$0xff] }
 0xc4b   : > { %14410 = vst [vmem:[#allocation98_spill] sm:$0xff] %v12882_v47 }
 0xc4c   : > { %v5359_v63 = vmax.f32 %v4121_v37, 0.0 }
 0xc4d   : > { %v5139_v17 = vpop.f32.mrf.mxu3  ;;  %v6275_v10 = vpop.f32.mrf.mxu0 }
 0xc4e   : > { %v6276_v38 = vadd.f32 %v12817_v57, %v6275_v10 }
 0xc50   : > { %v6925_v32 = vadd.f32 %v14408_v27, %v6276_v38 }
 0xc51   : > { %v4122_v29 = vpop.f32.mrf.mxu2 }
 0xc52   : > { %v9136_v26 = vpack.c.bf16 %v6925_v32, %v6923_v42  ;;  %v4123_v45 = vadd.f32 %v4122_v29, %v12161_v9  ;;  %v5140_v42 = vadd.f32 %v5139_v17, %v10947_v44  ;;  %v14411_v32 = vld [vmem:[#allocation127_spill] sm:$0xff] }
 0xc54   : > { %9608 = vst [vmem:[%s12270_s27 + $0x148] sm:$0xff] %v9136_v26   ;;  %v5361_v8 = vmax.f32 %v4123_v45, 0.0 }
 0xc55   : > { %v5141_v0 = vpop.f32.mrf.mxu3  ;;  %v6278_v10 = vpop.f32.mrf.mxu0 }
 0xc56   : > { %4164 = vmatmul.bf16.gmra.mxu2 %v14409_v2  ;;  %7331 = vmatmul.bf16.gmra.mxu1 %v5918_v5  ;;  %v5771_v22 = vpack.c.bf16 %v5361_v8, %v5359_v63  ;;  %v5142_v38 = vadd.f32 %v5141_v0, %v10947_v44  ;;  %v6279_v39 = vadd.f32 %v12817_v57, %v6278_v10  ;;  %v5656_v5 = vmax.f32 %v5140_v42, 0.0  ;;  %v12892_v0 = vpop.f32.mrf.mxu1 }
 0xc57   : > { %14413 = vst [vmem:[#allocation49_spill] sm:$0xff] %v12892_v0 }
 0xc58   : > { %6317 = vmatmul.bf16.gmra.mxu0 %v5771_v22  ;;  %v5658_v27 = vmax.f32 %v5142_v38, 0.0  ;;  %v6928_v2 = vadd.f32 %v14411_v32, %v6279_v39  ;;  %v14414_v38 = vld [vmem:[#allocation166_spill] sm:$0xff] }
 0xc59   : > { %v4125_v51 = vpop.f32.mrf.mxu2 }
 0xc5a   : > { %v4126_v29 = vadd.f32 %v4125_v51, %v12161_v9  ;;  %v5920_v10 = vpack.c.bf16 %v5658_v27, %v5656_v5 }
 0xc5c   : > { %v5363_v22 = vmax.f32 %v4126_v29, 0.0 }
 0xc5d   : > { %v5144_v36 = vpop.f32.mrf.mxu3  ;;  %v6280_v50 = vpop.f32.mrf.mxu0 }
 0xc5e   : > { %v6281_v37 = vadd.f32 %v12817_v57, %v6280_v50  ;;  %v5145_v27 = vadd.f32 %v5144_v36, %v10947_v44 }
 0xc60   : > { %v6930_v26 = vadd.f32 %v14412_v20, %v6281_v37  ;;  %v12898_v20 = vpop.f32.mrf.mxu1 }
 0xc61   : > { %v4127_v45 = vpop.f32.mrf.mxu2  ;;  %14415 = vst [vmem:[#allocation187_spill] sm:$0xff] %v12898_v20 }
 0xc62   : > { %v9141_v63 = vpack.c.bf16 %v6930_v26, %v6928_v2  ;;  %v4128_v8 = vadd.f32 %v4127_v45, %v12161_v9  ;;  %v14416_v45 = vld [vmem:[#allocation130_spill] sm:$0xff] }
 0xc64   : > { %9609 = vst [vmem:[%s12270_s27 + $0x150] sm:$0xff] %v9141_v63   ;;  %v5365_v17 = vmax.f32 %v4128_v8, 0.0  ;;  %v14417_v8 = vld [vmem:[#allocation214_spill] sm:$0xff] }
 0xc65   : > { %v5146_v47 = vpop.f32.mrf.mxu3  ;;  %v6283_v50 = vpop.f32.mrf.mxu0 }
 0xc66   : > { %4169 = vmatmul.bf16.gmra.mxu2 %v14414_v38  ;;  %7336 = vmatmul.bf16.gmra.mxu1 %v5920_v10  ;;  %v5773_v39 = vpack.c.bf16 %v5365_v17, %v5363_v22  ;;  %v5147_v37 = vadd.f32 %v5146_v47, %v10947_v44  ;;  %v6284_v42 = vadd.f32 %v12817_v57, %v6283_v50  ;;  %v5660_v47 = vmax.f32 %v5145_v27, 0.0 }
 0xc68   : > { %6322 = vmatmul.bf16.gmra.mxu0 %v5773_v39  ;;  %v5662_v26 = vmax.f32 %v5147_v37, 0.0  ;;  %v6933_v5 = vadd.f32 %v14416_v45, %v6284_v42  ;;  %v12908_v42 = vpop.f32.mrf.mxu1 }
 0xc69   : > { %v4130_v51 = vpop.f32.mrf.mxu2 }
 0xc6a   : > { %v4131_v63 = vadd.f32 %v4130_v51, %v12161_v9  ;;  %v5922_v38 = vpack.c.bf16 %v5662_v26, %v5660_v47 }
 0xc6c   : > { %v5367_v39 = vmax.f32 %v4131_v63, 0.0 }
 0xc6d   : > { %v5149_v32 = vpop.f32.mrf.mxu3  ;;  %v6285_v2 = vpop.f32.mrf.mxu0 }
 0xc6e   : > { %v6286_v29 = vadd.f32 %v12817_v57, %v6285_v2  ;;  %v5150_v26 = vadd.f32 %v5149_v32, %v10947_v44 }
 0xc70   : > { %v6935_v10 = vadd.f32 %v14417_v8, %v6286_v29  ;;  %v14419_v8 = vld [vmem:[#allocation133_spill] sm:$0xff] }
 0xc71   : > { %v4132_v22 = vpop.f32.mrf.mxu2 }
 0xc72   : > { %v9146_v17 = vpack.c.bf16 %v6935_v10, %v6933_v5  ;;  %v4133_v50 = vadd.f32 %v4132_v22, %v12161_v9  ;;  %v14420_v10 = vld [vmem:[#allocation215_spill] sm:$0xff] }
 0xc74   : > { %9610 = vst [vmem:[%s12270_s27 + $0x158] sm:$0xff] %v9146_v17   ;;  %v5369_v20 = vmax.f32 %v4133_v50, 0.0  ;;  %v12917_v17 = vpop.f32.mrf.mxu1 }
 0xc75   : > { %v5151_v0 = vpop.f32.mrf.mxu3  ;;  %v6288_v36 = vpop.f32.mrf.mxu0 }
 0xc76   : > { %4174 = vmatmul.bf16.gmra.mxu2 %v14418_v18  ;;  %7341 = vmatmul.bf16.gmra.mxu1 %v5922_v38  ;;  %v5775_v37 = vpack.c.bf16 %v5369_v20, %v5367_v39  ;;  %v5152_v2 = vadd.f32 %v5151_v0, %v10947_v44  ;;  %v6289_v27 = vadd.f32 %v12817_v57, %v6288_v36  ;;  %v5664_v0 = vmax.f32 %v5150_v26, 0.0 }
 0xc78   : > { %6327 = vmatmul.bf16.gmra.mxu0 %v5775_v37  ;;  %v5666_v63 = vmax.f32 %v5152_v2, 0.0  ;;  %v6938_v18 = vadd.f32 %v14419_v8, %v6289_v27 }
 0xc79   : > { %v4135_v51 = vpop.f32.mrf.mxu2 }
 0xc7a   : > { %v4136_v20 = vadd.f32 %v4135_v51, %v12161_v9  ;;  %v5924_v39 = vpack.c.bf16 %v5666_v63, %v5664_v0 }
 0xc7c   : > { %v5371_v36 = vmax.f32 %v4136_v20, 0.0 }
 0xc7d   : > { %v6290_v29 = vpop.f32.mrf.mxu0  ;;  %v5154_v5 = vpop.f32.mrf.mxu3 }
 0xc7e   : > { %v6291_v45 = vadd.f32 %v12817_v57, %v6290_v29  ;;  %v14421_v29 = vld [vmem:[#allocation168_spill] sm:$0xff]  ;;  %v5155_v63 = vadd.f32 %v5154_v5, %v10947_v44  ;;  %v14425_v5 = vld [vmem:[#allocation169_spill] sm:$0xff] }
 0xc80   : > { %v6940_v22 = vadd.f32 %v14420_v10, %v6291_v45  ;;  %v12922_v45 = vpop.f32.mrf.mxu1 }
 0xc81   : > { %v4137_v47 = vpop.f32.mrf.mxu2  ;;  %14422 = vst [vmem:[#allocation101_spill] sm:$0xff] %v12922_v45 }
 0xc82   : > { %v9151_v50 = vpack.c.bf16 %v6940_v22, %v6938_v18  ;;  %v4138_v38 = vadd.f32 %v4137_v47, %v12161_v9  ;;  %v14423_v22 = vld [vmem:[#allocation136_spill] sm:$0xff] }
 0xc84   : > { %9611 = vst [vmem:[%s12270_s27 + $0x160] sm:$0xff] %v9151_v50   ;;  %v5373_v32 = vmax.f32 %v4138_v38, 0.0  ;;  %v14424_v50 = vld [vmem:[#allocation216_spill] sm:$0xff] }
 0xc85   : > { %v6293_v37 = vpop.f32.mrf.mxu0  ;;  %v5156_v51 = vpop.f32.mrf.mxu3 }
 0xc86   : > { %4179 = vmatmul.bf16.gmra.mxu2 %v14421_v29  ;;  %7346 = vmatmul.bf16.gmra.mxu1 %v5924_v39  ;;  %v5777_v2 = vpack.c.bf16 %v5373_v32, %v5371_v36  ;;  %v5157_v26 = vadd.f32 %v5156_v51, %v10947_v44  ;;  %v6294_v8 = vadd.f32 %v12817_v57, %v6293_v37  ;;  %v5668_v36 = vmax.f32 %v5155_v63, 0.0 }
 0xc88   : > { %6332 = vmatmul.bf16.gmra.mxu0 %v5777_v2  ;;  %v5670_v10 = vmax.f32 %v5157_v26, 0.0  ;;  %v6943_v47 = vadd.f32 %v14423_v22, %v6294_v8  ;;  %v12933_v44 = vpop.f32.mrf.mxu1 }
 0xc89   : > { %v4140_v27 = vpop.f32.mrf.mxu2 }
 0xc8a   : > { %v4141_v0 = vadd.f32 %v4140_v27, %v12161_v9  ;;  %v5926_v2 = vpack.c.bf16 %v5670_v10, %v5668_v36 }
 0xc8c   : > { %v5375_v51 = vmax.f32 %v4141_v0, 0.0 }
 0xc8d   : > { %v6295_v18 = vpop.f32.mrf.mxu0 }
 0xc8e   : > { %v6296_v20 = vadd.f32 %v12817_v57, %v6295_v18 }
 0xc90   : > { %v6945_v38 = vadd.f32 %v14424_v50, %v6296_v20  ;;  %v14426_v20 = vld [vmem:[#allocation139_spill] sm:$0xff] }
 0xc91   : > { %v4142_v39 = vpop.f32.mrf.mxu2 }
 0xc92   : > { %v9156_v32 = vpack.c.bf16 %v6945_v38, %v6943_v47  ;;  %v4143_v29 = vadd.f32 %v4142_v39, %v12161_v9  ;;  %v14427_v47 = vld [vmem:[#allocation217_spill] sm:$0xff] }
 0xc94   : > { %9612 = vst [vmem:[%s12270_s27 + $0x168] sm:$0xff] %v9156_v32   ;;  %v5377_v37 = vmax.f32 %v4143_v29, 0.0 }
 0xc95   : > { %v6298_v45 = vpop.f32.mrf.mxu0 }
 0xc96   : > { %4184 = vmatmul.bf16.gmra.mxu2 %v14425_v5  ;;  %7351 = vmatmul.bf16.gmra.mxu1 %v5926_v2  ;;  %v5779_v26 = vpack.c.bf16 %v5377_v37, %v5375_v51  ;;  %v6299_v8 = vadd.f32 %v12817_v57, %v6298_v45  ;;  %v14428_v2 = vld [vmem:[#allocation173_spill] sm:$0xff] }
 0xc98   : > { %6337 = vmatmul.bf16.gmra.mxu0 %v5779_v26  ;;  %v6948_v10 = vadd.f32 %v14426_v20, %v6299_v8 }
 0xc99   : > { %v4145_v27 = vpop.f32.mrf.mxu2 }
 0xc9a   : > { %v4146_v22 = vadd.f32 %v4145_v27, %v12161_v9  ;;  %v14429_v27 = vld [vmem:[#allocation142_spill] sm:$0xff] }
 0xc9c   : > { %v5379_v36 = vmax.f32 %v4146_v22, 0.0 }
 0xc9d   : > { %v6300_v18 = vpop.f32.mrf.mxu0 }
 0xc9e   : > { %v6301_v63 = vadd.f32 %v12817_v57, %v6300_v18 }
 0xca0   : > { %v6950_v0 = vadd.f32 %v14427_v47, %v6301_v63  ;;  %v14430_v63 = vld [vmem:[#allocation218_spill] sm:$0xff] }
 0xca1   : > { %v4147_v50 = vpop.f32.mrf.mxu2 }
 0xca2   : > { %v9161_v38 = vpack.c.bf16 %v6950_v0, %v6948_v10  ;;  %v4148_v39 = vadd.f32 %v4147_v50, %v12161_v9 }
 0xca4   : > { %9613 = vst [vmem:[%s12270_s27 + $0x170] sm:$0xff] %v9161_v38   ;;  %v5381_v32 = vmax.f32 %v4148_v39, 0.0  ;;  %v14431_v39 = vld [vmem:[#allocation10_spill] sm:$0xff] }
 0xca5   : > { %v6303_v29 = vpop.f32.mrf.mxu0 }
 0xca6   : > { %4189 = vmatmul.bf16.gmra.mxu2 %v14428_v2  ;;  %v5781_v45 = vpack.c.bf16 %v5381_v32, %v5379_v36  ;;  %v6304_v37 = vadd.f32 %v12817_v57, %v6303_v29 }
 0xca8   : > { %6342 = vmatmul.bf16.gmra.mxu0 %v5781_v45  ;;  %v6953_v8 = vadd.f32 %v14429_v27, %v6304_v37 }
 0xca9   : > { %v4150_v51 = vpop.f32.mrf.mxu2 }
 0xcaa   : > { %v4151_v18 = vadd.f32 %v4150_v51, %v12161_v9  ;;  %v14432_v51 = vld [vmem:[#allocation145_spill] sm:$0xff] }
 0xcac   : > { %v5383_v0 = vmax.f32 %v4151_v18, 0.0 }
 0xcad   : > { %v6305_v5 = vpop.f32.mrf.mxu0 }
 0xcae   : > { %v6306_v26 = vadd.f32 %v12817_v57, %v6305_v5 }
 0xcb0   : > { %v6955_v20 = vadd.f32 %v14430_v63, %v6306_v26  ;;  %v14433_v26 = vld [vmem:[#allocation219_spill] sm:$0xff] }
 0xcb1   : > { %v4152_v10 = vpop.f32.mrf.mxu2 }
 0xcb2   : > { %v9166_v22 = vpack.c.bf16 %v6955_v20, %v6953_v8  ;;  %v4153_v47 = vadd.f32 %v4152_v10, %v12161_v9 }
 0xcb4   : > { %9614 = vst [vmem:[%s12270_s27 + $0x178] sm:$0xff] %v9166_v22   ;;  %v5385_v50 = vmax.f32 %v4153_v47, 0.0  ;;  %v14434_v47 = vld [vmem:[#allocation13_spill] sm:$0xff] }
 0xcb5   : > { %v6308_v38 = vpop.f32.mrf.mxu0 }
 0xcb6   : > { %4194 = vmatmul.bf16.gmra.mxu2 %v14431_v39  ;;  %v5783_v36 = vpack.c.bf16 %v5385_v50, %v5383_v0  ;;  %v6309_v29 = vadd.f32 %v12817_v57, %v6308_v38 }
 0xcb8   : > { %6347 = vmatmul.bf16.gmra.mxu0 %v5783_v36  ;;  %v6958_v37 = vadd.f32 %v14432_v51, %v6309_v29 }
 0xcb9   : > { %v4155_v32 = vpop.f32.mrf.mxu2 }
 0xcba   : > { %v4156_v5 = vadd.f32 %v4155_v32, %v12161_v9  ;;  %v14435_v32 = vld [vmem:[#allocation148_spill] sm:$0xff] }
 0xcbc   : > { %v5387_v20 = vmax.f32 %v4156_v5, 0.0 }
 0xcbd   : > { %v6310_v2 = vpop.f32.mrf.mxu0 }
 0xcbe   : > { %v6311_v45 = vadd.f32 %v12817_v57, %v6310_v2 }
 0xcc0   : > { %v6960_v27 = vadd.f32 %v14433_v26, %v6311_v45  ;;  %v14436_v45 = vld [vmem:[#allocation220_spill] sm:$0xff] }
 0xcc1   : > { %v4157_v8 = vpop.f32.mrf.mxu2 }
 0xcc2   : > { %v9171_v18 = vpack.c.bf16 %v6960_v27, %v6958_v37  ;;  %v4158_v63 = vadd.f32 %v4157_v8, %v12161_v9 }
 0xcc4   : > { %9615 = vst [vmem:[%s12270_s27 + $0x180] sm:$0xff] %v9171_v18   ;;  %v5389_v10 = vmax.f32 %v4158_v63, 0.0  ;;  %v14437_v63 = vld [vmem:[#allocation16_spill] sm:$0xff] }
 0xcc5   : > { %v6313_v22 = vpop.f32.mrf.mxu0 }
 0xcc6   : > { %4199 = vmatmul.bf16.gmra.mxu2 %v14434_v47  ;;  %v5785_v0 = vpack.c.bf16 %v5389_v10, %v5387_v20  ;;  %v6314_v38 = vadd.f32 %v12817_v57, %v6313_v22 }
 0xcc8   : > { %6352 = vmatmul.bf16.gmra.mxu0 %v5785_v0  ;;  %v6963_v29 = vadd.f32 %v14435_v32, %v6314_v38 }
 0xcc9   : > { %v4160_v50 = vpop.f32.mrf.mxu2 }
 0xcca   : > { %v4161_v2 = vadd.f32 %v4160_v50, %v12161_v9  ;;  %v14438_v50 = vld [vmem:[#allocation151_spill] sm:$0xff] }
 0xccc   : > { %v5391_v27 = vmax.f32 %v4161_v2, 0.0 }
 0xccd   : > { %v6315_v39 = vpop.f32.mrf.mxu0 }
 0xcce   : > { %v6316_v36 = vadd.f32 %v12817_v57, %v6315_v39 }
 0xcd0   : > { %v6965_v51 = vadd.f32 %v14436_v45, %v6316_v36  ;;  %v14439_v36 = vld [vmem:[#allocation221_spill] sm:$0xff] }
 0xcd1   : > { %v4162_v37 = vpop.f32.mrf.mxu2 }
 0xcd2   : > { %v9176_v5 = vpack.c.bf16 %v6965_v51, %v6963_v29  ;;  %v4163_v26 = vadd.f32 %v4162_v37, %v12161_v9 }
 0xcd4   : > { %9616 = vst [vmem:[%s12270_s27 + $0x188] sm:$0xff] %v9176_v5   ;;  %v5393_v8 = vmax.f32 %v4163_v26, 0.0  ;;  %v14440_v26 = vld [vmem:[#allocation19_spill] sm:$0xff] }
 0xcd5   : > { %v6318_v18 = vpop.f32.mrf.mxu0 }
 0xcd6   : > { %4204 = vmatmul.bf16.gmra.mxu2 %v14437_v63  ;;  %v5787_v20 = vpack.c.bf16 %v5393_v8, %v5391_v27  ;;  %v6319_v22 = vadd.f32 %v12817_v57, %v6318_v18 }
 0xcd8   : > { %6357 = vmatmul.bf16.gmra.mxu0 %v5787_v20  ;;  %v6968_v38 = vadd.f32 %v14438_v50, %v6319_v22 }
 0xcd9   : > { %v4165_v10 = vpop.f32.mrf.mxu2 }
 0xcda   : > { %v4166_v39 = vadd.f32 %v4165_v10, %v12161_v9  ;;  %v14441_v10 = vld [vmem:[#allocation154_spill] sm:$0xff] }
 0xcdc   : > { %v5395_v51 = vmax.f32 %v4166_v39, 0.0 }
 0xcdd   : > { %v6320_v47 = vpop.f32.mrf.mxu0 }
 0xcde   : > { %v6321_v0 = vadd.f32 %v12817_v57, %v6320_v47 }
 0xce0   : > { %v6970_v32 = vadd.f32 %v14439_v36, %v6321_v0  ;;  %v14442_v0 = vld [vmem:[#allocation222_spill] sm:$0xff] }
 0xce1   : > { %v4167_v29 = vpop.f32.mrf.mxu2 }
 0xce2   : > { %v9181_v2 = vpack.c.bf16 %v6970_v32, %v6968_v38  ;;  %v4168_v45 = vadd.f32 %v4167_v29, %v12161_v9 }
 0xce4   : > { %9617 = vst [vmem:[%s12270_s27 + $0x190] sm:$0xff] %v9181_v2   ;;  %v5397_v37 = vmax.f32 %v4168_v45, 0.0  ;;  %v14443_v45 = vld [vmem:[#allocation22_spill] sm:$0xff] }
 0xce5   : > { %v6323_v5 = vpop.f32.mrf.mxu0 }
 0xce6   : > { %4209 = vmatmul.bf16.gmra.mxu2 %v14440_v26  ;;  %v5789_v27 = vpack.c.bf16 %v5397_v37, %v5395_v51  ;;  %v6324_v18 = vadd.f32 %v12817_v57, %v6323_v5 }
 0xce8   : > { %6362 = vmatmul.bf16.gmra.mxu0 %v5789_v27  ;;  %v6973_v22 = vadd.f32 %v14441_v10, %v6324_v18 }
 0xce9   : > { %v4170_v8 = vpop.f32.mrf.mxu2 }
 0xcea   : > { %v4171_v47 = vadd.f32 %v4170_v8, %v12161_v9  ;;  %v14444_v8 = vld [vmem:[#allocation157_spill] sm:$0xff] }
 0xcec   : > { %v5399_v32 = vmax.f32 %v4171_v47, 0.0 }
 0xced   : > { %v6325_v63 = vpop.f32.mrf.mxu0 }
 0xcee   : > { %v6326_v20 = vadd.f32 %v12817_v57, %v6325_v63 }
 0xcf0   : > { %v6975_v50 = vadd.f32 %v14442_v0, %v6326_v20 }
 0xcf1   : > { %v4172_v38 = vpop.f32.mrf.mxu2 }
 0xcf2   : > { %v9186_v39 = vpack.c.bf16 %v6975_v50, %v6973_v22  ;;  %v4173_v36 = vadd.f32 %v4172_v38, %v12161_v9 }
 0xcf4   : > { %9618 = vst [vmem:[%s12270_s27 + $0x198] sm:$0xff] %v9186_v39   ;;  %v5401_v29 = vmax.f32 %v4173_v36, 0.0 }
 0xcf5   : > { %v6328_v2 = vpop.f32.mrf.mxu0 }
 0xcf6   : > { %4214 = vmatmul.bf16.gmra.mxu2 %v14443_v45  ;;  %v5791_v51 = vpack.c.bf16 %v5401_v29, %v5399_v32  ;;  %v6329_v5 = vadd.f32 %v12817_v57, %v6328_v2 }
 0xcf8   : > { %6367 = vmatmul.bf16.gmra.mxu0 %v5791_v51  ;;  %v6978_v18 = vadd.f32 %v14444_v8, %v6329_v5 }
 0xcf9   : > { %v4175_v37 = vpop.f32.mrf.mxu2 }
 0xcfa   : > { %v4176_v63 = vadd.f32 %v4175_v37, %v12161_v9 }
 0xcfc   : > { %v5403_v0 = vmax.f32 %v4176_v63, 0.0 }
 0xcfd   : > { %v6330_v26 = vpop.f32.mrf.mxu0 }
 0xcfe   : > { %v6331_v27 = vadd.f32 %v12817_v57, %v6330_v26 }
 0xd00   : > { %v6980_v20 = vadd.f32 %v12011_v21, %v6331_v27 }
 0xd01   : > { %v4177_v10 = vpop.f32.mrf.mxu2 }
 0xd02   : > { %v9191_v22 = vpack.c.bf16 %v6980_v20, %v6978_v18  ;;  %v4178_v47 = vadd.f32 %v4177_v10, %v12161_v9 }
 0xd04   : > { %9619 = vst [vmem:[%s12270_s27 + $0x1a0] sm:$0xff] %v9191_v22   ;;  %v5405_v50 = vmax.f32 %v4178_v47, 0.0  ;;  %v14445_v47 = vld [vmem:[#allocation225_spill] sm:$0xff] }
 0xd05   : > { %v6333_v38 = vpop.f32.mrf.mxu0 }
 0xd06   : > { %4219 = vmatmul.bf16.gmra.mxu2 %v11197_v4  ;;  %v5793_v39 = vpack.c.bf16 %v5405_v50, %v5403_v0  ;;  %v6334_v32 = vadd.f32 %v12817_v57, %v6333_v38 }
 0xd08   : > { %6372 = vmatmul.bf16.gmra.mxu0 %v5793_v39  ;;  %v6983_v21 = vadd.f32 %v12017_v33, %v6334_v32 }
 0xd09   : > { %v4180_v36 = vpop.f32.mrf.mxu2 }
 0xd0a   : > { %v4181_v45 = vadd.f32 %v4180_v36, %v12161_v9 }
 0xd0c   : > { %v5407_v27 = vmax.f32 %v4181_v45, 0.0 }
 0xd0d   : > { %v6335_v29 = vpop.f32.mrf.mxu0 }
 0xd0e   : > { %v6336_v2 = vadd.f32 %v12817_v57, %v6335_v29  ;;  %v14446_v29 = vld [vmem:[#allocation30_spill] sm:$0xff] }
 0xd10   : > { %v6985_v51 = vadd.f32 %v12022_v35, %v6336_v2 }
 0xd11   : > { %v4182_v37 = vpop.f32.mrf.mxu2 }
 0xd12   : > { %v9196_v5 = vpack.c.bf16 %v6985_v51, %v6983_v21  ;;  %v4183_v26 = vadd.f32 %v4182_v37, %v12161_v9  ;;  %v14447_v37 = vld [vmem:[#allocation226_spill] sm:$0xff] }
 0xd14   : > { %9620 = vst [vmem:[%s12270_s27 + $0x1a8] sm:$0xff] %v9196_v5   ;;  %v5409_v4 = vmax.f32 %v4183_v26, 0.0 }
 0xd15   : > { %v6338_v8 = vpop.f32.mrf.mxu0 }
 0xd16   : > { %4224 = vmatmul.bf16.gmra.mxu2 %v11213_v41  ;;  %v5795_v18 = vpack.c.bf16 %v5409_v4, %v5407_v27  ;;  %v6339_v33 = vadd.f32 %v12817_v57, %v6338_v8  ;;  %v14448_v27 = vld [vmem:[#allocation228_spill] sm:$0xff] }
 0xd18   : > { %6377 = vmatmul.bf16.gmra.mxu0 %v5795_v18  ;;  %v6988_v35 = vadd.f32 %v12028_v59, %v6339_v33 }
 0xd19   : > { %v4185_v63 = vpop.f32.mrf.mxu2 }
 0xd1a   : > { %v4186_v22 = vadd.f32 %v4185_v63, %v12161_v9 }
 0xd1c   : > { %v5411_v36 = vmax.f32 %v4186_v22, 0.0 }
 0xd1d   : > { %v6340_v20 = vpop.f32.mrf.mxu0 }
 0xd1e   : > { %v6341_v10 = vadd.f32 %v12817_v57, %v6340_v20 }
 0xd20   : > { %v6990_v0 = vadd.f32 %v14445_v47, %v6341_v10 }
 0xd21   : > { %v4187_v50 = vpop.f32.mrf.mxu2 }
 0xd22   : > { %v9201_v38 = vpack.c.bf16 %v6990_v0, %v6988_v35  ;;  %v4188_v39 = vadd.f32 %v4187_v50, %v12161_v9  ;;  %v14449_v35 = vld [vmem:[#allocation33_spill] sm:$0xff] }
 0xd24   : > { %9621 = vst [vmem:[%s12270_s27 + $0x1b0] sm:$0xff] %v9201_v38   ;;  %v5413_v41 = vmax.f32 %v4188_v39, 0.0  ;;  %v14450_v39 = vld [vmem:[#allocation229_spill] sm:$0xff] }
 0xd25   : > { %v6343_v32 = vpop.f32.mrf.mxu0 }
 0xd26   : > { %4229 = vmatmul.bf16.gmra.mxu2 %v14446_v29  ;;  %v5797_v2 = vpack.c.bf16 %v5413_v41, %v5411_v36  ;;  %v6344_v59 = vadd.f32 %v12817_v57, %v6343_v32  ;;  %v14451_v32 = vld [vmem:[#allocation230_spill] sm:$0xff] }
 0xd28   : > { %6382 = vmatmul.bf16.gmra.mxu0 %v5797_v2  ;;  %v6993_v5 = vadd.f32 %v14447_v37, %v6344_v59 }
 0xd29   : > { %v4190_v21 = vpop.f32.mrf.mxu2 }
 0xd2a   : > { %v4191_v26 = vadd.f32 %v4190_v21, %v12161_v9 }
 0xd2c   : > { %v5415_v33 = vmax.f32 %v4191_v26, 0.0 }
 0xd2d   : > { %v6345_v45 = vpop.f32.mrf.mxu0 }
 0xd2e   : > { %v6346_v51 = vadd.f32 %v12817_v57, %v6345_v45 }
 0xd30   : > { %v6995_v4 = vadd.f32 %v14448_v27, %v6346_v51 }
 0xd31   : > { %v4192_v8 = vpop.f32.mrf.mxu2 }
 0xd32   : > { %v9206_v18 = vpack.c.bf16 %v6995_v4, %v6993_v5  ;;  %v4193_v63 = vadd.f32 %v4192_v8, %v12161_v9  ;;  %v14452_v5 = vld [vmem:[#allocation36_spill] sm:$0xff] }
 0xd34   : > { %9622 = vst [vmem:[%s12270_s27 + $0x1b8] sm:$0xff] %v9206_v18   ;;  %v5417_v20 = vmax.f32 %v4193_v63, 0.0  ;;  %v14453_v63 = vld [vmem:[#allocation231_spill] sm:$0xff] }
 0xd35   : > { %v6348_v10 = vpop.f32.mrf.mxu0 }
 0xd36   : > { %4234 = vmatmul.bf16.gmra.mxu2 %v14449_v35  ;;  %v5799_v22 = vpack.c.bf16 %v5417_v20, %v5415_v33  ;;  %v6349_v0 = vadd.f32 %v12817_v57, %v6348_v10  ;;  %v14454_v10 = vld [vmem:[#allocation232_spill] sm:$0xff] }
 0xd38   : > { %6387 = vmatmul.bf16.gmra.mxu0 %v5799_v22  ;;  %v6998_v36 = vadd.f32 %v14450_v39, %v6349_v0 }
 0xd39   : > { %v4195_v47 = vpop.f32.mrf.mxu2 }
 0xd3a   : > { %v4196_v41 = vadd.f32 %v4195_v47, %v12161_v9 }
 0xd3c   : > { %v5419_v45 = vmax.f32 %v4196_v41, 0.0 }
 0xd3d   : > { %v6350_v50 = vpop.f32.mrf.mxu0 }
 0xd3e   : > { %v6351_v38 = vadd.f32 %v12817_v57, %v6350_v50 }
 0xd40   : > { %v7000_v29 = vadd.f32 %v14451_v32, %v6351_v38 }
 0xd41   : > { %v4197_v2 = vpop.f32.mrf.mxu2 }
 0xd42   : > { %v9211_v21 = vpack.c.bf16 %v7000_v29, %v6998_v36  ;;  %v4198_v59 = vadd.f32 %v4197_v2, %v12161_v9  ;;  %v14455_v36 = vld [vmem:[#allocation39_spill] sm:$0xff] }
 0xd44   : > { %9623 = vst [vmem:[%s12270_s27 + $0x1c0] sm:$0xff] %v9211_v21   ;;  %v5421_v51 = vmax.f32 %v4198_v59, 0.0  ;;  %v14456_v59 = vld [vmem:[#allocation233_spill] sm:$0xff] }
 0xd45   : > { %v6353_v37 = vpop.f32.mrf.mxu0 }
 0xd46   : > { %4239 = vmatmul.bf16.gmra.mxu2 %v14452_v5  ;;  %v5801_v26 = vpack.c.bf16 %v5421_v51, %v5419_v45  ;;  %v6354_v4 = vadd.f32 %v12817_v57, %v6353_v37  ;;  %v14457_v37 = vld [vmem:[#allocation234_spill] sm:$0xff] }
 0xd48   : > { %6392 = vmatmul.bf16.gmra.mxu0 %v5801_v26  ;;  %v7003_v33 = vadd.f32 %v14453_v63, %v6354_v4 }
 0xd49   : > { %v4200_v27 = vpop.f32.mrf.mxu2 }
 0xd4a   : > { %v4201_v20 = vadd.f32 %v4200_v27, %v12161_v9 }
 0xd4c   : > { %v5423_v50 = vmax.f32 %v4201_v20, 0.0 }
 0xd4d   : > { %v6355_v8 = vpop.f32.mrf.mxu0 }
 0xd4e   : > { %v6356_v18 = vadd.f32 %v12817_v57, %v6355_v8 }
 0xd50   : > { %v7005_v35 = vadd.f32 %v14454_v10, %v6356_v18 }
 0xd51   : > { %v4202_v22 = vpop.f32.mrf.mxu2 }
 0xd52   : > { %v9216_v47 = vpack.c.bf16 %v7005_v35, %v7003_v33  ;;  %v4203_v0 = vadd.f32 %v4202_v22, %v12161_v9  ;;  %v14458_v33 = vld [vmem:[#allocation42_spill] sm:$0xff] }
 0xd54   : > { %9624 = vst [vmem:[%s12270_s27 + $0x1c8] sm:$0xff] %v9216_v47   ;;  %v5425_v38 = vmax.f32 %v4203_v0, 0.0  ;;  %v14459_v0 = vld [vmem:[#allocation235_spill] sm:$0xff] }
 0xd55   : > { %v6358_v39 = vpop.f32.mrf.mxu0 }
 0xd56   : > { %4244 = vmatmul.bf16.gmra.mxu2 %v14455_v36  ;;  %v5803_v41 = vpack.c.bf16 %v5425_v38, %v5423_v50  ;;  %v6359_v29 = vadd.f32 %v12817_v57, %v6358_v39  ;;  %v14460_v39 = vld [vmem:[#allocation236_spill] sm:$0xff] }
 0xd58   : > { %6397 = vmatmul.bf16.gmra.mxu0 %v5803_v41  ;;  %v7008_v45 = vadd.f32 %v14456_v59, %v6359_v29 }
 0xd59   : > { %v4205_v32 = vpop.f32.mrf.mxu2 }
 0xd5a   : > { %v4206_v51 = vadd.f32 %v4205_v32, %v12161_v9 }
 0xd5c   : > { %v5427_v8 = vmax.f32 %v4206_v51, 0.0 }
 0xd5d   : > { %v6360_v2 = vpop.f32.mrf.mxu0 }
 0xd5e   : > { %v6361_v21 = vadd.f32 %v12817_v57, %v6360_v2 }
 0xd60   : > { %v7010_v5 = vadd.f32 %v14457_v37, %v6361_v21 }
 0xd61   : > { %v4207_v26 = vpop.f32.mrf.mxu2 }
 0xd62   : > { %v9221_v27 = vpack.c.bf16 %v7010_v5, %v7008_v45  ;;  %v4208_v4 = vadd.f32 %v4207_v26, %v12161_v9  ;;  %v14461_v45 = vld [vmem:[#allocation45_spill] sm:$0xff] }
 0xd64   : > { %9625 = vst [vmem:[%s12270_s27 + $0x1d0] sm:$0xff] %v9221_v27   ;;  %v5429_v18 = vmax.f32 %v4208_v4, 0.0  ;;  %v14462_v4 = vld [vmem:[#allocation237_spill] sm:$0xff] }
 0xd65   : > { %v6363_v63 = vpop.f32.mrf.mxu0 }
 0xd66   : > { %4249 = vmatmul.bf16.gmra.mxu2 %v14458_v33  ;;  %v5805_v20 = vpack.c.bf16 %v5429_v18, %v5427_v8  ;;  %v6364_v35 = vadd.f32 %v12817_v57, %v6363_v63  ;;  %v14463_v63 = vld [vmem:[#allocation238_spill] sm:$0xff] }
 0xd68   : > { %6402 = vmatmul.bf16.gmra.mxu0 %v5805_v20  ;;  %v7013_v50 = vadd.f32 %v14459_v0, %v6364_v35 }
 0xd69   : > { %v4210_v10 = vpop.f32.mrf.mxu2 }
 0xd6a   : > { %v4211_v38 = vadd.f32 %v4210_v10, %v12161_v9 }
 0xd6c   : > { %v5431_v2 = vmax.f32 %v4211_v38, 0.0 }
 0xd6d   : > { %v6365_v22 = vpop.f32.mrf.mxu0 }
 0xd6e   : > { %v6366_v47 = vadd.f32 %v12817_v57, %v6365_v22 }
 0xd70   : > { %v7015_v36 = vadd.f32 %v14460_v39, %v6366_v47 }
 0xd71   : > { %v4212_v41 = vpop.f32.mrf.mxu2 }
 0xd72   : > { %v9226_v32 = vpack.c.bf16 %v7015_v36, %v7013_v50  ;;  %v4213_v29 = vadd.f32 %v4212_v41, %v12161_v9  ;;  %v14464_v50 = vld [vmem:[#allocation48_spill] sm:$0xff] }
 0xd74   : > { %9626 = vst [vmem:[%s12270_s27 + $0x1d8] sm:$0xff] %v9226_v32   ;;  %v5433_v21 = vmax.f32 %v4213_v29, 0.0  ;;  %v14465_v29 = vld [vmem:[#allocation239_spill] sm:$0xff] }
 0xd75   : > { %v6368_v59 = vpop.f32.mrf.mxu0 }
 0xd76   : > { %4254 = vmatmul.bf16.gmra.mxu2 %v14461_v45  ;;  %v5807_v51 = vpack.c.bf16 %v5433_v21, %v5431_v2  ;;  %v6369_v5 = vadd.f32 %v12817_v57, %v6368_v59  ;;  %v14466_v59 = vld [vmem:[#allocation240_spill] sm:$0xff] }
 0xd78   : > { %6407 = vmatmul.bf16.gmra.mxu0 %v5807_v51  ;;  %v7018_v8 = vadd.f32 %v14462_v4, %v6369_v5 }
 0xd79   : > { %v4215_v37 = vpop.f32.mrf.mxu2 }
 0xd7a   : > { %v4216_v18 = vadd.f32 %v4215_v37, %v12161_v9 }
 0xd7c   : > { %v5435_v22 = vmax.f32 %v4216_v18, 0.0 }
 0xd7d   : > { %v6370_v26 = vpop.f32.mrf.mxu0 }
 0xd7e   : > { %v6371_v27 = vadd.f32 %v12817_v57, %v6370_v26 }
 0xd80   : > { %v7020_v33 = vadd.f32 %v14463_v63, %v6371_v27 }
 0xd81   : > { %v4217_v20 = vpop.f32.mrf.mxu2 }
 0xd82   : > { %v9231_v10 = vpack.c.bf16 %v7020_v33, %v7018_v8  ;;  %v4218_v35 = vadd.f32 %v4217_v20, %v12161_v9  ;;  %v14467_v8 = vld [vmem:[#allocation51_spill] sm:$0xff] }
 0xd84   : > { %9627 = vst [vmem:[%s12270_s27 + $0x1e0] sm:$0xff] %v9231_v10   ;;  %v5437_v47 = vmax.f32 %v4218_v35, 0.0  ;;  %v14468_v35 = vld [vmem:[#allocation241_spill] sm:$0xff] }
 0xd85   : > { %v6373_v0 = vpop.f32.mrf.mxu0 }
 0xd86   : > { %4259 = vmatmul.bf16.gmra.mxu2 %v14464_v50  ;;  %v5809_v38 = vpack.c.bf16 %v5437_v47, %v5435_v22  ;;  %v6374_v36 = vadd.f32 %v12817_v57, %v6373_v0  ;;  %v14469_v0 = vld [vmem:[#allocation242_spill] sm:$0xff] }
 0xd88   : > { %6412 = vmatmul.bf16.gmra.mxu0 %v5809_v38  ;;  %v7023_v2 = vadd.f32 %v14465_v29, %v6374_v36 }
 0xd89   : > { %v4220_v39 = vpop.f32.mrf.mxu2 }
 0xd8a   : > { %v4221_v21 = vadd.f32 %v4220_v39, %v12161_v9 }
 0xd8c   : > { %v5439_v26 = vmax.f32 %v4221_v21, 0.0 }
 0xd8d   : > { %v6375_v41 = vpop.f32.mrf.mxu0 }
 0xd8e   : > { %v6376_v32 = vadd.f32 %v12817_v57, %v6375_v41 }
 0xd90   : > { %v7025_v45 = vadd.f32 %v14466_v59, %v6376_v32  ;;  %v13075_v59 = vld [vmem:[%s13585_s8] ss:$0 sm:$0xff] }
 0xd91   : > { %v4222_v51 = vpop.f32.mrf.mxu2 }
 0xd92   : > { %v9236_v37 = vpack.c.bf16 %v7025_v45, %v7023_v2  ;;  %v4223_v5 = vadd.f32 %v4222_v51, %v12161_v9  ;;  %v14470_v2 = vld [vmem:[#allocation54_spill] sm:$0xff] }
 0xd94   : > { %9628 = vst [vmem:[%s12270_s27 + $0x1e8] sm:$0xff] %v9236_v37   ;;  %v5441_v27 = vmax.f32 %v4223_v5, 0.0  ;;  %v14471_v5 = vld [vmem:[#allocation243_spill] sm:$0xff] }
 0xd95   : > { %v6378_v4 = vpop.f32.mrf.mxu0 }
 0xd96   : > { %4264 = vmatmul.bf16.gmra.mxu2 %v14467_v8  ;;  %v5811_v18 = vpack.c.bf16 %v5441_v27, %v5439_v26  ;;  %v6379_v33 = vadd.f32 %v12817_v57, %v6378_v4  ;;  %v14472_v4 = vld [vmem:[#allocation244_spill] sm:$0xff] }
 0xd98   : > { %6417 = vmatmul.bf16.gmra.mxu0 %v5811_v18  ;;  %v7028_v22 = vadd.f32 %v14468_v35, %v6379_v33 }
 0xd99   : > { %v4225_v63 = vpop.f32.mrf.mxu2 }
 0xd9a   : > { %v4226_v47 = vadd.f32 %v4225_v63, %v12161_v9 }
 0xd9c   : > { %v5443_v41 = vmax.f32 %v4226_v47, 0.0 }
 0xd9d   : > { %v6380_v20 = vpop.f32.mrf.mxu0 }
 0xd9e   : > { %v6381_v10 = vadd.f32 %v12817_v57, %v6380_v20 }
 0xda0   : > { %v7030_v50 = vadd.f32 %v14469_v0, %v6381_v10 }
 0xda1   : > { %v4227_v38 = vpop.f32.mrf.mxu2 }
 0xda2   : > { %v9241_v39 = vpack.c.bf16 %v7030_v50, %v7028_v22  ;;  %v4228_v36 = vadd.f32 %v4227_v38, %v12161_v9  ;;  %v14473_v22 = vld [vmem:[#allocation57_spill] sm:$0xff] }
 0xda4   : > { %9629 = vst [vmem:[%s12270_s27 + $0x1f0] sm:$0xff] %v9241_v39   ;;  %v5445_v32 = vmax.f32 %v4228_v36, 0.0  ;;  %v14474_v36 = vld [vmem:[#allocation245_spill] sm:$0xff] }
 0xda5   : > { %v6383_v29 = vpop.f32.mrf.mxu0 }
 0xda6   : > { %4269 = vmatmul.bf16.gmra.mxu2 %v14470_v2  ;;  %v5813_v21 = vpack.c.bf16 %v5445_v32, %v5443_v41  ;;  %v6384_v45 = vadd.f32 %v13075_v59, %v6383_v29  ;;  %v14475_v29 = vld [vmem:[#allocation246_spill] sm:$0xff] }
 0xda8   : > { %6422 = vmatmul.bf16.gmra.mxu0 %v5813_v21  ;;  %v7033_v26 = vadd.f32 %v14471_v5, %v6384_v45 }
 0xda9   : > { %v4230_v57 = vpop.f32.mrf.mxu2 }
 0xdaa   : > { %v4231_v27 = vadd.f32 %v4230_v57, %v12161_v9 }
 0xdac   : > { %v5447_v20 = vmax.f32 %v4231_v27, 0.0 }
 0xdad   : > { %v6385_v51 = vpop.f32.mrf.mxu0 }
 0xdae   : > { %v6386_v37 = vadd.f32 %v13075_v59, %v6385_v51 }
 0xdb0   : > { %v7035_v8 = vadd.f32 %v14472_v4, %v6386_v37 }
 0xdb1   : > { %v4232_v18 = vpop.f32.mrf.mxu2 }
 0xdb2   : > { %v9246_v63 = vpack.c.bf16 %v7035_v8, %v7033_v26  ;;  %v4233_v33 = vadd.f32 %v4232_v18, %v12161_v9  ;;  %v14476_v26 = vld [vmem:[#allocation60_spill] sm:$0xff] }
 0xdb4   : > { %9630 = vst [vmem:[%s12270_s27 + $0x1f8] sm:$0xff] %v9246_v63   ;;  %v5449_v10 = vmax.f32 %v4233_v33, 0.0 }
 0xdb5   : > { %v6388_v35 = vpop.f32.mrf.mxu0 }
 0xdb6   : > { %4274 = vmatmul.bf16.gmra.mxu2 %v14473_v22  ;;  %v5815_v47 = vpack.c.bf16 %v5449_v10, %v5447_v20  ;;  %v6389_v50 = vadd.f32 %v13075_v59, %v6388_v35 }
 0xdb8   : > { %6427 = vmatmul.bf16.gmra.mxu0 %v5815_v47  ;;  %v7038_v41 = vadd.f32 %v14474_v36, %v6389_v50 }
 0xdb9   : > { %v4235_v0 = vpop.f32.mrf.mxu2 }
 0xdba   : > { %v4236_v32 = vadd.f32 %v4235_v0, %v12161_v9 }
 0xdbc   : > { %v5451_v51 = vmax.f32 %v4236_v32, 0.0 }
 0xdbd   : > { %v6390_v38 = vpop.f32.mrf.mxu0 }
 0xdbe   : > { %v6391_v39 = vadd.f32 %v13075_v59, %v6390_v38 }
 0xdc0   : > { %v7040_v2 = vadd.f32 %v14475_v29, %v6391_v39  ;;  %v14477_v39 = vld [vmem:[#allocation63_spill] sm:$0xff] }
 0xdc1   : > { %v4237_v21 = vpop.f32.mrf.mxu2 }
 0xdc2   : > { %v9251_v57 = vpack.c.bf16 %v7040_v2, %v7038_v41  ;;  %v4238_v45 = vadd.f32 %v4237_v21, %v12161_v9 }
 0xdc4   : > { %9631 = vst [vmem:[%s12270_s27 + $0x200] sm:$0xff] %v9251_v57   ;;  %v5453_v37 = vmax.f32 %v4238_v45, 0.0  ;;  %v14479_v57 = vld [vmem:[#allocation247_spill] sm:$0xff] }
 0xdc5   : > { %v6393_v5 = vpop.f32.mrf.mxu0 }
 0xdc6   : > { %4279 = vmatmul.bf16.gmra.mxu2 %v14476_v26  ;;  %v5817_v27 = vpack.c.bf16 %v5453_v37, %v5451_v51  ;;  %v6394_v8 = vadd.f32 %v13075_v59, %v6393_v5 }
 0xdc8   : > { %6432 = vmatmul.bf16.gmra.mxu0 %v5817_v27  ;;  %v7043_v33 = vadd.f32 %v12166_v52, %v6394_v8  ;;  %v14480_v8 = vld [vmem:[#allocation66_spill] sm:$0xff] }
 0xdc9   : > { %v4240_v4 = vpop.f32.mrf.mxu2 }
 0xdca   : > { %v4241_v20 = vadd.f32 %v4240_v4, %v12161_v9 }
 0xdcc   : > { %v5455_v0 = vmax.f32 %v4241_v20, 0.0 }
 0xdcd   : > { %v6395_v18 = vpop.f32.mrf.mxu0 }
 0xdce   : > { %v6396_v63 = vadd.f32 %v13075_v59, %v6395_v18 }
 0xdd0   : > { %v7045_v10 = vadd.f32 %v12170_v19, %v6396_v63  ;;  %v14478_v19 = vld [vmem:[#allocation27_spill] sm:$0xff] }
 0xdd1   : > { %v4242_v35 = vpop.f32.mrf.mxu2 }
 0xdd2   : > { %v9256_v22 = vpack.c.bf16 %v7045_v10, %v7043_v33  ;;  %v4243_v47 = vadd.f32 %v4242_v35, %v12161_v9  ;;  %v14481_v35 = vld [vmem:[#allocation248_spill] sm:$0xff] }
 0xdd4   : > { %9632 = vst [vmem:[%s12270_s27 + $0x208] sm:$0xff] %v9256_v22   ;;  %v5457_v50 = vmax.f32 %v4243_v47, 0.0 }
 0xdd5   : > { %v6398_v38 = vpop.f32.mrf.mxu0 }
 0xdd6   : > { %4284 = vmatmul.bf16.gmra.mxu2 %v14477_v39  ;;  %v5819_v36 = vpack.c.bf16 %v5457_v50, %v5455_v0  ;;  %v6399_v52 = vadd.f32 %v13075_v59, %v6398_v38  ;;  %v14482_v0 = vld [vmem:[#allocation32_spill] sm:$0xff] }
 0xdd8   : > { %6437 = vmatmul.bf16.gmra.mxu0 %v5819_v36  ;;  %v7048_v2 = vadd.f32 %v14478_v19, %v6399_v52 }
 0xdd9   : > { %v4245_v41 = vpop.f32.mrf.mxu2 }
 0xdda   : > { %v4246_v21 = vadd.f32 %v4245_v41, %v12161_v9 }
 0xddc   : > { %v5459_v26 = vmax.f32 %v4246_v21, 0.0 }
 0xddd   : > { %v6400_v32 = vpop.f32.mrf.mxu0 }
 0xdde   : > { %v6401_v29 = vadd.f32 %v13075_v59, %v6400_v32 }
 0xde0   : > { %v7050_v45 = vadd.f32 %v14479_v57, %v6401_v29  ;;  %v14483_v29 = vld [vmem:[#allocation69_spill] sm:$0xff] }
 0xde1   : > { %v4247_v51 = vpop.f32.mrf.mxu2 }
 0xde2   : > { %v9261_v37 = vpack.c.bf16 %v7050_v45, %v7048_v2  ;;  %v4248_v5 = vadd.f32 %v4247_v51, %v12161_v9  ;;  %v14484_v51 = vld [vmem:[#allocation249_spill] sm:$0xff] }
 0xde4   : > { %9633 = vst [vmem:[%s12270_s27 + $0x210] sm:$0xff] %v9261_v37   ;;  %v5461_v27 = vmax.f32 %v4248_v5, 0.0 }
 0xde5   : > { %v6403_v4 = vpop.f32.mrf.mxu0 }
 0xde6   : > { %4289 = vmatmul.bf16.gmra.mxu2 %v14480_v8  ;;  %v5821_v18 = vpack.c.bf16 %v5461_v27, %v5459_v26  ;;  %v6404_v33 = vadd.f32 %v13075_v59, %v6403_v4  ;;  %v14485_v26 = vld [vmem:[#allocation35_spill] sm:$0xff] }
 0xde8   : > { %6442 = vmatmul.bf16.gmra.mxu0 %v5821_v18  ;;  %v7053_v22 = vadd.f32 %v14481_v35, %v6404_v33 }
 0xde9   : > { %v4250_v63 = vpop.f32.mrf.mxu2 }
 0xdea   : > { %v4251_v47 = vadd.f32 %v4250_v63, %v12161_v9 }
 0xdec   : > { %v5463_v41 = vmax.f32 %v4251_v47, 0.0 }
 0xded   : > { %v6405_v20 = vpop.f32.mrf.mxu0 }
 0xdee   : > { %v6406_v10 = vadd.f32 %v13075_v59, %v6405_v20 }
 0xdf0   : > { %v7055_v50 = vadd.f32 %v14482_v0, %v6406_v10  ;;  %v14486_v10 = vld [vmem:[#allocation72_spill] sm:$0xff] }
 0xdf1   : > { %v4252_v38 = vpop.f32.mrf.mxu2 }
 0xdf2   : > { %v9266_v39 = vpack.c.bf16 %v7055_v50, %v7053_v22  ;;  %v4253_v36 = vadd.f32 %v4252_v38, %v12161_v9  ;;  %v14487_v38 = vld [vmem:[#allocation250_spill] sm:$0xff] }
 0xdf4   : > { %9634 = vst [vmem:[%s12270_s27 + $0x218] sm:$0xff] %v9266_v39   ;;  %v5465_v52 = vmax.f32 %v4253_v36, 0.0 }
 0xdf5   : > { %v6408_v32 = vpop.f32.mrf.mxu0 }
 0xdf6   : > { %4294 = vmatmul.bf16.gmra.mxu2 %v14483_v29  ;;  %v5823_v19 = vpack.c.bf16 %v5465_v52, %v5463_v41  ;;  %v6409_v21 = vadd.f32 %v13075_v59, %v6408_v32  ;;  %v14488_v41 = vld [vmem:[#allocation38_spill] sm:$0xff] }
 0xdf8   : > { %6447 = vmatmul.bf16.gmra.mxu0 %v5823_v19  ;;  %v7058_v37 = vadd.f32 %v14484_v51, %v6409_v21 }
 0xdf9   : > { %v4255_v2 = vpop.f32.mrf.mxu2 }
 0xdfa   : > { %v4256_v5 = vadd.f32 %v4255_v2, %v12161_v9 }
 0xdfc   : > { %v5467_v63 = vmax.f32 %v4256_v5, 0.0 }
 0xdfd   : > { %v6410_v57 = vpop.f32.mrf.mxu0 }
 0xdfe   : > { %v6411_v45 = vadd.f32 %v13075_v59, %v6410_v57 }
 0xe00   : > { %v7060_v27 = vadd.f32 %v14485_v26, %v6411_v45  ;;  %v14489_v45 = vld [vmem:[#allocation75_spill] sm:$0xff] }
 0xe01   : > { %v4257_v4 = vpop.f32.mrf.mxu2 }
 0xe02   : > { %v9271_v8 = vpack.c.bf16 %v7060_v27, %v7058_v37  ;;  %v4258_v18 = vadd.f32 %v4257_v4, %v12161_v9  ;;  %v14490_v4 = vld [vmem:[#allocation251_spill] sm:$0xff] }
 0xe04   : > { %9635 = vst [vmem:[%s12270_s27 + $0x220] sm:$0xff] %v9271_v8   ;;  %v5469_v33 = vmax.f32 %v4258_v18, 0.0 }
 0xe05   : > { %v6413_v20 = vpop.f32.mrf.mxu0 }
 0xe06   : > { %4299 = vmatmul.bf16.gmra.mxu2 %v14486_v10  ;;  %v5825_v35 = vpack.c.bf16 %v5469_v33, %v5467_v63  ;;  %v6414_v47 = vadd.f32 %v13075_v59, %v6413_v20  ;;  %v14491_v63 = vld [vmem:[#allocation41_spill] sm:$0xff] }
 0xe08   : > { %6452 = vmatmul.bf16.gmra.mxu0 %v5825_v35  ;;  %v7063_v39 = vadd.f32 %v14487_v38, %v6414_v47 }
 0xe09   : > { %v4260_v22 = vpop.f32.mrf.mxu2 }
 0xe0a   : > { %v4261_v36 = vadd.f32 %v4260_v22, %v12161_v9 }
 0xe0c   : > { %v5471_v2 = vmax.f32 %v4261_v36, 0.0 }
 0xe0d   : > { %v6415_v0 = vpop.f32.mrf.mxu0 }
 0xe0e   : > { %v6416_v50 = vadd.f32 %v13075_v59, %v6415_v0 }
 0xe10   : > { %v7065_v52 = vadd.f32 %v14488_v41, %v6416_v50  ;;  %v14492_v50 = vld [vmem:[#allocation78_spill] sm:$0xff] }
 0xe11   : > { %v4262_v32 = vpop.f32.mrf.mxu2 }
 0xe12   : > { %v9276_v29 = vpack.c.bf16 %v7065_v52, %v7063_v39  ;;  %v4263_v19 = vadd.f32 %v4262_v32, %v12161_v9  ;;  %v14493_v32 = vld [vmem:[#allocation252_spill] sm:$0xff] }
 0xe14   : > { %9636 = vst [vmem:[%s12270_s27 + $0x228] sm:$0xff] %v9276_v29   ;;  %v5473_v21 = vmax.f32 %v4263_v19, 0.0 }
 0xe15   : > { %v6418_v57 = vpop.f32.mrf.mxu0 }
 0xe16   : > { %4304 = vmatmul.bf16.gmra.mxu2 %v14489_v45  ;;  %v5827_v51 = vpack.c.bf16 %v5473_v21, %v5471_v2  ;;  %v6419_v5 = vadd.f32 %v13075_v59, %v6418_v57  ;;  %v14494_v2 = vld [vmem:[#allocation44_spill] sm:$0xff] }
 0xe18   : > { %6457 = vmatmul.bf16.gmra.mxu0 %v5827_v51  ;;  %v7068_v8 = vadd.f32 %v14490_v4, %v6419_v5 }
 0xe19   : > { %v4265_v37 = vpop.f32.mrf.mxu2 }
 0xe1a   : > { %v4266_v18 = vadd.f32 %v4265_v37, %v12161_v9 }
 0xe1c   : > { %v5475_v22 = vmax.f32 %v4266_v18, 0.0 }
 0xe1d   : > { %v6420_v26 = vpop.f32.mrf.mxu0 }
 0xe1e   : > { %v6421_v27 = vadd.f32 %v13075_v59, %v6420_v26 }
 0xe20   : > { %v7070_v33 = vadd.f32 %v14491_v63, %v6421_v27  ;;  %v14495_v27 = vld [vmem:[#allocation81_spill] sm:$0xff] }
 0xe21   : > { %v4267_v20 = vpop.f32.mrf.mxu2 }
 0xe22   : > { %v9281_v10 = vpack.c.bf16 %v7070_v33, %v7068_v8  ;;  %v4268_v35 = vadd.f32 %v4267_v20, %v12161_v9  ;;  %v14496_v20 = vld [vmem:[#allocation253_spill] sm:$0xff] }
 0xe24   : > { %9637 = vst [vmem:[%s12270_s27 + $0x230] sm:$0xff] %v9281_v10   ;;  %v5477_v47 = vmax.f32 %v4268_v35, 0.0 }
 0xe25   : > { %v6423_v0 = vpop.f32.mrf.mxu0 }
 0xe26   : > { %4309 = vmatmul.bf16.gmra.mxu2 %v14492_v50  ;;  %v5829_v38 = vpack.c.bf16 %v5477_v47, %v5475_v22  ;;  %v6424_v36 = vadd.f32 %v13075_v59, %v6423_v0  ;;  %v14497_v22 = vld [vmem:[#allocation47_spill] sm:$0xff] }
 0xe28   : > { %6462 = vmatmul.bf16.gmra.mxu0 %v5829_v38  ;;  %v7073_v29 = vadd.f32 %v14493_v32, %v6424_v36 }
 0xe29   : > { %v4270_v39 = vpop.f32.mrf.mxu2 }
 0xe2a   : > { %v4271_v19 = vadd.f32 %v4270_v39, %v12161_v9 }
 0xe2c   : > { %v5479_v37 = vmax.f32 %v4271_v19, 0.0 }
 0xe2d   : > { %v6425_v41 = vpop.f32.mrf.mxu0 }
 0xe2e   : > { %v6426_v52 = vadd.f32 %v13075_v59, %v6425_v41 }
 0xe30   : > { %v7075_v21 = vadd.f32 %v14494_v2, %v6426_v52  ;;  %v14498_v52 = vld [vmem:[#allocation84_spill] sm:$0xff] }
 0xe31   : > { %v4272_v57 = vpop.f32.mrf.mxu2 }
 0xe32   : > { %v9286_v45 = vpack.c.bf16 %v7075_v21, %v7073_v29  ;;  %v4273_v51 = vadd.f32 %v4272_v57, %v12161_v9  ;;  %v14499_v57 = vld [vmem:[#allocation254_spill] sm:$0xff] }
 0xe34   : > { %9638 = vst [vmem:[%s12270_s27 + $0x238] sm:$0xff] %v9286_v45   ;;  %v5481_v5 = vmax.f32 %v4273_v51, 0.0 }
 0xe35   : > { %v6428_v26 = vpop.f32.mrf.mxu0 }
 0xe36   : > { %4314 = vmatmul.bf16.gmra.mxu2 %v14495_v27  ;;  %v5831_v4 = vpack.c.bf16 %v5481_v5, %v5479_v37  ;;  %v6429_v18 = vadd.f32 %v13075_v59, %v6428_v26  ;;  %v14500_v37 = vld [vmem:[#allocation50_spill] sm:$0xff] }
 0xe38   : > { %6467 = vmatmul.bf16.gmra.mxu0 %v5831_v4  ;;  %v7078_v10 = vadd.f32 %v14496_v20, %v6429_v18 }
 0xe39   : > { %v4275_v8 = vpop.f32.mrf.mxu2 }
 0xe3a   : > { %v4276_v35 = vadd.f32 %v4275_v8, %v12161_v9 }
 0xe3c   : > { %v5483_v39 = vmax.f32 %v4276_v35, 0.0 }
 0xe3d   : > { %v6430_v63 = vpop.f32.mrf.mxu0 }
 0xe3e   : > { %v6431_v33 = vadd.f32 %v13075_v59, %v6430_v63 }
 0xe40   : > { %v7080_v47 = vadd.f32 %v14497_v22, %v6431_v33  ;;  %v14501_v33 = vld [vmem:[#allocation87_spill] sm:$0xff] }
 0xe41   : > { %v4277_v0 = vpop.f32.mrf.mxu2 }
 0xe42   : > { %v9291_v50 = vpack.c.bf16 %v7080_v47, %v7078_v10  ;;  %v4278_v38 = vadd.f32 %v4277_v0, %v12161_v9  ;;  %v14502_v0 = vld [vmem:[#allocation170_spill] sm:$0xff] }
 0xe44   : > { %9639 = vst [vmem:[%s12270_s27 + $0x240] sm:$0xff] %v9291_v50   ;;  %v5485_v36 = vmax.f32 %v4278_v38, 0.0 }
 0xe45   : > { %v6433_v41 = vpop.f32.mrf.mxu0 }
 0xe46   : > { %4319 = vmatmul.bf16.gmra.mxu2 %v14498_v52  ;;  %v5833_v32 = vpack.c.bf16 %v5485_v36, %v5483_v39  ;;  %v6434_v19 = vadd.f32 %v13075_v59, %v6433_v41  ;;  %v14503_v39 = vld [vmem:[#allocation171_spill] sm:$0xff] }
 0xe48   : > { %6472 = vmatmul.bf16.gmra.mxu0 %v5833_v32  ;;  %v7083_v45 = vadd.f32 %v14499_v57, %v6434_v19 }
 0xe49   : > { %v4280_v29 = vpop.f32.mrf.mxu2 }
 0xe4a   : > { %v4281_v51 = vadd.f32 %v4280_v29, %v12161_v9 }
 0xe4c   : > { %v5487_v8 = vmax.f32 %v4281_v51, 0.0 }
 0xe4d   : > { %v6435_v2 = vpop.f32.mrf.mxu0 }
 0xe4e   : > { %v6436_v21 = vadd.f32 %v13075_v59, %v6435_v2 }
 0xe50   : > { %v7085_v5 = vadd.f32 %v14500_v37, %v6436_v21  ;;  %v14504_v21 = vld [vmem:[#allocation90_spill] sm:$0xff] }
 0xe51   : > { %v4282_v26 = vpop.f32.mrf.mxu2 }
 0xe52   : > { %v9296_v27 = vpack.c.bf16 %v7085_v5, %v7083_v45  ;;  %v4283_v4 = vadd.f32 %v4282_v26, %v12161_v9 }
 0xe54   : > { %9640 = vst [vmem:[%s12270_s27 + $0x248] sm:$0xff] %v9296_v27   ;;  %v5489_v18 = vmax.f32 %v4283_v4, 0.0  ;;  %v14505_v4 = vld [vmem:[#allocation53_spill] sm:$0xff] }
 0xe55   : > { %v6438_v63 = vpop.f32.mrf.mxu0 }
 0xe56   : > { %4324 = vmatmul.bf16.gmra.mxu2 %v14501_v33  ;;  %v5835_v20 = vpack.c.bf16 %v5489_v18, %v5487_v8  ;;  %v6439_v35 = vadd.f32 %v13075_v59, %v6438_v63 }
 0xe58   : > { %6477 = vmatmul.bf16.gmra.mxu0 %v5835_v20  ;;  %v7088_v50 = vadd.f32 %v14502_v0, %v6439_v35 }
 0xe59   : > { %v4285_v10 = vpop.f32.mrf.mxu2 }
 0xe5a   : > { %v4286_v38 = vadd.f32 %v4285_v10, %v12161_v9 }
 0xe5c   : > { %v5491_v29 = vmax.f32 %v4286_v38, 0.0 }
 0xe5d   : > { %v6440_v22 = vpop.f32.mrf.mxu0 }
 0xe5e   : > { %v6441_v47 = vadd.f32 %v13075_v59, %v6440_v22  ;;  %v14506_v22 = vld [vmem:[#allocation93_spill] sm:$0xff] }
 0xe60   : > { %v7090_v36 = vadd.f32 %v14503_v39, %v6441_v47 }
 0xe61   : > { %v4287_v41 = vpop.f32.mrf.mxu2 }
 0xe62   : > { %v9301_v52 = vpack.c.bf16 %v7090_v36, %v7088_v50  ;;  %v4288_v32 = vadd.f32 %v4287_v41, %v12161_v9  ;;  %v14507_v41 = vld [vmem:[#allocation172_spill] sm:$0xff] }
 0xe64   : > { %9641 = vst [vmem:[%s12270_s27 + $0x250] sm:$0xff] %v9301_v52   ;;  %v5493_v19 = vmax.f32 %v4288_v32, 0.0 }
 0xe65   : > { %v6443_v2 = vpop.f32.mrf.mxu0 }
 0xe66   : > { %4329 = vmatmul.bf16.gmra.mxu2 %v14504_v21  ;;  %v5837_v57 = vpack.c.bf16 %v5493_v19, %v5491_v29  ;;  %v6444_v51 = vadd.f32 %v13075_v59, %v6443_v2 }
 0xe68   : > { %6482 = vmatmul.bf16.gmra.mxu0 %v5837_v57  ;;  %v7093_v26 = vadd.f32 %v12285_v23, %v6444_v51 }
 0xe69   : > { %v4290_v45 = vpop.f32.mrf.mxu2 }
 0xe6a   : > { %v4291_v27 = vadd.f32 %v4290_v45, %v12161_v9  ;;  %v14508_v45 = vld [vmem:[#allocation96_spill] sm:$0xff] }
 0xe6c   : > { %v5495_v20 = vmax.f32 %v4291_v27, 0.0  ;;  %v14509_v27 = vld [vmem:[#allocation174_spill] sm:$0xff] }
 0xe6d   : > { %v6445_v37 = vpop.f32.mrf.mxu0 }
 0xe6e   : > { %v6446_v5 = vadd.f32 %v13075_v59, %v6445_v37 }
 0xe70   : > { %v7095_v8 = vadd.f32 %v14505_v4, %v6446_v5 }
 0xe71   : > { %v4292_v18 = vpop.f32.mrf.mxu2 }
 0xe72   : > { %v9306_v63 = vpack.c.bf16 %v7095_v8, %v7093_v26  ;;  %v4293_v33 = vadd.f32 %v4292_v18, %v12161_v9  ;;  %v14510_v18 = vld [vmem:[#allocation56_spill] sm:$0xff] }
 0xe74   : > { %9642 = vst [vmem:[%s12270_s27 + $0x258] sm:$0xff] %v9306_v63   ;;  %v5497_v10 = vmax.f32 %v4293_v33, 0.0 }
 0xe75   : > { %v6448_v35 = vpop.f32.mrf.mxu0 }
 0xe76   : > { %4334 = vmatmul.bf16.gmra.mxu2 %v14506_v22  ;;  %v5839_v47 = vpack.c.bf16 %v5497_v10, %v5495_v20  ;;  %v6449_v23 = vadd.f32 %v13075_v59, %v6448_v35 }
 0xe78   : > { %6487 = vmatmul.bf16.gmra.mxu0 %v5839_v47  ;;  %v7098_v39 = vadd.f32 %v12300_v13, %v6449_v23 }
 0xe79   : > { %v4295_v0 = vpop.f32.mrf.mxu2 }
 0xe7a   : > { %v4296_v36 = vadd.f32 %v4295_v0, %v12161_v9  ;;  %v14511_v0 = vld [vmem:[#allocation99_spill] sm:$0xff] }
 0xe7c   : > { %v5499_v2 = vmax.f32 %v4296_v36, 0.0 }
 0xe7d   : > { %v6450_v50 = vpop.f32.mrf.mxu0 }
 0xe7e   : > { %v6451_v38 = vadd.f32 %v13075_v59, %v6450_v50 }
 0xe80   : > { %v7100_v52 = vadd.f32 %v14507_v41, %v6451_v38  ;;  %v14512_v41 = vld [vmem:[#allocation8_spill] sm:$0xff] }
 0xe81   : > { %v4297_v32 = vpop.f32.mrf.mxu2 }
 0xe82   : > { %v9311_v29 = vpack.c.bf16 %v7100_v52, %v7098_v39  ;;  %v4298_v19 = vadd.f32 %v4297_v32, %v12161_v9 }
 0xe84   : > { %9643 = vst [vmem:[%s12270_s27 + $0x260] sm:$0xff] %v9311_v29   ;;  %v5501_v21 = vmax.f32 %v4298_v19, 0.0  ;;  %v14513_v29 = vld [vmem:[#allocation175_spill] sm:$0xff] }
 0xe85   : > { %v6453_v57 = vpop.f32.mrf.mxu0 }
 0xe86   : > { %4339 = vmatmul.bf16.gmra.mxu2 %v14508_v45  ;;  %v5841_v51 = vpack.c.bf16 %v5501_v21, %v5499_v2  ;;  %v6454_v13 = vadd.f32 %v13075_v59, %v6453_v57 }
 0xe88   : > { %6492 = vmatmul.bf16.gmra.mxu0 %v5841_v51  ;;  %v7103_v4 = vadd.f32 %v14509_v27, %v6454_v13  ;;  %v14514_v13 = vld [vmem:[#allocation102_spill] sm:$0xff] }
 0xe89   : > { %v4300_v37 = vpop.f32.mrf.mxu2 }
 0xe8a   : > { %v4301_v8 = vadd.f32 %v4300_v37, %v12161_v9 }
 0xe8c   : > { %v5503_v35 = vmax.f32 %v4301_v8, 0.0 }
 0xe8d   : > { %v6455_v5 = vpop.f32.mrf.mxu0 }
 0xe8e   : > { %v6456_v26 = vadd.f32 %v13075_v59, %v6455_v5 }
 0xe90   : > { %v7105_v63 = vadd.f32 %v14510_v18, %v6456_v26  ;;  %v14515_v18 = vld [vmem:[#allocation59_spill] sm:$0xff] }
 0xe91   : > { %v4302_v33 = vpop.f32.mrf.mxu2 }
 0xe92   : > { %v9316_v20 = vpack.c.bf16 %v7105_v63, %v7103_v4  ;;  %v4303_v10 = vadd.f32 %v4302_v33, %v12161_v9 }
 0xe94   : > { %9644 = vst [vmem:[%s12270_s27 + $0x268] sm:$0xff] %v9316_v20   ;;  %v5505_v22 = vmax.f32 %v4303_v10, 0.0  ;;  %v14516_v20 = vld [vmem:[#allocation11_spill] sm:$0xff] }
 0xe95   : > { %v6458_v47 = vpop.f32.mrf.mxu0 }
 0xe96   : > { %4344 = vmatmul.bf16.gmra.mxu2 %v14511_v0  ;;  %v5843_v23 = vpack.c.bf16 %v5505_v22, %v5503_v35  ;;  %v6459_v38 = vadd.f32 %v13075_v59, %v6458_v47 }
 0xe98   : > { %6497 = vmatmul.bf16.gmra.mxu0 %v5843_v23  ;;  %v7108_v52 = vadd.f32 %v14512_v41, %v6459_v38  ;;  %v14517_v38 = vld [vmem:[#allocation105_spill] sm:$0xff] }
 0xe99   : > { %v4305_v50 = vpop.f32.mrf.mxu2 }
 0xe9a   : > { %v4306_v32 = vadd.f32 %v4305_v50, %v12161_v9 }
 0xe9c   : > { %v5507_v45 = vmax.f32 %v4306_v32, 0.0 }
 0xe9d   : > { %v6460_v39 = vpop.f32.mrf.mxu0 }
 0xe9e   : > { %v6461_v36 = vadd.f32 %v13075_v59, %v6460_v39 }
 0xea0   : > { %v7110_v19 = vadd.f32 %v14513_v29, %v6461_v36 }
 0xea1   : > { %v4307_v2 = vpop.f32.mrf.mxu2 }
 0xea2   : > { %v9321_v21 = vpack.c.bf16 %v7110_v19, %v7108_v52  ;;  %v4308_v57 = vadd.f32 %v4307_v2, %v12161_v9  ;;  %v14518_v2 = vld [vmem:[#allocation176_spill] sm:$0xff] }
 0xea4   : > { %9645 = vst [vmem:[%s12270_s27 + $0x270] sm:$0xff] %v9321_v21   ;;  %v5509_v51 = vmax.f32 %v4308_v57, 0.0 }
 0xea5   : > { %v6463_v37 = vpop.f32.mrf.mxu0 }
 0xea6   : > { %4349 = vmatmul.bf16.gmra.mxu2 %v14514_v13  ;;  %v5845_v5 = vpack.c.bf16 %v5509_v51, %v5507_v45  ;;  %v6464_v27 = vadd.f32 %v13075_v59, %v6463_v37 }
 0xea8   : > { %6502 = vmatmul.bf16.gmra.mxu0 %v5845_v5  ;;  %v7113_v63 = vadd.f32 %v14515_v18, %v6464_v27 }
 0xea9   : > { %v4310_v26 = vpop.f32.mrf.mxu2 }
 0xeaa   : > { %v4311_v33 = vadd.f32 %v4310_v26, %v12161_v9  ;;  %v14519_v26 = vld [vmem:[#allocation108_spill] sm:$0xff] }
 0xeac   : > { %v5511_v0 = vmax.f32 %v4311_v33, 0.0 }
 0xead   : > { %v6465_v4 = vpop.f32.mrf.mxu0 }
 0xeae   : > { %v6466_v8 = vadd.f32 %v13075_v59, %v6465_v4 }
 0xeb0   : > { %v7115_v10 = vadd.f32 %v14516_v20, %v6466_v8  ;;  %v14520_v20 = vld [vmem:[#allocation62_spill] sm:$0xff] }
 0xeb1   : > { %v4312_v35 = vpop.f32.mrf.mxu2 }
 0xeb2   : > { %v9326_v22 = vpack.c.bf16 %v7115_v10, %v7113_v63  ;;  %v4313_v47 = vadd.f32 %v4312_v35, %v12161_v9 }
 0xeb4   : > { %9646 = vst [vmem:[%s12270_s27 + $0x278] sm:$0xff] %v9326_v22   ;;  %v5513_v23 = vmax.f32 %v4313_v47, 0.0 }
 0xeb5   : > { %v6468_v50 = vpop.f32.mrf.mxu0 }
 0xeb6   : > { %4354 = vmatmul.bf16.gmra.mxu2 %v14517_v38  ;;  %v5847_v39 = vpack.c.bf16 %v5513_v23, %v5511_v0  ;;  %v6469_v41 = vadd.f32 %v13075_v59, %v6468_v50  ;;  %v14521_v38 = vld [vmem:[#allocation111_spill] sm:$0xff] }
 0xeb8   : > { %6507 = vmatmul.bf16.gmra.mxu0 %v5847_v39  ;;  %v7118_v29 = vadd.f32 %v12360_v60, %v6469_v41 }
 0xeb9   : > { %v4315_v36 = vpop.f32.mrf.mxu2 }
 0xeba   : > { %v4316_v19 = vadd.f32 %v4315_v36, %v12161_v9 }
 0xebc   : > { %v5515_v37 = vmax.f32 %v4316_v19, 0.0  ;;  %v14522_v19 = vld [vmem:[#allocation14_spill] sm:$0xff] }
 0xebd   : > { %v6470_v52 = vpop.f32.mrf.mxu0 }
 0xebe   : > { %v6471_v32 = vadd.f32 %v13075_v59, %v6470_v52 }
 0xec0   : > { %v7120_v21 = vadd.f32 %v14518_v2, %v6471_v32 }
 0xec1   : > { %v4317_v57 = vpop.f32.mrf.mxu2 }
 0xec2   : > { %v9331_v45 = vpack.c.bf16 %v7120_v21, %v7118_v29  ;;  %v4318_v51 = vadd.f32 %v4317_v57, %v12161_v9 }
 0xec4   : > { %9647 = vst [vmem:[%s12270_s27 + $0x280] sm:$0xff] %v9331_v45   ;;  %v5517_v13 = vmax.f32 %v4318_v51, 0.0 }
 0xec5   : > { %v6473_v5 = vpop.f32.mrf.mxu0 }
 0xec6   : > { %4359 = vmatmul.bf16.gmra.mxu2 %v14519_v26  ;;  %v5849_v27 = vpack.c.bf16 %v5517_v13, %v5515_v37  ;;  %v6474_v60 = vadd.f32 %v13075_v59, %v6473_v5  ;;  %v14523_v5 = vld [vmem:[#allocation114_spill] sm:$0xff] }
 0xec8   : > { %6512 = vmatmul.bf16.gmra.mxu0 %v5849_v27  ;;  %v7123_v63 = vadd.f32 %v12375_v7, %v6474_v60 }
 0xec9   : > { %v4320_v4 = vpop.f32.mrf.mxu2 }
 0xeca   : > { %v4321_v33 = vadd.f32 %v4320_v4, %v12161_v9 }
 0xecc   : > { %v5519_v0 = vmax.f32 %v4321_v33, 0.0 }
 0xecd   : > { %v6475_v8 = vpop.f32.mrf.mxu0 }
 0xece   : > { %v6476_v18 = vadd.f32 %v13075_v59, %v6475_v8 }
 0xed0   : > { %v7125_v10 = vadd.f32 %v14520_v20, %v6476_v18 }
 0xed1   : > { %v4322_v35 = vpop.f32.mrf.mxu2 }
 0xed2   : > { %v9336_v22 = vpack.c.bf16 %v7125_v10, %v7123_v63  ;;  %v4323_v47 = vadd.f32 %v4322_v35, %v12161_v9  ;;  %v14524_v63 = vld [vmem:[#allocation177_spill] sm:$0xff] }
 0xed4   : > { %9648 = vst [vmem:[%s12270_s27 + $0x288] sm:$0xff] %v9336_v22   ;;  %v5521_v23 = vmax.f32 %v4323_v47, 0.0 }
 0xed5   : > { %v6478_v50 = vpop.f32.mrf.mxu0 }
 0xed6   : > { %4364 = vmatmul.bf16.gmra.mxu2 %v14521_v38  ;;  %v5851_v39 = vpack.c.bf16 %v5521_v23, %v5519_v0  ;;  %v6479_v7 = vadd.f32 %v13075_v59, %v6478_v50  ;;  %v14525_v23 = vld [vmem:[#allocation117_spill] sm:$0xff] }
 0xed8   : > { %6517 = vmatmul.bf16.gmra.mxu0 %v5851_v39  ;;  %v7128_v32 = vadd.f32 %v12390_v56, %v6479_v7 }
 0xed9   : > { %v4325_v36 = vpop.f32.mrf.mxu2 }
 0xeda   : > { %v4326_v29 = vadd.f32 %v4325_v36, %v12161_v9 }
 0xedc   : > { %v5523_v51 = vmax.f32 %v4326_v29, 0.0 }
 0xedd   : > { %v6480_v41 = vpop.f32.mrf.mxu0 }
 0xede   : > { %v6481_v52 = vadd.f32 %v13075_v59, %v6480_v41 }
 0xee0   : > { %v7130_v2 = vadd.f32 %v14522_v19, %v6481_v52  ;;  %v14526_v52 = vld [vmem:[#allocation65_spill] sm:$0xff] }
 0xee1   : > { %v4327_v21 = vpop.f32.mrf.mxu2 }
 0xee2   : > { %v9341_v57 = vpack.c.bf16 %v7130_v2, %v7128_v32  ;;  %v4328_v45 = vadd.f32 %v4327_v21, %v12161_v9 }
 0xee4   : > { %9649 = vst [vmem:[%s12270_s27 + $0x290] sm:$0xff] %v9341_v57   ;;  %v5525_v37 = vmax.f32 %v4328_v45, 0.0 }
 0xee5   : > { %v6483_v13 = vpop.f32.mrf.mxu0 }
 0xee6   : > { %4369 = vmatmul.bf16.gmra.mxu2 %v14523_v5  ;;  %v5853_v26 = vpack.c.bf16 %v5525_v37, %v5523_v51  ;;  %v6484_v56 = vadd.f32 %v13075_v59, %v6483_v13  ;;  %v14527_v51 = vld [vmem:[#allocation120_spill] sm:$0xff] }
 0xee8   : > { %6522 = vmatmul.bf16.gmra.mxu0 %v5853_v26  ;;  %v7133_v8 = vadd.f32 %v12405_v30, %v6484_v56 }
 0xee9   : > { %v4330_v27 = vpop.f32.mrf.mxu2 }
 0xeea   : > { %v4331_v18 = vadd.f32 %v4330_v27, %v12161_v9 }
 0xeec   : > { %v5527_v22 = vmax.f32 %v4331_v18, 0.0 }
 0xeed   : > { %v6485_v4 = vpop.f32.mrf.mxu0 }
 0xeee   : > { %v6486_v60 = vadd.f32 %v13075_v59, %v6485_v4  ;;  %v14528_v4 = vld [vmem:[#allocation17_spill] sm:$0xff] }
 0xef0   : > { %v7135_v33 = vadd.f32 %v14524_v63, %v6486_v60 }
 0xef1   : > { %v4332_v20 = vpop.f32.mrf.mxu2 }
 0xef2   : > { %v9346_v10 = vpack.c.bf16 %v7135_v33, %v7133_v8  ;;  %v4333_v35 = vadd.f32 %v4332_v20, %v12161_v9 }
 0xef4   : > { %9650 = vst [vmem:[%s12270_s27 + $0x298] sm:$0xff] %v9346_v10   ;;  %v5529_v47 = vmax.f32 %v4333_v35, 0.0  ;;  %v14529_v35 = vld [vmem:[#allocation123_spill] sm:$0xff] }
 0xef5   : > { %v6488_v0 = vpop.f32.mrf.mxu0 }
 0xef6   : > { %4374 = vmatmul.bf16.gmra.mxu2 %v14525_v23  ;;  %v5855_v50 = vpack.c.bf16 %v5529_v47, %v5527_v22  ;;  %v6489_v30 = vadd.f32 %v13075_v59, %v6488_v0 }
 0xef8   : > { %6527 = vmatmul.bf16.gmra.mxu0 %v5855_v50  ;;  %v7138_v7 = vadd.f32 %v12420_v24, %v6489_v30  ;;  %v14530_v30 = vld [vmem:[#allocation178_spill] sm:$0xff] }
 0xef9   : > { %v4335_v38 = vpop.f32.mrf.mxu2 }
 0xefa   : > { %v4336_v41 = vadd.f32 %v4335_v38, %v12161_v9 }
 0xefc   : > { %v5531_v21 = vmax.f32 %v4336_v41, 0.0 }
 0xefd   : > { %v6490_v39 = vpop.f32.mrf.mxu0 }
 0xefe   : > { %v6491_v36 = vadd.f32 %v13075_v59, %v6490_v39 }
 0xf00   : > { %v7140_v32 = vadd.f32 %v14526_v52, %v6491_v36 }
 0xf01   : > { %v4337_v29 = vpop.f32.mrf.mxu2 }
 0xf02   : > { %v9351_v19 = vpack.c.bf16 %v7140_v32, %v7138_v7  ;;  %v4338_v2 = vadd.f32 %v4337_v29, %v12161_v9 }
 0xf04   : > { %9651 = vst [vmem:[%s12270_s27 + $0x2a0] sm:$0xff] %v9351_v19   ;;  %v5533_v57 = vmax.f32 %v4338_v2, 0.0  ;;  %v14531_v19 = vld [vmem:[#allocation126_spill] sm:$0xff] }
 0xf05   : > { %v6493_v45 = vpop.f32.mrf.mxu0 }
 0xf06   : > { %4379 = vmatmul.bf16.gmra.mxu2 %v14527_v51  ;;  %v5857_v37 = vpack.c.bf16 %v5533_v57, %v5531_v21  ;;  %v6494_v24 = vadd.f32 %v13075_v59, %v6493_v45 }
 0xf08   : > { %6532 = vmatmul.bf16.gmra.mxu0 %v5857_v37  ;;  %v7143_v27 = vadd.f32 %v12435_v40, %v6494_v24 }
 0xf09   : > { %v4340_v13 = vpop.f32.mrf.mxu2 }
 0xf0a   : > { %v4341_v56 = vadd.f32 %v4340_v13, %v12161_v9  ;;  %v14532_v13 = vld [vmem:[#allocation68_spill] sm:$0xff] }
 0xf0c   : > { %v5535_v33 = vmax.f32 %v4341_v56, 0.0 }
 0xf0d   : > { %v6495_v5 = vpop.f32.mrf.mxu0 }
 0xf0e   : > { %v6496_v26 = vadd.f32 %v13075_v59, %v6495_v5 }
 0xf10   : > { %v7145_v60 = vadd.f32 %v14528_v4, %v6496_v26 }
 0xf11   : > { %v4342_v8 = vpop.f32.mrf.mxu2 }
 0xf12   : > { %v9356_v18 = vpack.c.bf16 %v7145_v60, %v7143_v27  ;;  %v4343_v63 = vadd.f32 %v4342_v8, %v12161_v9  ;;  %v14533_v8 = vld [vmem:[#allocation129_spill] sm:$0xff] }
 0xf14   : > { %9652 = vst [vmem:[%s12270_s27 + $0x2a8] sm:$0xff] %v9356_v18   ;;  %v5537_v20 = vmax.f32 %v4343_v63, 0.0 }
 0xf15   : > { %v6498_v10 = vpop.f32.mrf.mxu0 }
 0xf16   : > { %4384 = vmatmul.bf16.gmra.mxu2 %v14529_v35  ;;  %v5859_v22 = vpack.c.bf16 %v5537_v20, %v5535_v33  ;;  %v6499_v40 = vadd.f32 %v13075_v59, %v6498_v10 }
 0xf18   : > { %6537 = vmatmul.bf16.gmra.mxu0 %v5859_v22  ;;  %v7148_v50 = vadd.f32 %v12450_v55, %v6499_v40  ;;  %v14534_v22 = vld [vmem:[#allocation20_spill] sm:$0xff] }
 0xf19   : > { %v4345_v47 = vpop.f32.mrf.mxu2 }
 0xf1a   : > { %v4346_v38 = vadd.f32 %v4345_v47, %v12161_v9 }
 0xf1c   : > { %v5539_v52 = vmax.f32 %v4346_v38, 0.0 }
 0xf1d   : > { %v6500_v0 = vpop.f32.mrf.mxu0 }
 0xf1e   : > { %v6501_v23 = vadd.f32 %v13075_v59, %v6500_v0 }
 0xf20   : > { %v7150_v39 = vadd.f32 %v14530_v30, %v6501_v23 }
 0xf21   : > { %v4347_v36 = vpop.f32.mrf.mxu2 }
 0xf22   : > { %v9361_v7 = vpack.c.bf16 %v7150_v39, %v7148_v50  ;;  %v4348_v41 = vadd.f32 %v4347_v36, %v12161_v9  ;;  %v14535_v39 = vld [vmem:[#allocation132_spill] sm:$0xff] }
 0xf24   : > { %9653 = vst [vmem:[%s12270_s27 + $0x2b0] sm:$0xff] %v9361_v7   ;;  %v5541_v32 = vmax.f32 %v4348_v41, 0.0 }
 0xf25   : > { %v6503_v29 = vpop.f32.mrf.mxu0 }
 0xf26   : > { %4389 = vmatmul.bf16.gmra.mxu2 %v14531_v19  ;;  %v5861_v2 = vpack.c.bf16 %v5541_v32, %v5539_v52  ;;  %v6504_v55 = vadd.f32 %v13075_v59, %v6503_v29  ;;  %v14536_v19 = vld [vmem:[#allocation179_spill] sm:$0xff] }
 0xf28   : > { %6542 = vmatmul.bf16.gmra.mxu0 %v5861_v2  ;;  %v7153_v51 = vadd.f32 %v12465_v53, %v6504_v55 }
 0xf29   : > { %v4350_v21 = vpop.f32.mrf.mxu2 }
 0xf2a   : > { %v4351_v37 = vadd.f32 %v4350_v21, %v12161_v9 }
 0xf2c   : > { %v5543_v56 = vmax.f32 %v4351_v37, 0.0 }
 0xf2d   : > { %v6505_v57 = vpop.f32.mrf.mxu0 }
 0xf2e   : > { %v6506_v45 = vadd.f32 %v13075_v59, %v6505_v57 }
 0xf30   : > { %v7155_v24 = vadd.f32 %v14532_v13, %v6506_v45  ;;  %v14537_v13 = vld [vmem:[#allocation135_spill] sm:$0xff] }
 0xf31   : > { %v4352_v5 = vpop.f32.mrf.mxu2 }
 0xf32   : > { %v9366_v26 = vpack.c.bf16 %v7155_v24, %v7153_v51  ;;  %v4353_v27 = vadd.f32 %v4352_v5, %v12161_v9 }
 0xf34   : > { %9654 = vst [vmem:[%s12270_s27 + $0x2b8] sm:$0xff] %v9366_v26   ;;  %v5545_v4 = vmax.f32 %v4353_v27, 0.0 }
 0xf35   : > { %v6508_v60 = vpop.f32.mrf.mxu0 }
 0xf36   : > { %4394 = vmatmul.bf16.gmra.mxu2 %v14533_v8  ;;  %v5863_v18 = vpack.c.bf16 %v5545_v4, %v5543_v56  ;;  %v6509_v53 = vadd.f32 %v13075_v59, %v6508_v60  ;;  %v14538_v60 = vld [vmem:[#allocation71_spill] sm:$0xff] }
 0xf38   : > { %6547 = vmatmul.bf16.gmra.mxu0 %v5863_v18  ;;  %v7158_v10 = vadd.f32 %v12480_v48, %v6509_v53 }
 0xf39   : > { %v4355_v63 = vpop.f32.mrf.mxu2 }
 0xf3a   : > { %v4356_v35 = vadd.f32 %v4355_v63, %v12161_v9 }
 0xf3c   : > { %v5547_v50 = vmax.f32 %v4356_v35, 0.0  ;;  %v14539_v35 = vld [vmem:[#allocation138_spill] sm:$0xff] }
 0xf3d   : > { %v6510_v33 = vpop.f32.mrf.mxu0 }
 0xf3e   : > { %v6511_v20 = vadd.f32 %v13075_v59, %v6510_v33 }
 0xf40   : > { %v7160_v47 = vadd.f32 %v14534_v22, %v6511_v20 }
 0xf41   : > { %v4357_v40 = vpop.f32.mrf.mxu2 }
 0xf42   : > { %v9371_v0 = vpack.c.bf16 %v7160_v47, %v7158_v10  ;;  %v4358_v23 = vadd.f32 %v4357_v40, %v12161_v9 }
 0xf44   : > { %9655 = vst [vmem:[%s12270_s27 + $0x2c0] sm:$0xff] %v9371_v0   ;;  %v5549_v38 = vmax.f32 %v4358_v23, 0.0 }
 0xf45   : > { %v6513_v30 = vpop.f32.mrf.mxu0 }
 0xf46   : > { %4399 = vmatmul.bf16.gmra.mxu2 %v14535_v39  ;;  %v5865_v36 = vpack.c.bf16 %v5549_v38, %v5547_v50  ;;  %v6514_v48 = vadd.f32 %v13075_v59, %v6513_v30  ;;  %v14540_v38 = vld [vmem:[#allocation23_spill] sm:$0xff] }
 0xf48   : > { %6552 = vmatmul.bf16.gmra.mxu0 %v5865_v36  ;;  %v7163_v32 = vadd.f32 %v12495_v3, %v6514_v48 }
 0xf49   : > { %v4360_v7 = vpop.f32.mrf.mxu2 }
 0xf4a   : > { %v4361_v29 = vadd.f32 %v4360_v7, %v12161_v9 }
 0xf4c   : > { %v5551_v45 = vmax.f32 %v4361_v29, 0.0 }
 0xf4d   : > { %v6515_v41 = vpop.f32.mrf.mxu0 }
 0xf4e   : > { %v6516_v52 = vadd.f32 %v13075_v59, %v6515_v41 }
 0xf50   : > { %v7165_v2 = vadd.f32 %v14536_v19, %v6516_v52 }
 0xf51   : > { %v4362_v21 = vpop.f32.mrf.mxu2 }
 0xf52   : > { %v9376_v55 = vpack.c.bf16 %v7165_v2, %v7163_v32  ;;  %v4363_v57 = vadd.f32 %v4362_v21, %v12161_v9  ;;  %v14541_v32 = vld [vmem:[#allocation141_spill] sm:$0xff] }
 0xf54   : > { %9656 = vst [vmem:[%s12270_s27 + $0x2c8] sm:$0xff] %v9376_v55   ;;  %v5553_v51 = vmax.f32 %v4363_v57, 0.0 }
 0xf55   : > { %v6518_v37 = vpop.f32.mrf.mxu0 }
 0xf56   : > { %4404 = vmatmul.bf16.gmra.mxu2 %v14537_v13  ;;  %v5867_v24 = vpack.c.bf16 %v5553_v51, %v5551_v45  ;;  %v6519_v3 = vadd.f32 %v13075_v59, %v6518_v37  ;;  %v14542_v45 = vld [vmem:[#allocation25_spill] sm:$0xff] }
 0xf58   : > { %6557 = vmatmul.bf16.gmra.mxu0 %v5867_v24  ;;  %v7168_v56 = vadd.f32 %v12510_v61, %v6519_v3 }
 0xf59   : > { %v4365_v5 = vpop.f32.mrf.mxu2 }
 0xf5a   : > { %v4366_v4 = vadd.f32 %v4365_v5, %v12161_v9 }
 0xf5c   : > { %v5555_v33 = vmax.f32 %v4366_v4, 0.0 }
 0xf5d   : > { %v6520_v26 = vpop.f32.mrf.mxu0 }
 0xf5e   : > { %v6521_v27 = vadd.f32 %v13075_v59, %v6520_v26 }
 0xf60   : > { %v7170_v8 = vadd.f32 %v14538_v60, %v6521_v27  ;;  %v14543_v27 = vld [vmem:[#allocation144_spill] sm:$0xff] }
 0xf61   : > { %v4367_v18 = vpop.f32.mrf.mxu2 }
 0xf62   : > { %v9381_v63 = vpack.c.bf16 %v7170_v8, %v7168_v56  ;;  %v4368_v53 = vadd.f32 %v4367_v18, %v12161_v9  ;;  %v13321_v8 = vld [vmem:[%s13585_s8] ss:$0 sm:$0xff] }
 0xf64   : > { %9657 = vst [vmem:[%s12270_s27 + $0x2d0] sm:$0xff] %v9381_v63   ;;  %v5557_v20 = vmax.f32 %v4368_v53, 0.0 }
 0xf65   : > { %v6523_v10 = vpop.f32.mrf.mxu0 }
 0xf66   : > { %4409 = vmatmul.bf16.gmra.mxu2 %v14539_v35  ;;  %v5869_v22 = vpack.c.bf16 %v5557_v20, %v5555_v33  ;;  %v6524_v61 = vadd.f32 %v13075_v59, %v6523_v10  ;;  %v14544_v33 = vld [vmem:[#allocation74_spill] sm:$0xff] }
 0xf68   : > { %6562 = vmatmul.bf16.gmra.mxu0 %v5869_v22  ;;  %v7173_v23 = vadd.f32 %v12525_v54, %v6524_v61 }
 0xf69   : > { %v4370_v47 = vpop.f32.mrf.mxu2 }
 0xf6a   : > { %v4371_v50 = vadd.f32 %v4370_v47, %v12161_v9 }
 0xf6c   : > { %v5559_v48 = vmax.f32 %v4371_v50, 0.0 }
 0xf6d   : > { %v6525_v40 = vpop.f32.mrf.mxu0 }
 0xf6e   : > { %v6526_v0 = vadd.f32 %v13075_v59, %v6525_v40  ;;  %v14545_v40 = vld [vmem:[#allocation147_spill] sm:$0xff] }
 0xf70   : > { %v7175_v30 = vadd.f32 %v14540_v38, %v6526_v0 }
 0xf71   : > { %v4372_v39 = vpop.f32.mrf.mxu2 }
 0xf72   : > { %v9386_v36 = vpack.c.bf16 %v7175_v30, %v7173_v23  ;;  %v4373_v7 = vadd.f32 %v4372_v39, %v12161_v9 }
 0xf74   : > { %9658 = vst [vmem:[%s12270_s27 + $0x2d8] sm:$0xff] %v9386_v36   ;;  %v5561_v41 = vmax.f32 %v4373_v7, 0.0  ;;  %v14546_v36 = vld [vmem:[#allocation26_spill] sm:$0xff] }
 0xf75   : > { %v6528_v52 = vpop.f32.mrf.mxu0 }
 0xf76   : > { %4414 = vmatmul.bf16.gmra.mxu2 %v14541_v32  ;;  %v5871_v29 = vpack.c.bf16 %v5561_v41, %v5559_v48  ;;  %v6529_v54 = vadd.f32 %v13075_v59, %v6528_v52 }
 0xf78   : > { %6567 = vmatmul.bf16.gmra.mxu0 %v5871_v29  ;;  %v7178_v55 = vadd.f32 %v12545_v58, %v6529_v54  ;;  %v14547_v54 = vld [vmem:[#allocation150_spill] sm:$0xff] }
 0xf79   : > { %v4375_v19 = vpop.f32.mrf.mxu2 }
 0xf7a   : > { %v4376_v57 = vadd.f32 %v4375_v19, %v12161_v9 }
 0xf7c   : > { %v5563_v5 = vmax.f32 %v4376_v57, 0.0 }
 0xf7d   : > { %v6530_v2 = vpop.f32.mrf.mxu0 }
 0xf7e   : > { %v6531_v21 = vadd.f32 %v13075_v59, %v6530_v2 }
 0xf80   : > { %v7180_v51 = vadd.f32 %v14542_v45, %v6531_v21  ;;  %v14548_v45 = vld [vmem:[#allocation28_spill] sm:$0xff] }
 0xf81   : > { %v4377_v37 = vpop.f32.mrf.mxu2 }
 0xf82   : > { %v9391_v13 = vpack.c.bf16 %v7180_v51, %v7178_v55  ;;  %v4378_v24 = vadd.f32 %v4377_v37, %v12161_v9 }
 0xf84   : > { %9659 = vst [vmem:[%s12270_s27 + $0x2e0] sm:$0xff] %v9391_v13   ;;  %v5565_v3 = vmax.f32 %v4378_v24, 0.0  ;;  %v14549_v13 = vld [vmem:[#allocation77_spill] sm:$0xff] }
 0xf85   : > { %v6533_v26 = vpop.f32.mrf.mxu0 }
 0xf86   : > { %4419 = vmatmul.bf16.gmra.mxu2 %v14543_v27  ;;  %v5873_v56 = vpack.c.bf16 %v5565_v3, %v5563_v5  ;;  %v6534_v58 = vadd.f32 %v13075_v59, %v6533_v26 }
 0xf88   : > { %6572 = vmatmul.bf16.gmra.mxu0 %v5873_v56  ;;  %v7183_v63 = vadd.f32 %v12560_v49, %v6534_v58  ;;  %v14550_v58 = vld [vmem:[#allocation153_spill] sm:$0xff] }
 0xf89   : > { %v4380_v4 = vpop.f32.mrf.mxu2 }
 0xf8a   : > { %v4381_v53 = vadd.f32 %v4380_v4, %v12161_v9 }
 0xf8c   : > { %v5567_v47 = vmax.f32 %v4381_v53, 0.0 }
 0xf8d   : > { %v6535_v60 = vpop.f32.mrf.mxu0 }
 0xf8e   : > { %v6536_v18 = vadd.f32 %v13321_v8, %v6535_v60 }
 0xf90   : > { %v7185_v20 = vadd.f32 %v14544_v33, %v6536_v18 }
 0xf91   : > { %v4382_v10 = vpop.f32.mrf.mxu2 }
 0xf92   : > { %v9396_v35 = vpack.c.bf16 %v7185_v20, %v7183_v63  ;;  %v4383_v22 = vadd.f32 %v4382_v10, %v12161_v9 }
 0xf94   : > { %9660 = vst [vmem:[%s12270_s27 + $0x2e8] sm:$0xff] %v9396_v35   ;;  %v5569_v59 = vmax.f32 %v4383_v22, 0.0  ;;  %v14551_v35 = vld [vmem:[#allocation29_spill] sm:$0xff] }
 0xf95   : > { %v6538_v61 = vpop.f32.mrf.mxu0 }
 0xf96   : > { %4424 = vmatmul.bf16.gmra.mxu2 %v14545_v40  ;;  %v5875_v0 = vpack.c.bf16 %v5569_v59, %v5567_v47  ;;  %v6539_v49 = vadd.f32 %v13321_v8, %v6538_v61 }
 0xf98   : > { %6577 = vmatmul.bf16.gmra.mxu0 %v5875_v0  ;;  %v7188_v30 = vadd.f32 %v12575_v14, %v6539_v49  ;;  %v14552_v49 = vld [vmem:[#allocation156_spill] sm:$0xff] }
 0xf99   : > { %v4385_v23 = vpop.f32.mrf.mxu2 }
 0xf9a   : > { %v4386_v39 = vadd.f32 %v4385_v23, %v12161_v9 }
 0xf9c   : > { %v5571_v32 = vmax.f32 %v4386_v39, 0.0 }
 0xf9d   : > { %v6540_v50 = vpop.f32.mrf.mxu0 }
 0xf9e   : > { %v6541_v38 = vadd.f32 %v13321_v8, %v6540_v50 }
 0xfa0   : > { %v7190_v7 = vadd.f32 %v14546_v36, %v6541_v38 }
 0xfa1   : > { %v4387_v48 = vpop.f32.mrf.mxu2 }
 0xfa2   : > { %v9401_v41 = vpack.c.bf16 %v7190_v7, %v7188_v30  ;;  %v4388_v52 = vadd.f32 %v4387_v48, %v12161_v9  ;;  %v14553_v48 = vld [vmem:[#allocation180_spill] sm:$0xff] }
 0xfa4   : > { %9661 = vst [vmem:[%s12270_s27 + $0x2f0] sm:$0xff] %v9401_v41   ;;  %v5573_v29 = vmax.f32 %v4388_v52, 0.0 }
 0xfa5   : > { %v6543_v19 = vpop.f32.mrf.mxu0 }
 0xfa6   : > { %4429 = vmatmul.bf16.gmra.mxu2 %v14547_v54  ;;  %v5877_v2 = vpack.c.bf16 %v5573_v29, %v5571_v32  ;;  %v6544_v14 = vadd.f32 %v13321_v8, %v6543_v19 }
 0xfa8   : > { %6582 = vmatmul.bf16.gmra.mxu0 %v5877_v2  ;;  %v7193_v51 = vadd.f32 %v14548_v45, %v6544_v14 }
 0xfa9   : > { %v4390_v21 = vpop.f32.mrf.mxu2 }
 0xfaa   : > { %v4391_v37 = vadd.f32 %v4390_v21, %v12161_v9  ;;  %v14554_v21 = vld [vmem:[#allocation159_spill] sm:$0xff] }
 0xfac   : > { %v5575_v27 = vmax.f32 %v4391_v37, 0.0 }
 0xfad   : > { %v6545_v55 = vpop.f32.mrf.mxu0 }
 0xfae   : > { %v6546_v57 = vadd.f32 %v13321_v8, %v6545_v55 }
 0xfb0   : > { %v7195_v24 = vadd.f32 %v14549_v13, %v6546_v57  ;;  %v14555_v13 = vld [vmem:[#allocation80_spill] sm:$0xff] }
 0xfb1   : > { %v4392_v5 = vpop.f32.mrf.mxu2 }
 0xfb2   : > { %v9406_v3 = vpack.c.bf16 %v7195_v24, %v7193_v51  ;;  %v4393_v26 = vadd.f32 %v4392_v5, %v12161_v9 }
 0xfb4   : > { %9662 = vst [vmem:[%s12270_s27 + $0x2f8] sm:$0xff] %v9406_v3   ;;  %v5577_v56 = vmax.f32 %v4393_v26, 0.0 }
 0xfb5   : > { %v6548_v4 = vpop.f32.mrf.mxu0 }
 0xfb6   : > { %4434 = vmatmul.bf16.gmra.mxu2 %v14550_v58  ;;  %v5879_v60 = vpack.c.bf16 %v5577_v56, %v5575_v27  ;;  %v6549_v63 = vadd.f32 %v13321_v8, %v6548_v4  ;;  %v14556_v58 = vld [vmem:[#allocation223_spill] sm:$0xff] }
 0xfb8   : > { %6587 = vmatmul.bf16.gmra.mxu0 %v5879_v60  ;;  %v7198_v20 = vadd.f32 %v12605_v12, %v6549_v63 }
 0xfb9   : > { %v4395_v18 = vpop.f32.mrf.mxu2 }
 0xfba   : > { %v4396_v10 = vadd.f32 %v4395_v18, %v12161_v9 }
 0xfbc   : > { %v5579_v40 = vmax.f32 %v4396_v10, 0.0  ;;  %v14557_v10 = vld [vmem:[#allocation31_spill] sm:$0xff] }
 0xfbd   : > { %v6550_v53 = vpop.f32.mrf.mxu0 }
 0xfbe   : > { %v6551_v33 = vadd.f32 %v13321_v8, %v6550_v53 }
 0xfc0   : > { %v7200_v22 = vadd.f32 %v14551_v35, %v6551_v33 }
 0xfc1   : > { %v4397_v47 = vpop.f32.mrf.mxu2 }
 0xfc2   : > { %v9411_v59 = vpack.c.bf16 %v7200_v22, %v7198_v20  ;;  %v4398_v61 = vadd.f32 %v4397_v47, %v12161_v9 }
 0xfc4   : > { %9663 = vst [vmem:[%s12270_s27 + $0x300] sm:$0xff] %v9411_v59   ;;  %v5581_v0 = vmax.f32 %v4398_v61, 0.0 }
 0xfc5   : > { %v6553_v23 = vpop.f32.mrf.mxu0 }
 0xfc6   : > { %4439 = vmatmul.bf16.gmra.mxu2 %v14552_v49  ;;  %v5881_v50 = vpack.c.bf16 %v5581_v0, %v5579_v40  ;;  %v6554_v12 = vadd.f32 %v13321_v8, %v6553_v23  ;;  %v14558_v23 = vld [vmem:[#allocation224_spill] sm:$0xff] }
 0xfc8   : > { %6592 = vmatmul.bf16.gmra.mxu0 %v5881_v50  ;;  %v7203_v36 = vadd.f32 %v12620_v31, %v6554_v12 }
 0xfc9   : > { %v4400_v38 = vpop.f32.mrf.mxu2 }
 0xfca   : > { %v4401_v7 = vadd.f32 %v4400_v38, %v12161_v9 }
 0xfcc   : > { %v5583_v19 = vmax.f32 %v4401_v7, 0.0 }
 0xfcd   : > { %v6555_v30 = vpop.f32.mrf.mxu0 }
 0xfce   : > { %v6556_v39 = vadd.f32 %v13321_v8, %v6555_v30 }
 0xfd0   : > { %v7205_v41 = vadd.f32 %v14553_v48, %v6556_v39 }
 0xfd1   : > { %v4402_v52 = vpop.f32.mrf.mxu2 }
 0xfd2   : > { %v9416_v32 = vpack.c.bf16 %v7205_v41, %v7203_v36  ;;  %v4403_v29 = vadd.f32 %v4402_v52, %v12161_v9  ;;  %v14559_v36 = vld [vmem:[#allocation181_spill] sm:$0xff] }
 0xfd4   : > { %9664 = vst [vmem:[%s12270_s27 + $0x308] sm:$0xff] %v9416_v32   ;;  %v5585_v54 = vmax.f32 %v4403_v29, 0.0 }
 0xfd5   : > { %v6558_v2 = vpop.f32.mrf.mxu0 }
 0xfd6   : > { %4444 = vmatmul.bf16.gmra.mxu2 %v14554_v21  ;;  %v5883_v14 = vpack.c.bf16 %v5585_v54, %v5583_v19  ;;  %v6559_v31 = vadd.f32 %v13321_v8, %v6558_v2  ;;  %v14560_v54 = vld [vmem:[#allocation227_spill] sm:$0xff] }
 0xfd8   : > { %6597 = vmatmul.bf16.gmra.mxu0 %v5883_v14  ;;  %v7208_v51 = vadd.f32 %v12635_v16, %v6559_v31  ;;  %v14561_v31 = vld [vmem:[#allocation83_spill] sm:$0xff] }
 0xfd9   : > { %v4405_v55 = vpop.f32.mrf.mxu2 }
 0xfda   : > { %v4406_v37 = vadd.f32 %v4405_v55, %v12161_v9 }
 0xfdc   : > { %v5587_v27 = vmax.f32 %v4406_v37, 0.0 }
 0xfdd   : > { %v6560_v57 = vpop.f32.mrf.mxu0 }
 0xfde   : > { %v6561_v45 = vadd.f32 %v13321_v8, %v6560_v57 }
 0xfe0   : > { %v7210_v24 = vadd.f32 %v14555_v13, %v6561_v45 }
 0xfe1   : > { %v4407_v5 = vpop.f32.mrf.mxu2 }
 0xfe2   : > { %v9421_v3 = vpack.c.bf16 %v7210_v24, %v7208_v51  ;;  %v4408_v26 = vadd.f32 %v4407_v5, %v12161_v9  ;;  %v14562_v51 = vld [vmem:[#allocation34_spill] sm:$0xff] }
 0xfe4   : > { %9665 = vst [vmem:[%s12270_s27 + $0x310] sm:$0xff] %v9421_v3   ;;  %v5589_v56 = vmax.f32 %v4408_v26, 0.0 }
 0xfe5   : > { %v6563_v4 = vpop.f32.mrf.mxu0 }
 0xfe6   : > { %4449 = vmatmul.bf16.gmra.mxu2 %v14556_v58  ;;  %v5885_v60 = vpack.c.bf16 %v5589_v56, %v5587_v27  ;;  %v6564_v16 = vadd.f32 %v13321_v8, %v6563_v4  ;;  %v14563_v56 = vld [vmem:[#allocation5_spill] sm:$0xff] }
 0xfe8   : > { %6602 = vmatmul.bf16.gmra.mxu0 %v5885_v60  ;;  %v7213_v33 = vadd.f32 %v12650_v62, %v6564_v16 }
 0xfe9   : > { %v4410_v18 = vpop.f32.mrf.mxu2 }
 0xfea   : > { %v4411_v20 = vadd.f32 %v4410_v18, %v12161_v9 }
 0xfec   : > { %v5591_v61 = vmax.f32 %v4411_v20, 0.0 }
 0xfed   : > { %v6565_v63 = vpop.f32.mrf.mxu0 }
 0xfee   : > { %v6566_v53 = vadd.f32 %v13321_v8, %v6565_v63 }
 0xff0   : > { %v7215_v35 = vadd.f32 %v14557_v10, %v6566_v53 }
 0xff1   : > { %v4412_v22 = vpop.f32.mrf.mxu2 }
 0xff2   : > { %v9426_v47 = vpack.c.bf16 %v7215_v35, %v7213_v33  ;;  %v4413_v59 = vadd.f32 %v4412_v22, %v12161_v9 }
 0xff4   : > { %9666 = vst [vmem:[%s12270_s27 + $0x318] sm:$0xff] %v9426_v47   ;;  %v5593_v40 = vmax.f32 %v4413_v59, 0.0 }
 0xff5   : > { %v6568_v0 = vpop.f32.mrf.mxu0 }
 0xff6   : > { %4454 = vmatmul.bf16.gmra.mxu2 %v14558_v23  ;;  %v5887_v49 = vpack.c.bf16 %v5593_v40, %v5591_v61  ;;  %v6569_v62 = vadd.f32 %v13321_v8, %v6568_v0  ;;  %v14564_v61 = vld [vmem:[#allocation6_spill] sm:$0xff] }
 0xff8   : > { %6607 = vmatmul.bf16.gmra.mxu0 %v5887_v49  ;;  %v7218_v30 = vadd.f32 %v12665_v15, %v6569_v62 }
 0xff9   : > { %v4415_v50 = vpop.f32.mrf.mxu2 }
 0xffa   : > { %v4416_v39 = vadd.f32 %v4415_v50, %v12161_v9 }
 0xffc   : > { %v5595_v32 = vmax.f32 %v4416_v39, 0.0 }
 0xffd   : > { %v6570_v38 = vpop.f32.mrf.mxu0 }
 0xffe   : > { %v6571_v12 = vadd.f32 %v13321_v8, %v6570_v38 }
0x1000   : > { %v7220_v7 = vadd.f32 %v14559_v36, %v6571_v12 }
0x1001   : > { %v4417_v48 = vpop.f32.mrf.mxu2 }
0x1002   : > { %v9431_v41 = vpack.c.bf16 %v7220_v7, %v7218_v30  ;;  %v4418_v52 = vadd.f32 %v4417_v48, %v12161_v9 }
0x1004   : > { %9667 = vst [vmem:[%s12270_s27 + $0x320] sm:$0xff] %v9431_v41   ;;  %v5597_v29 = vmax.f32 %v4418_v52, 0.0  ;;  %v14566_v41 = vld [vmem:[#allocation7_spill] sm:$0xff] }
0x1005   : > { %v6573_v19 = vpop.f32.mrf.mxu0 }
0x1006   : > { %4459 = vmatmul.bf16.gmra.mxu2 %v14560_v54  ;;  %v5889_v2 = vpack.c.bf16 %v5597_v29, %v5595_v32  ;;  %v6574_v15 = vadd.f32 %v13321_v8, %v6573_v19 }
0x1008   : > { %6612 = vmatmul.bf16.gmra.mxu0 %v5889_v2  ;;  %v7223_v57 = vadd.f32 %v14561_v31, %v6574_v15 }
0x1009   : > { %v4420_v21 = vpop.f32.mrf.mxu2 }
0x100a   : > { %v4421_v45 = vadd.f32 %v4420_v21, %v12161_v9 }
0x100c   : > { %v5599_v3 = vmax.f32 %v4421_v45, 0.0 }
0x100d   : > { %v6575_v14 = vpop.f32.mrf.mxu0 }
0x100e   : > { %v6576_v55 = vadd.f32 %v13321_v8, %v6575_v14 }
0x1010   : > { %v7225_v37 = vadd.f32 %v14562_v51, %v6576_v55  ;;  %v14567_v51 = vld [vmem:[#allocation9_spill] sm:$0xff] }
0x1011   : > { %v4422_v13 = vpop.f32.mrf.mxu2 }
0x1012   : > { %v9436_v24 = vpack.c.bf16 %v7225_v37, %v7223_v57  ;;  %v4423_v5 = vadd.f32 %v4422_v13, %v12161_v9 }
0x1014   : > { %9668 = vst [vmem:[%s12270_s27 + $0x328] sm:$0xff] %v9436_v24   ;;  %v5601_v26 = vmax.f32 %v4423_v5, 0.0 }
0x1015   : > { %v6578_v27 = vpop.f32.mrf.mxu0 }
0x1016   : > { %4464 = vmatmul.bf16.gmra.mxu2 %v14563_v56  ;;  %v5891_v4 = vpack.c.bf16 %v5601_v26, %v5599_v3  ;;  %v6579_v60 = vadd.f32 %v13321_v8, %v6578_v27  ;;  %v14569_v27 = vld [vmem:[#allocation37_spill] sm:$0xff] }
0x1018   : > { %6617 = vmatmul.bf16.gmra.mxu0 %v5891_v4  ;;  %v7228_v63 = vadd.f32 %v12697_v1, %v6579_v60 }
0x1019   : > { %v4425_v58 = vpop.f32.mrf.mxu2 }
0x101a   : > { %v4426_v53 = vadd.f32 %v4425_v58, %v12161_v9 }
0x101c   : > { %v5603_v22 = vmax.f32 %v4426_v53, 0.0  ;;  %v14570_v53 = vld [vmem:[#allocation12_spill] sm:$0xff] }
0x101d   : > { %v6580_v18 = vpop.f32.mrf.mxu0 }
0x101e   : > { %v6581_v16 = vadd.f32 %v13321_v8, %v6580_v18 }
0x1020   : > { %v7230_v33 = vadd.f32 %v12707_v25, %v6581_v16  ;;  %v14565_v25 = vld [vmem:[#allocation182_spill] sm:$0xff] }
0x1021   : > { %v4427_v20 = vpop.f32.mrf.mxu2 }
0x1022   : > { %v9441_v10 = vpack.c.bf16 %v7230_v33, %v7228_v63  ;;  %v4428_v35 = vadd.f32 %v4427_v20, %v12161_v9 }
0x1024   : > { %9669 = vst [vmem:[%s12270_s27 + $0x330] sm:$0xff] %v9441_v10   ;;  %v5605_v47 = vmax.f32 %v4428_v35, 0.0 }
0x1025   : > { %v6583_v59 = vpop.f32.mrf.mxu0 }
0x1026   : > { %4469 = vmatmul.bf16.gmra.mxu2 %v14564_v61  ;;  %v5893_v40 = vpack.c.bf16 %v5605_v47, %v5603_v22  ;;  %v6584_v1 = vadd.f32 %v13321_v8, %v6583_v59 }
0x1028   : > { %6622 = vmatmul.bf16.gmra.mxu0 %v5893_v40  ;;  %v7233_v50 = vadd.f32 %v14565_v25, %v6584_v1 }
0x1029   : > { %v4430_v0 = vpop.f32.mrf.mxu2 }
0x102a   : > { %v4431_v62 = vadd.f32 %v4430_v0, %v12161_v9 }
0x102c   : > { %v5607_v36 = vmax.f32 %v4431_v62, 0.0 }
0x102d   : > { %v6585_v23 = vpop.f32.mrf.mxu0 }
0x102e   : > { %v6586_v49 = vadd.f32 %v13321_v8, %v6585_v23 }
0x1030   : > { %v7235_v38 = vadd.f32 %v12724_v28, %v6586_v49 }
0x1031   : > { %v4432_v12 = vpop.f32.mrf.mxu2 }
0x1032   : > { %v9446_v30 = vpack.c.bf16 %v7235_v38, %v7233_v50  ;;  %v4433_v39 = vadd.f32 %v4432_v12, %v12161_v9  ;;  %v14571_v50 = vld [vmem:[#allocation15_spill] sm:$0xff] }
0x1034   : > { %9670 = vst [vmem:[%s12270_s27 + $0x338] sm:$0xff] %v9446_v30   ;;  %v5609_v7 = vmax.f32 %v4433_v39, 0.0 }
0x1035   : > { %v6588_v48 = vpop.f32.mrf.mxu0 }
0x1036   : > { %4474 = vmatmul.bf16.gmra.mxu2 %v14566_v41  ;;  %v5895_v52 = vpack.c.bf16 %v5609_v7, %v5607_v36  ;;  %v6589_v29 = vadd.f32 %v13321_v8, %v6588_v48 }
0x1038   : > { %6627 = vmatmul.bf16.gmra.mxu0 %v5895_v52  ;;  %v7238_v28 = vadd.f32 %v12732_v43, %v6589_v29 }
0x1039   : > { %v4435_v32 = vpop.f32.mrf.mxu2 }
0x103a   : > { %v4436_v2 = vadd.f32 %v4435_v32, %v12161_v9 }
0x103c   : > { %v5611_v31 = vmax.f32 %v4436_v2, 0.0 }
0x103d   : > { %v6590_v19 = vpop.f32.mrf.mxu0 }
0x103e   : > { %v6591_v54 = vadd.f32 %v13321_v8, %v6590_v19 }
0x1040   : > { %v7240_v21 = vadd.f32 %v12740_v34, %v6591_v54  ;;  %v14568_v34 = vld [vmem:[#allocation86_spill] sm:$0xff] }
0x1041   : > { %v4437_v15 = vpop.f32.mrf.mxu2 }
0x1042   : > { %v9451_v14 = vpack.c.bf16 %v7240_v21, %v7238_v28  ;;  %v4438_v55 = vadd.f32 %v4437_v15, %v12161_v9  ;;  %v14573_v28 = vld [vmem:[#allocation18_spill] sm:$0xff] }
0x1044   : > { %9671 = vst [vmem:[%s12270_s27 + $0x340] sm:$0xff] %v9451_v14   ;;  %v5613_v57 = vmax.f32 %v4438_v55, 0.0 }
0x1045   : > { %v6593_v45 = vpop.f32.mrf.mxu0 }
0x1046   : > { %4479 = vmatmul.bf16.gmra.mxu2 %v14567_v51  ;;  %v5897_v37 = vpack.c.bf16 %v5613_v57, %v5611_v31  ;;  %v6594_v43 = vadd.f32 %v13321_v8, %v6593_v45  ;;  %v14575_v57 = vld [vmem:[#allocation40_spill] sm:$0xff] }
0x1048   : > { %6632 = vmatmul.bf16.gmra.mxu0 %v5897_v37  ;;  %v7243_v3 = vadd.f32 %v14568_v34, %v6594_v43 }
0x1049   : > { %v4440_v13 = vpop.f32.mrf.mxu2 }
0x104a   : > { %v4441_v26 = vadd.f32 %v4440_v13, %v12161_v9 }
0x104c   : > { %v5615_v18 = vmax.f32 %v4441_v26, 0.0 }
0x104d   : > { %v6595_v24 = vpop.f32.mrf.mxu0 }
0x104e   : > { %v6596_v5 = vadd.f32 %v13321_v8, %v6595_v24 }
0x1050   : > { %v7245_v56 = vadd.f32 %v14569_v27, %v6596_v5 }
0x1051   : > { %v4442_v4 = vpop.f32.mrf.mxu2 }
0x1052   : > { %v9456_v58 = vpack.c.bf16 %v7245_v56, %v7243_v3  ;;  %v4443_v60 = vadd.f32 %v4442_v4, %v12161_v9  ;;  %v14576_v3 = vld [vmem:[#allocation21_spill] sm:$0xff] }
0x1054   : > { %9672 = vst [vmem:[%s12270_s27 + $0x348] sm:$0xff] %v9456_v58   ;;  %v5617_v16 = vmax.f32 %v4443_v60, 0.0  ;;  %v14577_v58 = vld [vmem:[#allocation184_spill] sm:$0xff] }
0x1055   : > { %v6598_v63 = vpop.f32.mrf.mxu0 }
0x1056   : > { %4484 = vmatmul.bf16.gmra.mxu2 %v14570_v53  ;;  %v5899_v33 = vpack.c.bf16 %v5617_v16, %v5615_v18  ;;  %v6599_v10 = vadd.f32 %v13321_v8, %v6598_v63  ;;  %v14578_v16 = vld [vmem:[#allocation92_spill] sm:$0xff] }
0x1058   : > { %6637 = vmatmul.bf16.gmra.mxu0 %v5899_v33  ;;  %v7248_v47 = vadd.f32 %v12768_v6, %v6599_v10 }
0x1059   : > { %v4445_v20 = vpop.f32.mrf.mxu2 }
0x105a   : > { %v4446_v59 = vadd.f32 %v4445_v20, %v12161_v9 }
0x105c   : > { %v5619_v23 = vmax.f32 %v4446_v59, 0.0  ;;  %v14579_v59 = vld [vmem:[#allocation24_spill] sm:$0xff] }
0x105d   : > { %v6600_v35 = vpop.f32.mrf.mxu0 }
0x105e   : > { %v6601_v22 = vadd.f32 %v13321_v8, %v6600_v35 }
0x1060   : > { %v7250_v61 = vadd.f32 %v12778_v46, %v6601_v22  ;;  %v14572_v46 = vld [vmem:[#allocation183_spill] sm:$0xff] }
0x1061   : > { %v4447_v40 = vpop.f32.mrf.mxu2 }
0x1062   : > { %v9461_v0 = vpack.c.bf16 %v7250_v61, %v7248_v47  ;;  %v4448_v1 = vadd.f32 %v4447_v40, %v12161_v9 }
0x1064   : > { %9673 = vst [vmem:[%s12270_s27 + $0x350] sm:$0xff] %v9461_v0   ;;  %v5621_v49 = vmax.f32 %v4448_v1, 0.0 }
0x1065   : > { %v6603_v25 = vpop.f32.mrf.mxu0 }
0x1066   : > { %4489 = vmatmul.bf16.gmra.mxu2 %v14571_v50  ;;  %v5901_v62 = vpack.c.bf16 %v5621_v49, %v5619_v23  ;;  %v6604_v6 = vadd.f32 %v13321_v8, %v6603_v25  ;;  %v14580_v23 = vld [vmem:[#allocation43_spill] sm:$0xff]  ;;  %v14581_v50 = vld [vmem:[#allocation185_spill] sm:$0xff] }
0x1068   : > { %6642 = vmatmul.bf16.gmra.mxu0 %v5901_v62  ;;  %v7253_v39 = vadd.f32 %v14572_v46, %v6604_v6 }
0x1069   : > { %v4450_v38 = vpop.f32.mrf.mxu2 }
0x106a   : > { %v4451_v36 = vadd.f32 %v4450_v38, %v12161_v9 }
0x106c   : > { %v5623_v32 = vmax.f32 %v4451_v36, 0.0 }
0x106d   : > { %v6605_v12 = vpop.f32.mrf.mxu0 }
0x106e   : > { %v6606_v30 = vadd.f32 %v13321_v8, %v6605_v12 }
0x1070   : > { %v7255_v7 = vadd.f32 %v12795_v11, %v6606_v30  ;;  %v14574_v11 = vld [vmem:[#allocation89_spill] sm:$0xff] }
0x1071   : > { %v4452_v48 = vpop.f32.mrf.mxu2 }
0x1072   : > { %v9466_v41 = vpack.c.bf16 %v7255_v7, %v7253_v39  ;;  %v4453_v52 = vadd.f32 %v4452_v48, %v12161_v9 }
0x1074   : > { %9674 = vst [vmem:[%s12270_s27 + $0x358] sm:$0xff] %v9466_v41   ;;  %v5625_v29 = vmax.f32 %v4453_v52, 0.0 }
0x1075   : > { %v6608_v19 = vpop.f32.mrf.mxu0 }
0x1076   : > { %v5903_v54 = vpack.c.bf16 %v5625_v29, %v5623_v32  ;;  %4494 = vmatmul.bf16.gmra.mxu2 %v14573_v28  ;;  %v6609_v21 = vadd.f32 %v13321_v8, %v6608_v19  ;;  %v14582_v32 = vld [vmem:[#allocation95_spill] sm:$0xff] }
0x1078   : > { %6647 = vmatmul.bf16.gmra.mxu0 %v5903_v54  ;;  %v7258_v55 = vadd.f32 %v14574_v11, %v6609_v21  ;;  %v14583_v54 = vld [vmem:[#allocation46_spill] sm:$0xff] }
0x1079   : > { %v4455_v2 = vpop.f32.mrf.mxu2 }
0x107a   : > { %v4456_v31 = vadd.f32 %v4455_v2, %v12161_v9 }
0x107c   : > { %v5627_v43 = vmax.f32 %v4456_v31, 0.0 }
0x107d   : > { %v6610_v15 = vpop.f32.mrf.mxu0 }
0x107e   : > { %v6611_v14 = vadd.f32 %v13321_v8, %v6610_v15 }
0x1080   : > { %v7260_v45 = vadd.f32 %v14575_v57, %v6611_v14 }
0x1081   : > { %v4457_v51 = vpop.f32.mrf.mxu2 }
0x1082   : > { %v9471_v37 = vpack.c.bf16 %v7260_v45, %v7258_v55  ;;  %v4458_v13 = vadd.f32 %v4457_v51, %v12161_v9 }
0x1084   : > { %9675 = vst [vmem:[%s12270_s27 + $0x360] sm:$0xff] %v9471_v37   ;;  %v5629_v24 = vmax.f32 %v4458_v13, 0.0  ;;  %v14584_v13 = vld [vmem:[#allocation186_spill] sm:$0xff] }
0x1085   : > { %v6613_v5 = vpop.f32.mrf.mxu0 }
0x1086   : > { %v5905_v34 = vpack.c.bf16 %v5629_v24, %v5627_v43  ;;  %4499 = vmatmul.bf16.gmra.mxu2 %v14576_v3  ;;  %v6614_v27 = vadd.f32 %v13321_v8, %v6613_v5  ;;  %v14585_v5 = vld [vmem:[#allocation98_spill] sm:$0xff] }
0x1088   : > { %6652 = vmatmul.bf16.gmra.mxu0 %v5905_v34  ;;  %v7263_v60 = vadd.f32 %v14577_v58, %v6614_v27 }
0x1089   : > { %v4460_v26 = vpop.f32.mrf.mxu2 }
0x108a   : > { %v4461_v18 = vadd.f32 %v4460_v26, %v12161_v9 }
0x108c   : > { %v5631_v10 = vmax.f32 %v4461_v18, 0.0  ;;  %v7297_v18 = vpop.f32.mrf.mxu1 }
0x108d   : > { %v6615_v56 = vpop.f32.mrf.mxu0 }
0x108e   : > { %v6616_v4 = vadd.f32 %v13321_v8, %v6615_v56 }
0x1090   : > { %v7265_v63 = vadd.f32 %v14578_v16, %v6616_v4 }
0x1091   : > { %v4462_v53 = vpop.f32.mrf.mxu2 }
0x1092   : > { %v9476_v33 = vpack.c.bf16 %v7265_v63, %v7263_v60  ;;  %v4463_v20 = vadd.f32 %v4462_v53, %v12161_v9 }
0x1094   : > { %9676 = vst [vmem:[%s12270_s27 + $0x368] sm:$0xff] %v9476_v33   ;;  %v5633_v35 = vmax.f32 %v4463_v20, 0.0  ;;  %v14586_v20 = vld [vmem:[#allocation49_spill] sm:$0xff] }
0x1095   : > { %v6618_v22 = vpop.f32.mrf.mxu0 }
0x1096   : > { %v5907_v47 = vpack.c.bf16 %v5633_v35, %v5631_v10  ;;  %4504 = vmatmul.bf16.gmra.mxu2 %v14579_v59  ;;  %v6619_v40 = vadd.f32 %v13321_v8, %v6618_v22  ;;  %v14587_v22 = vld [vmem:[#allocation187_spill] sm:$0xff] }
0x1098   : > { %6657 = vmatmul.bf16.gmra.mxu0 %v5907_v47  ;;  %v7268_v49 = vadd.f32 %v14580_v23, %v6619_v40 }
0x1099   : > { %v4465_v61 = vpop.f32.mrf.mxu2 }
0x109a   : > { %v4466_v25 = vadd.f32 %v4465_v61, %v12161_v9 }
0x109c   : > { %v5635_v30 = vmax.f32 %v4466_v25, 0.0 }
0x109d   : > { %v6620_v0 = vpop.f32.mrf.mxu0 }
0x109e   : > { %v6621_v1 = vadd.f32 %v13321_v8, %v6620_v0  ;;  %v7299_v0 = vpop.f32.mrf.mxu1 }
0x10a0   : > { %v7270_v62 = vadd.f32 %v14581_v50, %v6621_v1 }
0x10a1   : > { %v4467_v38 = vpop.f32.mrf.mxu2 }
0x10a2   : > { %v9481_v6 = vpack.c.bf16 %v7270_v62, %v7268_v49  ;;  %v4468_v12 = vadd.f32 %v4467_v38, %v12161_v9 }
0x10a4   : > { %9677 = vst [vmem:[%s12270_s27 + $0x370] sm:$0xff] %v9481_v6   ;;  %v5637_v46 = vmax.f32 %v4468_v12, 0.0 }
0x10a5   : > { %v6623_v39 = vpop.f32.mrf.mxu0 }
0x10a6   : > { %v5909_v36 = vpack.c.bf16 %v5637_v46, %v5635_v30  ;;  %v6624_v48 = vadd.f32 %v13321_v8, %v6623_v39  ;;  %v7302_v38 = vpop.f32.mrf.mxu1 }
0x10a8   : > { %6662 = vmatmul.bf16.gmra.mxu0 %v5909_v36  ;;  %v7273_v29 = vadd.f32 %v14582_v32, %v6624_v48 }
0x10a9   : > { %v4470_v7 = vpop.f32.mrf.mxu2 }
0x10aa   : > { %v4471_v19 = vadd.f32 %v4470_v7, %v12161_v9 }
0x10ac   : > { %v5639_v14 = vmax.f32 %v4471_v19, 0.0 }
0x10ad   : > { %v6625_v41 = vpop.f32.mrf.mxu0 }
0x10ae   : > { %v6626_v52 = vadd.f32 %v13321_v8, %v6625_v41  ;;  %v7304_v19 = vpop.f32.mrf.mxu1 }
0x10b0   : > { %v7275_v28 = vadd.f32 %v14583_v54, %v6626_v52 }
0x10b1   : > { %v4472_v2 = vpop.f32.mrf.mxu2 }
0x10b2   : > { %v9486_v21 = vpack.c.bf16 %v7275_v28, %v7273_v29  ;;  %v4473_v15 = vadd.f32 %v4472_v2, %v12161_v9 }
0x10b4   : > { %9678 = vst [vmem:[%s12270_s27 + $0x378] sm:$0xff] %v9486_v21   ;;  %v5641_v11 = vmax.f32 %v4473_v15, 0.0  ;;  %v14588_v21 = vld [vmem:[#allocation101_spill] sm:$0xff] }
0x10b5   : > { %v6628_v55 = vpop.f32.mrf.mxu0 }
0x10b6   : > { %v5911_v31 = vpack.c.bf16 %v5641_v11, %v5639_v14  ;;  %v6629_v45 = vadd.f32 %v13321_v8, %v6628_v55  ;;  %v7307_v11 = vpop.f32.mrf.mxu1 }
0x10b8   : > { %6667 = vmatmul.bf16.gmra.mxu0 %v5911_v31  ;;  %v7278_v43 = vadd.f32 %v14584_v13, %v6629_v45 }
0x10b9   : > { %v4475_v57 = vpop.f32.mrf.mxu2 }
0x10ba   : > { %v4476_v24 = vadd.f32 %v4475_v57, %v12161_v9 }
0x10bc   : > { %v5643_v56 = vmax.f32 %v4476_v24, 0.0 }
0x10bd   : > { %v6630_v51 = vpop.f32.mrf.mxu0 }
0x10be   : > { %v6631_v37 = vadd.f32 %v13321_v8, %v6630_v51  ;;  %v7309_v24 = vpop.f32.mrf.mxu1 }
0x10c0   : > { %v7280_v34 = vadd.f32 %v14585_v5, %v6631_v37 }
0x10c1   : > { %v4477_v3 = vpop.f32.mrf.mxu2 }
0x10c2   : > { %v9491_v26 = vpack.c.bf16 %v7280_v34, %v7278_v43  ;;  %v4478_v27 = vadd.f32 %v4477_v3, %v12161_v9 }
0x10c4   : > { %9679 = vst [vmem:[%s12270_s27 + $0x380] sm:$0xff] %v9491_v26   ;;  %v5645_v4 = vmax.f32 %v4478_v27, 0.0 }
0x10c5   : > { %v6633_v58 = vpop.f32.mrf.mxu0 }
0x10c6   : > { %v5913_v60 = vpack.c.bf16 %v5645_v4, %v5643_v56  ;;  %v6634_v63 = vadd.f32 %v13321_v8, %v6633_v58 }
0x10c8   : > { %6672 = vmatmul.bf16.gmra.mxu0 %v5913_v60  ;;  %v7283_v10 = vadd.f32 %v14586_v20, %v6634_v63  ;;  %v7312_v63 = vpop.f32.mrf.mxu1 }
0x10c9   : > { %v4480_v16 = vpop.f32.mrf.mxu2 }
0x10ca   : > { %v4481_v35 = vadd.f32 %v4480_v16, %v12161_v9 }
0x10cc   : > { %v5647_v1 = vmax.f32 %v4481_v35, 0.0 }
0x10cd   : > { %v6635_v53 = vpop.f32.mrf.mxu0 }
0x10ce   : > { %v6636_v33 = vadd.f32 %v13321_v8, %v6635_v53 }
0x10d0   : > { %v7285_v47 = vadd.f32 %v14587_v22, %v6636_v33  ;;  %v7314_v22 = vpop.f32.mrf.mxu1 }
0x10d1   : > { %v4482_v59 = vpop.f32.mrf.mxu2 }
0x10d2   : > { %v9496_v61 = vpack.c.bf16 %v7285_v47, %v7283_v10  ;;  %v4483_v40 = vadd.f32 %v4482_v59, %v12161_v9 }
0x10d4   : > { %9680 = vst [vmem:[%s12270_s27 + $0x388] sm:$0xff] %v9496_v61   ;;  %v5649_v23 = vmax.f32 %v4483_v40, 0.0 }
0x10d5   : > { %v6638_v49 = vpop.f32.mrf.mxu0 }
0x10d6   : > { %v5915_v25 = vpack.c.bf16 %v5649_v23, %v5647_v1  ;;  %v6639_v62 = vadd.f32 %v13321_v8, %v6638_v49 }
0x10d8   : > { %6677 = vmatmul.bf16.gmra.mxu0 %v5915_v25  ;;  %v7288_v30 = vadd.f32 %v12908_v42, %v6639_v62  ;;  %v7317_v62 = vpop.f32.mrf.mxu1 }
0x10d9   : > { %v4485_v50 = vpop.f32.mrf.mxu2 }
0x10da   : > { %v4486_v46 = vadd.f32 %v4485_v50, %v12161_v9 }
0x10dc   : > { %v5651_v41 = vmax.f32 %v4486_v46, 0.0 }
0x10dd   : > { %v6640_v6 = vpop.f32.mrf.mxu0 }
0x10de   : > { %v6641_v12 = vadd.f32 %v13321_v8, %v6640_v6 }
0x10e0   : > { %v7290_v39 = vadd.f32 %v12917_v17, %v6641_v12 }
0x10e1   : > { %v4487_v36 = vpop.f32.mrf.mxu2 }
0x10e2   : > { %v9501_v7 = vpack.c.bf16 %v7290_v39, %v7288_v30  ;;  %v4488_v48 = vadd.f32 %v4487_v36, %v12161_v9 }
0x10e4   : > { %9681 = vst [vmem:[%s12270_s27 + $0x390] sm:$0xff] %v9501_v7   ;;  %v5653_v52 = vmax.f32 %v4488_v48, 0.0 }
0x10e5   : > { %v6643_v32 = vpop.f32.mrf.mxu0 }
0x10e6   : > { %v5917_v29 = vpack.c.bf16 %v5653_v52, %v5651_v41  ;;  %v6644_v28 = vadd.f32 %v13321_v8, %v6643_v32  ;;  %v7319_v52 = vpop.f32.mrf.mxu1 }
0x10e8   : > { %6682 = vmatmul.bf16.gmra.mxu0 %v5917_v29  ;;  %v7293_v17 = vadd.f32 %v14588_v21, %v6644_v28 }
0x10e9   : > { %v4490_v54 = vpop.f32.mrf.mxu2 }
0x10ea   : > { %v4491_v15 = vadd.f32 %v4490_v54, %v12161_v9 }
0x10ec   : > { %v5655_v45 = vmax.f32 %v4491_v15, 0.0 }
0x10ed   : > { %v6645_v42 = vpop.f32.mrf.mxu0 }
0x10ee   : > { %v6646_v2 = vadd.f32 %v13321_v8, %v6645_v42  ;;  %v7322_v42 = vpop.f32.mrf.mxu1 }
0x10f0   : > { %v7295_v14 = vadd.f32 %v12933_v44, %v6646_v2 }
0x10f1   : > { %v4492_v55 = vpop.f32.mrf.mxu2 }
0x10f2   : > { %v9506_v31 = vpack.c.bf16 %v7295_v14, %v7293_v17  ;;  %v4493_v57 = vadd.f32 %v4492_v55, %v12161_v9 }
0x10f4   : > { %9682 = vst [vmem:[%s12270_s27 + $0x398] sm:$0xff] %v9506_v31   ;;  %v5657_v51 = vmax.f32 %v4493_v57, 0.0 }
0x10f5   : > { %v6648_v37 = vpop.f32.mrf.mxu0 }
0x10f6   : > { %v5919_v13 = vpack.c.bf16 %v5657_v51, %v5655_v45  ;;  %v6649_v5 = vadd.f32 %v13321_v8, %v6648_v37 }
0x10f8   : > { %6687 = vmatmul.bf16.gmra.mxu0 %v5919_v13  ;;  %v7298_v44 = vadd.f32 %v7297_v18, %v6649_v5 }
0x10f9   : > { %v4495_v43 = vpop.f32.mrf.mxu2 }
0x10fa   : > { %v4496_v26 = vadd.f32 %v4495_v43, %v12161_v9 }
0x10fc   : > { %v5659_v60 = vmax.f32 %v4496_v26, 0.0 }
0x10fd   : > { %v6650_v34 = vpop.f32.mrf.mxu0 }
0x10fe   : > { %v6651_v3 = vadd.f32 %v13321_v8, %v6650_v34 }
0x1100   : > { %v7300_v27 = vadd.f32 %v7299_v0, %v6651_v3 }
0x1101   : > { %v4497_v56 = vpop.f32.mrf.mxu2 }
0x1102   : > { %v9511_v4 = vpack.c.bf16 %v7300_v27, %v7298_v44  ;;  %v4498_v58 = vadd.f32 %v4497_v56, %v12161_v9 }
0x1104   : > { %9683 = vst [vmem:[%s12270_s27 + $0x3a0] sm:$0xff] %v9511_v4   ;;  %v5661_v16 = vmax.f32 %v4498_v58, 0.0 }
0x1105   : > { %v6653_v53 = vpop.f32.mrf.mxu0 }
0x1106   : > { %v5921_v33 = vpack.c.bf16 %v5661_v16, %v5659_v60  ;;  %v6654_v10 = vadd.f32 %v13321_v8, %v6653_v53 }
0x1108   : > { %6692 = vmatmul.bf16.gmra.mxu0 %v5921_v33  ;;  %v7303_v47 = vadd.f32 %v7302_v38, %v6654_v10 }
0x1109   : > { %v4500_v20 = vpop.f32.mrf.mxu2 }
0x110a   : > { %v4501_v59 = vadd.f32 %v4500_v20, %v12161_v9 }
0x110c   : > { %v5663_v23 = vmax.f32 %v4501_v59, 0.0 }
0x110d   : > { %v6655_v35 = vpop.f32.mrf.mxu0 }
0x110e   : > { %v6656_v18 = vadd.f32 %v13321_v8, %v6655_v35 }
0x1110   : > { %v7305_v61 = vadd.f32 %v7304_v19, %v6656_v18 }
0x1111   : > { %v4502_v40 = vpop.f32.mrf.mxu2 }
0x1112   : > { %v9516_v0 = vpack.c.bf16 %v7305_v61, %v7303_v47  ;;  %v4503_v1 = vadd.f32 %v4502_v40, %v12161_v9 }
0x1114   : > { %9684 = vst [vmem:[%s12270_s27 + $0x3a8] sm:$0xff] %v9516_v0   ;;  %v5665_v49 = vmax.f32 %v4503_v1, 0.0 }
0x1115   : > { %v6658_v25 = vpop.f32.mrf.mxu0 }
0x1116   : > { %v5923_v50 = vpack.c.bf16 %v5665_v49, %v5663_v23  ;;  %v6659_v12 = vadd.f32 %v13321_v8, %v6658_v25 }
0x1118   : > { %6697 = vmatmul.bf16.gmra.mxu0 %v5923_v50  ;;  %v7308_v46 = vadd.f32 %v7307_v11, %v6659_v12 }
0x1119   : > { %v4505_v6 = vpop.f32.mrf.mxu2 }
0x111a   : > { %v4506_v39 = vadd.f32 %v4505_v6, %v12161_v9 }
0x111c   : > { %v5667_v32 = vmax.f32 %v4506_v39, 0.0 }
0x111d   : > { %v6660_v30 = vpop.f32.mrf.mxu0 }
0x111e   : > { %v6661_v38 = vadd.f32 %v13321_v8, %v6660_v30 }
0x1120   : > { %v7310_v36 = vadd.f32 %v7309_v24, %v6661_v38 }
0x1121   : > { %v4507_v7 = vpop.f32.mrf.mxu2 }
0x1122   : > { %v9521_v48 = vpack.c.bf16 %v7310_v36, %v7308_v46  ;;  %v4508_v41 = vadd.f32 %v4507_v7, %v12161_v9  ;;  %v7324_v9 = vpop.f32.mrf.mxu1 }
0x1124   : > { %9685 = vst [vmem:[%s12270_s27 + $0x3b0] sm:$0xff] %v9521_v48   ;;  %v5669_v29 = vmax.f32 %v4508_v41, 0.0 }
0x1125   : > { %v6663_v19 = vpop.f32.mrf.mxu0 }
0x1126   : > { %v5925_v54 = vpack.c.bf16 %v5669_v29, %v5667_v32  ;;  %v6664_v28 = vadd.f32 %v13321_v8, %v6663_v19 }
0x1128   : > { %6702 = vmatmul.bf16.gmra.mxu0 %v5925_v54  ;;  %v7313_v17 = vadd.f32 %v7312_v63, %v6664_v28 }
0x112a   : > { %v7327_v37 = vpop.f32.mrf.mxu1 }
0x112d   : > { %v6665_v2 = vpop.f32.mrf.mxu0 }
0x112e   : > { %v6666_v21 = vadd.f32 %v13321_v8, %v6665_v2 }
0x1130   : > { %v7315_v15 = vadd.f32 %v7314_v22, %v6666_v21 }
0x1132   : > { %v9526_v14 = vpack.c.bf16 %v7315_v15, %v7313_v17  ;;  %v7329_v24 = vpop.f32.mrf.mxu1 }
0x1134   : > { %9686 = vst [vmem:[%s12270_s27 + $0x3b8] sm:$0xff] %v9526_v14   ;;  %v9763_v14 = vld [vmem:[%s13585_s8] ss:$0 sm:$0xff] }
0x1135   : > { %v6668_v11 = vpop.f32.mrf.mxu0 }
0x1136   : > { %v6669_v55 = vadd.f32 %v13321_v8, %v6668_v11 }
0x1138   : > { %v7318_v45 = vadd.f32 %v7317_v62, %v6669_v55 }
0x113a   : > { %v7332_v56 = vpop.f32.mrf.mxu1 }
0x113d   : > { %v6670_v31 = vpop.f32.mrf.mxu0 }
0x113e   : > { %v6671_v57 = vadd.f32 %v13321_v8, %v6670_v31 }
0x1140   : > { %v7320_v51 = vadd.f32 %v7319_v52, %v6671_v57 }
0x1142   : > { %v9531_v13 = vpack.c.bf16 %v7320_v51, %v7318_v45  ;;  %v7334_v63 = vpop.f32.mrf.mxu1 }
0x1144   : > { %9687 = vst [vmem:[%s12270_s27 + $0x3c0] sm:$0xff] %v9531_v13  }
0x1145   : > { %v6673_v43 = vpop.f32.mrf.mxu0 }
0x1146   : > { %v6674_v5 = vadd.f32 %v13321_v8, %v6673_v43 }
0x1148   : > { %v7323_v44 = vadd.f32 %v7322_v42, %v6674_v5 }
0x114a   : > { %v7337_v35 = vpop.f32.mrf.mxu1 }
0x114d   : > { %v6675_v34 = vpop.f32.mrf.mxu0 }
0x114e   : > { %v6676_v3 = vadd.f32 %v13321_v8, %v6675_v34 }
0x1150   : > { %v7325_v26 = vadd.f32 %v7324_v9, %v6676_v3 }
0x1152   : > { %v9536_v27 = vpack.c.bf16 %v7325_v26, %v7323_v44  ;;  %v7339_v0 = vpop.f32.mrf.mxu1 }
0x1154   : > { %9688 = vst [vmem:[%s12270_s27 + $0x3c8] sm:$0xff] %v9536_v27  }
0x1155   : > { %v6678_v4 = vpop.f32.mrf.mxu0 }
0x1156   : > { %v6679_v58 = vadd.f32 %v13321_v8, %v6678_v4 }
0x1158   : > { %v7328_v53 = vadd.f32 %v7327_v37, %v6679_v58 }
0x115a   : > { %v7342_v49 = vpop.f32.mrf.mxu1 }
0x115d   : > { %v6680_v60 = vpop.f32.mrf.mxu0 }
0x115e   : > { %v6681_v16 = vadd.f32 %v13321_v8, %v6680_v60 }
0x1160   : > { %v7330_v33 = vadd.f32 %v7329_v24, %v6681_v16 }
0x1162   : > { %v9541_v20 = vpack.c.bf16 %v7330_v33, %v7328_v53  ;;  %v7344_v38 = vpop.f32.mrf.mxu1 }
0x1164   : > { %9689 = vst [vmem:[%s12270_s27 + $0x3d0] sm:$0xff] %v9541_v20  }
0x1165   : > { %v6683_v10 = vpop.f32.mrf.mxu0 }
0x1166   : > { %v6684_v18 = vadd.f32 %v13321_v8, %v6683_v10 }
0x1168   : > { %v7333_v59 = vadd.f32 %v7332_v56, %v6684_v18 }
0x116a   : > { %v7347_v41 = vpop.f32.mrf.mxu1 }
0x116d   : > { %v6685_v22 = vpop.f32.mrf.mxu0 }
0x116e   : > { %v6686_v47 = vadd.f32 %v13321_v8, %v6685_v22 }
0x1170   : > { %v7335_v61 = vadd.f32 %v7334_v63, %v6686_v47 }
0x1172   : > { %v9546_v40 = vpack.c.bf16 %v7335_v61, %v7333_v59  ;;  %v7349_v29 = vpop.f32.mrf.mxu1 }
0x1174   : > { %9690 = vst [vmem:[%s12270_s27 + $0x3d8] sm:$0xff] %v9546_v40  }
0x1175   : > { %v6688_v1 = vpop.f32.mrf.mxu0 }
0x1176   : > { %v6689_v23 = vadd.f32 %v13321_v8, %v6688_v1 }
0x1178   : > { %v7338_v62 = vadd.f32 %v7337_v35, %v6689_v23 }
0x117a   : > { %v7352_v17 = vpop.f32.mrf.mxu1 }
0x117d   : > { %v6690_v25 = vpop.f32.mrf.mxu0 }
0x117e   : > { %v6691_v50 = vadd.f32 %v13321_v8, %v6690_v25 }
0x1180   : > { %v7340_v6 = vadd.f32 %v7339_v0, %v6691_v50 }
0x1182   : > { %v9551_v12 = vpack.c.bf16 %v7340_v6, %v7338_v62  ;;  %v7354_v55 = vpop.f32.mrf.mxu1 }
0x1184   : > { %9691 = vst [vmem:[%s12270_s27 + $0x3e0] sm:$0xff] %v9551_v12  }
0x1185   : > { %v6693_v30 = vpop.f32.mrf.mxu0 }
0x1186   : > { %v6694_v46 = vadd.f32 %v13321_v8, %v6693_v30 }
0x1188   : > { %v7343_v7 = vadd.f32 %v7342_v49, %v6694_v46 }
0x118d   : > { %v6695_v39 = vpop.f32.mrf.mxu0 }
0x118e   : > { %v6696_v36 = vadd.f32 %v13321_v8, %v6695_v39 }
0x1190   : > { %v7345_v48 = vadd.f32 %v7344_v38, %v6696_v36 }
0x1192   : > { %v9556_v52 = vpack.c.bf16 %v7345_v48, %v7343_v7 }
0x1194   : > { %9692 = vst [vmem:[%s12270_s27 + $0x3e8] sm:$0xff] %v9556_v52  }
0x1195   : > { %v6698_v32 = vpop.f32.mrf.mxu0 }
0x1196   : > { %v6699_v19 = vadd.f32 %v13321_v8, %v6698_v32 }
0x1198   : > { %v7348_v42 = vadd.f32 %v7347_v41, %v6699_v19 }
0x119d   : > { %v6700_v54 = vpop.f32.mrf.mxu0 }
0x119e   : > { %v6701_v28 = vadd.f32 %v13321_v8, %v6700_v54 }
0x11a0   : > { %v7350_v2 = vadd.f32 %v7349_v29, %v6701_v28 }
0x11a2   : > { %v9561_v21 = vpack.c.bf16 %v7350_v2, %v7348_v42 }
0x11a4   : > { %9693 = vst [vmem:[%s12270_s27 + $0x3f0] sm:$0xff] %v9561_v21  }
0x11a5   : > { %v6703_v15 = vpop.f32.mrf.mxu0 }
0x11a6   : > { %v6704_v11 = vadd.f32 %v9763_v14, %v6703_v15 }
0x11a8   : > { %v7353_v31 = vadd.f32 %v7352_v17, %v6704_v11 }
0x11ad   : > { %v6705_v9 = vpop.f32.mrf.mxu0 }
0x11ae   : > { %v6706_v8 = vadd.f32 %v9763_v14, %v6705_v9 }
0x11b0   : > { %v7355_v57 = vadd.f32 %v7354_v55, %v6706_v8 }
0x11b2   : > { %v9566_v45 = vpack.c.bf16 %v7355_v57, %v7353_v31 }
0x11b4   : > { %9694 = vst [vmem:[%s12270_s27 + $0x3f8] sm:$0xff] %v9566_v45  }
0x11b5   : > { %9791 = shalt.err (!%p9788_p3)
}
0x11b6   : > { %s9828_s16 = smov 64   ;;  %s9829_s27 = smov 4  }
0x11b7   : > { %9704 = dma.vmem_to_hbm [thread:$0]  (%p9918_p5), %s7883_s25, 16384, %s7885_s26, %s7870_s13, %s9828_s16, %s9828_s16, %s9829_s27  }
0x11b8 PF: > { %p9710_p4 = scmp.ge.s32.totalorder %s9826_s12, 2  ;;  %s7899_s24 = sand.u32 1, %s9814_s30  }
0x11b9   : > { %s7900_s14 = scalar_lea.sflag [#allocation3], %s7899_s24 }
0x11ba   : > { %p9707_p7 = pnand %p9710_p4, %p9922_p6 }
0x11bc   : > { %p9708_p8 = pneg %p9707_p7 }
0x11be   : > { %9809 = dma.done.wait (%p9708_p8), %s7900_s14, 16384  }
0x11bf   : > { %9811 = vsyncadd (%p9708_p8), %s7900_s14, 4294950912  ;;  %p19_p9 = scmp.ge.s32.totalorder %s9905_s15, 4   ;;  %s14589_s30 = smov %s9818_s10 }
0x11c0   : > { %s14590_s10 = smov %s9822_s11  ;;  %s14591_s11 = smov %s9916_s18 }
0x11c1   : > { %s14592_s12 = smov %s9905_s15  ;;  %21 = sbr.rel (!%p19_p9) target bundleno = 3 (0x3), region = 91 }
0x11c6   :  { %7906 = vsyncpa [#allocation3], 1 }
0x11c7   :  { %7908 = vsyncpa [#allocation3 + $0x1], 1 }

</bundles_post_ra>
